<compile_context>
chip_gen: v7x
topology: tpu7x:2x2x1
jax: 0.10.0
libtpu: 0.0.40
codegen_flags: <defaults>
</compile_context>

<pallas_src>
import functools

import numpy as np
import jax
import jax.numpy as jnp
from jax import lax
from jax.experimental import pallas as pl
from jax.experimental.pallas import tpu as pltpu


def _round_up(x, m):
    return (x + m - 1) // m * m


def _cdiv(a, b):
    return -(-a // b)


# ---------------------------------------------------------------------------
# GEMM (conv hot path): A @ B + bias [-> tanh], fused epilogue
# ---------------------------------------------------------------------------
_MAX_TM = 512      # row tile (multiple of 8)
_MAX_TK = 512      # contraction tile (multiple of 128), only if K is large
_MAX_TN = 1024     # lane tile (multiple of 128): keep output lane-dense


def _m_dims(m):
    """Row tile + padded row count.  Splits into >=2 'parallel' M tiles for
    moderately large M so both TensorCores can be used (v7x megacore)."""
    nmt = max(1, _cdiv(m, _MAX_TM))
    if nmt == 1 and m >= 256:
        nmt = 2
    tm = _round_up(_cdiv(m, nmt), 8)
    return tm, tm * nmt


def _largest_tile(total, cap, quantum=128):
    """Largest multiple of `quantum` <= cap dividing `total` (a 128-multiple)."""
    if total <= cap:
        return total
    best = quantum
    t = quantum
    while t <= cap:
        if total % t == 0:
            best = t
        t += quantum
    return best


def _gemm_kernel(a_ref, b_ref, bias_ref, o_ref, *, activation):
    y = jnp.dot(a_ref[...], b_ref[...], preferred_element_type=jnp.float32)
    y = y + bias_ref[...]
    if activation == "tanh":
        y = jnp.tanh(y)
    o_ref[...] = y


def _gemm_kernel_ktiled(a_ref, b_ref, bias_ref, o_ref, acc_ref, *, activation):
    @pl.when(pl.program_id(2) == 0)
    def _():
        acc_ref[...] = jnp.zeros_like(acc_ref)

    acc_ref[...] += jnp.dot(a_ref[...], b_ref[...],
                            preferred_element_type=jnp.float32)

    @pl.when(pl.program_id(2) == pl.num_programs(2) - 1)
    def _():
        y = acc_ref[...] + bias_ref[...]
        if activation == "tanh":
            y = jnp.tanh(y)
        o_ref[...] = y


def gemm_bias_act(a, b_p, bias_p, activation=None):
    """(M, K) @ (Kp, Np) + bias [-> tanh] -> (M, Np) float32.

    `b_p` / `bias_p` are pre-padded (Kp, Np multiples of 128) at init time.
    `a` is cast to b_p.dtype (bf16 on the MXU for v6e/v7x, f32 on v5e)."""
    m, k = a.shape
    kp, npl = b_p.shape
    tm, mp = _m_dims(m)
    tk = _largest_tile(kp, _MAX_TK)
    tn = _largest_tile(npl, _MAX_TN)
    a = a.astype(b_p.dtype)
    if (mp, kp) != (m, k):
        a = jnp.pad(a, ((0, mp - m), (0, kp - k)))
    nmt, nnt, nkt = mp // tm, npl // tn, kp // tk

    # N tiles outermost so the (small) weight tile stays resident across the
    # whole M sweep; K (reduction) innermost and 'arbitrary'.
    if nkt == 1:
        kernel = functools.partial(_gemm_kernel, activation=activation)
        grid = (nnt, nmt)
        in_specs = [pl.BlockSpec((tm, kp), lambda j, i: (i, 0)),
                    pl.BlockSpec((kp, tn), lambda j, i: (0, j)),
                    pl.BlockSpec((1, tn), lambda j, i: (0, j))]
        out_spec = pl.BlockSpec((tm, tn), lambda j, i: (i, j))
        scratch = []
        dims = ("parallel", "parallel")
    else:
        kernel = functools.partial(_gemm_kernel_ktiled, activation=activation)
        grid = (nnt, nmt, nkt)
        in_specs = [pl.BlockSpec((tm, tk), lambda j, i, kk: (i, kk)),
                    pl.BlockSpec((tk, tn), lambda j, i, kk: (kk, j)),
                    pl.BlockSpec((1, tn), lambda j, i, kk: (0, j))]
        out_spec = pl.BlockSpec((tm, tn), lambda j, i, kk: (i, j))
        scratch = [pltpu.VMEM((tm, tn), jnp.float32)]
        dims = ("parallel", "parallel", "arbitrary")

    est = 4 * (2 * tm * tk + 2 * tk * tn + 3 * tm * tn) + (2 << 20)
    out = pl.pallas_call(
        kernel,
        out_shape=jax.ShapeDtypeStruct((mp, npl), jnp.float32),
        grid_spec=pltpu.PrefetchScalarGridSpec(
            num_scalar_prefetch=0,
            grid=grid,
            in_specs=in_specs,
            out_specs=out_spec,
            scratch_shapes=scratch),
        compiler_params=pltpu.CompilerParams(
            dimension_semantics=dims,
            vmem_limit_bytes=int(max(est, 32 * 1024 * 1024))),
    )(a, b_p, bias_p)
    return out[:m]


# ---------------------------------------------------------------------------
# BatchNorm2d (batch statistics) + ReLU : stats reduce + fused FMA normalize
# ---------------------------------------------------------------------------
def _bn_stats_kernel(x_ref, sum_ref, sq_ref):
    # Output blocks keep a constant index -> resident accumulators ('arbitrary').
    @pl.when(pl.program_id(0) == 0)
    def _():
        sum_ref[...] = jnp.zeros_like(sum_ref)
        sq_ref[...] = jnp.zeros_like(sq_ref)

    x = x_ref[...]
    sum_ref[...] += jnp.sum(x, axis=0, keepdims=True)
    sq_ref[...] += jnp.sum(x * x, axis=0, keepdims=True)


def _scale_shift_relu_kernel(x_ref, scale_ref, shift_ref, o_ref):
    # Single fused multiply-add per element + ReLU.
    o_ref[...] = jnp.maximum(x_ref[...] * scale_ref[...] + shift_ref[...], 0.0)


def _row_tile(rows, cap=512):
    p2 = rows & -rows                 # largest power-of-two divisor
    tr = min(cap, p2)
    if tr >= 8:
        return tr, rows               # no row padding needed (usual case)
    tr = min(cap, _round_up(rows, 8))
    return tr, _round_up(rows, tr)


def batchnorm_relu_nhwc(h, gamma, beta, eps=1e-5):
    """Training-mode BatchNorm2d (biased batch variance) + ReLU on NHWC."""
    n, hh, ww, c = h.shape
    rows = n * hh * ww
    x2 = h.reshape(rows, c)
    tr, rp = _row_tile(rows)
    if rp != rows:
        x2 = jnp.pad(x2, ((0, rp - rows), (0, 0)))   # zero rows: neutral for sums
    nrt = rp // tr

    s, q = pl.pallas_call(
        _bn_stats_kernel,
        out_shape=(jax.ShapeDtypeStruct((1, c), jnp.float32),
                   jax.ShapeDtypeStruct((1, c), jnp.float32)),
        grid_spec=pltpu.PrefetchScalarGridSpec(
            num_scalar_prefetch=0,
            grid=(nrt,),
            in_specs=[pl.BlockSpec((tr, c), lambda i: (i, 0))],
            out_specs=(pl.BlockSpec((1, c), lambda i: (0, 0)),
                       pl.BlockSpec((1, c), lambda i: (0, 0)))),
        compiler_params=pltpu.CompilerParams(
            dimension_semantics=("arbitrary",)),
    )(x2)

    # Tiny per-channel math, shape (1, C) -- negligible XLA work.
    # TODO(synk): E[x^2]-mean^2 can cancel if |mean|>>std; a centered second
    # pass would be safer for very large activations.
    cnt = float(rows)
    mean = s / cnt
    var = jnp.maximum(q / cnt - mean * mean, 0.0)
    scale = gamma.reshape(1, c).astype(jnp.float32) * lax.rsqrt(var + eps)
    shift = beta.reshape(1, c).astype(jnp.float32) - mean * scale

    y = pl.pallas_call(
        _scale_shift_relu_kernel,
        out_shape=jax.ShapeDtypeStruct((rp, c), jnp.float32),
        grid_spec=pltpu.PrefetchScalarGridSpec(
            num_scalar_prefetch=0,
            grid=(nrt,),
            in_specs=[pl.BlockSpec((tr, c), lambda i: (i, 0)),
                      pl.BlockSpec((1, c), lambda i: (0, 0)),
                      pl.BlockSpec((1, c), lambda i: (0, 0))],
            out_specs=pl.BlockSpec((tr, c), lambda i: (i, 0))),
        compiler_params=pltpu.CompilerParams(
            dimension_semantics=("parallel",)),
    )(x2, scale, shift)
    if rp != rows:
        y = y[:rows]
    return y.reshape(n, hh, ww, c)


# ---------------------------------------------------------------------------
# ConvTranspose2d(k=4, s=2, p=1) == phase-packed GEMM + layout-only glue
# ---------------------------------------------------------------------------
# For output phase r and patch offset d, the contributing kernel tap is
# tap = (3 - r) - 2*d   (r, d in {0, 1}).
_TAP = np.array([[3, 1], [2, 0]], dtype=np.int32)


def _phase_weight(w):
    """(Cin, Cout, 4, 4) -> (4*Cin, 4*Cout) GEMM weight.
    Rows ordered (da, db, cin); columns ordered (rh, rw, cout)."""
    cin, cout = w.shape[0], w.shape[1]
    wt = w[:, :, _TAP, :]                 # (cin, cout, rh, da, kw)
    wt = wt[:, :, :, :, _TAP]             # (cin, cout, rh, da, rw, db)
    wt = wt.transpose(3, 5, 0, 2, 4, 1)   # (da, db, cin, rh, rw, cout)
    return wt.reshape(4 * cin, 4 * cout)


def _im2col_2x2(x):
    """NHWC (N,H,W,C) -> (N, H+1, W+1, 4*C): patches x[U-1+da, V-1+db, :]."""
    n, h, w, c = x.shape
    xp = jnp.pad(x, ((0, 0), (1, 1), (1, 1), (0, 0)))
    pats = [xp[:, da:da + h + 1, db:db + w + 1, :]
            for da in (0, 1) for db in (0, 1)]
    return jnp.concatenate(pats, axis=-1)


def _depth_to_space(y6, h, w):
    """(N, H+1, W+1, 2, 2, C) phase slabs -> NHWC (N, 2H, 2W, C)."""
    rows = []
    for rh in (0, 1):
        cols = [y6[:, rh:rh + h, rw:rw + w, rh, rw, :] for rw in (0, 1)]
        rows.append(jnp.stack(cols, axis=3))       # (N, H, W, 2, C)
    t = jnp.stack(rows, axis=2)                    # (N, H, 2, W, 2, C)
    return t.reshape(y6.shape[0], 2 * h, 2 * w, y6.shape[-1])


def conv_transpose4x4_s2(h, layer, activation=None):
    """One ConvTranspose2d(4, stride 2, pad 1) layer as a single Pallas GEMM
    (bias + optional tanh fused) plus static slice/reshape glue."""
    n, hh, ww, cin = h.shape
    a = _im2col_2x2(h).reshape(n * (hh + 1) * (ww + 1), 4 * cin)
    y = gemm_bias_act(a, layer["B"], layer["bias"], activation)
    cout = layer["cout"]
    y6 = y[:, :4 * cout].reshape(n, hh + 1, ww + 1, 2, 2, cout)
    return _depth_to_space(y6, hh, ww)


# ---------------------------------------------------------------------------
# Parameters
# ---------------------------------------------------------------------------
def init_params(key, channels_noise, channels_img, features_g):
    """Raw parameters in PyTorch ConvTranspose2d / BatchNorm2d layout."""
    chans = [channels_noise, features_g * 16, features_g * 8,
             features_g * 4, features_g * 2, channels_img]
    params = {}
    for i in range(5):
        key, k1, k2, k3, k4 = jax.random.split(key, 5)
        cin, cout = chans[i], chans[i + 1]
        params[f"w{i}"] = 0.05 * jax.random.normal(k1, (cin, cout, 4, 4),
                                                   jnp.float32)
        params[f"b{i}"] = 0.05 * jax.random.normal(k2, (cout,), jnp.float32)
        if i < 4:
            params[f"g{i}"] = 1.0 + 0.1 * jax.random.normal(k3, (cout,),
                                                            jnp.float32)
            params[f"beta{i}"] = 0.05 * jax.random.normal(k4, (cout,),
                                                          jnp.float32)
    return params


def _pack_gemm_layer(b_mat, bias_vec, reps, cout, gamma, beta, mxu_dtype):
    k, nl = b_mat.shape
    kp, npl = _round_up(k, 128), _round_up(nl, 128)
    layer = {
        "B": jnp.pad(b_mat, ((0, kp - k), (0, npl - nl))).astype(mxu_dtype),
        "bias": jnp.pad(jnp.tile(bias_vec, reps)[None, :].astype(jnp.float32),
                        ((0, 0), (0, npl - nl))),
        "cout": cout,
    }
    if gamma is not None:
        layer["gamma"] = gamma
        layer["beta"] = beta
    return layer


def prepare_params(params, mxu_dtype=jnp.float32):
    """One-time repack: pad weights/bias to 128-multiples and cast GEMM
    operands to the MXU dtype (done once at init, not per call)."""
    layers = []
    # Layer 0: 1x1 -> 4x4 deconv (stride 1, pad 0) == plain GEMM,
    # columns ordered (kh, kw, cout).
    w = params["w0"]
    cin, cout = w.shape[0], w.shape[1]
    b0 = w.transpose(0, 2, 3, 1).reshape(cin, 16 * cout)
    layers.append(_pack_gemm_layer(b0, params["b0"], 16, cout,
                                   params["g0"], params["beta0"], mxu_dtype))
    # Layers 1..4: phase-packed 2x-upsampling GEMM weights.
    for i in range(1, 5):
        w = params[f"w{i}"]
        cout = w.shape[1]
        layers.append(_pack_gemm_layer(_phase_weight(w), params[f"b{i}"], 4,
                                       cout, params.get(f"g{i}"),
                                       params.get(f"beta{i}"), mxu_dtype))
    return layers


# ---------------------------------------------------------------------------
# Generator forward
# ---------------------------------------------------------------------------
def generator_forward(x_nchw, layers):
    n = x_nchw.shape[0]
    # Layer 0 (1x1 input): pure GEMM -> (N, 4, 4, 16*fg) NHWC.
    l0 = layers[0]
    y = gemm_bias_act(x_nchw.reshape(n, -1), l0["B"], l0["bias"])
    h = y[:, :16 * l0["cout"]].reshape(n, 4, 4, l0["cout"])
    h = batchnorm_relu_nhwc(h, l0["gamma"], l0["beta"])
    # Layers 1..3: deconv + BN + ReLU.
    for i in range(1, 4):
        li = layers[i]
        h = conv_transpose4x4_s2(h, li)
        h = batchnorm_relu_nhwc(h, li["gamma"], li["beta"])
    # Layer 4: deconv with tanh fused into the GEMM epilogue.
    h = conv_transpose4x4_s2(h, layers[4], activation="tanh")
    return h.transpose(0, 3, 1, 2)    # NHWC -> NCHW


# ---------------------------------------------------------------------------
# Pure-JAX reference (PyTorch semantics)
# ---------------------------------------------------------------------------
def _conv_transpose2d_ref(x, w, bias, stride, pad):
    k = w.shape[2]
    w_conv = jnp.flip(w, axis=(2, 3)).transpose(1, 0, 2, 3)   # (Cout, Cin, k, k)
    y = lax.conv_general_dilated(
        x, w_conv, window_strides=(1, 1),
        padding=[(k - 1 - pad, k - 1 - pad)] * 2,
        lhs_dilation=(stride, stride),
        dimension_numbers=("NCHW", "OIHW", "NCHW"))
    return y + bias.reshape(1, -1, 1, 1)


def _bn_relu_ref(x, g, b, eps=1e-5):
    mean = x.mean(axis=(0, 2, 3), keepdims=True)
    var = ((x - mean) ** 2).mean(axis=(0, 2, 3), keepdims=True)
    y = (x - mean) / jnp.sqrt(var + eps) * g.reshape(1, -1, 1, 1) \
        + b.reshape(1, -1, 1, 1)
    return jnp.maximum(y, 0.0)


def generator_ref(x, params):
    h = x
    for i in range(4):
        stride, pad = ((1, 0) if i == 0 else (2, 1))
        h = _conv_transpose2d_ref(h, params[f"w{i}"], params[f"b{i}"], stride, pad)
        h = _bn_relu_ref(h, params[f"g{i}"], params[f"beta{i}"])
    h = _conv_transpose2d_ref(h, params["w4"], params["b4"], 2, 1)
    return jnp.tanh(h)


if __name__ == "__main__":
    channels_noise, channels_img, features_g, batch = 8, 3, 4, 2
    key = jax.random.PRNGKey(0)
    kp, kx = jax.random.split(key)
    params = init_params(kp, channels_noise, channels_img, features_g)
    x = jax.random.normal(kx, (batch, channels_noise, 1, 1), jnp.float32)

    ref = jax.block_until_ready(generator_ref(x, params))

    # f32 MXU operands (exact path; also the recommended setting on v5e).
    layers_f32 = prepare_params(params, jnp.float32)
    fwd_f32 = jax.jit(lambda z: generator_forward(z, layers_f32))
    out = jax.block_until_ready(fwd_f32(x))
    assert out.shape == (batch, channels_img, 64, 64), out.shape
    np.testing.assert_allclose(np.asarray(out), np.asarray(ref),
                               atol=2e-3, rtol=2e-3)

    # bf16 MXU operands with f32 accumulation (recommended on v6e/v7x);
    # same code path, only the GEMM input dtype changes.  Loose sanity check.
    layers_bf16 = prepare_params(params, jnp.bfloat16)
    fwd_bf16 = jax.jit(lambda z: generator_forward(z, layers_bf16))
    out_bf16 = jax.block_until_ready(fwd_bf16(x))
    np.testing.assert_allclose(np.asarray(out_bf16), np.asarray(ref),
                               atol=1e-1, rtol=1e-1)

    print("KERNEL_OK")
</pallas_src>

<mosaic_0001>
module attributes {stable_mosaic.version = 11 : i64} {
  func.func @_gemm_kernel(%arg0: i32, %arg1: i32, %arg2: memref<8x128xf32, #tpu.memory_space<vmem>>, %arg3: memref<128x1024xf32, #tpu.memory_space<vmem>>, %arg4: memref<1x1024xf32, #tpu.memory_space<vmem>>, %arg5: memref<8x1024xf32, #tpu.memory_space<vmem>>) attributes {dimension_semantics = [#tpu.dimension_semantics<parallel>, #tpu.dimension_semantics<parallel>], iteration_bounds = array<i64: 1, 1>, scalar_prefetch = 0 : i64, scratch_operands = 0 : i64, tpu.core_type = #tpu.core_type<tc>, window_params = [{transform_indices = @transform_0, window_bounds = array<i64: 8, 128>}, {transform_indices = @transform_1, window_bounds = array<i64: 128, 1024>}, {transform_indices = @transform_2, window_bounds = array<i64: 1, 1024>}, {transform_indices = @transform_3, window_bounds = array<i64: 8, 1024>}]} {
    %c0 = arith.constant 0 : index
    %c0_0 = arith.constant 0 : index
    %0 = vector.load %arg2[%c0, %c0_0] : memref<8x128xf32, #tpu.memory_space<vmem>>, vector<8x128xf32>
    %c0_1 = arith.constant 0 : index
    %c0_2 = arith.constant 0 : index
    %1 = vector.load %arg3[%c0_1, %c0_2] : memref<128x1024xf32, #tpu.memory_space<vmem>>, vector<128x1024xf32>
    %cst = arith.constant dense<0.000000e+00> : vector<8x1024xf32>
    %2 = tpu.matmul %0, %1, %cst {dimension_numbers = #tpu.dot_dimension_numbers<[1], [0], [0], [1], [0, 0, 1, 1], [], []>} : vector<8x128xf32>, vector<128x1024xf32>, vector<8x1024xf32> -> vector<8x1024xf32>
    %c0_3 = arith.constant 0 : index
    %c0_4 = arith.constant 0 : index
    %3 = vector.load %arg4[%c0_3, %c0_4] : memref<1x1024xf32, #tpu.memory_space<vmem>>, vector<1x1024xf32>
    %4 = vector.broadcast %3 : vector<1x1024xf32> to vector<8x1024xf32>
    %5 = arith.addf %2, %4 : vector<8x1024xf32>
    %c0_5 = arith.constant 0 : index
    %c0_6 = arith.constant 0 : index
    %6 = vector.load %arg5[%c0_5, %c0_6] : memref<8x1024xf32, #tpu.memory_space<vmem>>, vector<8x1024xf32>
    tpu.vector_store %arg5[%c0_5, %c0_6], %5 {strides = array<i32>} : memref<8x1024xf32, #tpu.memory_space<vmem>>, vector<8x1024xf32>,
    return
  }
  func.func @transform_0(%arg0: i32, %arg1: i32) -> (i32, i32) {
    %c0_i32 = arith.constant 0 : i32
    %c0_i32_0 = arith.constant 0 : i32
    return %arg1, %c0_i32 : i32, i32
  }
  func.func @transform_1(%arg0: i32, %arg1: i32) -> (i32, i32) {
    %c0_i32 = arith.constant 0 : i32
    %c0_i32_0 = arith.constant 0 : i32
    return %c0_i32, %arg0 : i32, i32
  }
  func.func @transform_2(%arg0: i32, %arg1: i32) -> (i32, i32) {
    %c0_i32 = arith.constant 0 : i32
    %c0_i32_0 = arith.constant 0 : i32
    return %c0_i32, %arg0 : i32, i32
  }
  func.func @transform_3(%arg0: i32, %arg1: i32) -> (i32, i32) {
    %c0_i32 = arith.constant 0 : i32
    return %arg1, %arg0 : i32, i32
  }
}

module attributes {stable_mosaic.version = 11 : i64} {
  func.func @_bn_stats_kernel(%arg0: i32, %arg1: memref<32x64xf32, #tpu.memory_space<vmem>>, %arg2: memref<1x64xf32, #tpu.memory_space<vmem>>, %arg3: memref<1x64xf32, #tpu.memory_space<vmem>>) attributes {dimension_semantics = [#tpu.dimension_semantics<arbitrary>], iteration_bounds = array<i64: 1>, scalar_prefetch = 0 : i64, scratch_operands = 0 : i64, tpu.core_type = #tpu.core_type<tc>, window_params = [{transform_indices = @transform_0, window_bounds = array<i64: 32, 64>}, {pipeline_mode = #tpu.pipeline_mode<synchronous>, transform_indices = @transform_1, window_bounds = array<i64: 1, 64>}, {pipeline_mode = #tpu.pipeline_mode<synchronous>, transform_indices = @transform_2, window_bounds = array<i64: 1, 64>}]} {
    %c0_i32 = arith.constant 0 : i32
    %0 = arith.cmpi eq, %arg0, %c0_i32 : i32
    %1 = arith.extui %0 : i1 to i32
    %c0_i32_0 = arith.constant 0 : i32
    %2 = arith.cmpi ne, %1, %c0_i32_0 : i32
    scf.if %2 {
      %cst_11 = arith.constant 0.000000e+00 : f32
      %15 = vector.broadcast %cst_11 : f32 to vector<1x64xf32>
      %c0_12 = arith.constant 0 : index
      %c0_13 = arith.constant 0 : index
      %16 = vector.load %arg2[%c0_12, %c0_13] : memref<1x64xf32, #tpu.memory_space<vmem>>, vector<1x64xf32>
      tpu.vector_store %arg2[%c0_12, %c0_13], %15 {strides = array<i32>} : memref<1x64xf32, #tpu.memory_space<vmem>>, vector<1x64xf32>,
      %cst_14 = arith.constant 0.000000e+00 : f32
      %17 = vector.broadcast %cst_14 : f32 to vector<1x64xf32>
      %c0_15 = arith.constant 0 : index
      %c0_16 = arith.constant 0 : index
      %18 = vector.load %arg3[%c0_15, %c0_16] : memref<1x64xf32, #tpu.memory_space<vmem>>, vector<1x64xf32>
      tpu.vector_store %arg3[%c0_15, %c0_16], %17 {strides = array<i32>} : memref<1x64xf32, #tpu.memory_space<vmem>>, vector<1x64xf32>,
    } else {
    }
    %c0 = arith.constant 0 : index
    %c0_1 = arith.constant 0 : index
    %3 = vector.load %arg1[%c0, %c0_1] : memref<32x64xf32, #tpu.memory_space<vmem>>, vector<32x64xf32>
    %c0_2 = arith.constant 0 : index
    %c0_3 = arith.constant 0 : index
    %4 = vector.load %arg2[%c0_2, %c0_3] : memref<1x64xf32, #tpu.memory_space<vmem>>, vector<1x64xf32>
    %cst = arith.constant dense<0.000000e+00> : vector<64xf32>
    %5 = vector.multi_reduction <add>, %3, %cst [0] : vector<32x64xf32> to vector<64xf32>
    %6 = vector.shape_cast %5 : vector<64xf32> to vector<1x64xf32>
    %7 = arith.addf %4, %6 : vector<1x64xf32>
    %c0_4 = arith.constant 0 : index
    %c0_5 = arith.constant 0 : index
    %8 = vector.load %arg2[%c0_4, %c0_5] : memref<1x64xf32, #tpu.memory_space<vmem>>, vector<1x64xf32>
    tpu.vector_store %arg2[%c0_4, %c0_5], %7 {strides = array<i32>} : memref<1x64xf32, #tpu.memory_space<vmem>>, vector<1x64xf32>,
    %c0_6 = arith.constant 0 : index
    %c0_7 = arith.constant 0 : index
    %9 = vector.load %arg3[%c0_6, %c0_7] : memref<1x64xf32, #tpu.memory_space<vmem>>, vector<1x64xf32>
    %10 = arith.mulf %3, %3 : vector<32x64xf32>
    %cst_8 = arith.constant dense<0.000000e+00> : vector<64xf32>
    %11 = vector.multi_reduction <add>, %10, %cst_8 [0] : vector<32x64xf32> to vector<64xf32>
    %12 = vector.shape_cast %11 : vector<64xf32> to vector<1x64xf32>
    %13 = arith.addf %9, %12 : vector<1x64xf32>
    %c0_9 = arith.constant 0 : index
    %c0_10 = arith.constant 0 : index
    %14 = vector.load %arg3[%c0_9, %c0_10] : memref<1x64xf32, #tpu.memory_space<vmem>>, vector<1x64xf32>
    tpu.vector_store %arg3[%c0_9, %c0_10], %13 {strides = array<i32>} : memref<1x64xf32, #tpu.memory_space<vmem>>, vector<1x64xf32>,
    return
  }
  func.func @transform_0(%arg0: i32) -> (i32, i32) {
    %c0_i32 = arith.constant 0 : i32
    %c0_i32_0 = arith.constant 0 : i32
    return %arg0, %c0_i32 : i32, i32
  }
  func.func @transform_1(%arg0: i32) -> (i32, i32) {
    %c0_i32 = arith.constant 0 : i32
    %c0_i32_0 = arith.constant 0 : i32
    %c0_i32_1 = arith.constant 0 : i32
    return %c0_i32, %c0_i32_0 : i32, i32
  }
  func.func @transform_2(%arg0: i32) -> (i32, i32) {
    %c0_i32 = arith.constant 0 : i32
    %c0_i32_0 = arith.constant 0 : i32
    %c0_i32_1 = arith.constant 0 : i32
    return %c0_i32, %c0_i32_0 : i32, i32
  }
}

module attributes {stable_mosaic.version = 11 : i64} {
  func.func @_scale_shift_relu_kernel(%arg0: i32, %arg1: memref<32x64xf32, #tpu.memory_space<vmem>>, %arg2: memref<1x64xf32, #tpu.memory_space<vmem>>, %arg3: memref<1x64xf32, #tpu.memory_space<vmem>>, %arg4: memref<32x64xf32, #tpu.memory_space<vmem>>) attributes {dimension_semantics = [#tpu.dimension_semantics<parallel>], iteration_bounds = array<i64: 1>, scalar_prefetch = 0 : i64, scratch_operands = 0 : i64, tpu.core_type = #tpu.core_type<tc>, window_params = [{transform_indices = @transform_0, window_bounds = array<i64: 32, 64>}, {pipeline_mode = #tpu.pipeline_mode<synchronous>, transform_indices = @transform_1, window_bounds = array<i64: 1, 64>}, {pipeline_mode = #tpu.pipeline_mode<synchronous>, transform_indices = @transform_2, window_bounds = array<i64: 1, 64>}, {transform_indices = @transform_3, window_bounds = array<i64: 32, 64>}]} {
    %c0 = arith.constant 0 : index
    %c0_0 = arith.constant 0 : index
    %0 = vector.load %arg1[%c0, %c0_0] : memref<32x64xf32, #tpu.memory_space<vmem>>, vector<32x64xf32>
    %c0_1 = arith.constant 0 : index
    %c0_2 = arith.constant 0 : index
    %1 = vector.load %arg2[%c0_1, %c0_2] : memref<1x64xf32, #tpu.memory_space<vmem>>, vector<1x64xf32>
    %2 = vector.broadcast %1 : vector<1x64xf32> to vector<32x64xf32>
    %3 = arith.mulf %0, %2 : vector<32x64xf32>
    %c0_3 = arith.constant 0 : index
    %c0_4 = arith.constant 0 : index
    %4 = vector.load %arg3[%c0_3, %c0_4] : memref<1x64xf32, #tpu.memory_space<vmem>>, vector<1x64xf32>
    %5 = vector.broadcast %4 : vector<1x64xf32> to vector<32x64xf32>
    %6 = arith.addf %3, %5 : vector<32x64xf32>
    %cst = arith.constant 0.000000e+00 : f32
    %7 = vector.broadcast %cst : f32 to vector<32x64xf32>
    %8 = arith.maximumf %6, %7 : vector<32x64xf32>
    %c0_5 = arith.constant 0 : index
    %c0_6 = arith.constant 0 : index
    %9 = vector.load %arg4[%c0_5, %c0_6] : memref<32x64xf32, #tpu.memory_space<vmem>>, vector<32x64xf32>
    tpu.vector_store %arg4[%c0_5, %c0_6], %8 {strides = array<i32>} : memref<32x64xf32, #tpu.memory_space<vmem>>, vector<32x64xf32>,
    return
  }
  func.func @transform_0(%arg0: i32) -> (i32, i32) {
    %c0_i32 = arith.constant 0 : i32
    %c0_i32_0 = arith.constant 0 : i32
    return %arg0, %c0_i32 : i32, i32
  }
  func.func @transform_1(%arg0: i32) -> (i32, i32) {
    %c0_i32 = arith.constant 0 : i32
    %c0_i32_0 = arith.constant 0 : i32
    %c0_i32_1 = arith.constant 0 : i32
    return %c0_i32, %c0_i32_0 : i32, i32
  }
  func.func @transform_2(%arg0: i32) -> (i32, i32) {
    %c0_i32 = arith.constant 0 : i32
    %c0_i32_0 = arith.constant 0 : i32
    %c0_i32_1 = arith.constant 0 : i32
    return %c0_i32, %c0_i32_0 : i32, i32
  }
  func.func @transform_3(%arg0: i32) -> (i32, i32) {
    %c0_i32 = arith.constant 0 : i32
    %c0_i32_0 = arith.constant 0 : i32
    return %arg0, %c0_i32 : i32, i32
  }
}

module attributes {stable_mosaic.version = 11 : i64} {
  func.func @_gemm_kernel(%arg0: i32, %arg1: i32, %arg2: memref<56x256xf32, #tpu.memory_space<vmem>>, %arg3: memref<256x128xf32, #tpu.memory_space<vmem>>, %arg4: memref<1x128xf32, #tpu.memory_space<vmem>>, %arg5: memref<56x128xf32, #tpu.memory_space<vmem>>) attributes {dimension_semantics = [#tpu.dimension_semantics<parallel>, #tpu.dimension_semantics<parallel>], iteration_bounds = array<i64: 1, 1>, scalar_prefetch = 0 : i64, scratch_operands = 0 : i64, tpu.core_type = #tpu.core_type<tc>, window_params = [{transform_indices = @transform_0, window_bounds = array<i64: 56, 256>}, {transform_indices = @transform_1, window_bounds = array<i64: 256, 128>}, {transform_indices = @transform_2, window_bounds = array<i64: 1, 128>}, {transform_indices = @transform_3, window_bounds = array<i64: 56, 128>}]} {
    %c0 = arith.constant 0 : index
    %c0_0 = arith.constant 0 : index
    %0 = vector.load %arg2[%c0, %c0_0] : memref<56x256xf32, #tpu.memory_space<vmem>>, vector<56x256xf32>
    %c0_1 = arith.constant 0 : index
    %c0_2 = arith.constant 0 : index
    %1 = vector.load %arg3[%c0_1, %c0_2] : memref<256x128xf32, #tpu.memory_space<vmem>>, vector<256x128xf32>
    %cst = arith.constant dense<0.000000e+00> : vector<56x128xf32>
    %2 = tpu.matmul %0, %1, %cst {dimension_numbers = #tpu.dot_dimension_numbers<[1], [0], [0], [1], [0, 0, 1, 1], [], []>} : vector<56x256xf32>, vector<256x128xf32>, vector<56x128xf32> -> vector<56x128xf32>
    %c0_3 = arith.constant 0 : index
    %c0_4 = arith.constant 0 : index
    %3 = vector.load %arg4[%c0_3, %c0_4] : memref<1x128xf32, #tpu.memory_space<vmem>>, vector<1x128xf32>
    %4 = vector.broadcast %3 : vector<1x128xf32> to vector<56x128xf32>
    %5 = arith.addf %2, %4 : vector<56x128xf32>
    %c0_5 = arith.constant 0 : index
    %c0_6 = arith.constant 0 : index
    %6 = vector.load %arg5[%c0_5, %c0_6] : memref<56x128xf32, #tpu.memory_space<vmem>>, vector<56x128xf32>
    tpu.vector_store %arg5[%c0_5, %c0_6], %5 {strides = array<i32>} : memref<56x128xf32, #tpu.memory_space<vmem>>, vector<56x128xf32>,
    return
  }
  func.func @transform_0(%arg0: i32, %arg1: i32) -> (i32, i32) {
    %c0_i32 = arith.constant 0 : i32
    %c0_i32_0 = arith.constant 0 : i32
    return %arg1, %c0_i32 : i32, i32
  }
  func.func @transform_1(%arg0: i32, %arg1: i32) -> (i32, i32) {
    %c0_i32 = arith.constant 0 : i32
    %c0_i32_0 = arith.constant 0 : i32
    return %c0_i32, %arg0 : i32, i32
  }
  func.func @transform_2(%arg0: i32, %arg1: i32) -> (i32, i32) {
    %c0_i32 = arith.constant 0 : i32
    %c0_i32_0 = arith.constant 0 : i32
    return %c0_i32, %arg0 : i32, i32
  }
  func.func @transform_3(%arg0: i32, %arg1: i32) -> (i32, i32) {
    %c0_i32 = arith.constant 0 : i32
    return %arg1, %arg0 : i32, i32
  }
}

module attributes {stable_mosaic.version = 11 : i64} {
  func.func @_bn_stats_kernel(%arg0: i32, %arg1: memref<128x32xf32, #tpu.memory_space<vmem>>, %arg2: memref<1x32xf32, #tpu.memory_space<vmem>>, %arg3: memref<1x32xf32, #tpu.memory_space<vmem>>) attributes {dimension_semantics = [#tpu.dimension_semantics<arbitrary>], iteration_bounds = array<i64: 1>, scalar_prefetch = 0 : i64, scratch_operands = 0 : i64, tpu.core_type = #tpu.core_type<tc>, window_params = [{transform_indices = @transform_0, window_bounds = array<i64: 128, 32>}, {pipeline_mode = #tpu.pipeline_mode<synchronous>, transform_indices = @transform_1, window_bounds = array<i64: 1, 32>}, {pipeline_mode = #tpu.pipeline_mode<synchronous>, transform_indices = @transform_2, window_bounds = array<i64: 1, 32>}]} {
    %c0_i32 = arith.constant 0 : i32
    %0 = arith.cmpi eq, %arg0, %c0_i32 : i32
    %1 = arith.extui %0 : i1 to i32
    %c0_i32_0 = arith.constant 0 : i32
    %2 = arith.cmpi ne, %1, %c0_i32_0 : i32
    scf.if %2 {
      %cst_11 = arith.constant 0.000000e+00 : f32
      %15 = vector.broadcast %cst_11 : f32 to vector<1x32xf32>
      %c0_12 = arith.constant 0 : index
      %c0_13 = arith.constant 0 : index
      %16 = vector.load %arg2[%c0_12, %c0_13] : memref<1x32xf32, #tpu.memory_space<vmem>>, vector<1x32xf32>
      tpu.vector_store %arg2[%c0_12, %c0_13], %15 {strides = array<i32>} : memref<1x32xf32, #tpu.memory_space<vmem>>, vector<1x32xf32>,
      %cst_14 = arith.constant 0.000000e+00 : f32
      %17 = vector.broadcast %cst_14 : f32 to vector<1x32xf32>
      %c0_15 = arith.constant 0 : index
      %c0_16 = arith.constant 0 : index
      %18 = vector.load %arg3[%c0_15, %c0_16] : memref<1x32xf32, #tpu.memory_space<vmem>>, vector<1x32xf32>
      tpu.vector_store %arg3[%c0_15, %c0_16], %17 {strides = array<i32>} : memref<1x32xf32, #tpu.memory_space<vmem>>, vector<1x32xf32>,
    } else {
    }
    %c0 = arith.constant 0 : index
    %c0_1 = arith.constant 0 : index
    %3 = vector.load %arg1[%c0, %c0_1] : memref<128x32xf32, #tpu.memory_space<vmem>>, vector<128x32xf32>
    %c0_2 = arith.constant 0 : index
    %c0_3 = arith.constant 0 : index
    %4 = vector.load %arg2[%c0_2, %c0_3] : memref<1x32xf32, #tpu.memory_space<vmem>>, vector<1x32xf32>
    %cst = arith.constant dense<0.000000e+00> : vector<32xf32>
    %5 = vector.multi_reduction <add>, %3, %cst [0] : vector<128x32xf32> to vector<32xf32>
    %6 = vector.shape_cast %5 : vector<32xf32> to vector<1x32xf32>
    %7 = arith.addf %4, %6 : vector<1x32xf32>
    %c0_4 = arith.constant 0 : index
    %c0_5 = arith.constant 0 : index
    %8 = vector.load %arg2[%c0_4, %c0_5] : memref<1x32xf32, #tpu.memory_space<vmem>>, vector<1x32xf32>
    tpu.vector_store %arg2[%c0_4, %c0_5], %7 {strides = array<i32>} : memref<1x32xf32, #tpu.memory_space<vmem>>, vector<1x32xf32>,
    %c0_6 = arith.constant 0 : index
    %c0_7 = arith.constant 0 : index
    %9 = vector.load %arg3[%c0_6, %c0_7] : memref<1x32xf32, #tpu.memory_space<vmem>>, vector<1x32xf32>
    %10 = arith.mulf %3, %3 : vector<128x32xf32>
    %cst_8 = arith.constant dense<0.000000e+00> : vector<32xf32>
    %11 = vector.multi_reduction <add>, %10, %cst_8 [0] : vector<128x32xf32> to vector<32xf32>
    %12 = vector.shape_cast %11 : vector<32xf32> to vector<1x32xf32>
    %13 = arith.addf %9, %12 : vector<1x32xf32>
    %c0_9 = arith.constant 0 : index
    %c0_10 = arith.constant 0 : index
    %14 = vector.load %arg3[%c0_9, %c0_10] : memref<1x32xf32, #tpu.memory_space<vmem>>, vector<1x32xf32>
    tpu.vector_store %arg3[%c0_9, %c0_10], %13 {strides = array<i32>} : memref<1x32xf32, #tpu.memory_space<vmem>>, vector<1x32xf32>,
    return
  }
  func.func @transform_0(%arg0: i32) -> (i32, i32) {
    %c0_i32 = arith.constant 0 : i32
    %c0_i32_0 = arith.constant 0 : i32
    return %arg0, %c0_i32 : i32, i32
  }
  func.func @transform_1(%arg0: i32) -> (i32, i32) {
    %c0_i32 = arith.constant 0 : i32
    %c0_i32_0 = arith.constant 0 : i32
    %c0_i32_1 = arith.constant 0 : i32
    return %c0_i32, %c0_i32_0 : i32, i32
  }
  func.func @transform_2(%arg0: i32) -> (i32, i32) {
    %c0_i32 = arith.constant 0 : i32
    %c0_i32_0 = arith.constant 0 : i32
    %c0_i32_1 = arith.constant 0 : i32
    return %c0_i32, %c0_i32_0 : i32, i32
  }
}

module attributes {stable_mosaic.version = 11 : i64} {
  func.func @_scale_shift_relu_kernel(%arg0: i32, %arg1: memref<128x32xf32, #tpu.memory_space<vmem>>, %arg2: memref<1x32xf32, #tpu.memory_space<vmem>>, %arg3: memref<1x32xf32, #tpu.memory_space<vmem>>, %arg4: memref<128x32xf32, #tpu.memory_space<vmem>>) attributes {dimension_semantics = [#tpu.dimension_semantics<parallel>], iteration_bounds = array<i64: 1>, scalar_prefetch = 0 : i64, scratch_operands = 0 : i64, tpu.core_type = #tpu.core_type<tc>, window_params = [{transform_indices = @transform_0, window_bounds = array<i64: 128, 32>}, {pipeline_mode = #tpu.pipeline_mode<synchronous>, transform_indices = @transform_1, window_bounds = array<i64: 1, 32>}, {pipeline_mode = #tpu.pipeline_mode<synchronous>, transform_indices = @transform_2, window_bounds = array<i64: 1, 32>}, {transform_indices = @transform_3, window_bounds = array<i64: 128, 32>}]} {
    %c0 = arith.constant 0 : index
    %c0_0 = arith.constant 0 : index
    %0 = vector.load %arg1[%c0, %c0_0] : memref<128x32xf32, #tpu.memory_space<vmem>>, vector<128x32xf32>
    %c0_1 = arith.constant 0 : index
    %c0_2 = arith.constant 0 : index
    %1 = vector.load %arg2[%c0_1, %c0_2] : memref<1x32xf32, #tpu.memory_space<vmem>>, vector<1x32xf32>
    %2 = vector.broadcast %1 : vector<1x32xf32> to vector<128x32xf32>
    %3 = arith.mulf %0, %2 : vector<128x32xf32>
    %c0_3 = arith.constant 0 : index
    %c0_4 = arith.constant 0 : index
    %4 = vector.load %arg3[%c0_3, %c0_4] : memref<1x32xf32, #tpu.memory_space<vmem>>, vector<1x32xf32>
    %5 = vector.broadcast %4 : vector<1x32xf32> to vector<128x32xf32>
    %6 = arith.addf %3, %5 : vector<128x32xf32>
    %cst = arith.constant 0.000000e+00 : f32
    %7 = vector.broadcast %cst : f32 to vector<128x32xf32>
    %8 = arith.maximumf %6, %7 : vector<128x32xf32>
    %c0_5 = arith.constant 0 : index
    %c0_6 = arith.constant 0 : index
    %9 = vector.load %arg4[%c0_5, %c0_6] : memref<128x32xf32, #tpu.memory_space<vmem>>, vector<128x32xf32>
    tpu.vector_store %arg4[%c0_5, %c0_6], %8 {strides = array<i32>} : memref<128x32xf32, #tpu.memory_space<vmem>>, vector<128x32xf32>,
    return
  }
  func.func @transform_0(%arg0: i32) -> (i32, i32) {
    %c0_i32 = arith.constant 0 : i32
    %c0_i32_0 = arith.constant 0 : i32
    return %arg0, %c0_i32 : i32, i32
  }
  func.func @transform_1(%arg0: i32) -> (i32, i32) {
    %c0_i32 = arith.constant 0 : i32
    %c0_i32_0 = arith.constant 0 : i32
    %c0_i32_1 = arith.constant 0 : i32
    return %c0_i32, %c0_i32_0 : i32, i32
  }
  func.func @transform_2(%arg0: i32) -> (i32, i32) {
    %c0_i32 = arith.constant 0 : i32
    %c0_i32_0 = arith.constant 0 : i32
    %c0_i32_1 = arith.constant 0 : i32
    return %c0_i32, %c0_i32_0 : i32, i32
  }
  func.func @transform_3(%arg0: i32) -> (i32, i32) {
    %c0_i32 = arith.constant 0 : i32
    %c0_i32_0 = arith.constant 0 : i32
    return %arg0, %c0_i32 : i32, i32
  }
}

module attributes {stable_mosaic.version = 11 : i64} {
  func.func @_gemm_kernel(%arg0: i32, %arg1: i32, %arg2: memref<168x128xf32, #tpu.memory_space<vmem>>, %arg3: memref<128x128xf32, #tpu.memory_space<vmem>>, %arg4: memref<1x128xf32, #tpu.memory_space<vmem>>, %arg5: memref<168x128xf32, #tpu.memory_space<vmem>>) attributes {dimension_semantics = [#tpu.dimension_semantics<parallel>, #tpu.dimension_semantics<parallel>], iteration_bounds = array<i64: 1, 1>, scalar_prefetch = 0 : i64, scratch_operands = 0 : i64, tpu.core_type = #tpu.core_type<tc>, window_params = [{transform_indices = @transform_0, window_bounds = array<i64: 168, 128>}, {transform_indices = @transform_1, window_bounds = array<i64: 128, 128>}, {transform_indices = @transform_2, window_bounds = array<i64: 1, 128>}, {transform_indices = @transform_3, window_bounds = array<i64: 168, 128>}]} {
    %c0 = arith.constant 0 : index
    %c0_0 = arith.constant 0 : index
    %0 = vector.load %arg2[%c0, %c0_0] : memref<168x128xf32, #tpu.memory_space<vmem>>, vector<168x128xf32>
    %c0_1 = arith.constant 0 : index
    %c0_2 = arith.constant 0 : index
    %1 = vector.load %arg3[%c0_1, %c0_2] : memref<128x128xf32, #tpu.memory_space<vmem>>, vector<128x128xf32>
    %cst = arith.constant dense<0.000000e+00> : vector<168x128xf32>
    %2 = tpu.matmul %0, %1, %cst {dimension_numbers = #tpu.dot_dimension_numbers<[1], [0], [0], [1], [0, 0, 1, 1], [], []>} : vector<168x128xf32>, vector<128x128xf32>, vector<168x128xf32> -> vector<168x128xf32>
    %c0_3 = arith.constant 0 : index
    %c0_4 = arith.constant 0 : index
    %3 = vector.load %arg4[%c0_3, %c0_4] : memref<1x128xf32, #tpu.memory_space<vmem>>, vector<1x128xf32>
    %4 = vector.broadcast %3 : vector<1x128xf32> to vector<168x128xf32>
    %5 = arith.addf %2, %4 : vector<168x128xf32>
    %c0_5 = arith.constant 0 : index
    %c0_6 = arith.constant 0 : index
    %6 = vector.load %arg5[%c0_5, %c0_6] : memref<168x128xf32, #tpu.memory_space<vmem>>, vector<168x128xf32>
    tpu.vector_store %arg5[%c0_5, %c0_6], %5 {strides = array<i32>} : memref<168x128xf32, #tpu.memory_space<vmem>>, vector<168x128xf32>,
    return
  }
  func.func @transform_0(%arg0: i32, %arg1: i32) -> (i32, i32) {
    %c0_i32 = arith.constant 0 : i32
    %c0_i32_0 = arith.constant 0 : i32
    return %arg1, %c0_i32 : i32, i32
  }
  func.func @transform_1(%arg0: i32, %arg1: i32) -> (i32, i32) {
    %c0_i32 = arith.constant 0 : i32
    %c0_i32_0 = arith.constant 0 : i32
    return %c0_i32, %arg0 : i32, i32
  }
  func.func @transform_2(%arg0: i32, %arg1: i32) -> (i32, i32) {
    %c0_i32 = arith.constant 0 : i32
    %c0_i32_0 = arith.constant 0 : i32
    return %c0_i32, %arg0 : i32, i32
  }
  func.func @transform_3(%arg0: i32, %arg1: i32) -> (i32, i32) {
    %c0_i32 = arith.constant 0 : i32
    return %arg1, %arg0 : i32, i32
  }
}

module attributes {stable_mosaic.version = 11 : i64} {
  func.func @_bn_stats_kernel(%arg0: i32, %arg1: memref<512x16xf32, #tpu.memory_space<vmem>>, %arg2: memref<1x16xf32, #tpu.memory_space<vmem>>, %arg3: memref<1x16xf32, #tpu.memory_space<vmem>>) attributes {dimension_semantics = [#tpu.dimension_semantics<arbitrary>], iteration_bounds = array<i64: 1>, scalar_prefetch = 0 : i64, scratch_operands = 0 : i64, tpu.core_type = #tpu.core_type<tc>, window_params = [{transform_indices = @transform_0, window_bounds = array<i64: 512, 16>}, {pipeline_mode = #tpu.pipeline_mode<synchronous>, transform_indices = @transform_1, window_bounds = array<i64: 1, 16>}, {pipeline_mode = #tpu.pipeline_mode<synchronous>, transform_indices = @transform_2, window_bounds = array<i64: 1, 16>}]} {
    %c0_i32 = arith.constant 0 : i32
    %0 = arith.cmpi eq, %arg0, %c0_i32 : i32
    %1 = arith.extui %0 : i1 to i32
    %c0_i32_0 = arith.constant 0 : i32
    %2 = arith.cmpi ne, %1, %c0_i32_0 : i32
    scf.if %2 {
      %cst_11 = arith.constant 0.000000e+00 : f32
      %15 = vector.broadcast %cst_11 : f32 to vector<1x16xf32>
      %c0_12 = arith.constant 0 : index
      %c0_13 = arith.constant 0 : index
      %16 = vector.load %arg2[%c0_12, %c0_13] : memref<1x16xf32, #tpu.memory_space<vmem>>, vector<1x16xf32>
      tpu.vector_store %arg2[%c0_12, %c0_13], %15 {strides = array<i32>} : memref<1x16xf32, #tpu.memory_space<vmem>>, vector<1x16xf32>,
      %cst_14 = arith.constant 0.000000e+00 : f32
      %17 = vector.broadcast %cst_14 : f32 to vector<1x16xf32>
      %c0_15 = arith.constant 0 : index
      %c0_16 = arith.constant 0 : index
      %18 = vector.load %arg3[%c0_15, %c0_16] : memref<1x16xf32, #tpu.memory_space<vmem>>, vector<1x16xf32>
      tpu.vector_store %arg3[%c0_15, %c0_16], %17 {strides = array<i32>} : memref<1x16xf32, #tpu.memory_space<vmem>>, vector<1x16xf32>,
    } else {
    }
    %c0 = arith.constant 0 : index
    %c0_1 = arith.constant 0 : index
    %3 = vector.load %arg1[%c0, %c0_1] : memref<512x16xf32, #tpu.memory_space<vmem>>, vector<512x16xf32>
    %c0_2 = arith.constant 0 : index
    %c0_3 = arith.constant 0 : index
    %4 = vector.load %arg2[%c0_2, %c0_3] : memref<1x16xf32, #tpu.memory_space<vmem>>, vector<1x16xf32>
    %cst = arith.constant dense<0.000000e+00> : vector<16xf32>
    %5 = vector.multi_reduction <add>, %3, %cst [0] : vector<512x16xf32> to vector<16xf32>
    %6 = vector.shape_cast %5 : vector<16xf32> to vector<1x16xf32>
    %7 = arith.addf %4, %6 : vector<1x16xf32>
    %c0_4 = arith.constant 0 : index
    %c0_5 = arith.constant 0 : index
    %8 = vector.load %arg2[%c0_4, %c0_5] : memref<1x16xf32, #tpu.memory_space<vmem>>, vector<1x16xf32>
    tpu.vector_store %arg2[%c0_4, %c0_5], %7 {strides = array<i32>} : memref<1x16xf32, #tpu.memory_space<vmem>>, vector<1x16xf32>,
    %c0_6 = arith.constant 0 : index
    %c0_7 = arith.constant 0 : index
    %9 = vector.load %arg3[%c0_6, %c0_7] : memref<1x16xf32, #tpu.memory_space<vmem>>, vector<1x16xf32>
    %10 = arith.mulf %3, %3 : vector<512x16xf32>
    %cst_8 = arith.constant dense<0.000000e+00> : vector<16xf32>
    %11 = vector.multi_reduction <add>, %10, %cst_8 [0] : vector<512x16xf32> to vector<16xf32>
    %12 = vector.shape_cast %11 : vector<16xf32> to vector<1x16xf32>
    %13 = arith.addf %9, %12 : vector<1x16xf32>
    %c0_9 = arith.constant 0 : index
    %c0_10 = arith.constant 0 : index
    %14 = vector.load %arg3[%c0_9, %c0_10] : memref<1x16xf32, #tpu.memory_space<vmem>>, vector<1x16xf32>
    tpu.vector_store %arg3[%c0_9, %c0_10], %13 {strides = array<i32>} : memref<1x16xf32, #tpu.memory_space<vmem>>, vector<1x16xf32>,
    return
  }
  func.func @transform_0(%arg0: i32) -> (i32, i32) {
    %c0_i32 = arith.constant 0 : i32
    %c0_i32_0 = arith.constant 0 : i32
    return %arg0, %c0_i32 : i32, i32
  }
  func.func @transform_1(%arg0: i32) -> (i32, i32) {
    %c0_i32 = arith.constant 0 : i32
    %c0_i32_0 = arith.constant 0 : i32
    %c0_i32_1 = arith.constant 0 : i32
    return %c0_i32, %c0_i32_0 : i32, i32
  }
  func.func @transform_2(%arg0: i32) -> (i32, i32) {
    %c0_i32 = arith.constant 0 : i32
    %c0_i32_0 = arith.constant 0 : i32
    %c0_i32_1 = arith.constant 0 : i32
    return %c0_i32, %c0_i32_0 : i32, i32
  }
}

module attributes {stable_mosaic.version = 11 : i64} {
  func.func @_scale_shift_relu_kernel(%arg0: i32, %arg1: memref<512x16xf32, #tpu.memory_space<vmem>>, %arg2: memref<1x16xf32, #tpu.memory_space<vmem>>, %arg3: memref<1x16xf32, #tpu.memory_space<vmem>>, %arg4: memref<512x16xf32, #tpu.memory_space<vmem>>) attributes {dimension_semantics = [#tpu.dimension_semantics<parallel>], iteration_bounds = array<i64: 1>, scalar_prefetch = 0 : i64, scratch_operands = 0 : i64, tpu.core_type = #tpu.core_type<tc>, window_params = [{transform_indices = @transform_0, window_bounds = array<i64: 512, 16>}, {pipeline_mode = #tpu.pipeline_mode<synchronous>, transform_indices = @transform_1, window_bounds = array<i64: 1, 16>}, {pipeline_mode = #tpu.pipeline_mode<synchronous>, transform_indices = @transform_2, window_bounds = array<i64: 1, 16>}, {transform_indices = @transform_3, window_bounds = array<i64: 512, 16>}]} {
    %c0 = arith.constant 0 : index
    %c0_0 = arith.constant 0 : index
    %0 = vector.load %arg1[%c0, %c0_0] : memref<512x16xf32, #tpu.memory_space<vmem>>, vector<512x16xf32>
    %c0_1 = arith.constant 0 : index
    %c0_2 = arith.constant 0 : index
    %1 = vector.load %arg2[%c0_1, %c0_2] : memref<1x16xf32, #tpu.memory_space<vmem>>, vector<1x16xf32>
    %2 = vector.broadcast %1 : vector<1x16xf32> to vector<512x16xf32>
    %3 = arith.mulf %0, %2 : vector<512x16xf32>
    %c0_3 = arith.constant 0 : index
    %c0_4 = arith.constant 0 : index
    %4 = vector.load %arg3[%c0_3, %c0_4] : memref<1x16xf32, #tpu.memory_space<vmem>>, vector<1x16xf32>
    %5 = vector.broadcast %4 : vector<1x16xf32> to vector<512x16xf32>
    %6 = arith.addf %3, %5 : vector<512x16xf32>
    %cst = arith.constant 0.000000e+00 : f32
    %7 = vector.broadcast %cst : f32 to vector<512x16xf32>
    %8 = arith.maximumf %6, %7 : vector<512x16xf32>
    %c0_5 = arith.constant 0 : index
    %c0_6 = arith.constant 0 : index
    %9 = vector.load %arg4[%c0_5, %c0_6] : memref<512x16xf32, #tpu.memory_space<vmem>>, vector<512x16xf32>
    tpu.vector_store %arg4[%c0_5, %c0_6], %8 {strides = array<i32>} : memref<512x16xf32, #tpu.memory_space<vmem>>, vector<512x16xf32>,
    return
  }
  func.func @transform_0(%arg0: i32) -> (i32, i32) {
    %c0_i32 = arith.constant 0 : i32
    %c0_i32_0 = arith.constant 0 : i32
    return %arg0, %c0_i32 : i32, i32
  }
  func.func @transform_1(%arg0: i32) -> (i32, i32) {
    %c0_i32 = arith.constant 0 : i32
    %c0_i32_0 = arith.constant 0 : i32
    %c0_i32_1 = arith.constant 0 : i32
    return %c0_i32, %c0_i32_0 : i32, i32
  }
  func.func @transform_2(%arg0: i32) -> (i32, i32) {
    %c0_i32 = arith.constant 0 : i32
    %c0_i32_0 = arith.constant 0 : i32
    %c0_i32_1 = arith.constant 0 : i32
    return %c0_i32, %c0_i32_0 : i32, i32
  }
  func.func @transform_3(%arg0: i32) -> (i32, i32) {
    %c0_i32 = arith.constant 0 : i32
    %c0_i32_0 = arith.constant 0 : i32
    return %arg0, %c0_i32 : i32, i32
  }
}

module attributes {stable_mosaic.version = 11 : i64} {
  func.func @_gemm_kernel(%arg0: i32, %arg1: i32, %arg2: memref<296x128xf32, #tpu.memory_space<vmem>>, %arg3: memref<128x128xf32, #tpu.memory_space<vmem>>, %arg4: memref<1x128xf32, #tpu.memory_space<vmem>>, %arg5: memref<296x128xf32, #tpu.memory_space<vmem>>) attributes {dimension_semantics = [#tpu.dimension_semantics<parallel>, #tpu.dimension_semantics<parallel>], iteration_bounds = array<i64: 1, 2>, scalar_prefetch = 0 : i64, scratch_operands = 0 : i64, tpu.core_type = #tpu.core_type<tc>, window_params = [{transform_indices = @transform_0, window_bounds = array<i64: 296, 128>}, {transform_indices = @transform_1, window_bounds = array<i64: 128, 128>}, {transform_indices = @transform_2, window_bounds = array<i64: 1, 128>}, {transform_indices = @transform_3, window_bounds = array<i64: 296, 128>}]} {
    %c0 = arith.constant 0 : index
    %c0_0 = arith.constant 0 : index
    %0 = vector.load %arg2[%c0, %c0_0] : memref<296x128xf32, #tpu.memory_space<vmem>>, vector<296x128xf32>
    %c0_1 = arith.constant 0 : index
    %c0_2 = arith.constant 0 : index
    %1 = vector.load %arg3[%c0_1, %c0_2] : memref<128x128xf32, #tpu.memory_space<vmem>>, vector<128x128xf32>
    %cst = arith.constant dense<0.000000e+00> : vector<296x128xf32>
    %2 = tpu.matmul %0, %1, %cst {dimension_numbers = #tpu.dot_dimension_numbers<[1], [0], [0], [1], [0, 0, 1, 1], [], []>} : vector<296x128xf32>, vector<128x128xf32>, vector<296x128xf32> -> vector<296x128xf32>
    %c0_3 = arith.constant 0 : index
    %c0_4 = arith.constant 0 : index
    %3 = vector.load %arg4[%c0_3, %c0_4] : memref<1x128xf32, #tpu.memory_space<vmem>>, vector<1x128xf32>
    %4 = vector.broadcast %3 : vector<1x128xf32> to vector<296x128xf32>
    %5 = arith.addf %2, %4 : vector<296x128xf32>
    %c0_5 = arith.constant 0 : index
    %c0_6 = arith.constant 0 : index
    %6 = vector.load %arg5[%c0_5, %c0_6] : memref<296x128xf32, #tpu.memory_space<vmem>>, vector<296x128xf32>
    tpu.vector_store %arg5[%c0_5, %c0_6], %5 {strides = array<i32>} : memref<296x128xf32, #tpu.memory_space<vmem>>, vector<296x128xf32>,
    return
  }
  func.func @transform_0(%arg0: i32, %arg1: i32) -> (i32, i32) {
    %c0_i32 = arith.constant 0 : i32
    %c0_i32_0 = arith.constant 0 : i32
    return %arg1, %c0_i32 : i32, i32
  }
  func.func @transform_1(%arg0: i32, %arg1: i32) -> (i32, i32) {
    %c0_i32 = arith.constant 0 : i32
    %c0_i32_0 = arith.constant 0 : i32
    return %c0_i32, %arg0 : i32, i32
  }
  func.func @transform_2(%arg0: i32, %arg1: i32) -> (i32, i32) {
    %c0_i32 = arith.constant 0 : i32
    %c0_i32_0 = arith.constant 0 : i32
    return %c0_i32, %arg0 : i32, i32
  }
  func.func @transform_3(%arg0: i32, %arg1: i32) -> (i32, i32) {
    %c0_i32 = arith.constant 0 : i32
    return %arg1, %arg0 : i32, i32
  }
}

module attributes {stable_mosaic.version = 11 : i64} {
  func.func @_bn_stats_kernel(%arg0: i32, %arg1: memref<512x8xf32, #tpu.memory_space<vmem>>, %arg2: memref<1x8xf32, #tpu.memory_space<vmem>>, %arg3: memref<1x8xf32, #tpu.memory_space<vmem>>) attributes {dimension_semantics = [#tpu.dimension_semantics<arbitrary>], iteration_bounds = array<i64: 4>, scalar_prefetch = 0 : i64, scratch_operands = 0 : i64, tpu.core_type = #tpu.core_type<tc>, window_params = [{transform_indices = @transform_0, window_bounds = array<i64: 512, 8>}, {pipeline_mode = #tpu.pipeline_mode<synchronous>, transform_indices = @transform_1, window_bounds = array<i64: 1, 8>}, {pipeline_mode = #tpu.pipeline_mode<synchronous>, transform_indices = @transform_2, window_bounds = array<i64: 1, 8>}]} {
    %c0_i32 = arith.constant 0 : i32
    %0 = arith.cmpi eq, %arg0, %c0_i32 : i32
    %1 = arith.extui %0 : i1 to i32
    %c0_i32_0 = arith.constant 0 : i32
    %2 = arith.cmpi ne, %1, %c0_i32_0 : i32
    scf.if %2 {
      %cst_11 = arith.constant 0.000000e+00 : f32
      %15 = vector.broadcast %cst_11 : f32 to vector<1x8xf32>
      %c0_12 = arith.constant 0 : index
      %c0_13 = arith.constant 0 : index
      %16 = vector.load %arg2[%c0_12, %c0_13] : memref<1x8xf32, #tpu.memory_space<vmem>>, vector<1x8xf32>
      tpu.vector_store %arg2[%c0_12, %c0_13], %15 {strides = array<i32>} : memref<1x8xf32, #tpu.memory_space<vmem>>, vector<1x8xf32>,
      %cst_14 = arith.constant 0.000000e+00 : f32
      %17 = vector.broadcast %cst_14 : f32 to vector<1x8xf32>
      %c0_15 = arith.constant 0 : index
      %c0_16 = arith.constant 0 : index
      %18 = vector.load %arg3[%c0_15, %c0_16] : memref<1x8xf32, #tpu.memory_space<vmem>>, vector<1x8xf32>
      tpu.vector_store %arg3[%c0_15, %c0_16], %17 {strides = array<i32>} : memref<1x8xf32, #tpu.memory_space<vmem>>, vector<1x8xf32>,
    } else {
    }
    %c0 = arith.constant 0 : index
    %c0_1 = arith.constant 0 : index
    %3 = vector.load %arg1[%c0, %c0_1] : memref<512x8xf32, #tpu.memory_space<vmem>>, vector<512x8xf32>
    %c0_2 = arith.constant 0 : index
    %c0_3 = arith.constant 0 : index
    %4 = vector.load %arg2[%c0_2, %c0_3] : memref<1x8xf32, #tpu.memory_space<vmem>>, vector<1x8xf32>
    %cst = arith.constant dense<0.000000e+00> : vector<8xf32>
    %5 = vector.multi_reduction <add>, %3, %cst [0] : vector<512x8xf32> to vector<8xf32>
    %6 = vector.shape_cast %5 : vector<8xf32> to vector<1x8xf32>
    %7 = arith.addf %4, %6 : vector<1x8xf32>
    %c0_4 = arith.constant 0 : index
    %c0_5 = arith.constant 0 : index
    %8 = vector.load %arg2[%c0_4, %c0_5] : memref<1x8xf32, #tpu.memory_space<vmem>>, vector<1x8xf32>
    tpu.vector_store %arg2[%c0_4, %c0_5], %7 {strides = array<i32>} : memref<1x8xf32, #tpu.memory_space<vmem>>, vector<1x8xf32>,
    %c0_6 = arith.constant 0 : index
    %c0_7 = arith.constant 0 : index
    %9 = vector.load %arg3[%c0_6, %c0_7] : memref<1x8xf32, #tpu.memory_space<vmem>>, vector<1x8xf32>
    %10 = arith.mulf %3, %3 : vector<512x8xf32>
    %cst_8 = arith.constant dense<0.000000e+00> : vector<8xf32>
    %11 = vector.multi_reduction <add>, %10, %cst_8 [0] : vector<512x8xf32> to vector<8xf32>
    %12 = vector.shape_cast %11 : vector<8xf32> to vector<1x8xf32>
    %13 = arith.addf %9, %12 : vector<1x8xf32>
    %c0_9 = arith.constant 0 : index
    %c0_10 = arith.constant 0 : index
    %14 = vector.load %arg3[%c0_9, %c0_10] : memref<1x8xf32, #tpu.memory_space<vmem>>, vector<1x8xf32>
    tpu.vector_store %arg3[%c0_9, %c0_10], %13 {strides = array<i32>} : memref<1x8xf32, #tpu.memory_space<vmem>>, vector<1x8xf32>,
    return
  }
  func.func @transform_0(%arg0: i32) -> (i32, i32) {
    %c0_i32 = arith.constant 0 : i32
    %c0_i32_0 = arith.constant 0 : i32
    return %arg0, %c0_i32 : i32, i32
  }
  func.func @transform_1(%arg0: i32) -> (i32, i32) {
    %c0_i32 = arith.constant 0 : i32
    %c0_i32_0 = arith.constant 0 : i32
    %c0_i32_1 = arith.constant 0 : i32
    return %c0_i32, %c0_i32_0 : i32, i32
  }
  func.func @transform_2(%arg0: i32) -> (i32, i32) {
    %c0_i32 = arith.constant 0 : i32
    %c0_i32_0 = arith.constant 0 : i32
    %c0_i32_1 = arith.constant 0 : i32
    return %c0_i32, %c0_i32_0 : i32, i32
  }
}

module attributes {stable_mosaic.version = 11 : i64} {
  func.func @_scale_shift_relu_kernel(%arg0: i32, %arg1: memref<512x8xf32, #tpu.memory_space<vmem>>, %arg2: memref<1x8xf32, #tpu.memory_space<vmem>>, %arg3: memref<1x8xf32, #tpu.memory_space<vmem>>, %arg4: memref<512x8xf32, #tpu.memory_space<vmem>>) attributes {dimension_semantics = [#tpu.dimension_semantics<parallel>], iteration_bounds = array<i64: 4>, scalar_prefetch = 0 : i64, scratch_operands = 0 : i64, tpu.core_type = #tpu.core_type<tc>, window_params = [{transform_indices = @transform_0, window_bounds = array<i64: 512, 8>}, {pipeline_mode = #tpu.pipeline_mode<synchronous>, transform_indices = @transform_1, window_bounds = array<i64: 1, 8>}, {pipeline_mode = #tpu.pipeline_mode<synchronous>, transform_indices = @transform_2, window_bounds = array<i64: 1, 8>}, {transform_indices = @transform_3, window_bounds = array<i64: 512, 8>}]} {
    %c0 = arith.constant 0 : index
    %c0_0 = arith.constant 0 : index
    %0 = vector.load %arg1[%c0, %c0_0] : memref<512x8xf32, #tpu.memory_space<vmem>>, vector<512x8xf32>
    %c0_1 = arith.constant 0 : index
    %c0_2 = arith.constant 0 : index
    %1 = vector.load %arg2[%c0_1, %c0_2] : memref<1x8xf32, #tpu.memory_space<vmem>>, vector<1x8xf32>
    %2 = vector.broadcast %1 : vector<1x8xf32> to vector<512x8xf32>
    %3 = arith.mulf %0, %2 : vector<512x8xf32>
    %c0_3 = arith.constant 0 : index
    %c0_4 = arith.constant 0 : index
    %4 = vector.load %arg3[%c0_3, %c0_4] : memref<1x8xf32, #tpu.memory_space<vmem>>, vector<1x8xf32>
    %5 = vector.broadcast %4 : vector<1x8xf32> to vector<512x8xf32>
    %6 = arith.addf %3, %5 : vector<512x8xf32>
    %cst = arith.constant 0.000000e+00 : f32
    %7 = vector.broadcast %cst : f32 to vector<512x8xf32>
    %8 = arith.maximumf %6, %7 : vector<512x8xf32>
    %c0_5 = arith.constant 0 : index
    %c0_6 = arith.constant 0 : index
    %9 = vector.load %arg4[%c0_5, %c0_6] : memref<512x8xf32, #tpu.memory_space<vmem>>, vector<512x8xf32>
    tpu.vector_store %arg4[%c0_5, %c0_6], %8 {strides = array<i32>} : memref<512x8xf32, #tpu.memory_space<vmem>>, vector<512x8xf32>,
    return
  }
  func.func @transform_0(%arg0: i32) -> (i32, i32) {
    %c0_i32 = arith.constant 0 : i32
    %c0_i32_0 = arith.constant 0 : i32
    return %arg0, %c0_i32 : i32, i32
  }
  func.func @transform_1(%arg0: i32) -> (i32, i32) {
    %c0_i32 = arith.constant 0 : i32
    %c0_i32_0 = arith.constant 0 : i32
    %c0_i32_1 = arith.constant 0 : i32
    return %c0_i32, %c0_i32_0 : i32, i32
  }
  func.func @transform_2(%arg0: i32) -> (i32, i32) {
    %c0_i32 = arith.constant 0 : i32
    %c0_i32_0 = arith.constant 0 : i32
    %c0_i32_1 = arith.constant 0 : i32
    return %c0_i32, %c0_i32_0 : i32, i32
  }
  func.func @transform_3(%arg0: i32) -> (i32, i32) {
    %c0_i32 = arith.constant 0 : i32
    %c0_i32_0 = arith.constant 0 : i32
    return %arg0, %c0_i32 : i32, i32
  }
}

module attributes {stable_mosaic.version = 11 : i64} {
  func.func @_gemm_kernel(%arg0: i32, %arg1: i32, %arg2: memref<440x128xf32, #tpu.memory_space<vmem>>, %arg3: memref<128x128xf32, #tpu.memory_space<vmem>>, %arg4: memref<1x128xf32, #tpu.memory_space<vmem>>, %arg5: memref<440x128xf32, #tpu.memory_space<vmem>>) attributes {dimension_semantics = [#tpu.dimension_semantics<parallel>, #tpu.dimension_semantics<parallel>], iteration_bounds = array<i64: 1, 5>, scalar_prefetch = 0 : i64, scratch_operands = 0 : i64, tpu.core_type = #tpu.core_type<tc>, window_params = [{transform_indices = @transform_0, window_bounds = array<i64: 440, 128>}, {transform_indices = @transform_1, window_bounds = array<i64: 128, 128>}, {transform_indices = @transform_2, window_bounds = array<i64: 1, 128>}, {transform_indices = @transform_3, window_bounds = array<i64: 440, 128>}]} {
    %c0 = arith.constant 0 : index
    %c0_0 = arith.constant 0 : index
    %0 = vector.load %arg2[%c0, %c0_0] : memref<440x128xf32, #tpu.memory_space<vmem>>, vector<440x128xf32>
    %c0_1 = arith.constant 0 : index
    %c0_2 = arith.constant 0 : index
    %1 = vector.load %arg3[%c0_1, %c0_2] : memref<128x128xf32, #tpu.memory_space<vmem>>, vector<128x128xf32>
    %cst = arith.constant dense<0.000000e+00> : vector<440x128xf32>
    %2 = tpu.matmul %0, %1, %cst {dimension_numbers = #tpu.dot_dimension_numbers<[1], [0], [0], [1], [0, 0, 1, 1], [], []>} : vector<440x128xf32>, vector<128x128xf32>, vector<440x128xf32> -> vector<440x128xf32>
    %c0_3 = arith.constant 0 : index
    %c0_4 = arith.constant 0 : index
    %3 = vector.load %arg4[%c0_3, %c0_4] : memref<1x128xf32, #tpu.memory_space<vmem>>, vector<1x128xf32>
    %4 = vector.broadcast %3 : vector<1x128xf32> to vector<440x128xf32>
    %5 = arith.addf %2, %4 : vector<440x128xf32>
    %6 = math.tanh %5 : vector<440x128xf32>
    %c0_5 = arith.constant 0 : index
    %c0_6 = arith.constant 0 : index
    %7 = vector.load %arg5[%c0_5, %c0_6] : memref<440x128xf32, #tpu.memory_space<vmem>>, vector<440x128xf32>
    tpu.vector_store %arg5[%c0_5, %c0_6], %6 {strides = array<i32>} : memref<440x128xf32, #tpu.memory_space<vmem>>, vector<440x128xf32>,
    return
  }
  func.func @transform_0(%arg0: i32, %arg1: i32) -> (i32, i32) {
    %c0_i32 = arith.constant 0 : i32
    %c0_i32_0 = arith.constant 0 : i32
    return %arg1, %c0_i32 : i32, i32
  }
  func.func @transform_1(%arg0: i32, %arg1: i32) -> (i32, i32) {
    %c0_i32 = arith.constant 0 : i32
    %c0_i32_0 = arith.constant 0 : i32
    return %c0_i32, %arg0 : i32, i32
  }
  func.func @transform_2(%arg0: i32, %arg1: i32) -> (i32, i32) {
    %c0_i32 = arith.constant 0 : i32
    %c0_i32_0 = arith.constant 0 : i32
    return %c0_i32, %arg0 : i32, i32
  }
  func.func @transform_3(%arg0: i32, %arg1: i32) -> (i32, i32) {
    %c0_i32 = arith.constant 0 : i32
    return %arg1, %arg0 : i32, i32
  }
}

</mosaic_0001>

<bundles_post_ra>
// kernel: _lambda_.14
= control target key start
LH: loop header
LB: loop body
LE: loop exit
PB: predicated region body
PF: predicated region fallthrough
CT: control target
= control target key end

     0   :  { %vm14_vm0 = vcmask 516096   ;;  %vm22_vm1 = vcmask 523264   ;;  %v68_v0 = vmov 0.0   ;;  %s126_s0 = inlined_call_operand.vmem [shape: f32[32,64], index: 0, kind: input, shape index: {}]   ;;  %s127_s1 = inlined_call_operand.vmem [shape: f32[1,64], index: 1, kind: output, shape index: {0}]   ;;  %s128_s2 = inlined_call_operand.vmem [shape: f32[1,64], index: 2, kind: output, shape index: {1}]  }
   0x1   :  { %15 = vst.msk [vmem:[%s127_s1] sm:$0x1] %vm14_vm0, %v68_v0  ;;  %v17_v1 = vld [vmem:[%s126_s0] sm:$0xff]  ;;  %v18_v2 = vld [vmem:[%s126_s0 + $0x8] sm:$0xff]  ;;  %v19_v3 = vld [vmem:[%s126_s0 + $0x10] sm:$0xff] }
   0x2   :  { %16 = vst.msk [vmem:[%s128_s2] sm:$0x1] %vm14_vm0, %v68_v0  ;;  %v20_v4 = vld [vmem:[%s126_s0 + $0x18] sm:$0xff]  ;;  %v23_v5 = vsel %vm22_vm1, %v17_v1, 0.0  ;;  %v24_v6 = vsel %vm22_vm1, %v18_v2, 0.0  ;;  %v26_v7 = vsel %vm22_vm1, %v19_v3, 0.0  ;;  %v40_v8 = vmul.f32 %v17_v1, %v17_v1 }
   0x3   :  { %v25_v9 = vadd.f32 %v24_v6, %v23_v5  ;;  %v41_v10 = vmul.f32 %v18_v2, %v18_v2  ;;  %v42_v11 = vmul.f32 %v19_v3, %v19_v3  ;;  %v28_v12 = vsel %vm22_vm1, %v20_v4, 0.0 }
   0x4   :  { %v43_v13 = vmul.f32 %v20_v4, %v20_v4  ;;  %v44_v14 = vsel %vm22_vm1, %v40_v8, 0.0 }
   0x5   :  { %v27_v15 = vadd.f32 %v26_v7, %v25_v9  ;;  %v45_v16 = vsel %vm22_vm1, %v41_v10, 0.0  ;;  %v47_v17 = vsel %vm22_vm1, %v42_v11, 0.0 }
   0x6   :  { %v46_v18 = vadd.f32 %v45_v16, %v44_v14  ;;  %v49_v20 = vsel %vm22_vm1, %v43_v13, 0.0 }
   0x7   :  { %v29_v19 = vadd.f32 %v28_v12, %v27_v15 }
   0x8   :  { %v48_v21 = vadd.f32 %v47_v17, %v46_v18  ;;  %v21_v31 = vld [vmem:[%s127_s1] sm:$0x1] }
   0x9   :  { %v30_v22 = vrot.slane %v29_v19, 4  ;;  %v39_v36 = vld [vmem:[%s128_s2] sm:$0x1] }
   0xa   :  { %v50_v23 = vadd.f32 %v49_v20, %v48_v21 }
   0xb   :  { %v31_v24 = vadd.f32 %v30_v22, %v29_v19 }
   0xc   :  { %v51_v25 = vrot.slane %v50_v23, 4 }
   0xd   :  { %v32_v26 = vrot.slane %v31_v24, 2 }
   0xe   :  { %v52_v27 = vadd.f32 %v51_v25, %v50_v23 }
   0xf   :  { %v33_v28 = vadd.f32 %v32_v26, %v31_v24 }
  0x10   :  { %v53_v29 = vrot.slane %v52_v27, 2 }
  0x11   :  { %v34_v30 = vrot.slane %v33_v28, 1 }
  0x12   :  { %v54_v32 = vadd.f32 %v53_v29, %v52_v27 }
  0x13   :  { %v35_v33 = vadd.f32 %v34_v30, %v33_v28 }
  0x14   :  { %v55_v34 = vrot.slane %v54_v32, 1 }
  0x15   :  { %v36_v35 = vadd.f32 %v35_v33, %v21_v31 }
  0x16   :  { %v56_v37 = vadd.f32 %v55_v34, %v54_v32 }
  0x17   :  { %38 = vst.msk [vmem:[%s127_s1] sm:$0x1] %vm14_vm0, %v36_v35 }
  0x18   :  { %v57_v38 = vadd.f32 %v56_v37, %v39_v36 }
  0x1a   :  { %58 = vst.msk [vmem:[%s128_s2] sm:$0x1] %vm14_vm0, %v57_v38 }

// kernel: _lambda_.15
= control target key start
LH: loop header
LB: loop body
LE: loop exit
PB: predicated region body
PF: predicated region fallthrough
CT: control target
= control target key end

     0   :  { %vm44_vm0 = vcmask 523264   ;;  %s105_s0 = inlined_call_operand.vmem [shape: f32[32,64], index: 0, kind: input, shape index: {}]   ;;  %s106_s1 = inlined_call_operand.vmem [shape: f32[1,64], index: 1, kind: input, shape index: {}]   ;;  %s107_s2 = inlined_call_operand.vmem [shape: f32[1,64], index: 2, kind: input, shape index: {}]   ;;  %s108_s3 = inlined_call_operand.vmem [shape: f32[32,64], index: 3, kind: output, shape index: {}]  }
   0x1   :  { %v14_v0 = vld [vmem:[%s105_s0] sm:$0xff]  ;;  %v15_v4 = vld [vmem:[%s105_s0 + $0x8] sm:$0xff]  ;;  %v16_v5 = vld [vmem:[%s105_s0 + $0x10] sm:$0xff] }
   0x2   :  { %v53_v1 = vld [vmem:[%s106_s1] ss:$0 sm:$0xff]  ;;  %v17_v6 = vld [vmem:[%s105_s0 + $0x18] sm:$0xff] }
   0x3   :  { %v54_v2 = vld [vmem:[%s107_s2] ss:$0 sm:$0xff]  ;;  %v25_v3 = vmul.f32 %v53_v1, %v14_v0  ;;  %v26_v7 = vmul.f32 %v53_v1, %v15_v4  ;;  %v27_v8 = vmul.f32 %v53_v1, %v16_v5  ;;  %v28_v9 = vmul.f32 %v53_v1, %v17_v6 }
   0x5   :  { %v36_v10 = vadd.f32 %v54_v2, %v25_v3  ;;  %v37_v11 = vadd.f32 %v54_v2, %v26_v7  ;;  %v38_v12 = vadd.f32 %v54_v2, %v27_v8  ;;  %v39_v13 = vadd.f32 %v54_v2, %v28_v9 }
   0x7   :  { %v40_v14 = vmax.f32 %v36_v10, 0.0  ;;  %v41_v15 = vmax.f32 %v37_v11, 0.0  ;;  %v42_v16 = vmax.f32 %v38_v12, 0.0  ;;  %v43_v17 = vmax.f32 %v39_v13, 0.0 }
   0x9   :  { %45 = vst.msk [vmem:[%s108_s3] sm:$0xff] %vm44_vm0, %v40_v14  ;;  %46 = vst.msk [vmem:[%s108_s3 + $0x8] sm:$0xff] %vm44_vm0, %v41_v15 }
   0xa   :  { %47 = vst.msk [vmem:[%s108_s3 + $0x10] sm:$0xff] %vm44_vm0, %v42_v16  ;;  %48 = vst.msk [vmem:[%s108_s3 + $0x18] sm:$0xff] %vm44_vm0, %v43_v17 }

// kernel: _lambda_.13
= control target key start
LH: loop header
LB: loop body
LE: loop exit
PB: predicated region body
PF: predicated region fallthrough
CT: control target
= control target key end

     0   :  { %8 = vsyncpa [#allocation3], 0  ;;  %s776_s0 = inlined_call_operand.vmem [shape: f32[8,128], index: 0, kind: input, shape index: {}]   ;;  %s777_s1 = inlined_call_operand.hbm [shape: f32[128,1024], index: 1, kind: input, shape index: {}]   ;;  %s778_s2 = inlined_call_operand.hbm [shape: f32[1,1024], index: 2, kind: input, shape index: {}]   ;;  %s779_s3 = inlined_call_operand.vmem [shape: f32[8,1024], index: 3, kind: output, shape index: {}]  }
   0x1   :  { %9 = vsyncpa [#allocation5], 0  ;;  %s690_s12 = smov [#allocation2]   ;;  %s642_s16 = scalar_lea.hbm %s777_s1, 16384 }
   0x2   :  { %s17_s13 = sshll.u32 %s690_s12, 4  ;;  %p643_p0 = scmp.ne.s32.totalorder %s777_s1, %s642_s16  ;;  %s18_s13 = int_to_ptr.vmem [resolvable:$true] %s17_s13 }
   0x3   :  { %p646_p1 = scmp.lt.u32.totalorder %s642_s16, %s777_s1 }
   0x5   :  { %p648_p2 = pnand %p646_p1, %p643_p0 }
   0x7   :  { %651 = shalt.err (!%p648_p2)
}
   0x8   :  { %s652_s21 = scalar_lea.vmem %s18_s13, 16384  ;;  %p657_p4 = scmp.lt.s32.totalorder %s18_s13, %s18_s13 }
   0x9   :  { %p653_p3 = scmp.ne.s32.totalorder %s18_s13, %s652_s21  ;;  %p658_p5 = scmp.lt.s32.totalorder %s652_s21, %s652_s21 }
   0xb   :  { %p659_p6 = por %p658_p5, %p657_p4 }
   0xd   :  { %p660_p7 = pnand %p659_p6, %p653_p3 }
   0xf   :  { %663 = shalt.err (!%p660_p7)
}
  0x10   :  { %s691_s22 = smov 1024   ;;  %s692_s23 = smov 64  }
  0x11   :  { %23 = dma.hbm_to_vmem [thread:$0]  %s777_s1, 16384, %s18_s13, [#allocation3], %s691_s22, %s691_s22, %s692_s23  }
  0x12   :  { %s693_s26 = smov [#allocation4]   ;;  %s664_s30 = scalar_lea.hbm %s778_s2, 128 }
  0x13   :  { %s30_s27 = sshll.u32 %s693_s26, 4  ;;  %p665_p8 = scmp.ne.s32.totalorder %s778_s2, %s664_s30  ;;  %s31_s27 = int_to_ptr.vmem [resolvable:$true] %s30_s27 }
  0x14   :  { %p668_p9 = scmp.lt.u32.totalorder %s664_s30, %s778_s2 }
  0x16   :  { %p670_p10 = pnand %p668_p9, %p665_p8 }
  0x18   :  { %673 = shalt.err (!%p670_p10)
}
  0x19   :  { %s674_s8 = scalar_lea.vmem %s31_s27, 128  ;;  %p679_p12 = scmp.lt.s32.totalorder %s31_s27, %s31_s27 }
  0x1a   :  { %p675_p11 = scmp.ne.s32.totalorder %s31_s27, %s674_s8  ;;  %p680_p13 = scmp.lt.s32.totalorder %s674_s8, %s674_s8 }
  0x1c   :  { %p681_p0 = por %p680_p13, %p679_p12 }
  0x1e   :  { %p682_p1 = pnand %p681_p0, %p675_p11 }
  0x20   :  { %685 = shalt.err (!%p682_p1)
}
  0x21   :  { %33 = dma.hbm_to_vmem [thread:$0]  %s778_s2, 128, %s31_s27, [#allocation5]  }
  0x22   :  { %686 = dma.done.wait [#allocation3], 16384  }
  0x23   :  { %687 = vsyncadd [#allocation3], 4294950912 }
  0x24   :  { %688 = dma.done.wait [#allocation5], 128  }
  0x25   :  { %689 = vsyncadd [#allocation5], 4294967168  ;;  %v694_v0 = vmov 0.0   ;;  %v42_v1 = vld [vmem:[#allocation2 + $0x8] sm:$0xff]  ;;  %v44_v3 = vld [vmem:[#allocation2 + $0x18] sm:$0xff] }
  0x26   :  { %275 = vmatprep.mubr.f32.mxu0 %v694_v0  ;;  %346 = vmatprep.mubr.f32.mxu1 %v694_v0  ;;  %v50_v2 = vld [vmem:[#allocation2 + $0x48] sm:$0xff]  ;;  %v52_v5 = vld [vmem:[#allocation2 + $0x58] sm:$0xff]  ;;  %v41_v6 = vld [vmem:[#allocation2] sm:$0xff] }
  0x27   :  { %v509_v4 = vpack.c.bf16 %v50_v2, %v42_v1  ;;  %v49_v7 = vld [vmem:[#allocation2 + $0x40] sm:$0xff]  ;;  %v541_v8 = vpack.c.bf16 %v52_v5, %v44_v3  ;;  %v43_v10 = vld [vmem:[#allocation2 + $0x10] sm:$0xff]  ;;  %v58_v12 = vld [vmem:[#allocation2 + $0x88] sm:$0xff] }
  0x28   :  { %v511_v9 = vpack.c.bf16 %v49_v7, %v41_v6  ;;  %v51_v11 = vld [vmem:[#allocation2 + $0x50] sm:$0xff]  ;;  %v66_v14 = vld [vmem:[#allocation2 + $0xc8] sm:$0xff]  ;;  %v60_v15 = vld [vmem:[#allocation2 + $0x98] sm:$0xff] }
  0x29   :  { %510 = vmatprep.subr.bf16.mxu0 %v509_v4  ;;  %v543_v13 = vpack.c.bf16 %v51_v11, %v43_v10  ;;  %v68_v16 = vld [vmem:[#allocation2 + $0xd8] sm:$0xff]  ;;  %542 = vmatprep.subr.bf16.mxu1 %v541_v8  ;;  %v513_v17 = vpack.c.bf16 %v66_v14, %v58_v12  ;;  %v57_v19 = vld [vmem:[#allocation2 + $0x80] sm:$0xff]  ;;  %v59_v21 = vld [vmem:[#allocation2 + $0x90] sm:$0xff] }
  0x2a   :  { %512 = vmatpush1.bf16.msra.mxu0 %v511_v9  ;;  %v545_v18 = vpack.c.bf16 %v68_v16, %v60_v15  ;;  %v65_v20 = vld [vmem:[#allocation2 + $0xc0] sm:$0xff]  ;;  %v67_v23 = vld [vmem:[#allocation2 + $0xd0] sm:$0xff]  ;;  %v74_v24 = vld [vmem:[#allocation2 + $0x108] sm:$0xff] }
  0x2b   :  { %544 = vmatpush1.bf16.msra.mxu1 %v543_v13  ;;  %v515_v22 = vpack.c.bf16 %v65_v20, %v57_v19  ;;  %v82_v25 = vld [vmem:[#allocation2 + $0x148] sm:$0xff]  ;;  %514 = vmatprep.subr.bf16.mxu0 %v513_v17  ;;  %v547_v26 = vpack.c.bf16 %v67_v23, %v59_v21  ;;  %v76_v28 = vld [vmem:[#allocation2 + $0x118] sm:$0xff]  ;;  %v73_v30 = vld [vmem:[#allocation2 + $0x100] sm:$0xff] }
  0x2c   :  { %546 = vmatprep.subr.bf16.mxu1 %v545_v18  ;;  %v517_v27 = vpack.c.bf16 %v82_v25, %v74_v24  ;;  %v84_v29 = vld [vmem:[#allocation2 + $0x158] sm:$0xff]  ;;  %v81_v32 = vld [vmem:[#allocation2 + $0x140] sm:$0xff]  ;;  %v75_v33 = vld [vmem:[#allocation2 + $0x110] sm:$0xff] }
  0x2d   :  { %v549_v31 = vpack.c.bf16 %v84_v29, %v76_v28  ;;  %v83_v34 = vld [vmem:[#allocation2 + $0x150] sm:$0xff]  ;;  %v519_v35 = vpack.c.bf16 %v81_v32, %v73_v30  ;;  %v90_v36 = vld [vmem:[#allocation2 + $0x188] sm:$0xff]  ;;  %v92_v38 = vld [vmem:[#allocation2 + $0x198] sm:$0xff] }
  0x2e   :  { %516 = vmatpush1.bf16.msra.mxu0 %v515_v22  ;;  %v98_v37 = vld [vmem:[#allocation2 + $0x1c8] sm:$0xff]  ;;  %v551_v39 = vpack.c.bf16 %v83_v34, %v75_v33  ;;  %v100_v41 = vld [vmem:[#allocation2 + $0x1d8] sm:$0xff]  ;;  %v89_v42 = vld [vmem:[#allocation2 + $0x180] sm:$0xff] }
  0x2f   :  { %548 = vmatpush1.bf16.msra.mxu1 %v547_v26  ;;  %518 = vmatprep.subr.bf16.mxu0 %v517_v27  ;;  %v521_v40 = vpack.c.bf16 %v98_v37, %v90_v36  ;;  %v97_v43 = vld [vmem:[#allocation2 + $0x1c0] sm:$0xff]  ;;  %v553_v44 = vpack.c.bf16 %v100_v41, %v92_v38  ;;  %v91_v45 = vld [vmem:[#allocation2 + $0x190] sm:$0xff]  ;;  %v106_v47 = vld [vmem:[#allocation2 + $0x208] sm:$0xff] }
  0x30   :  { %550 = vmatprep.subr.bf16.mxu1 %v549_v31  ;;  %v99_v46 = vld [vmem:[#allocation2 + $0x1d0] sm:$0xff]  ;;  %v114_v48 = vld [vmem:[#allocation2 + $0x248] sm:$0xff]  ;;  %v108_v49 = vld [vmem:[#allocation2 + $0x218] sm:$0xff]  ;;  %v523_v51 = vpack.c.bf16 %v97_v43, %v89_v42 }
  0x31   :  { %v116_v50 = vld [vmem:[#allocation2 + $0x258] sm:$0xff]  ;;  %v555_v52 = vpack.c.bf16 %v99_v46, %v91_v45  ;;  %v525_v53 = vpack.c.bf16 %v114_v48, %v106_v47  ;;  %v105_v54 = vld [vmem:[#allocation2 + $0x200] sm:$0xff]  ;;  %v107_v56 = vld [vmem:[#allocation2 + $0x210] sm:$0xff] }
  0x32   :  { %520 = vmatpush1.bf16.msra.mxu0 %v519_v35  ;;  %v113_v55 = vld [vmem:[#allocation2 + $0x240] sm:$0xff]  ;;  %v557_v57 = vpack.c.bf16 %v116_v50, %v108_v49  ;;  %v115_v58 = vld [vmem:[#allocation2 + $0x250] sm:$0xff]  ;;  %v122_v59 = vld [vmem:[#allocation2 + $0x288] sm:$0xff] }
  0x33   :  { %552 = vmatpush1.bf16.msra.mxu1 %v551_v39  ;;  %522 = vmatprep.subr.bf16.mxu0 %v521_v40  ;;  %v130_v60 = vld [vmem:[#allocation2 + $0x2c8] sm:$0xff]  ;;  %v124_v61 = vld [vmem:[#allocation2 + $0x298] sm:$0xff]  ;;  %v527_v63 = vpack.c.bf16 %v113_v55, %v105_v54  ;;  %v559_v1 = vpack.c.bf16 %v115_v58, %v107_v56  ;;  %v121_v3 = vld [vmem:[#allocation2 + $0x280] sm:$0xff] }
  0x34   :  { %554 = vmatprep.subr.bf16.mxu1 %v553_v44  ;;  %v132_v62 = vld [vmem:[#allocation2 + $0x2d8] sm:$0xff]  ;;  %v529_v2 = vpack.c.bf16 %v130_v60, %v122_v59  ;;  %v129_v4 = vld [vmem:[#allocation2 + $0x2c0] sm:$0xff]  ;;  %v123_v5 = vld [vmem:[#allocation2 + $0x290] sm:$0xff] }
  0x35   :  { %v561_v6 = vpack.c.bf16 %v132_v62, %v124_v61  ;;  %v131_v7 = vld [vmem:[#allocation2 + $0x2d0] sm:$0xff]  ;;  %v138_v8 = vld [vmem:[#allocation2 + $0x308] sm:$0xff]  ;;  %v140_v10 = vld [vmem:[#allocation2 + $0x318] sm:$0xff]  ;;  %v531_v12 = vpack.c.bf16 %v129_v4, %v121_v3 }
  0x36   :  { %524 = vmatpush1.bf16.msra.mxu0 %v523_v51  ;;  %v146_v9 = vld [vmem:[#allocation2 + $0x348] sm:$0xff]  ;;  %v148_v11 = vld [vmem:[#allocation2 + $0x358] sm:$0xff]  ;;  %v563_v13 = vpack.c.bf16 %v131_v7, %v123_v5  ;;  %v137_v15 = vld [vmem:[#allocation2 + $0x300] sm:$0xff] }
  0x37   :  { %556 = vmatpush1.bf16.msra.mxu1 %v555_v52  ;;  %526 = vmatprep.subr.bf16.mxu0 %v525_v53  ;;  %v533_v14 = vpack.c.bf16 %v146_v9, %v138_v8  ;;  %v145_v16 = vld [vmem:[#allocation2 + $0x340] sm:$0xff]  ;;  %v139_v17 = vld [vmem:[#allocation2 + $0x310] sm:$0xff]  ;;  %v565_v18 = vpack.c.bf16 %v148_v11, %v140_v10  ;;  %v154_v20 = vld [vmem:[#allocation2 + $0x388] sm:$0xff] }
  0x38   :  { %558 = vmatprep.subr.bf16.mxu1 %v557_v57  ;;  %v147_v19 = vld [vmem:[#allocation2 + $0x350] sm:$0xff]  ;;  %v162_v21 = vld [vmem:[#allocation2 + $0x3c8] sm:$0xff]  ;;  %v156_v22 = vld [vmem:[#allocation2 + $0x398] sm:$0xff]  ;;  %v535_v24 = vpack.c.bf16 %v145_v16, %v137_v15 }
  0x39   :  { %v164_v23 = vld [vmem:[#allocation2 + $0x3d8] sm:$0xff]  ;;  %v567_v25 = vpack.c.bf16 %v147_v19, %v139_v17  ;;  %v537_v26 = vpack.c.bf16 %v162_v21, %v154_v20  ;;  %v153_v27 = vld [vmem:[#allocation2 + $0x380] sm:$0xff]  ;;  %v155_v29 = vld [vmem:[#allocation2 + $0x390] sm:$0xff] }
  0x3a   :  { %528 = vmatpush1.bf16.msra.mxu0 %v527_v63  ;;  %v161_v28 = vld [vmem:[#allocation2 + $0x3c0] sm:$0xff]  ;;  %v569_v30 = vpack.c.bf16 %v164_v23, %v156_v22  ;;  %v163_v31 = vld [vmem:[#allocation2 + $0x3d0] sm:$0xff]  ;;  %v46_v32 = vld [vmem:[#allocation2 + $0x28] sm:$0xff] }
  0x3b   :  { %560 = vmatpush1.bf16.msra.mxu1 %v559_v1  ;;  %530 = vmatprep.subr.bf16.mxu0 %v529_v2  ;;  %v54_v33 = vld [vmem:[#allocation2 + $0x68] sm:$0xff]  ;;  %v48_v34 = vld [vmem:[#allocation2 + $0x38] sm:$0xff]  ;;  %v539_v36 = vpack.c.bf16 %v161_v28, %v153_v27  ;;  %v571_v37 = vpack.c.bf16 %v163_v31, %v155_v29  ;;  %v45_v39 = vld [vmem:[#allocation2 + $0x20] sm:$0xff] }
  0x3c   :  { %562 = vmatprep.subr.bf16.mxu1 %v561_v6  ;;  %v56_v35 = vld [vmem:[#allocation2 + $0x78] sm:$0xff]  ;;  %v573_v38 = vpack.c.bf16 %v54_v33, %v46_v32  ;;  %v53_v40 = vld [vmem:[#allocation2 + $0x60] sm:$0xff]  ;;  %v47_v41 = vld [vmem:[#allocation2 + $0x30] sm:$0xff] }
  0x3d   :  { %v605_v42 = vpack.c.bf16 %v56_v35, %v48_v34  ;;  %v55_v43 = vld [vmem:[#allocation2 + $0x70] sm:$0xff]  ;;  %v62_v44 = vld [vmem:[#allocation2 + $0xa8] sm:$0xff]  ;;  %v64_v46 = vld [vmem:[#allocation2 + $0xb8] sm:$0xff]  ;;  %v575_v49 = vpack.c.bf16 %v53_v40, %v45_v39 }
  0x3e   :  { %532 = vmatpush1.bf16.msra.mxu0 %v531_v12  ;;  %v70_v45 = vld [vmem:[#allocation2 + $0xe8] sm:$0xff]  ;;  %v72_v47 = vld [vmem:[#allocation2 + $0xf8] sm:$0xff]  ;;  %v744_v48 = vld [vmem:[%s776_s0] sm:$0xff]  ;;  %v607_v50 = vpack.c.bf16 %v55_v43, %v47_v41 }
  0x3f   :  { %564 = vmatpush1.bf16.msra.mxu1 %v563_v13  ;;  %534 = vmatprep.subr.bf16.mxu0 %v533_v14  ;;  %v577_v51 = vpack.c.bf16 %v70_v45, %v62_v44  ;;  %v61_v52 = vld [vmem:[#allocation2 + $0xa0] sm:$0xff]  ;;  %v63_v54 = vld [vmem:[#allocation2 + $0xb0] sm:$0xff]  ;;  %v609_v55 = vpack.c.bf16 %v72_v47, %v64_v46  ;;  %v78_v57 = vld [vmem:[#allocation2 + $0x128] sm:$0xff] }
  0x40   :  { %566 = vmatprep.subr.bf16.mxu1 %v565_v18  ;;  %v69_v53 = vld [vmem:[#allocation2 + $0xe0] sm:$0xff]  ;;  %v71_v56 = vld [vmem:[#allocation2 + $0xf0] sm:$0xff]  ;;  %v86_v58 = vld [vmem:[#allocation2 + $0x168] sm:$0xff] }
  0x41   :  { %v80_v59 = vld [vmem:[#allocation2 + $0x138] sm:$0xff]  ;;  %v579_v61 = vpack.c.bf16 %v69_v53, %v61_v52  ;;  %v611_v62 = vpack.c.bf16 %v71_v56, %v63_v54  ;;  %v581_v63 = vpack.c.bf16 %v86_v58, %v78_v57  ;;  %v77_v1 = vld [vmem:[#allocation2 + $0x120] sm:$0xff]  ;;  %v79_v3 = vld [vmem:[#allocation2 + $0x130] sm:$0xff] }
  0x42   :  { %536 = vmatpush1.bf16.msra.mxu0 %v535_v24  ;;  %v88_v60 = vld [vmem:[#allocation2 + $0x178] sm:$0xff]  ;;  %v85_v2 = vld [vmem:[#allocation2 + $0x160] sm:$0xff]  ;;  %v87_v5 = vld [vmem:[#allocation2 + $0x170] sm:$0xff] }
  0x43   :  { %568 = vmatpush1.bf16.msra.mxu1 %v567_v25  ;;  %538 = vmatprep.subr.bf16.mxu0 %v537_v26  ;;  %v613_v4 = vpack.c.bf16 %v88_v60, %v80_v59  ;;  %v94_v6 = vld [vmem:[#allocation2 + $0x1a8] sm:$0xff]  ;;  %v96_v8 = vld [vmem:[#allocation2 + $0x1b8] sm:$0xff]  ;;  %v583_v10 = vpack.c.bf16 %v85_v2, %v77_v1  ;;  %v615_v11 = vpack.c.bf16 %v87_v5, %v79_v3  ;;  %v93_v13 = vld [vmem:[#allocation2 + $0x1a0] sm:$0xff]  ;;  %v171_v5 = vlaneseq }
  0x44   :  { %570 = vmatprep.subr.bf16.mxu1 %v569_v30  ;;  %v102_v7 = vld [vmem:[#allocation2 + $0x1e8] sm:$0xff]  ;;  %v104_v9 = vld [vmem:[#allocation2 + $0x1f8] sm:$0xff]  ;;  %v101_v14 = vld [vmem:[#allocation2 + $0x1e0] sm:$0xff] }
  0x45   :  { %v585_v12 = vpack.c.bf16 %v102_v7, %v94_v6  ;;  %v95_v15 = vld [vmem:[#allocation2 + $0x1b0] sm:$0xff]  ;;  %v617_v16 = vpack.c.bf16 %v104_v9, %v96_v8  ;;  %v110_v18 = vld [vmem:[#allocation2 + $0x228] sm:$0xff]  ;;  %v112_v20 = vld [vmem:[#allocation2 + $0x238] sm:$0xff]  ;;  %v587_v22 = vpack.c.bf16 %v101_v14, %v93_v13  ;;  %v172_v6 = vshrl.u32 %v171_v5, 7 }
  0x46   :  { %540 = vmatpush1.bf16.msra.mxu0 %v539_v36  ;;  %v103_v17 = vld [vmem:[#allocation2 + $0x1f0] sm:$0xff]  ;;  %v118_v19 = vld [vmem:[#allocation2 + $0x268] sm:$0xff]  ;;  %v120_v21 = vld [vmem:[#allocation2 + $0x278] sm:$0xff] }
  0x47   :  { %572 = vmatpush1.bf16.msra.mxu1 %v571_v37  ;;  %574 = vmatprep.subr.bf16.mxu0 %v573_v38  ;;  %v589_v23 = vpack.c.bf16 %v118_v19, %v110_v18  ;;  %v109_v24 = vld [vmem:[#allocation2 + $0x220] sm:$0xff]  ;;  %v111_v26 = vld [vmem:[#allocation2 + $0x230] sm:$0xff]  ;;  %v621_v27 = vpack.c.bf16 %v120_v21, %v112_v20  ;;  %v126_v29 = vld [vmem:[#allocation2 + $0x2a8] sm:$0xff]  ;;  %v173_v7 = vsub.s32 0, %v172_v6  ;;  %v181_v9 = vsub.s32 2, %v172_v6 }
  0x48   :  { %606 = vmatprep.subr.bf16.mxu1 %v605_v42  ;;  %v117_v25 = vld [vmem:[#allocation2 + $0x260] sm:$0xff]  ;;  %v119_v28 = vld [vmem:[#allocation2 + $0x270] sm:$0xff]  ;;  %v134_v30 = vld [vmem:[#allocation2 + $0x2e8] sm:$0xff] }
  0x49   :  { %276 = vmatmul.mubr.f32.vlgmr.msra.gmra.mrb[0].mxu0 %v744_v48  ;;  %v128_v31 = vld [vmem:[#allocation2 + $0x2b8] sm:$0xff]  ;;  %v591_v33 = vpack.c.bf16 %v117_v25, %v109_v24  ;;  %v623_v34 = vpack.c.bf16 %v119_v28, %v111_v26  ;;  %v593_v35 = vpack.c.bf16 %v134_v30, %v126_v29  ;;  %v125_v36 = vld [vmem:[#allocation2 + $0x2a0] sm:$0xff]  ;;  %v127_v38 = vld [vmem:[#allocation2 + $0x2b0] sm:$0xff]  ;;  %v193_v24 = vsub.s32 5, %v172_v6 }
  0x4a   :  { %347 = vmatmul.mubr.f32.vlgmr.msra.gmra.mrb[0].mxu1 %v744_v48  ;;  %576 = vmatpush1.bf16.msra.mxu0 %v575_v49  ;;  %v136_v32 = vld [vmem:[#allocation2 + $0x2f8] sm:$0xff]  ;;  %v133_v37 = vld [vmem:[#allocation2 + $0x2e0] sm:$0xff]  ;;  %v135_v40 = vld [vmem:[#allocation2 + $0x2f0] sm:$0xff]  ;;  %v201_v25 = vsub.s32 7, %v172_v6 }
  0x4b   :  { %608 = vmatpush1.bf16.msra.mxu1 %v607_v50  ;;  %578 = vmatprep.subr.bf16.mxu0 %v577_v51  ;;  %v625_v39 = vpack.c.bf16 %v136_v32, %v128_v31  ;;  %v142_v41 = vld [vmem:[#allocation2 + $0x328] sm:$0xff]  ;;  %v144_v43 = vld [vmem:[#allocation2 + $0x338] sm:$0xff]  ;;  %v595_v45 = vpack.c.bf16 %v133_v37, %v125_v36  ;;  %v627_v46 = vpack.c.bf16 %v135_v40, %v127_v38  ;;  %v141_v49 = vld [vmem:[#allocation2 + $0x320] sm:$0xff] }
  0x4c   :  { %610 = vmatprep.subr.bf16.mxu1 %v609_v55  ;;  %417 = vmatprep.mubr.f32.mxu0 %v694_v0  ;;  %v150_v42 = vld [vmem:[#allocation2 + $0x368] sm:$0xff]  ;;  %v152_v44 = vld [vmem:[#allocation2 + $0x378] sm:$0xff]  ;;  %v149_v50 = vld [vmem:[#allocation2 + $0x360] sm:$0xff] }
  0x4d   :  { %488 = vmatprep.mubr.f32.mxu1 %v694_v0  ;;  %v619_v0 = vpack.c.bf16 %v103_v17, %v95_v15  ;;  %v597_v47 = vpack.c.bf16 %v150_v42, %v142_v41  ;;  %v143_v51 = vld [vmem:[#allocation2 + $0x330] sm:$0xff]  ;;  %v629_v52 = vpack.c.bf16 %v152_v44, %v144_v43  ;;  %v158_v54 = vld [vmem:[#allocation2 + $0x3a8] sm:$0xff]  ;;  %v160_v56 = vld [vmem:[#allocation2 + $0x3b8] sm:$0xff]  ;;  %v599_v58 = vpack.c.bf16 %v149_v50, %v141_v49 }
  0x4e   :  { %580 = vmatpush1.bf16.msra.mxu0 %v579_v61  ;;  %v151_v53 = vld [vmem:[#allocation2 + $0x370] sm:$0xff]  ;;  %v166_v55 = vld [vmem:[#allocation2 + $0x3e8] sm:$0xff]  ;;  %v168_v57 = vld [vmem:[#allocation2 + $0x3f8] sm:$0xff] }
  0x4f   :  { %612 = vmatpush1.bf16.msra.mxu1 %v611_v62  ;;  %582 = vmatprep.subr.bf16.mxu0 %v581_v63  ;;  %v631_v59 = vpack.c.bf16 %v151_v53, %v143_v51  ;;  %v601_v60 = vpack.c.bf16 %v166_v55, %v158_v54  ;;  %v157_v61 = vld [vmem:[#allocation2 + $0x3a0] sm:$0xff]  ;;  %v633_v63 = vpack.c.bf16 %v168_v57, %v160_v56  ;;  %v159_v1 = vld [vmem:[#allocation2 + $0x3b0] sm:$0xff] }
  0x50   :  { %614 = vmatprep.subr.bf16.mxu1 %v613_v4  ;;  %v165_v62 = vld [vmem:[#allocation2 + $0x3e0] sm:$0xff]  ;;  %v167_v2 = vld [vmem:[#allocation2 + $0x3f0] sm:$0xff] }
  0x51   :  { %v603_v3 = vpack.c.bf16 %v165_v62, %v157_v61  ;;  %v635_v4 = vpack.c.bf16 %v167_v2, %v159_v1  ;;  %v169_v8 = vld [vmem:[#allocation4] sm:$0xff] }
  0x52   :  { %584 = vmatpush1.bf16.msra.mxu0 %v583_v10  ;;  %v177_v10 = vsub.s32 1, %v172_v6  ;;  %v182_v13 = vrot.slane %v169_v8, %v181_v9  ;;  %v194_v28 = vrot.slane %v169_v8, %v193_v24  ;;  %v202_v29 = vrot.slane %v169_v8, %v201_v25 }
  0x53   :  { %616 = vmatpush1.bf16.msra.mxu1 %v615_v11  ;;  %586 = vmatprep.subr.bf16.mxu0 %v585_v12  ;;  %v185_v11 = vsub.s32 3, %v172_v6  ;;  %v174_v12 = vrot.slane %v169_v8, %v173_v7 }
  0x54   :  { %618 = vmatprep.subr.bf16.mxu1 %v617_v16  ;;  %v178_v14 = vrot.slane %v169_v8, %v177_v10 }
  0x55   :  { %v186_v15 = vrot.slane %v169_v8, %v185_v11 }
  0x56   :  { %588 = vmatpush1.bf16.msra.mxu0 %v587_v22 }
  0x57   :  { %620 = vmatpush1.bf16.msra.mxu1 %v619_v0  ;;  %590 = vmatprep.subr.bf16.mxu0 %v589_v23  ;;  %v189_v0 = vsub.s32 4, %v172_v6  ;;  %v197_v23 = vsub.s32 6, %v172_v6 }
  0x58   :  { %622 = vmatprep.subr.bf16.mxu1 %v621_v27 }
  0x59   :  { %v190_v26 = vrot.slane %v169_v8, %v189_v0  ;;  %v198_v27 = vrot.slane %v169_v8, %v197_v23 }
  0x5a   :  { %592 = vmatpush1.bf16.msra.mxu0 %v591_v33 }
  0x5b   :  { %624 = vmatpush1.bf16.msra.mxu1 %v623_v34  ;;  %594 = vmatprep.subr.bf16.mxu0 %v593_v35 }
  0x5c   :  { %626 = vmatprep.subr.bf16.mxu1 %v625_v39 }
  0x5e   :  { %596 = vmatpush1.bf16.msra.mxu0 %v595_v45 }
  0x5f   :  { %628 = vmatpush1.bf16.msra.mxu1 %v627_v46  ;;  %598 = vmatprep.subr.bf16.mxu0 %v597_v47 }
  0x60   :  { %630 = vmatprep.subr.bf16.mxu1 %v629_v52 }
  0x62   :  { %600 = vmatpush1.bf16.msra.mxu0 %v599_v58 }
  0x63   :  { %632 = vmatpush1.bf16.msra.mxu1 %v631_v59  ;;  %602 = vmatprep.subr.bf16.mxu0 %v601_v60 }
  0x64   :  { %634 = vmatprep.subr.bf16.mxu1 %v633_v63 }
  0x66   :  { %604 = vmatpush1.bf16.msra.mxu0 %v603_v3 }
  0x67   :  { %636 = vmatpush1.bf16.msra.mxu1 %v635_v4 }
  0x69   :  { %418 = vmatmul.mubr.f32.vlgmr.msra.gmra.mrb[2].mxu0 %v744_v48 }
  0x6a   :  { %489 = vmatmul.mubr.f32.vlgmr.msra.gmra.mrb[2].mxu1 %v744_v48 }
 0x11c   :  { %v277_v16 = vpop.f32.mrb[0].mxu0 }
 0x11d   :  { %v278_v17 = vadd.f32 %v277_v16, %v174_v12  ;;  %v348_v18 = vpop.f32.mrb[0].mxu1  ;;  %v279_v19 = vpop.f32.mrb[1].mxu0 }
 0x11e   :  { %v349_v20 = vadd.f32 %v348_v18, %v182_v13  ;;  %v280_v21 = vadd.f32 %v279_v19, %v178_v14  ;;  %v350_v22 = vpop.f32.mrb[1].mxu1 }
 0x11f   :  { %495 = vst [vmem:[%s779_s3] sm:$0xff] %v278_v17  ;;  %v351_v48 = vadd.f32 %v350_v22, %v186_v15 }
 0x120   :  { %497 = vst [vmem:[%s779_s3 + $0x10] sm:$0xff] %v349_v20  ;;  %496 = vst [vmem:[%s779_s3 + $0x8] sm:$0xff] %v280_v21 }
 0x121   :  { %498 = vst [vmem:[%s779_s3 + $0x18] sm:$0xff] %v351_v48 }
 0x13c   :  { %v419_v30 = vpop.f32.mrb[2].mxu0 }
 0x13d   :  { %v420_v31 = vadd.f32 %v419_v30, %v190_v26  ;;  %v490_v32 = vpop.f32.mrb[2].mxu1  ;;  %v421_v33 = vpop.f32.mrb[3].mxu0 }
 0x13e   :  { %v491_v34 = vadd.f32 %v490_v32, %v198_v27  ;;  %v422_v35 = vadd.f32 %v421_v33, %v194_v28  ;;  %v492_v36 = vpop.f32.mrb[3].mxu1 }
 0x13f   :  { %499 = vst [vmem:[%s779_s3 + $0x20] sm:$0xff] %v420_v31  ;;  %v493_v37 = vadd.f32 %v492_v36, %v202_v29 }
 0x140   :  { %501 = vst [vmem:[%s779_s3 + $0x30] sm:$0xff] %v491_v34  ;;  %500 = vst [vmem:[%s779_s3 + $0x28] sm:$0xff] %v422_v35 }
 0x141   :  { %502 = vst [vmem:[%s779_s3 + $0x38] sm:$0xff] %v493_v37 }
 0x142   :  { %507 = vsyncpa [#allocation3], 1 }
 0x143   :  { %508 = vsyncpa [#allocation5], 1 }

// kernel: _lambda_.16
= control target key start
LH: loop header
LB: loop body
LE: loop exit
PB: predicated region body
PF: predicated region fallthrough
CT: control target
= control target key end

     0   :  { %s462_s1 = inlined_call_operand.vmem [shape: f32[256,128], index: 1, kind: input, shape index: {}]   ;;  %s463_s0 = inlined_call_operand.vmem [shape: f32[56,256], index: 0, kind: input, shape index: {}]   ;;  %s464_s2 = inlined_call_operand.vmem [shape: f32[1,128], index: 2, kind: input, shape index: {}]   ;;  %s465_s3 = inlined_call_operand.vmem [shape: f32[56,128], index: 3, kind: output, shape index: {}]  }
   0x1   :  { %v44_v0 = vld [vmem:[%s462_s1 + $0x80] sm:$0xff]  ;;  %v45_v1 = vld [vmem:[%s462_s1 + $0x88] sm:$0xff]  ;;  %v46_v5 = vld [vmem:[%s462_s1 + $0x90] sm:$0xff] }
   0x2   :  { %v28_v2 = vld [vmem:[%s462_s1] sm:$0xff]  ;;  %v232_v3 = vpack.c.bf16 %v45_v1, %v44_v0  ;;  %v29_v4 = vld [vmem:[%s462_s1 + $0x8] sm:$0xff]  ;;  %v47_v6 = vld [vmem:[%s462_s1 + $0x98] sm:$0xff] }
   0x3   :  { %v234_v7 = vpack.c.bf16 %v29_v4, %v28_v2  ;;  %v236_v8 = vpack.c.bf16 %v47_v6, %v46_v5  ;;  %v30_v9 = vld [vmem:[%s462_s1 + $0x10] sm:$0xff]  ;;  %v31_v10 = vld [vmem:[%s462_s1 + $0x18] sm:$0xff]  ;;  %v48_v11 = vld [vmem:[%s462_s1 + $0xa0] sm:$0xff] }
   0x4   :  { %233 = vmatprep.subr.bf16.mxu0 %v232_v3  ;;  %264 = vmatprep.subr.bf16.mxu1 %v232_v3  ;;  %v49_v12 = vld [vmem:[%s462_s1 + $0xa8] sm:$0xff]  ;;  %v238_v13 = vpack.c.bf16 %v31_v10, %v30_v9  ;;  %v32_v15 = vld [vmem:[%s462_s1 + $0x20] sm:$0xff]  ;;  %v50_v17 = vld [vmem:[%s462_s1 + $0xb0] sm:$0xff] }
   0x5   :  { %235 = vmatpush3.bf16.msra.mxu0 %v234_v7  ;;  %272 = vmatpush3.bf16.msra.mxu1 %v234_v7  ;;  %v240_v14 = vpack.c.bf16 %v49_v12, %v48_v11  ;;  %v33_v16 = vld [vmem:[%s462_s1 + $0x28] sm:$0xff]  ;;  %v51_v18 = vld [vmem:[%s462_s1 + $0xb8] sm:$0xff]  ;;  %v34_v21 = vld [vmem:[%s462_s1 + $0x30] sm:$0xff] }
   0x6   :  { %237 = vmatprep.subr.bf16.mxu0 %v236_v8  ;;  %265 = vmatprep.subr.bf16.mxu1 %v236_v8  ;;  %v242_v19 = vpack.c.bf16 %v33_v16, %v32_v15  ;;  %v244_v20 = vpack.c.bf16 %v51_v18, %v50_v17  ;;  %v35_v22 = vld [vmem:[%s462_s1 + $0x38] sm:$0xff]  ;;  %v52_v23 = vld [vmem:[%s462_s1 + $0xc0] sm:$0xff]  ;;  %v53_v24 = vld [vmem:[%s462_s1 + $0xc8] sm:$0xff] }
   0x7   :  { %v15_v25 = vld [vmem:[%s463_s0 + $0x8] sm:$0xff]  ;;  %v246_v27 = vpack.c.bf16 %v35_v22, %v34_v21  ;;  %v248_v28 = vpack.c.bf16 %v53_v24, %v52_v23  ;;  %v36_v29 = vld [vmem:[%s462_s1 + $0x40] sm:$0xff]  ;;  %v54_v31 = vld [vmem:[%s462_s1 + $0xd0] sm:$0xff] }
   0x8   :  { %131 = vmatprep.mubr.f32.mxu0 %v15_v25  ;;  %v23_v26 = vld [vmem:[%s463_s0 + $0x48] sm:$0xff]  ;;  %v55_v32 = vld [vmem:[%s462_s1 + $0xd8] sm:$0xff]  ;;  %v38_v35 = vld [vmem:[%s462_s1 + $0x50] sm:$0xff] }
   0x9   :  { %239 = vmatpush3.bf16.msra.mxu0 %v238_v13  ;;  %273 = vmatpush3.bf16.msra.mxu1 %v238_v13  ;;  %v37_v30 = vld [vmem:[%s462_s1 + $0x48] sm:$0xff]  ;;  %v252_v34 = vpack.c.bf16 %v55_v32, %v54_v31  ;;  %v39_v36 = vld [vmem:[%s462_s1 + $0x58] sm:$0xff]  ;;  %v56_v37 = vld [vmem:[%s462_s1 + $0xe0] sm:$0xff] }
   0xa   :  { %241 = vmatprep.subr.bf16.mxu0 %v240_v14  ;;  %266 = vmatprep.subr.bf16.mxu1 %v240_v14  ;;  %v250_v33 = vpack.c.bf16 %v37_v30, %v36_v29  ;;  %v57_v38 = vld [vmem:[%s462_s1 + $0xe8] sm:$0xff]  ;;  %v254_v39 = vpack.c.bf16 %v39_v36, %v38_v35  ;;  %v40_v41 = vld [vmem:[%s462_s1 + $0x60] sm:$0xff]  ;;  %v58_v43 = vld [vmem:[%s462_s1 + $0xf0] sm:$0xff] }
   0xb   :  { %151 = vmatprep.mubr.f32.mxu1 %v23_v26  ;;  %v256_v40 = vpack.c.bf16 %v57_v38, %v56_v37  ;;  %v41_v42 = vld [vmem:[%s462_s1 + $0x68] sm:$0xff]  ;;  %v59_v44 = vld [vmem:[%s462_s1 + $0xf8] sm:$0xff]  ;;  %v42_v47 = vld [vmem:[%s462_s1 + $0x70] sm:$0xff] }
   0xc   :  { %v258_v45 = vpack.c.bf16 %v41_v42, %v40_v41  ;;  %v260_v46 = vpack.c.bf16 %v59_v44, %v58_v43  ;;  %v43_v48 = vld [vmem:[%s462_s1 + $0x78] sm:$0xff]  ;;  %v14_v50 = vld [vmem:[%s463_s0] sm:$0xff]  ;;  %v16_v54 = vld [vmem:[%s463_s0 + $0x10] sm:$0xff] }
   0xd   :  { %243 = vmatpush3.bf16.msra.mxu0 %v242_v19  ;;  %274 = vmatpush3.bf16.msra.mxu1 %v242_v19  ;;  %v262_v49 = vpack.c.bf16 %v43_v48, %v42_v47  ;;  %v22_v51 = vld [vmem:[%s463_s0 + $0x40] sm:$0xff]  ;;  %v17_v52 = vld [vmem:[%s463_s0 + $0x18] sm:$0xff]  ;;  %v24_v55 = vld [vmem:[%s463_s0 + $0x50] sm:$0xff] }
   0xe   :  { %245 = vmatprep.subr.bf16.mxu0 %v244_v20  ;;  %267 = vmatprep.subr.bf16.mxu1 %v244_v20  ;;  %v25_v53 = vld [vmem:[%s463_s0 + $0x58] sm:$0xff]  ;;  %v19_v56 = vld [vmem:[%s463_s0 + $0x28] sm:$0xff]  ;;  %v18_v58 = vld [vmem:[%s463_s0 + $0x20] sm:$0xff] }
   0xf   :  { %v27_v57 = vld [vmem:[%s463_s0 + $0x68] sm:$0xff]  ;;  %v26_v59 = vld [vmem:[%s463_s0 + $0x60] sm:$0xff]  ;;  %v21_v60 = vld [vmem:[%s463_s0 + $0x38] sm:$0xff] }
  0x10   :  { %v20_v61 = vld [vmem:[%s463_s0 + $0x30] sm:$0xff]  ;;  %v178_v0 = vld [vmem:[%s464_s2] ss:$0 sm:$0xff] }
  0x11   :  { %247 = vmatpush3.bf16.msra.mxu0 %v246_v27  ;;  %275 = vmatpush3.bf16.msra.mxu1 %v246_v27 }
  0x12   :  { %249 = vmatprep.subr.bf16.mxu0 %v248_v28  ;;  %268 = vmatprep.subr.bf16.mxu1 %v248_v28 }
  0x15   :  { %251 = vmatpush3.bf16.msra.mxu0 %v250_v33  ;;  %276 = vmatpush3.bf16.msra.mxu1 %v250_v33 }
  0x16   :  { %253 = vmatprep.subr.bf16.mxu0 %v252_v34  ;;  %269 = vmatprep.subr.bf16.mxu1 %v252_v34 }
  0x19   :  { %255 = vmatpush3.bf16.msra.mxu0 %v254_v39  ;;  %277 = vmatpush3.bf16.msra.mxu1 %v254_v39 }
  0x1a   :  { %257 = vmatprep.subr.bf16.mxu0 %v256_v40  ;;  %270 = vmatprep.subr.bf16.mxu1 %v256_v40 }
  0x1d   :  { %259 = vmatpush3.bf16.msra.mxu0 %v258_v45  ;;  %278 = vmatpush3.bf16.msra.mxu1 %v258_v45 }
  0x1e   :  { %261 = vmatprep.subr.bf16.mxu0 %v260_v46  ;;  %271 = vmatprep.subr.bf16.mxu1 %v260_v46 }
  0x21   :  { %263 = vmatpush3.bf16.msra.mxu0 %v262_v49  ;;  %279 = vmatpush3.bf16.msra.mxu1 %v262_v49 }
  0x24   :  { %132 = vmatmul.mubr.f32.vlgmr.msra.gmra.mrb[0].mxu0 %v14_v50  ;;  %152 = vmatmul.mubr.f32.vlgmr.msra.gmra.mrb[0].mxu1 %v22_v51 }
  0x25   :  { %136 = vmatprep.mubr.f32.mxu0 %v17_v52  ;;  %156 = vmatprep.mubr.f32.mxu1 %v25_v53 }
  0x28   :  { %137 = vmatmul.mubr.f32.gmra.mrb[2].mxu0 %v16_v54  ;;  %157 = vmatmul.mubr.f32.gmra.mrb[2].mxu1 %v24_v55 }
  0x29   :  { %141 = vmatprep.mubr.f32.mxu0 %v19_v56  ;;  %161 = vmatprep.mubr.f32.mxu1 %v27_v57 }
  0x2c   :  { %142 = vmatmul.mubr.f32.gmra.mrb[4].mxu0 %v18_v58  ;;  %162 = vmatmul.mubr.f32.gmra.mrb[4].mxu1 %v26_v59 }
  0x2d   :  { %146 = vmatprep.mubr.f32.mxu0 %v21_v60 }
  0x30   :  { %147 = vmatmul.mubr.f32.gmra.mrb[6].mxu0 %v20_v61 }
  0xf7   :  { %v211_v62 = vpop.f32.mrb[0].mxu0  ;;  %v223_v63 = vpop.f32.mrb[0].mxu1 }
  0xf8   :  { %v212_v1 = vpop.f32.mrb[1].mxu0  ;;  %v224_v2 = vpop.f32.mrb[1].mxu1 }
  0xf9   :  { %v213_v3 = vadd.f32 %v212_v1, %v211_v62  ;;  %v225_v4 = vadd.f32 %v224_v2, %v223_v63 }
  0xfb   :  { %v134_v5 = vadd.f32 %v213_v3, %v178_v0  ;;  %v214_v6 = vpop.f32.mrb[2].mxu0  ;;  %v154_v7 = vadd.f32 %v225_v4, %v178_v0  ;;  %v226_v8 = vpop.f32.mrb[2].mxu1 }
  0xfc   :  { %v215_v9 = vpop.f32.mrb[3].mxu0  ;;  %v227_v10 = vpop.f32.mrb[3].mxu1 }
  0xfd   :  { %167 = vst [vmem:[%s465_s3] sm:$0xff] %v134_v5  ;;  %171 = vst [vmem:[%s465_s3 + $0x20] sm:$0xff] %v154_v7  ;;  %v216_v11 = vadd.f32 %v215_v9, %v214_v6  ;;  %v228_v12 = vadd.f32 %v227_v10, %v226_v8 }
  0xff   :  { %v139_v13 = vadd.f32 %v216_v11, %v178_v0  ;;  %v217_v14 = vpop.f32.mrb[4].mxu0  ;;  %v159_v15 = vadd.f32 %v228_v12, %v178_v0  ;;  %v229_v16 = vpop.f32.mrb[4].mxu1 }
 0x100   :  { %v218_v17 = vpop.f32.mrb[5].mxu0  ;;  %v230_v18 = vpop.f32.mrb[5].mxu1 }
 0x101   :  { %168 = vst [vmem:[%s465_s3 + $0x8] sm:$0xff] %v139_v13  ;;  %172 = vst [vmem:[%s465_s3 + $0x28] sm:$0xff] %v159_v15  ;;  %v219_v19 = vadd.f32 %v218_v17, %v217_v14  ;;  %v231_v20 = vadd.f32 %v230_v18, %v229_v16 }
 0x103   :  { %v144_v21 = vadd.f32 %v219_v19, %v178_v0  ;;  %v220_v22 = vpop.f32.mrb[6].mxu0  ;;  %v164_v23 = vadd.f32 %v231_v20, %v178_v0 }
 0x104   :  { %v221_v24 = vpop.f32.mrb[7].mxu0 }
 0x105   :  { %169 = vst [vmem:[%s465_s3 + $0x10] sm:$0xff] %v144_v21  ;;  %173 = vst [vmem:[%s465_s3 + $0x30] sm:$0xff] %v164_v23  ;;  %v222_v25 = vadd.f32 %v221_v24, %v220_v22 }
 0x107   :  { %v149_v26 = vadd.f32 %v222_v25, %v178_v0 }
 0x109   :  { %170 = vst [vmem:[%s465_s3 + $0x18] sm:$0xff] %v149_v26 }

// kernel: _lambda_.17
= control target key start
LH: loop header
LB: loop body
LE: loop exit
PB: predicated region body
PF: predicated region fallthrough
CT: control target
= control target key end

     0   :  { %vm14_vm0 = vcmask 253952   ;;  %vm34_vm1 = vcmask 261120   ;;  %v140_v0 = vmov 0.0   ;;  %s258_s0 = inlined_call_operand.vmem [shape: f32[128,32], index: 0, kind: input, shape index: {}]   ;;  %s259_s1 = inlined_call_operand.vmem [shape: f32[1,32], index: 1, kind: output, shape index: {0}]   ;;  %s260_s2 = inlined_call_operand.vmem [shape: f32[1,32], index: 2, kind: output, shape index: {1}]  }
   0x1   :  { %15 = vst.msk [vmem:[%s259_s1] sm:$0x1] %vm14_vm0, %v140_v0  ;;  %v17_v1 = vld [vmem:[%s258_s0] sm:$0xff]  ;;  %v18_v2 = vld [vmem:[%s258_s0 + $0x8] sm:$0xff]  ;;  %v19_v3 = vld [vmem:[%s258_s0 + $0x10] sm:$0xff] }
   0x2   :  { %16 = vst.msk [vmem:[%s260_s2] sm:$0x1] %vm14_vm0, %v140_v0  ;;  %v35_v4 = vsel %vm34_vm1, %v17_v1, 0.0  ;;  %v36_v5 = vsel %vm34_vm1, %v18_v2, 0.0  ;;  %v38_v6 = vsel %vm34_vm1, %v19_v3, 0.0  ;;  %v20_v7 = vld [vmem:[%s258_s0 + $0x18] sm:$0xff]  ;;  %v76_v15 = vmul.f32 %v17_v1, %v17_v1 }
   0x3   :  { %v37_v8 = vadd.f32 %v36_v5, %v35_v4  ;;  %v40_v9 = vsel %vm34_vm1, %v20_v7, 0.0  ;;  %v21_v10 = vld [vmem:[%s258_s0 + $0x20] sm:$0xff]  ;;  %v22_v13 = vld [vmem:[%s258_s0 + $0x28] sm:$0xff]  ;;  %v77_v16 = vmul.f32 %v18_v2, %v18_v2  ;;  %v78_v17 = vmul.f32 %v19_v3, %v19_v3  ;;  %v23_v19 = vld [vmem:[%s258_s0 + $0x30] sm:$0xff] }
   0x4   :  { %v42_v12 = vsel %vm34_vm1, %v21_v10, 0.0  ;;  %v44_v18 = vsel %vm34_vm1, %v22_v13, 0.0  ;;  %v79_v21 = vmul.f32 %v20_v7, %v20_v7  ;;  %v46_v22 = vsel %vm34_vm1, %v23_v19, 0.0  ;;  %v24_v24 = vld [vmem:[%s258_s0 + $0x38] sm:$0xff]  ;;  %v25_v31 = vld [vmem:[%s258_s0 + $0x40] sm:$0xff]  ;;  %v26_v37 = vld [vmem:[%s258_s0 + $0x48] sm:$0xff] }
   0x5   :  { %v39_v11 = vadd.f32 %v38_v6, %v37_v8  ;;  %v80_v23 = vmul.f32 %v21_v10, %v21_v10  ;;  %v92_v26 = vsel %vm34_vm1, %v76_v15, 0.0  ;;  %v93_v27 = vsel %vm34_vm1, %v77_v16, 0.0  ;;  %v27_v43 = vld [vmem:[%s258_s0 + $0x50] sm:$0xff]  ;;  %v28_v49 = vld [vmem:[%s258_s0 + $0x58] sm:$0xff]  ;;  %v29_v55 = vld [vmem:[%s258_s0 + $0x60] sm:$0xff] }
   0x6   :  { %v95_v28 = vsel %vm34_vm1, %v78_v17, 0.0  ;;  %v48_v29 = vsel %vm34_vm1, %v24_v24, 0.0  ;;  %v94_v30 = vadd.f32 %v93_v27, %v92_v26  ;;  %v81_v33 = vmul.f32 %v22_v13, %v22_v13  ;;  %v30_v61 = vld [vmem:[%s258_s0 + $0x68] sm:$0xff]  ;;  %v31_v3 = vld [vmem:[%s258_s0 + $0x70] sm:$0xff] }
   0x7   :  { %v41_v14 = vadd.f32 %v40_v9, %v39_v11  ;;  %v97_v34 = vsel %vm34_vm1, %v79_v21, 0.0  ;;  %v50_v35 = vsel %vm34_vm1, %v25_v31, 0.0  ;;  %v82_v39 = vmul.f32 %v23_v19, %v23_v19  ;;  %v32_v9 = vld [vmem:[%s258_s0 + $0x78] sm:$0xff] }
   0x8   :  { %v96_v36 = vadd.f32 %v95_v28, %v94_v30  ;;  %v99_v40 = vsel %vm34_vm1, %v80_v23, 0.0  ;;  %v52_v41 = vsel %vm34_vm1, %v26_v37, 0.0  ;;  %v83_v45 = vmul.f32 %v24_v24, %v24_v24 }
   0x9   :  { %v43_v20 = vadd.f32 %v42_v12, %v41_v14  ;;  %v101_v46 = vsel %vm34_vm1, %v81_v33, 0.0  ;;  %v54_v47 = vsel %vm34_vm1, %v27_v43, 0.0  ;;  %v84_v51 = vmul.f32 %v25_v31, %v25_v31 }
   0xa   :  { %v98_v42 = vadd.f32 %v97_v34, %v96_v36  ;;  %v103_v52 = vsel %vm34_vm1, %v82_v39, 0.0  ;;  %v56_v53 = vsel %vm34_vm1, %v28_v49, 0.0  ;;  %v85_v57 = vmul.f32 %v26_v37, %v26_v37  ;;  %v33_v36 = vld [vmem:[%s259_s1] sm:$0x1] }
   0xb   :  { %v45_v25 = vadd.f32 %v44_v18, %v43_v20  ;;  %v105_v58 = vsel %vm34_vm1, %v83_v45, 0.0  ;;  %v58_v59 = vsel %vm34_vm1, %v29_v55, 0.0  ;;  %v86_v63 = vmul.f32 %v27_v43, %v27_v43 }
   0xc   :  { %v100_v48 = vadd.f32 %v99_v40, %v98_v42  ;;  %v107_v0 = vsel %vm34_vm1, %v84_v51, 0.0  ;;  %v60_v1 = vsel %vm34_vm1, %v30_v61, 0.0  ;;  %v87_v5 = vmul.f32 %v28_v49, %v28_v49 }
   0xd   :  { %v47_v32 = vadd.f32 %v46_v22, %v45_v25  ;;  %v109_v6 = vsel %vm34_vm1, %v85_v57, 0.0  ;;  %v62_v7 = vsel %vm34_vm1, %v31_v3, 0.0  ;;  %v88_v11 = vmul.f32 %v29_v55, %v29_v55 }
   0xe   :  { %v102_v54 = vadd.f32 %v101_v46, %v100_v48  ;;  %v111_v12 = vsel %vm34_vm1, %v86_v63, 0.0  ;;  %v64_v13 = vsel %vm34_vm1, %v32_v9, 0.0  ;;  %v89_v16 = vmul.f32 %v30_v61, %v30_v61 }
   0xf   :  { %v49_v38 = vadd.f32 %v48_v29, %v47_v32  ;;  %v113_v17 = vsel %vm34_vm1, %v87_v5, 0.0  ;;  %v90_v20 = vmul.f32 %v31_v3, %v31_v3  ;;  %v115_v21 = vsel %vm34_vm1, %v88_v11, 0.0 }
  0x10   :  { %v104_v60 = vadd.f32 %v103_v52, %v102_v54  ;;  %v91_v24 = vmul.f32 %v32_v9, %v32_v9  ;;  %v117_v25 = vsel %vm34_vm1, %v89_v16, 0.0 }
  0x11   :  { %v51_v44 = vadd.f32 %v50_v35, %v49_v38  ;;  %v119_v28 = vsel %vm34_vm1, %v90_v20, 0.0 }
  0x12   :  { %v106_v2 = vadd.f32 %v105_v58, %v104_v60  ;;  %v121_v31 = vsel %vm34_vm1, %v91_v24, 0.0 }
  0x13   :  { %v53_v50 = vadd.f32 %v52_v41, %v51_v44  ;;  %v75_v44 = vld [vmem:[%s260_s2] sm:$0x1] }
  0x14   :  { %v108_v8 = vadd.f32 %v107_v0, %v106_v2 }
  0x15   :  { %v55_v56 = vadd.f32 %v54_v47, %v53_v50 }
  0x16   :  { %v110_v14 = vadd.f32 %v109_v6, %v108_v8 }
  0x17   :  { %v57_v62 = vadd.f32 %v56_v53, %v55_v56 }
  0x18   :  { %v112_v18 = vadd.f32 %v111_v12, %v110_v14 }
  0x19   :  { %v59_v4 = vadd.f32 %v58_v59, %v57_v62 }
  0x1a   :  { %v114_v22 = vadd.f32 %v113_v17, %v112_v18 }
  0x1b   :  { %v61_v10 = vadd.f32 %v60_v1, %v59_v4 }
  0x1c   :  { %v116_v26 = vadd.f32 %v115_v21, %v114_v22 }
  0x1d   :  { %v63_v15 = vadd.f32 %v62_v7, %v61_v10 }
  0x1e   :  { %v118_v29 = vadd.f32 %v117_v25, %v116_v26 }
  0x1f   :  { %v65_v19 = vadd.f32 %v64_v13, %v63_v15 }
  0x20   :  { %v120_v32 = vadd.f32 %v119_v28, %v118_v29 }
  0x21   :  { %v66_v23 = vrot.slane %v65_v19, 4 }
  0x22   :  { %v122_v34 = vadd.f32 %v121_v31, %v120_v32 }
  0x23   :  { %v67_v27 = vadd.f32 %v66_v23, %v65_v19 }
  0x24   :  { %v123_v37 = vrot.slane %v122_v34, 4 }
  0x25   :  { %v68_v30 = vrot.slane %v67_v27, 2 }
  0x26   :  { %v124_v39 = vadd.f32 %v123_v37, %v122_v34 }
  0x27   :  { %v69_v33 = vadd.f32 %v68_v30, %v67_v27 }
  0x28   :  { %v125_v41 = vrot.slane %v124_v39, 2 }
  0x29   :  { %v70_v35 = vrot.slane %v69_v33, 1 }
  0x2a   :  { %v126_v42 = vadd.f32 %v125_v41, %v124_v39 }
  0x2b   :  { %v71_v38 = vadd.f32 %v70_v35, %v69_v33 }
  0x2c   :  { %v127_v43 = vrot.slane %v126_v42, 1 }
  0x2d   :  { %v72_v40 = vadd.f32 %v71_v38, %v33_v36 }
  0x2e   :  { %v128_v45 = vadd.f32 %v127_v43, %v126_v42 }
  0x2f   :  { %74 = vst.msk [vmem:[%s259_s1] sm:$0x1] %vm14_vm0, %v72_v40 }
  0x30   :  { %v129_v46 = vadd.f32 %v128_v45, %v75_v44 }
  0x32   :  { %130 = vst.msk [vmem:[%s260_s2] sm:$0x1] %vm14_vm0, %v129_v46 }

// kernel: _lambda_.18
= control target key start
LH: loop header
LB: loop body
LE: loop exit
PB: predicated region body
PF: predicated region fallthrough
CT: control target
= control target key end

     0   :  { %vm92_vm0 = vcmask 261120   ;;  %s271_s0 = inlined_call_operand.vmem [shape: f32[128,32], index: 0, kind: input, shape index: {}]   ;;  %s272_s1 = inlined_call_operand.vmem [shape: f32[1,32], index: 1, kind: input, shape index: {}]   ;;  %s273_s2 = inlined_call_operand.vmem [shape: f32[1,32], index: 2, kind: input, shape index: {}]   ;;  %s274_s3 = inlined_call_operand.vmem [shape: f32[128,32], index: 3, kind: output, shape index: {}]  }
   0x1   :  { %v14_v0 = vld [vmem:[%s271_s0] sm:$0xff]  ;;  %v15_v4 = vld [vmem:[%s271_s0 + $0x8] sm:$0xff]  ;;  %v16_v5 = vld [vmem:[%s271_s0 + $0x10] sm:$0xff] }
   0x2   :  { %v113_v1 = vld [vmem:[%s272_s1] ss:$0 sm:$0xff]  ;;  %v17_v6 = vld [vmem:[%s271_s0 + $0x18] sm:$0xff]  ;;  %v19_v11 = vld [vmem:[%s271_s0 + $0x28] sm:$0xff] }
   0x3   :  { %v144_v2 = vld [vmem:[%s273_s2] ss:$0 sm:$0xff]  ;;  %v37_v3 = vmul.f32 %v113_v1, %v14_v0  ;;  %v38_v7 = vmul.f32 %v113_v1, %v15_v4  ;;  %v39_v8 = vmul.f32 %v113_v1, %v16_v5  ;;  %v40_v9 = vmul.f32 %v113_v1, %v17_v6  ;;  %v20_v12 = vld [vmem:[%s271_s0 + $0x30] sm:$0xff]  ;;  %v21_v17 = vld [vmem:[%s271_s0 + $0x38] sm:$0xff] }
   0x4   :  { %v18_v10 = vld [vmem:[%s271_s0 + $0x20] sm:$0xff]  ;;  %v42_v15 = vmul.f32 %v113_v1, %v19_v11  ;;  %v43_v16 = vmul.f32 %v113_v1, %v20_v12  ;;  %v44_v21 = vmul.f32 %v113_v1, %v21_v17  ;;  %v23_v27 = vld [vmem:[%s271_s0 + $0x48] sm:$0xff]  ;;  %v24_v28 = vld [vmem:[%s271_s0 + $0x50] sm:$0xff] }
   0x5   :  { %v60_v13 = vadd.f32 %v144_v2, %v37_v3  ;;  %v41_v14 = vmul.f32 %v113_v1, %v18_v10  ;;  %v61_v18 = vadd.f32 %v144_v2, %v38_v7  ;;  %v62_v19 = vadd.f32 %v144_v2, %v39_v8  ;;  %v22_v22 = vld [vmem:[%s271_s0 + $0x40] sm:$0xff]  ;;  %v25_v29 = vld [vmem:[%s271_s0 + $0x58] sm:$0xff]  ;;  %v27_v35 = vld [vmem:[%s271_s0 + $0x68] sm:$0xff] }
   0x6   :  { %v63_v20 = vadd.f32 %v144_v2, %v40_v9  ;;  %v65_v25 = vadd.f32 %v144_v2, %v42_v15  ;;  %v66_v26 = vadd.f32 %v144_v2, %v43_v16  ;;  %v67_v33 = vadd.f32 %v144_v2, %v44_v21  ;;  %v26_v34 = vld [vmem:[%s271_s0 + $0x60] sm:$0xff]  ;;  %v28_v36 = vld [vmem:[%s271_s0 + $0x70] sm:$0xff]  ;;  %v29_v41 = vld [vmem:[%s271_s0 + $0x78] sm:$0xff] }
   0x7   :  { %v76_v23 = vmax.f32 %v60_v13, 0.0  ;;  %v64_v24 = vadd.f32 %v144_v2, %v41_v14  ;;  %v77_v30 = vmax.f32 %v61_v18, 0.0  ;;  %v78_v31 = vmax.f32 %v62_v19, 0.0 }
   0x8   :  { %v79_v32 = vmax.f32 %v63_v20, 0.0  ;;  %v81_v38 = vmax.f32 %v65_v25, 0.0  ;;  %v82_v39 = vmax.f32 %v66_v26, 0.0  ;;  %v45_v40 = vmul.f32 %v113_v1, %v22_v22 }
   0x9   :  { %93 = vst.msk [vmem:[%s274_s3] sm:$0xff] %vm92_vm0, %v76_v23  ;;  %v80_v37 = vmax.f32 %v64_v24, 0.0  ;;  %94 = vst.msk [vmem:[%s274_s3 + $0x8] sm:$0xff] %vm92_vm0, %v77_v30  ;;  %v83_v42 = vmax.f32 %v67_v33, 0.0  ;;  %v46_v43 = vmul.f32 %v113_v1, %v23_v27  ;;  %v47_v44 = vmul.f32 %v113_v1, %v24_v28 }
   0xa   :  { %95 = vst.msk [vmem:[%s274_s3 + $0x10] sm:$0xff] %vm92_vm0, %v78_v31  ;;  %96 = vst.msk [vmem:[%s274_s3 + $0x18] sm:$0xff] %vm92_vm0, %v79_v32  ;;  %v48_v45 = vmul.f32 %v113_v1, %v25_v29  ;;  %v68_v46 = vadd.f32 %v144_v2, %v45_v40  ;;  %v49_v47 = vmul.f32 %v113_v1, %v26_v34 }
   0xb   :  { %97 = vst.msk [vmem:[%s274_s3 + $0x20] sm:$0xff] %vm92_vm0, %v80_v37  ;;  %98 = vst.msk [vmem:[%s274_s3 + $0x28] sm:$0xff] %vm92_vm0, %v81_v38  ;;  %v50_v48 = vmul.f32 %v113_v1, %v27_v35  ;;  %v51_v49 = vmul.f32 %v113_v1, %v28_v36  ;;  %v69_v50 = vadd.f32 %v144_v2, %v46_v43 }
   0xc   :  { %99 = vst.msk [vmem:[%s274_s3 + $0x30] sm:$0xff] %vm92_vm0, %v82_v39  ;;  %100 = vst.msk [vmem:[%s274_s3 + $0x38] sm:$0xff] %vm92_vm0, %v83_v42  ;;  %v70_v51 = vadd.f32 %v144_v2, %v47_v44  ;;  %v71_v52 = vadd.f32 %v144_v2, %v48_v45  ;;  %v52_v53 = vmul.f32 %v113_v1, %v29_v41  ;;  %v84_v54 = vmax.f32 %v68_v46, 0.0 }
   0xd   :  { %v72_v55 = vadd.f32 %v144_v2, %v49_v47  ;;  %v73_v56 = vadd.f32 %v144_v2, %v50_v48  ;;  %v74_v57 = vadd.f32 %v144_v2, %v51_v49  ;;  %v85_v58 = vmax.f32 %v69_v50, 0.0 }
   0xe   :  { %v86_v59 = vmax.f32 %v70_v51, 0.0  ;;  %v87_v60 = vmax.f32 %v71_v52, 0.0  ;;  %v75_v61 = vadd.f32 %v144_v2, %v52_v53  ;;  %101 = vst.msk [vmem:[%s274_s3 + $0x40] sm:$0xff] %vm92_vm0, %v84_v54 }
   0xf   :  { %v88_v62 = vmax.f32 %v72_v55, 0.0  ;;  %v89_v63 = vmax.f32 %v73_v56, 0.0  ;;  %v90_v0 = vmax.f32 %v74_v57, 0.0  ;;  %102 = vst.msk [vmem:[%s274_s3 + $0x48] sm:$0xff] %vm92_vm0, %v85_v58 }
  0x10   :  { %103 = vst.msk [vmem:[%s274_s3 + $0x50] sm:$0xff] %vm92_vm0, %v86_v59  ;;  %104 = vst.msk [vmem:[%s274_s3 + $0x58] sm:$0xff] %vm92_vm0, %v87_v60  ;;  %v91_v1 = vmax.f32 %v75_v61, 0.0 }
  0x11   :  { %105 = vst.msk [vmem:[%s274_s3 + $0x60] sm:$0xff] %vm92_vm0, %v88_v62  ;;  %106 = vst.msk [vmem:[%s274_s3 + $0x68] sm:$0xff] %vm92_vm0, %v89_v63 }
  0x12   :  { %107 = vst.msk [vmem:[%s274_s3 + $0x70] sm:$0xff] %vm92_vm0, %v90_v0  ;;  %108 = vst.msk [vmem:[%s274_s3 + $0x78] sm:$0xff] %vm92_vm0, %v91_v1 }

// kernel: _lambda_.19
= control target key start
LH: loop header
LB: loop body
LE: loop exit
PB: predicated region body
PF: predicated region fallthrough
CT: control target
= control target key end

     0   :  { %v429_v0 = vmov 0.0|0.0   ;;  %vm430_vm0 = vmmov 0   ;;  %v431_v6 = vmov 0.0   ;;  %s694_s1 = inlined_call_operand.vmem [shape: f32[128,128], index: 1, kind: input, shape index: {}]   ;;  %s695_s0 = inlined_call_operand.vmem [shape: f32[168,128], index: 0, kind: input, shape index: {}]   ;;  %s696_s2 = inlined_call_operand.vmem [shape: f32[1,128], index: 2, kind: input, shape index: {}]   ;;  %s697_s3 = inlined_call_operand.vmem [shape: f32[168,128], index: 3, kind: output, shape index: {}]  }
   0x1   :  { %386 = vmatprep.subr.bf16.mxu0 %v429_v0  ;;  %v35_v1 = vld [vmem:[%s694_s1] sm:$0xff]  ;;  %v36_v2 = vld [vmem:[%s694_s1 + $0x8] sm:$0xff]  ;;  %410 = vmatprep.subr.bf16.mxu1 %v429_v0  ;;  %v37_v3 = vld [vmem:[%s694_s1 + $0x10] sm:$0xff] }
   0x2   :  { %v387_v4 = vpack.c.bf16 %v36_v2, %v35_v1  ;;  %v38_v5 = vld [vmem:[%s694_s1 + $0x18] sm:$0xff]  ;;  %323 = vmatprep.mubr.msk.f32.mxu0 %vm430_vm0, %v431_v6  ;;  %356 = vmatprep.mubr.msk.f32.mxu1 %vm430_vm0, %v431_v6  ;;  %v39_v8 = vld [vmem:[%s694_s1 + $0x20] sm:$0xff]  ;;  %v40_v9 = vld [vmem:[%s694_s1 + $0x28] sm:$0xff] }
   0x3   :  { %v390_v7 = vpack.c.bf16 %v38_v5, %v37_v3  ;;  %v393_v10 = vpack.c.bf16 %v40_v9, %v39_v8  ;;  %v41_v11 = vld [vmem:[%s694_s1 + $0x30] sm:$0xff]  ;;  %v42_v12 = vld [vmem:[%s694_s1 + $0x38] sm:$0xff]  ;;  %v43_v14 = vld [vmem:[%s694_s1 + $0x40] sm:$0xff] }
   0x4   :  { %388 = vmatpush3.bf16.msra.mxu0 %v387_v4  ;;  %418 = vmatpush3.bf16.msra.mxu1 %v387_v4  ;;  %v396_v13 = vpack.c.bf16 %v42_v12, %v41_v11  ;;  %v44_v15 = vld [vmem:[%s694_s1 + $0x48] sm:$0xff]  ;;  %v45_v17 = vld [vmem:[%s694_s1 + $0x50] sm:$0xff]  ;;  %v46_v18 = vld [vmem:[%s694_s1 + $0x58] sm:$0xff] }
   0x5   :  { %389 = vmatprep.subr.bf16.mxu0 %v429_v0  ;;  %411 = vmatprep.subr.bf16.mxu1 %v429_v0  ;;  %v399_v16 = vpack.c.bf16 %v44_v15, %v43_v14  ;;  %v402_v19 = vpack.c.bf16 %v46_v18, %v45_v17  ;;  %v47_v20 = vld [vmem:[%s694_s1 + $0x60] sm:$0xff]  ;;  %v48_v21 = vld [vmem:[%s694_s1 + $0x68] sm:$0xff]  ;;  %v49_v23 = vld [vmem:[%s694_s1 + $0x70] sm:$0xff] }
   0x6   :  { %v405_v22 = vpack.c.bf16 %v48_v21, %v47_v20  ;;  %v50_v24 = vld [vmem:[%s694_s1 + $0x78] sm:$0xff]  ;;  %v14_v26 = vld [vmem:[%s695_s0] sm:$0xff]  ;;  %v15_v28 = vld [vmem:[%s695_s0 + $0x8] sm:$0xff] }
   0x7   :  { %v408_v25 = vpack.c.bf16 %v50_v24, %v49_v23  ;;  %v25_v27 = vld [vmem:[%s695_s0 + $0x58] sm:$0xff]  ;;  %v26_v29 = vld [vmem:[%s695_s0 + $0x60] sm:$0xff]  ;;  %v16_v30 = vld [vmem:[%s695_s0 + $0x10] sm:$0xff] }
   0x8   :  { %391 = vmatpush3.bf16.msra.mxu0 %v390_v7  ;;  %419 = vmatpush3.bf16.msra.mxu1 %v390_v7  ;;  %v27_v31 = vld [vmem:[%s695_s0 + $0x68] sm:$0xff]  ;;  %v17_v32 = vld [vmem:[%s695_s0 + $0x18] sm:$0xff]  ;;  %v28_v33 = vld [vmem:[%s695_s0 + $0x70] sm:$0xff] }
   0x9   :  { %392 = vmatprep.subr.bf16.mxu0 %v429_v0  ;;  %412 = vmatprep.subr.bf16.mxu1 %v429_v0  ;;  %v18_v34 = vld [vmem:[%s695_s0 + $0x20] sm:$0xff]  ;;  %v29_v35 = vld [vmem:[%s695_s0 + $0x78] sm:$0xff]  ;;  %v19_v36 = vld [vmem:[%s695_s0 + $0x28] sm:$0xff] }
   0xa   :  { %v30_v37 = vld [vmem:[%s695_s0 + $0x80] sm:$0xff]  ;;  %v20_v38 = vld [vmem:[%s695_s0 + $0x30] sm:$0xff]  ;;  %v31_v39 = vld [vmem:[%s695_s0 + $0x88] sm:$0xff] }
   0xb   :  { %v21_v40 = vld [vmem:[%s695_s0 + $0x38] sm:$0xff]  ;;  %v32_v41 = vld [vmem:[%s695_s0 + $0x90] sm:$0xff]  ;;  %v22_v42 = vld [vmem:[%s695_s0 + $0x40] sm:$0xff] }
   0xc   :  { %394 = vmatpush3.bf16.msra.mxu0 %v393_v10  ;;  %420 = vmatpush3.bf16.msra.mxu1 %v393_v10  ;;  %v33_v43 = vld [vmem:[%s695_s0 + $0x98] sm:$0xff]  ;;  %v23_v44 = vld [vmem:[%s695_s0 + $0x48] sm:$0xff]  ;;  %v34_v45 = vld [vmem:[%s695_s0 + $0xa0] sm:$0xff] }
   0xd   :  { %395 = vmatprep.subr.bf16.mxu0 %v429_v0  ;;  %413 = vmatprep.subr.bf16.mxu1 %v429_v0  ;;  %v24_v46 = vld [vmem:[%s695_s0 + $0x50] sm:$0xff]  ;;  %v608_v47 = vld [vmem:[%s696_s2] ss:$0 sm:$0xff] }
  0x10   :  { %397 = vmatpush3.bf16.msra.mxu0 %v396_v13  ;;  %421 = vmatpush3.bf16.msra.mxu1 %v396_v13 }
  0x11   :  { %398 = vmatprep.subr.bf16.mxu0 %v429_v0  ;;  %414 = vmatprep.subr.bf16.mxu1 %v429_v0 }
  0x14   :  { %400 = vmatpush3.bf16.msra.mxu0 %v399_v16  ;;  %422 = vmatpush3.bf16.msra.mxu1 %v399_v16 }
  0x15   :  { %401 = vmatprep.subr.bf16.mxu0 %v429_v0  ;;  %415 = vmatprep.subr.bf16.mxu1 %v429_v0 }
  0x18   :  { %403 = vmatpush3.bf16.msra.mxu0 %v402_v19  ;;  %423 = vmatpush3.bf16.msra.mxu1 %v402_v19 }
  0x19   :  { %404 = vmatprep.subr.bf16.mxu0 %v429_v0  ;;  %416 = vmatprep.subr.bf16.mxu1 %v429_v0 }
  0x1c   :  { %406 = vmatpush3.bf16.msra.mxu0 %v405_v22  ;;  %424 = vmatpush3.bf16.msra.mxu1 %v405_v22 }
  0x1d   :  { %407 = vmatprep.subr.bf16.mxu0 %v429_v0  ;;  %417 = vmatprep.subr.bf16.mxu1 %v429_v0 }
  0x20   :  { %409 = vmatpush3.bf16.msra.mxu0 %v408_v25  ;;  %425 = vmatpush3.bf16.msra.mxu1 %v408_v25 }
  0x23   :  { %324 = vmatmul.mubr.f32.vlgmr.msra.gmra.mrb[0].mxu0 %v14_v26  ;;  %357 = vmatmul.mubr.f32.vlgmr.msra.gmra.mrb[0].mxu1 %v25_v27 }
  0x24   :  { %326 = vmatprep.mubr.msk.f32.mxu0 %vm430_vm0, %v431_v6  ;;  %359 = vmatprep.mubr.msk.f32.mxu1 %vm430_vm0, %v431_v6 }
  0x27   :  { %327 = vmatmul.mubr.f32.gmra.mrb[2].mxu0 %v15_v28  ;;  %360 = vmatmul.mubr.f32.gmra.mrb[2].mxu1 %v26_v29 }
  0x28   :  { %329 = vmatprep.mubr.msk.f32.mxu0 %vm430_vm0, %v431_v6  ;;  %362 = vmatprep.mubr.msk.f32.mxu1 %vm430_vm0, %v431_v6 }
  0x2b   :  { %330 = vmatmul.mubr.f32.gmra.mrb[4].mxu0 %v16_v30  ;;  %363 = vmatmul.mubr.f32.gmra.mrb[4].mxu1 %v27_v31 }
  0x2c   :  { %332 = vmatprep.mubr.msk.f32.mxu0 %vm430_vm0, %v431_v6  ;;  %365 = vmatprep.mubr.msk.f32.mxu1 %vm430_vm0, %v431_v6 }
  0x2f   :  { %333 = vmatmul.mubr.f32.gmra.mrb[6].mxu0 %v17_v32  ;;  %366 = vmatmul.mubr.f32.gmra.mrb[6].mxu1 %v28_v33 }
  0x30   :  { %335 = vmatprep.mubr.msk.f32.mxu0 %vm430_vm0, %v431_v6  ;;  %368 = vmatprep.mubr.msk.f32.mxu1 %vm430_vm0, %v431_v6 }
  0x33   :  { %336 = vmatmul.mubr.f32.gmra.mrb[8].mxu0 %v18_v34  ;;  %369 = vmatmul.mubr.f32.gmra.mrb[8].mxu1 %v29_v35 }
  0x34   :  { %338 = vmatprep.mubr.msk.f32.mxu0 %vm430_vm0, %v431_v6  ;;  %371 = vmatprep.mubr.msk.f32.mxu1 %vm430_vm0, %v431_v6 }
  0x37   :  { %339 = vmatmul.mubr.f32.gmra.mrb[10].mxu0 %v19_v36  ;;  %372 = vmatmul.mubr.f32.gmra.mrb[10].mxu1 %v30_v37 }
  0x38   :  { %341 = vmatprep.mubr.msk.f32.mxu0 %vm430_vm0, %v431_v6  ;;  %374 = vmatprep.mubr.msk.f32.mxu1 %vm430_vm0, %v431_v6 }
  0x3b   :  { %342 = vmatmul.mubr.f32.gmra.mrb[12].mxu0 %v20_v38  ;;  %375 = vmatmul.mubr.f32.gmra.mrb[12].mxu1 %v31_v39 }
  0x3c   :  { %344 = vmatprep.mubr.msk.f32.mxu0 %vm430_vm0, %v431_v6  ;;  %377 = vmatprep.mubr.msk.f32.mxu1 %vm430_vm0, %v431_v6 }
  0x3f   :  { %345 = vmatmul.mubr.f32.gmra.mrb[14].mxu0 %v21_v40  ;;  %378 = vmatmul.mubr.f32.gmra.mrb[14].mxu1 %v32_v41 }
  0x40   :  { %347 = vmatprep.mubr.msk.f32.mxu0 %vm430_vm0, %v431_v6  ;;  %380 = vmatprep.mubr.msk.f32.mxu1 %vm430_vm0, %v431_v6 }
  0x43   :  { %348 = vmatmul.mubr.f32.gmra.mrb[16].mxu0 %v22_v42  ;;  %381 = vmatmul.mubr.f32.gmra.mrb[16].mxu1 %v33_v43 }
  0x44   :  { %350 = vmatprep.mubr.msk.f32.mxu0 %vm430_vm0, %v431_v6  ;;  %383 = vmatprep.mubr.msk.f32.mxu1 %vm430_vm0, %v431_v6 }
  0x47   :  { %351 = vmatmul.mubr.f32.gmra.mrb[18].mxu0 %v23_v44  ;;  %384 = vmatmul.mubr.f32.gmra.mrb[18].mxu1 %v34_v45 }
  0x48   :  { %353 = vmatprep.mubr.msk.f32.mxu0 %vm430_vm0, %v431_v6 }
  0x4b   :  { %354 = vmatmul.mubr.f32.gmra.mrb[20].mxu0 %v24_v46 }
  0xf6   :  { %v124_v48 = vpop.f32.mrb[0].mxu0  ;;  %v179_v49 = vpop.f32.mrb[0].mxu1 }
  0xf7   :  { %v125_v50 = vadd.f32 %v608_v47, %v124_v48  ;;  %v325_v51 = vpop.f32.mrb[1].mxu0  ;;  %v180_v52 = vadd.f32 %v608_v47, %v179_v49  ;;  %v358_v53 = vpop.f32.mrb[1].mxu1 }
  0xf9   :  { %228 = vst [vmem:[%s697_s3] sm:$0xff] %v125_v50  ;;  %239 = vst [vmem:[%s697_s3 + $0x58] sm:$0xff] %v180_v52 }
  0xfa   :  { %v129_v54 = vpop.f32.mrb[2].mxu0  ;;  %v184_v55 = vpop.f32.mrb[2].mxu1 }
  0xfb   :  { %v130_v56 = vadd.f32 %v608_v47, %v129_v54  ;;  %v328_v57 = vpop.f32.mrb[3].mxu0  ;;  %v185_v58 = vadd.f32 %v608_v47, %v184_v55  ;;  %v361_v59 = vpop.f32.mrb[3].mxu1 }
  0xfd   :  { %229 = vst [vmem:[%s697_s3 + $0x8] sm:$0xff] %v130_v56  ;;  %240 = vst [vmem:[%s697_s3 + $0x60] sm:$0xff] %v185_v58 }
  0xfe   :  { %v134_v60 = vpop.f32.mrb[4].mxu0  ;;  %v189_v61 = vpop.f32.mrb[4].mxu1 }
  0xff   :  { %v135_v62 = vadd.f32 %v608_v47, %v134_v60  ;;  %v331_v63 = vpop.f32.mrb[5].mxu0  ;;  %v190_v0 = vadd.f32 %v608_v47, %v189_v61  ;;  %v364_v1 = vpop.f32.mrb[5].mxu1 }
 0x101   :  { %230 = vst [vmem:[%s697_s3 + $0x10] sm:$0xff] %v135_v62  ;;  %241 = vst [vmem:[%s697_s3 + $0x68] sm:$0xff] %v190_v0 }
 0x102   :  { %v139_v2 = vpop.f32.mrb[6].mxu0  ;;  %v194_v3 = vpop.f32.mrb[6].mxu1 }
 0x103   :  { %v140_v4 = vadd.f32 %v608_v47, %v139_v2  ;;  %v334_v5 = vpop.f32.mrb[7].mxu0  ;;  %v195_v6 = vadd.f32 %v608_v47, %v194_v3  ;;  %v367_v7 = vpop.f32.mrb[7].mxu1 }
 0x105   :  { %231 = vst [vmem:[%s697_s3 + $0x18] sm:$0xff] %v140_v4  ;;  %242 = vst [vmem:[%s697_s3 + $0x70] sm:$0xff] %v195_v6 }
 0x106   :  { %v144_v8 = vpop.f32.mrb[8].mxu0  ;;  %v199_v9 = vpop.f32.mrb[8].mxu1 }
 0x107   :  { %v145_v10 = vadd.f32 %v608_v47, %v144_v8  ;;  %v337_v11 = vpop.f32.mrb[9].mxu0  ;;  %v200_v12 = vadd.f32 %v608_v47, %v199_v9  ;;  %v370_v13 = vpop.f32.mrb[9].mxu1 }
 0x109   :  { %232 = vst [vmem:[%s697_s3 + $0x20] sm:$0xff] %v145_v10  ;;  %243 = vst [vmem:[%s697_s3 + $0x78] sm:$0xff] %v200_v12 }
 0x10a   :  { %v149_v14 = vpop.f32.mrb[10].mxu0  ;;  %v204_v15 = vpop.f32.mrb[10].mxu1 }
 0x10b   :  { %v150_v16 = vadd.f32 %v608_v47, %v149_v14  ;;  %v340_v17 = vpop.f32.mrb[11].mxu0  ;;  %v205_v18 = vadd.f32 %v608_v47, %v204_v15  ;;  %v373_v19 = vpop.f32.mrb[11].mxu1 }
 0x10d   :  { %233 = vst [vmem:[%s697_s3 + $0x28] sm:$0xff] %v150_v16  ;;  %244 = vst [vmem:[%s697_s3 + $0x80] sm:$0xff] %v205_v18 }
 0x10e   :  { %v154_v20 = vpop.f32.mrb[12].mxu0  ;;  %v209_v21 = vpop.f32.mrb[12].mxu1 }
 0x10f   :  { %v155_v22 = vadd.f32 %v608_v47, %v154_v20  ;;  %v343_v23 = vpop.f32.mrb[13].mxu0  ;;  %v210_v24 = vadd.f32 %v608_v47, %v209_v21  ;;  %v376_v25 = vpop.f32.mrb[13].mxu1 }
 0x111   :  { %234 = vst [vmem:[%s697_s3 + $0x30] sm:$0xff] %v155_v22  ;;  %245 = vst [vmem:[%s697_s3 + $0x88] sm:$0xff] %v210_v24 }
 0x112   :  { %v159_v26 = vpop.f32.mrb[14].mxu0  ;;  %v214_v27 = vpop.f32.mrb[14].mxu1 }
 0x113   :  { %v160_v28 = vadd.f32 %v608_v47, %v159_v26  ;;  %v346_v29 = vpop.f32.mrb[15].mxu0  ;;  %v215_v30 = vadd.f32 %v608_v47, %v214_v27  ;;  %v379_v31 = vpop.f32.mrb[15].mxu1 }
 0x115   :  { %235 = vst [vmem:[%s697_s3 + $0x38] sm:$0xff] %v160_v28  ;;  %246 = vst [vmem:[%s697_s3 + $0x90] sm:$0xff] %v215_v30 }
 0x116   :  { %v164_v32 = vpop.f32.mrb[16].mxu0  ;;  %v219_v33 = vpop.f32.mrb[16].mxu1 }
 0x117   :  { %v165_v34 = vadd.f32 %v608_v47, %v164_v32  ;;  %v349_v35 = vpop.f32.mrb[17].mxu0  ;;  %v220_v36 = vadd.f32 %v608_v47, %v219_v33  ;;  %v382_v37 = vpop.f32.mrb[17].mxu1 }
 0x119   :  { %236 = vst [vmem:[%s697_s3 + $0x40] sm:$0xff] %v165_v34  ;;  %247 = vst [vmem:[%s697_s3 + $0x98] sm:$0xff] %v220_v36 }
 0x11a   :  { %v169_v38 = vpop.f32.mrb[18].mxu0  ;;  %v224_v39 = vpop.f32.mrb[18].mxu1 }
 0x11b   :  { %v170_v40 = vadd.f32 %v608_v47, %v169_v38  ;;  %v352_v41 = vpop.f32.mrb[19].mxu0  ;;  %v225_v42 = vadd.f32 %v608_v47, %v224_v39  ;;  %v385_v43 = vpop.f32.mrb[19].mxu1 }
 0x11d   :  { %237 = vst [vmem:[%s697_s3 + $0x48] sm:$0xff] %v170_v40  ;;  %248 = vst [vmem:[%s697_s3 + $0xa0] sm:$0xff] %v225_v42 }
 0x11e   :  { %v174_v44 = vpop.f32.mrb[20].mxu0 }
 0x11f   :  { %v175_v45 = vadd.f32 %v608_v47, %v174_v44  ;;  %v355_v46 = vpop.f32.mrb[21].mxu0 }
 0x121   :  { %238 = vst [vmem:[%s697_s3 + $0x50] sm:$0xff] %v175_v45 }

// kernel: _lambda_.20
= control target key start
LH: loop header
LB: loop body
LE: loop exit
PB: predicated region body
PF: predicated region fallthrough
CT: control target
= control target key end

     0   :  { %vm14_vm0 = vcmask 122880   ;;  %vm82_vm1 = vcmask 130048   ;;  %v428_v0 = vmov 0.0   ;;  %s1318_s0 = inlined_call_operand.vmem [shape: f32[512,16], index: 0, kind: input, shape index: {}]   ;;  %s1319_s1 = inlined_call_operand.vmem [shape: f32[1,16], index: 1, kind: output, shape index: {0}]   ;;  %s1320_s2 = inlined_call_operand.vmem [shape: f32[1,16], index: 2, kind: output, shape index: {1}]  }
   0x1   :  { %15 = vst.msk [vmem:[%s1319_s1] sm:$0x1] %vm14_vm0, %v428_v0  ;;  %16 = vst.msk [vmem:[%s1320_s2] sm:$0x1] %vm14_vm0, %v428_v0  ;;  %v455_v1 = vld [vmem:[%s1318_s0] sm:$0xff]  ;;  %v460_v2 = vld [vmem:[%s1318_s0 + $0x8] sm:$0xff] }
   0x2   :  { %v465_v3 = vld [vmem:[%s1318_s0 + $0x10] sm:$0xff]  ;;  %v83_v4 = vsel %vm82_vm1, %v455_v1, 0.0  ;;  %v84_v5 = vsel %vm82_vm1, %v460_v2, 0.0  ;;  %v476_v7 = vld [vmem:[%s1318_s0 + $0x18] sm:$0xff]  ;;  %v483_v10 = vld [vmem:[%s1318_s0 + $0x20] sm:$0xff] }
   0x3   :  { %v86_v6 = vsel %vm82_vm1, %v465_v3, 0.0  ;;  %v85_v8 = vadd.f32 %v84_v5, %v83_v4  ;;  %v88_v9 = vsel %vm82_vm1, %v476_v7, 0.0  ;;  %v90_v12 = vsel %vm82_vm1, %v483_v10, 0.0  ;;  %v490_v13 = vld [vmem:[%s1318_s0 + $0x28] sm:$0xff]  ;;  %v497_v16 = vld [vmem:[%s1318_s0 + $0x30] sm:$0xff]  ;;  %v502_v18 = vld [vmem:[%s1318_s0 + $0x38] sm:$0xff] }
   0x4   :  { %v92_v15 = vsel %vm82_vm1, %v490_v13, 0.0  ;;  %v507_v19 = vld [vmem:[%s1318_s0 + $0x40] sm:$0xff]  ;;  %v94_v20 = vsel %vm82_vm1, %v497_v16, 0.0  ;;  %v514_v21 = vld [vmem:[%s1318_s0 + $0x48] sm:$0xff]  ;;  %v519_v22 = vld [vmem:[%s1318_s0 + $0x50] sm:$0xff]  ;;  %v96_v25 = vsel %vm82_vm1, %v502_v18, 0.0 }
   0x5   :  { %v87_v11 = vadd.f32 %v86_v6, %v85_v8  ;;  %v524_v23 = vld [vmem:[%s1318_s0 + $0x58] sm:$0xff]  ;;  %v98_v26 = vsel %vm82_vm1, %v507_v19, 0.0  ;;  %v533_v27 = vld [vmem:[%s1318_s0 + $0x108] sm:$0xff]  ;;  %v538_v28 = vld [vmem:[%s1318_s0 + $0x110] sm:$0xff]  ;;  %v100_v30 = vsel %vm82_vm1, %v514_v21, 0.0  ;;  %v102_v31 = vsel %vm82_vm1, %v519_v22, 0.0 }
   0x6   :  { %v543_v29 = vld [vmem:[%s1318_s0 + $0x118] sm:$0xff]  ;;  %v551_v32 = vsel %vm82_vm1, %v524_v23, 0.0  ;;  %v556_v33 = vld [vmem:[%s1318_s0 + $0x120] sm:$0xff]  ;;  %v561_v34 = vld [vmem:[%s1318_s0 + $0x128] sm:$0xff]  ;;  %v570_v37 = vsel %vm82_vm1, %v533_v27, 0.0  ;;  %v574_v38 = vsel %vm82_vm1, %v538_v28, 0.0 }
   0x7   :  { %v89_v14 = vadd.f32 %v88_v9, %v87_v11  ;;  %v566_v35 = vld [vmem:[%s1318_s0 + $0x130] sm:$0xff]  ;;  %1339 = vst [vmem:[#allocation2_spill] sm:$0xff] %v570_v37  ;;  %1340 = vst [vmem:[#allocation3_spill] sm:$0xff] %v574_v38  ;;  %v578_v39 = vsel %vm82_vm1, %v543_v29, 0.0  ;;  %v583_v40 = vld [vmem:[%s1318_s0 + $0x138] sm:$0xff]  ;;  %v597_v43 = vsel %vm82_vm1, %v556_v33, 0.0  ;;  %v222_v37 = vmul.f32 %v465_v3, %v465_v3 }
   0x8   :  { %1341 = vst [vmem:[#allocation4_spill] sm:$0xff] %v578_v39  ;;  %v588_v41 = vld [vmem:[%s1318_s0 + $0x140] sm:$0xff]  ;;  %v593_v42 = vld [vmem:[%s1318_s0 + $0x148] sm:$0xff]  ;;  %1342 = vst [vmem:[#allocation5_spill] sm:$0xff] %v597_v43  ;;  %v601_v44 = vsel %vm82_vm1, %v561_v34, 0.0  ;;  %v605_v45 = vsel %vm82_vm1, %v566_v35, 0.0 }
   0x9   :  { %v91_v17 = vadd.f32 %v90_v12, %v89_v14  ;;  %1343 = vst [vmem:[#allocation6_spill] sm:$0xff] %v601_v44  ;;  %1344 = vst [vmem:[#allocation7_spill] sm:$0xff] %v605_v45  ;;  %v610_v46 = vld [vmem:[%s1318_s0 + $0x150] sm:$0xff]  ;;  %v615_v47 = vld [vmem:[%s1318_s0 + $0x158] sm:$0xff]  ;;  %v624_v50 = vsel %vm82_vm1, %v583_v40, 0.0  ;;  %v628_v51 = vsel %vm82_vm1, %v588_v41, 0.0 }
   0xa   :  { %v620_v48 = vld [vmem:[%s1318_s0 + $0x160] sm:$0xff]  ;;  %1345 = vst [vmem:[#allocation8_spill] sm:$0xff] %v624_v50  ;;  %1346 = vst [vmem:[#allocation9_spill] sm:$0xff] %v628_v51  ;;  %v632_v52 = vsel %vm82_vm1, %v593_v42, 0.0  ;;  %v637_v53 = vld [vmem:[%s1318_s0 + $0x168] sm:$0xff]  ;;  %v651_v56 = vsel %vm82_vm1, %v610_v46, 0.0 }
   0xb   :  { %v93_v24 = vadd.f32 %v92_v15, %v91_v17  ;;  %1347 = vst [vmem:[#allocation10_spill] sm:$0xff] %v632_v52  ;;  %v642_v54 = vld [vmem:[%s1318_s0 + $0x170] sm:$0xff]  ;;  %v647_v55 = vld [vmem:[%s1318_s0 + $0x178] sm:$0xff]  ;;  %1348 = vst [vmem:[#allocation11_spill] sm:$0xff] %v651_v56  ;;  %v655_v57 = vsel %vm82_vm1, %v615_v47, 0.0  ;;  %v659_v58 = vsel %vm82_vm1, %v620_v48, 0.0 }
   0xc   :  { %1349 = vst [vmem:[#allocation12_spill] sm:$0xff] %v655_v57  ;;  %1350 = vst [vmem:[#allocation13_spill] sm:$0xff] %v659_v58  ;;  %v664_v59 = vld [vmem:[%s1318_s0 + $0x180] sm:$0xff]  ;;  %v669_v60 = vld [vmem:[%s1318_s0 + $0x188] sm:$0xff]  ;;  %v678_v63 = vsel %vm82_vm1, %v637_v53, 0.0  ;;  %v682_v0 = vsel %vm82_vm1, %v642_v54, 0.0 }
   0xd   :  { %v95_v36 = vadd.f32 %v94_v20, %v93_v24  ;;  %v674_v61 = vld [vmem:[%s1318_s0 + $0x190] sm:$0xff]  ;;  %1351 = vst [vmem:[#allocation14_spill] sm:$0xff] %v678_v63  ;;  %1352 = vst [vmem:[#allocation15_spill] sm:$0xff] %v682_v0  ;;  %v686_v4 = vsel %vm82_vm1, %v647_v55, 0.0  ;;  %v691_v5 = vld [vmem:[%s1318_s0 + $0x198] sm:$0xff]  ;;  %v705_v9 = vsel %vm82_vm1, %v664_v59, 0.0 }
   0xe   :  { %1353 = vst [vmem:[#allocation16_spill] sm:$0xff] %v686_v4  ;;  %v696_v6 = vld [vmem:[%s1318_s0 + $0x1a0] sm:$0xff]  ;;  %v701_v8 = vld [vmem:[%s1318_s0 + $0x1a8] sm:$0xff]  ;;  %1354 = vst [vmem:[#allocation17_spill] sm:$0xff] %v705_v9  ;;  %v709_v11 = vsel %vm82_vm1, %v669_v60, 0.0  ;;  %v713_v12 = vsel %vm82_vm1, %v674_v61, 0.0 }
   0xf   :  { %v97_v49 = vadd.f32 %v96_v25, %v95_v36  ;;  %1355 = vst [vmem:[#allocation18_spill] sm:$0xff] %v709_v11  ;;  %1356 = vst [vmem:[#allocation19_spill] sm:$0xff] %v713_v12  ;;  %v718_v14 = vld [vmem:[%s1318_s0 + $0x60] sm:$0xff]  ;;  %v723_v15 = vld [vmem:[%s1318_s0 + $0x1b0] sm:$0xff]  ;;  %v737_v25 = vsel %vm82_vm1, %v691_v5, 0.0  ;;  %v745_v36 = vsel %vm82_vm1, %v701_v8, 0.0 }
  0x10   :  { %v728_v17 = vld [vmem:[%s1318_s0 + $0x1b8] sm:$0xff]  ;;  %v733_v20 = vld [vmem:[%s1318_s0 + $0x1c0] sm:$0xff]  ;;  %1357 = vst [vmem:[#allocation20_spill] sm:$0xff] %v737_v25  ;;  %1359 = vst [vmem:[#allocation22_spill] sm:$0xff] %v745_v36 }
  0x11   :  { %v99_v62 = vadd.f32 %v98_v26, %v97_v49  ;;  %v741_v26 = vsel %vm82_vm1, %v696_v6, 0.0  ;;  %v750_v49 = vld [vmem:[%s1318_s0 + $0x1c8] sm:$0xff]  ;;  %v768_v36 = vsel %vm82_vm1, %v728_v17, 0.0  ;;  %v772_v25 = vsel %vm82_vm1, %v733_v20, 0.0  ;;  %v777_v12 = vld [vmem:[%s1318_s0 + $0x1e0] sm:$0xff]  ;;  %v804_v0 = vld [vmem:[%s1318_s0 + $0x1f8] sm:$0xff] }
  0x12   :  { %1358 = vst [vmem:[#allocation21_spill] sm:$0xff] %v741_v26  ;;  %v764_v26 = vsel %vm82_vm1, %v723_v15, 0.0  ;;  %1361 = vst [vmem:[#allocation24_spill] sm:$0xff] %v768_v36  ;;  %v782_v11 = vld [vmem:[%s1318_s0 + $0x1e8] sm:$0xff]  ;;  %v791_v9 = vsel %vm82_vm1, %v750_v49, 0.0  ;;  %v826_v58 = vsel %vm82_vm1, %v804_v0, 0.0 }
  0x13   :  { %v101_v24 = vadd.f32 %v100_v30, %v99_v62  ;;  %v755_v30 = vld [vmem:[%s1318_s0 + $0x1d0] sm:$0xff]  ;;  %v760_v62 = vld [vmem:[%s1318_s0 + $0x1d8] sm:$0xff]  ;;  %1360 = vst [vmem:[#allocation23_spill] sm:$0xff] %v764_v26  ;;  %1362 = vst [vmem:[#allocation25_spill] sm:$0xff] %v772_v25 }
  0x14   :  { %v787_v26 = vld [vmem:[%s1318_s0 + $0x1f0] sm:$0xff]  ;;  %1364 = vst [vmem:[#allocation27_spill] sm:$0xff] %v791_v9  ;;  %v795_v25 = vsel %vm82_vm1, %v755_v30, 0.0  ;;  %v799_v4 = vsel %vm82_vm1, %v760_v62, 0.0  ;;  %1367 = vst [vmem:[#allocation30_spill] sm:$0xff] %v804_v0  ;;  %v814_v9 = vsel %vm82_vm1, %v782_v11, 0.0 }
  0x15   :  { %1363 = vst [vmem:[#allocation26_spill] sm:$0xff] %v787_v26  ;;  %v103_v36 = vadd.f32 %v102_v31, %v101_v24  ;;  %1365 = vst [vmem:[#allocation28_spill] sm:$0xff] %v795_v25  ;;  %v106_v31 = vsel %vm82_vm1, %v718_v14, 0.0  ;;  %v810_v24 = vsel %vm82_vm1, %v777_v12, 0.0  ;;  %v818_v25 = vsel %vm82_vm1, %v787_v26, 0.0  ;;  %v855_v56 = vld [vmem:[%s1318_s0 + $0x90] sm:$0xff] }
  0x16   :  { %1366 = vst [vmem:[#allocation29_spill] sm:$0xff] %v799_v4  ;;  %1368 = vst [vmem:[#allocation31_spill] sm:$0xff] %v810_v24  ;;  %v30_v4 = vld [vmem:[%s1318_s0 + $0x68] sm:$0xff]  ;;  %v860_v52 = vld [vmem:[%s1318_s0 + $0x98] sm:$0xff] }
  0x17   :  { %1369 = vst [vmem:[#allocation32_spill] sm:$0xff] %v814_v9  ;;  %1370 = vst [vmem:[#allocation33_spill] sm:$0xff] %v818_v25  ;;  %v105_v63 = vadd.f32 %v551_v32, %v103_v36  ;;  %v108_v24 = vsel %vm82_vm1, %v30_v4, 0.0  ;;  %v31_v9 = vld [vmem:[%s1318_s0 + $0x70] sm:$0xff]  ;;  %v835_v25 = vld [vmem:[%s1318_s0 + $0x78] sm:$0xff]  ;;  %v120_v39 = vsel %vm82_vm1, %v860_v52, 0.0 }
  0x18   :  { %1371 = vst [vmem:[#allocation34_spill] sm:$0xff] %v826_v58  ;;  %1372 = vst [vmem:[#allocation35_spill] sm:$0xff] %v835_v25  ;;  %v840_v32 = vld [vmem:[%s1318_s0 + $0x80] sm:$0xff]  ;;  %v845_v36 = vld [vmem:[%s1318_s0 + $0x88] sm:$0xff]  ;;  %v110_v58 = vsel %vm82_vm1, %v31_v9, 0.0 }
  0x19   :  { %v107_v57 = vadd.f32 %v106_v31, %v105_v63  ;;  %1373 = vst [vmem:[#allocation36_spill] sm:$0xff] %v840_v32  ;;  %1374 = vst [vmem:[#allocation37_spill] sm:$0xff] %v845_v36  ;;  %v220_v63 = vmul.f32 %v455_v1, %v455_v1  ;;  %v221_v31 = vmul.f32 %v460_v2, %v460_v2  ;;  %v865_v51 = vld [vmem:[%s1318_s0 + $0xa0] sm:$0xff]  ;;  %v112_v1 = vsel %vm82_vm1, %v835_v25, 0.0  ;;  %v876_v44 = vld [vmem:[%s1318_s0 + $0xa8] sm:$0xff] }
  0x1a   :  { %1375 = vst [vmem:[#allocation38_spill] sm:$0xff] %v855_v56  ;;  %1376 = vst [vmem:[#allocation39_spill] sm:$0xff] %v860_v52  ;;  %v114_v2 = vsel %vm82_vm1, %v840_v32, 0.0  ;;  %v116_v45 = vsel %vm82_vm1, %v845_v36, 0.0  ;;  %v881_v43 = vld [vmem:[%s1318_s0 + $0xb0] sm:$0xff]  ;;  %v122_v38 = vsel %vm82_vm1, %v865_v51, 0.0  ;;  %v223_v25 = vmul.f32 %v476_v7, %v476_v7 }
  0x1b   :  { %1377 = vst [vmem:[#allocation40_spill] sm:$0xff] %v865_v51  ;;  %v109_v50 = vadd.f32 %v108_v24, %v107_v57  ;;  %1378 = vst [vmem:[#allocation41_spill] sm:$0xff] %v876_v44  ;;  %v886_v57 = vld [vmem:[%s1318_s0 + $0xb8] sm:$0xff]  ;;  %v118_v24 = vsel %vm82_vm1, %v855_v56, 0.0  ;;  %v899_v36 = vld [vmem:[%s1318_s0 + $0xc0] sm:$0xff]  ;;  %v124_v51 = vsel %vm82_vm1, %v876_v44, 0.0 }
  0x1c   :  { %1379 = vst [vmem:[#allocation42_spill] sm:$0xff] %v881_v43  ;;  %1380 = vst [vmem:[#allocation43_spill] sm:$0xff] %v886_v57  ;;  %v904_v32 = vld [vmem:[%s1318_s0 + $0xc8] sm:$0xff]  ;;  %v909_v52 = vld [vmem:[%s1318_s0 + $0xd0] sm:$0xff]  ;;  %v915_v3 = vsel %vm82_vm1, %v881_v43, 0.0 }
  0x1d   :  { %1381 = vst [vmem:[#allocation44_spill] sm:$0xff] %v899_v36  ;;  %1382 = vst [vmem:[#allocation45_spill] sm:$0xff] %v904_v32  ;;  %v111_v56 = vadd.f32 %v110_v58, %v109_v50  ;;  %v922_v0 = vld [vmem:[%s1318_s0 + $0xd8] sm:$0xff]  ;;  %v927_v26 = vld [vmem:[%s1318_s0 + $0xe0] sm:$0xff]  ;;  %v931_v50 = vsel %vm82_vm1, %v886_v57, 0.0  ;;  %v935_v58 = vsel %vm82_vm1, %v899_v36, 0.0 }
  0x1e   :  { %1383 = vst [vmem:[#allocation46_spill] sm:$0xff] %v909_v52  ;;  %1384 = vst [vmem:[#allocation47_spill] sm:$0xff] %v922_v0  ;;  %v939_v7 = vsel %vm82_vm1, %v904_v32, 0.0  ;;  %v943_v43 = vsel %vm82_vm1, %v909_v52, 0.0  ;;  %v948_v44 = vld [vmem:[%s1318_s0 + $0xe8] sm:$0xff]  ;;  %v953_v57 = vld [vmem:[%s1318_s0 + $0xf0] sm:$0xff]  ;;  %v224_v52 = vmul.f32 %v483_v10, %v483_v10  ;;  %v228_v10 = vmul.f32 %v507_v19, %v507_v19 }
  0x1f   :  { %1385 = vst [vmem:[#allocation48_spill] sm:$0xff] %v927_v26  ;;  %1386 = vst [vmem:[#allocation49_spill] sm:$0xff] %v935_v58  ;;  %v113_v36 = vadd.f32 %v112_v1, %v111_v56  ;;  %v957_v58 = vsel %vm82_vm1, %v922_v0, 0.0  ;;  %v961_v32 = vsel %vm82_vm1, %v927_v26, 0.0  ;;  %v225_v56 = vmul.f32 %v490_v13, %v490_v13 }
  0x20   :  { %1387 = vst [vmem:[#allocation50_spill] sm:$0xff] %v939_v7  ;;  %1388 = vst [vmem:[#allocation51_spill] sm:$0xff] %v943_v43  ;;  %v967_v43 = vsel %vm82_vm1, %v948_v44, 0.0  ;;  %v971_v7 = vsel %vm82_vm1, %v953_v57, 0.0  ;;  %v226_v1 = vmul.f32 %v497_v16, %v497_v16  ;;  %v227_v26 = vmul.f32 %v502_v18, %v502_v18 }
  0x21   :  { %1389 = vst [vmem:[#allocation52_spill] sm:$0xff] %v948_v44  ;;  %1390 = vst [vmem:[#allocation53_spill] sm:$0xff] %v953_v57  ;;  %v115_v0 = vadd.f32 %v114_v2, %v113_v36  ;;  %v229_v44 = vmul.f32 %v514_v21, %v514_v21  ;;  %v230_v57 = vmul.f32 %v519_v22, %v519_v22 }
  0x22   :  { %1391 = vst [vmem:[#allocation54_spill] sm:$0xff] %v971_v7  ;;  %v231_v7 = vmul.f32 %v524_v23, %v524_v23  ;;  %v232_v13 = vmul.f32 %v718_v14, %v718_v14  ;;  %v989_v16 = vmul.f32 %v30_v4, %v30_v4  ;;  %v991_v2 = vmul.f32 %v31_v9, %v31_v9 }
  0x23   :  { %v117_v36 = vadd.f32 %v116_v45, %v115_v0  ;;  %v253_v18 = vmul.f32 %v533_v27, %v533_v27  ;;  %v254_v19 = vmul.f32 %v538_v28, %v538_v28  ;;  %v255_v21 = vmul.f32 %v543_v29, %v543_v29 }
  0x24   :  { %v256_v22 = vmul.f32 %v556_v33, %v556_v33  ;;  %v257_v23 = vmul.f32 %v561_v34, %v561_v34  ;;  %v258_v45 = vmul.f32 %v566_v35, %v566_v35  ;;  %v259_v4 = vmul.f32 %v583_v40, %v583_v40 }
  0x25   :  { %v119_v0 = vadd.f32 %v118_v24, %v117_v36  ;;  %v260_v27 = vmul.f32 %v588_v41, %v588_v41  ;;  %v261_v28 = vmul.f32 %v593_v42, %v593_v42  ;;  %v262_v29 = vmul.f32 %v610_v46, %v610_v46 }
  0x26   :  { %v263_v33 = vmul.f32 %v615_v47, %v615_v47  ;;  %v284_v34 = vsel %vm82_vm1, %v220_v63, 0.0  ;;  %v285_v35 = vsel %vm82_vm1, %v221_v31, 0.0  ;;  %v264_v40 = vmul.f32 %v620_v48, %v620_v48 }
  0x27   :  { %v121_v9 = vadd.f32 %v120_v39, %v119_v0  ;;  %v286_v14 = vadd.f32 %v285_v35, %v284_v34  ;;  %v287_v41 = vsel %vm82_vm1, %v222_v37, 0.0  ;;  %v265_v42 = vmul.f32 %v637_v53, %v637_v53  ;;  %v1392_v0 = vld [vmem:[#allocation26_spill] sm:$0xff] }
  0x28   :  { %v266_v46 = vmul.f32 %v642_v54, %v642_v54  ;;  %v267_v47 = vmul.f32 %v647_v55, %v647_v55  ;;  %v289_v63 = vsel %vm82_vm1, %v223_v25, 0.0  ;;  %v268_v39 = vmul.f32 %v664_v59, %v664_v59  ;;  %v1393_v34 = vld [vmem:[#allocation30_spill] sm:$0xff] }
  0x29   :  { %v123_v24 = vadd.f32 %v122_v38, %v121_v9  ;;  %v269_v48 = vmul.f32 %v669_v60, %v669_v60  ;;  %v288_v31 = vadd.f32 %v287_v41, %v286_v14  ;;  %v270_v37 = vmul.f32 %v674_v61, %v674_v61  ;;  %v1394_v41 = vld [vmem:[#allocation49_spill] sm:$0xff] }
  0x2a   :  { %v271_v53 = vmul.f32 %v691_v5, %v691_v5  ;;  %v272_v54 = vmul.f32 %v696_v6, %v696_v6  ;;  %v291_v55 = vsel %vm82_vm1, %v224_v52, 0.0  ;;  %v273_v38 = vmul.f32 %v701_v8, %v701_v8 }
  0x2b   :  { %v125_v25 = vadd.f32 %v124_v51, %v123_v24  ;;  %v274_v59 = vmul.f32 %v723_v15, %v723_v15  ;;  %v290_v60 = vadd.f32 %v289_v63, %v288_v31  ;;  %v275_v36 = vmul.f32 %v728_v17, %v728_v17 }
  0x2c   :  { %v276_v61 = vmul.f32 %v733_v20, %v733_v20  ;;  %v277_v5 = vmul.f32 %v750_v49, %v750_v49  ;;  %v293_v6 = vsel %vm82_vm1, %v225_v56, 0.0  ;;  %v278_v52 = vmul.f32 %v755_v30, %v755_v30 }
  0x2d   :  { %v127_v51 = vadd.f32 %v915_v3, %v125_v25  ;;  %v279_v8 = vmul.f32 %v760_v62, %v760_v62  ;;  %v292_v15 = vadd.f32 %v291_v55, %v290_v60  ;;  %v280_v17 = vmul.f32 %v777_v12, %v777_v12  ;;  %v1396_v25 = vld [vmem:[#allocation51_spill] sm:$0xff] }
  0x2e   :  { %v281_v20 = vmul.f32 %v782_v11, %v782_v11  ;;  %v282_v49 = vmul.f32 %v1392_v0, %v1392_v0  ;;  %v295_v56 = vsel %vm82_vm1, %v226_v1, 0.0  ;;  %v283_v30 = vmul.f32 %v1393_v34, %v1393_v34  ;;  %v1398_v34 = vld [vmem:[#allocation54_spill] sm:$0xff] }
  0x2f   :  { %v129_v3 = vadd.f32 %v931_v50, %v127_v51  ;;  %v294_v35 = vadd.f32 %v293_v6, %v292_v15  ;;  %v297_v62 = vsel %vm82_vm1, %v227_v26, 0.0  ;;  %v299_v9 = vsel %vm82_vm1, %v228_v10, 0.0 }
  0x30   :  { %v301_v12 = vsel %vm82_vm1, %v229_v44, 0.0  ;;  %v303_v14 = vsel %vm82_vm1, %v230_v57, 0.0  ;;  %v305_v11 = vsel %vm82_vm1, %v231_v7, 0.0  ;;  %v307_v1 = vsel %vm82_vm1, %v232_v13, 0.0  ;;  %v1395_v7 = vld [vmem:[#allocation50_spill] sm:$0xff] }
  0x31   :  { %v131_v63 = vadd.f32 %v1394_v41, %v129_v3  ;;  %v296_v24 = vadd.f32 %v295_v56, %v294_v35  ;;  %v1072_v50 = vsel %vm82_vm1, %v253_v18, 0.0  ;;  %v1075_v31 = vsel %vm82_vm1, %v254_v19, 0.0  ;;  %v1397_v56 = vld [vmem:[#allocation35_spill] sm:$0xff] }
  0x32   :  { %v1078_v26 = vsel %vm82_vm1, %v255_v21, 0.0  ;;  %v1081_v44 = vsel %vm82_vm1, %v256_v22, 0.0  ;;  %v1084_v57 = vsel %vm82_vm1, %v257_v23, 0.0  ;;  %v1088_v13 = vsel %vm82_vm1, %v258_v45, 0.0 }
  0x33   :  { %v133_v10 = vadd.f32 %v1395_v7, %v131_v63  ;;  %v298_v55 = vadd.f32 %v297_v62, %v296_v24  ;;  %v1091_v18 = vsel %vm82_vm1, %v259_v4, 0.0  ;;  %v1094_v19 = vsel %vm82_vm1, %v260_v27, 0.0  ;;  %v1399_v62 = vld [vmem:[#allocation36_spill] sm:$0xff] }
  0x34   :  { %v1097_v21 = vsel %vm82_vm1, %v261_v28, 0.0  ;;  %v1100_v22 = vsel %vm82_vm1, %v262_v29, 0.0  ;;  %v1103_v23 = vsel %vm82_vm1, %v263_v33, 0.0  ;;  %v1107_v45 = vsel %vm82_vm1, %v264_v40, 0.0 }
  0x35   :  { %v135_v60 = vadd.f32 %v1396_v25, %v133_v10  ;;  %v300_v6 = vadd.f32 %v299_v9, %v298_v55  ;;  %v1110_v4 = vsel %vm82_vm1, %v265_v42, 0.0  ;;  %v1113_v27 = vsel %vm82_vm1, %v266_v46, 0.0  ;;  %v1401_v10 = vld [vmem:[#allocation38_spill] sm:$0xff] }
  0x36   :  { %v1116_v28 = vsel %vm82_vm1, %v267_v47, 0.0  ;;  %v1119_v29 = vsel %vm82_vm1, %v268_v39, 0.0  ;;  %v1122_v33 = vsel %vm82_vm1, %v269_v48, 0.0  ;;  %v1126_v40 = vsel %vm82_vm1, %v270_v37, 0.0  ;;  %v1402_v25 = vld [vmem:[#allocation2_spill] sm:$0xff] }
  0x37   :  { %v137_v51 = vadd.f32 %v957_v58, %v135_v60  ;;  %v302_v15 = vadd.f32 %v301_v12, %v300_v6  ;;  %v1129_v42 = vsel %vm82_vm1, %v271_v53, 0.0  ;;  %v1132_v46 = vsel %vm82_vm1, %v272_v54, 0.0 }
  0x38   :  { %v1135_v47 = vsel %vm82_vm1, %v273_v38, 0.0  ;;  %v1138_v39 = vsel %vm82_vm1, %v274_v59, 0.0  ;;  %v1141_v48 = vsel %vm82_vm1, %v275_v36, 0.0  ;;  %v1145_v37 = vsel %vm82_vm1, %v276_v61, 0.0 }
  0x39   :  { %v139_v58 = vadd.f32 %v961_v32, %v137_v51  ;;  %v304_v0 = vadd.f32 %v303_v14, %v302_v15  ;;  %v1148_v53 = vsel %vm82_vm1, %v277_v5, 0.0  ;;  %v1151_v54 = vsel %vm82_vm1, %v278_v52, 0.0  ;;  %v1165_v32 = vld [vmem:[%s1318_s0 + $0xf8] sm:$0xff]  ;;  %v1403_v51 = vld [vmem:[#allocation39_spill] sm:$0xff] }
  0x3a   :  { %v1154_v38 = vsel %vm82_vm1, %v279_v8, 0.0  ;;  %v1157_v59 = vsel %vm82_vm1, %v280_v17, 0.0  ;;  %v1160_v36 = vsel %vm82_vm1, %v281_v20, 0.0  ;;  %v1169_v52 = vsel %vm82_vm1, %v282_v49, 0.0 }
  0x3b   :  { %v141_v61 = vadd.f32 %v967_v43, %v139_v58  ;;  %v306_v5 = vadd.f32 %v305_v11, %v304_v0  ;;  %v1172_v8 = vsel %vm82_vm1, %v283_v30, 0.0  ;;  %v144_v17 = vsel %vm82_vm1, %v1165_v32, 0.0  ;;  %v1183_v43 = vld [vmem:[%s1318_s0 + $0x100] sm:$0xff]  ;;  %v1404_v58 = vld [vmem:[#allocation3_spill] sm:$0xff] }
  0x3c   :  { %v235_v20 = vmul.f32 %v1397_v56, %v1397_v56  ;;  %v309_v3 = vsel %vm82_vm1, %v989_v16, 0.0  ;;  %v146_v30 = vsel %vm82_vm1, %v1183_v43, 0.0  ;;  %v236_v9 = vmul.f32 %v1399_v62, %v1399_v62  ;;  %v1400_v16 = vld [vmem:[#allocation37_spill] sm:$0xff] }
  0x3d   :  { %v143_v49 = vadd.f32 %v1398_v34, %v141_v61  ;;  %v308_v35 = vadd.f32 %v307_v1, %v306_v5  ;;  %v311_v12 = vsel %vm82_vm1, %v991_v2, 0.0  ;;  %v237_v41 = vmul.f32 %v1400_v16, %v1400_v16  ;;  %v1405_v5 = vld [vmem:[#allocation40_spill] sm:$0xff]  ;;  %v1408_v62 = vld [vmem:[#allocation5_spill] sm:$0xff] }
  0x3e   :  { %v313_v63 = vsel %vm82_vm1, %v235_v20, 0.0  ;;  %v238_v1 = vmul.f32 %v1401_v10, %v1401_v10  ;;  %v315_v55 = vsel %vm82_vm1, %v236_v9, 0.0  ;;  %v239_v2 = vmul.f32 %v1403_v51, %v1403_v51  ;;  %v1406_v20 = vld [vmem:[#allocation4_spill] sm:$0xff] }
  0x3f   :  { %v145_v14 = vadd.f32 %v144_v17, %v143_v49  ;;  %v310_v11 = vadd.f32 %v309_v3, %v308_v35  ;;  %v317_v15 = vsel %vm82_vm1, %v237_v41, 0.0  ;;  %v240_v17 = vmul.f32 %v1405_v5, %v1405_v5  ;;  %v1407_v49 = vld [vmem:[#allocation41_spill] sm:$0xff]  ;;  %v1410_v41 = vld [vmem:[#allocation6_spill] sm:$0xff] }
  0x40   :  { %v319_v56 = vsel %vm82_vm1, %v238_v1, 0.0  ;;  %v241_v35 = vmul.f32 %v1407_v49, %v1407_v49 }
  0x41   :  { %v147_v24 = vadd.f32 %v146_v30, %v145_v14  ;;  %v312_v7 = vadd.f32 %v311_v12, %v310_v11  ;;  %v321_v30 = vsel %vm82_vm1, %v239_v2, 0.0  ;;  %v1409_v14 = vld [vmem:[#allocation42_spill] sm:$0xff]  ;;  %v323_v16 = vsel %vm82_vm1, %v240_v17, 0.0 }
  0x42   :  { %v242_v11 = vmul.f32 %v1409_v14, %v1409_v14  ;;  %v325_v1 = vsel %vm82_vm1, %v241_v35, 0.0 }
  0x43   :  { %v149_v60 = vadd.f32 %v1402_v25, %v147_v24  ;;  %v314_v6 = vadd.f32 %v313_v63, %v312_v7  ;;  %v1411_v7 = vld [vmem:[#allocation43_spill] sm:$0xff] }
  0x44   :  { %v243_v10 = vmul.f32 %v1411_v7, %v1411_v7  ;;  %v327_v2 = vsel %vm82_vm1, %v242_v11, 0.0 }
  0x45   :  { %v151_v0 = vadd.f32 %v1404_v58, %v149_v60  ;;  %v316_v61 = vadd.f32 %v315_v55, %v314_v6  ;;  %v1412_v55 = vld [vmem:[#allocation7_spill] sm:$0xff]  ;;  %v1413_v6 = vld [vmem:[#allocation44_spill] sm:$0xff] }
  0x46   :  { %v244_v51 = vmul.f32 %v1413_v6, %v1413_v6  ;;  %v329_v17 = vsel %vm82_vm1, %v243_v10, 0.0 }
  0x47   :  { %v153_v3 = vadd.f32 %v1406_v20, %v151_v0  ;;  %v318_v34 = vadd.f32 %v317_v15, %v316_v61  ;;  %v1414_v15 = vld [vmem:[#allocation8_spill] sm:$0xff]  ;;  %v1415_v61 = vld [vmem:[#allocation45_spill] sm:$0xff] }
  0x48   :  { %v245_v5 = vmul.f32 %v1415_v61, %v1415_v61  ;;  %v331_v35 = vsel %vm82_vm1, %v244_v51, 0.0 }
  0x49   :  { %v155_v9 = vadd.f32 %v1408_v62, %v153_v3  ;;  %v320_v12 = vadd.f32 %v319_v56, %v318_v34  ;;  %v1416_v56 = vld [vmem:[#allocation9_spill] sm:$0xff]  ;;  %v1417_v34 = vld [vmem:[#allocation46_spill] sm:$0xff] }
  0x4a   :  { %v246_v49 = vmul.f32 %v1417_v34, %v1417_v34  ;;  %v333_v11 = vsel %vm82_vm1, %v245_v5, 0.0 }
  0x4b   :  { %v157_v63 = vadd.f32 %v1410_v41, %v155_v9  ;;  %v322_v24 = vadd.f32 %v321_v30, %v320_v12  ;;  %v1418_v30 = vld [vmem:[#allocation10_spill] sm:$0xff]  ;;  %v1419_v12 = vld [vmem:[#allocation47_spill] sm:$0xff] }
  0x4c   :  { %v247_v14 = vmul.f32 %v1419_v12, %v1419_v12  ;;  %v335_v10 = vsel %vm82_vm1, %v246_v49, 0.0  ;;  %v1427_v49 = vld [vmem:[#allocation15_spill] sm:$0xff]  ;;  %v1428_v12 = vld [vmem:[#allocation16_spill] sm:$0xff] }
  0x4d   :  { %v159_v25 = vadd.f32 %v1412_v55, %v157_v63  ;;  %v324_v60 = vadd.f32 %v323_v16, %v322_v24  ;;  %v1420_v16 = vld [vmem:[#allocation11_spill] sm:$0xff]  ;;  %v1421_v24 = vld [vmem:[#allocation48_spill] sm:$0xff] }
  0x4e   :  { %v248_v7 = vmul.f32 %v1421_v24, %v1421_v24  ;;  %v337_v51 = vsel %vm82_vm1, %v247_v14, 0.0 }
  0x4f   :  { %v161_v58 = vadd.f32 %v1414_v15, %v159_v25  ;;  %v326_v0 = vadd.f32 %v325_v1, %v324_v60  ;;  %v1422_v1 = vld [vmem:[#allocation12_spill] sm:$0xff] }
  0x50   :  { %v1423_v60 = vld [vmem:[#allocation52_spill] sm:$0xff]  ;;  %v339_v5 = vsel %vm82_vm1, %v248_v7, 0.0  ;;  %v1430_v7 = vld [vmem:[#allocation18_spill] sm:$0xff] }
  0x51   :  { %v163_v20 = vadd.f32 %v1416_v56, %v161_v58  ;;  %v328_v3 = vadd.f32 %v327_v2, %v326_v0  ;;  %v249_v6 = vmul.f32 %v1423_v60, %v1423_v60  ;;  %v1424_v2 = vld [vmem:[#allocation13_spill] sm:$0xff] }
  0x52   :  { %v1425_v0 = vld [vmem:[#allocation53_spill] sm:$0xff] }
  0x53   :  { %v165_v62 = vadd.f32 %v1418_v30, %v163_v20  ;;  %v330_v9 = vadd.f32 %v329_v17, %v328_v3  ;;  %v250_v61 = vmul.f32 %v1425_v0, %v1425_v0  ;;  %v1426_v17 = vld [vmem:[#allocation14_spill] sm:$0xff]  ;;  %v251_v3 = vmul.f32 %v1165_v32, %v1165_v32 }
  0x54   :  { %v341_v34 = vsel %vm82_vm1, %v249_v6, 0.0  ;;  %v1432_v6 = vld [vmem:[#allocation20_spill] sm:$0xff]  ;;  %v1434_v0 = vld [vmem:[#allocation22_spill] sm:$0xff] }
  0x55   :  { %v167_v41 = vadd.f32 %v1420_v16, %v165_v62  ;;  %v332_v63 = vadd.f32 %v331_v35, %v330_v9  ;;  %v252_v62 = vmul.f32 %v1183_v43, %v1183_v43  ;;  %v343_v9 = vsel %vm82_vm1, %v250_v61, 0.0 }
  0x56   :  { %v345_v16 = vsel %vm82_vm1, %v251_v3, 0.0  ;;  %v1436_v3 = vld [vmem:[#allocation24_spill] sm:$0xff] }
  0x57   :  { %v169_v55 = vadd.f32 %v1422_v1, %v167_v41  ;;  %v334_v25 = vadd.f32 %v333_v11, %v332_v63  ;;  %v1429_v41 = vld [vmem:[#allocation17_spill] sm:$0xff]  ;;  %v347_v32 = vsel %vm82_vm1, %v252_v62, 0.0  ;;  %v1438_v62 = vld [vmem:[#allocation27_spill] sm:$0xff] }
  0x59   :  { %v171_v15 = vadd.f32 %v1424_v2, %v169_v55  ;;  %v336_v58 = vadd.f32 %v335_v10, %v334_v25  ;;  %v1431_v55 = vld [vmem:[#allocation19_spill] sm:$0xff]  ;;  %v1433_v2 = vld [vmem:[#allocation21_spill] sm:$0xff] }
  0x5b   :  { %v173_v56 = vadd.f32 %v1426_v17, %v171_v15  ;;  %v338_v20 = vadd.f32 %v337_v51, %v336_v58  ;;  %v1435_v17 = vld [vmem:[#allocation23_spill] sm:$0xff] }
  0x5d   :  { %v175_v35 = vadd.f32 %v1427_v49, %v173_v56  ;;  %v340_v30 = vadd.f32 %v339_v5, %v338_v20 }
  0x5f   :  { %v177_v14 = vadd.f32 %v1428_v12, %v175_v35  ;;  %v342_v11 = vadd.f32 %v341_v34, %v340_v30  ;;  %v1437_v35 = vld [vmem:[#allocation25_spill] sm:$0xff]  ;;  %v1439_v12 = vld [vmem:[#allocation28_spill] sm:$0xff] }
  0x61   :  { %v179_v63 = vadd.f32 %v1429_v41, %v177_v14  ;;  %v344_v24 = vadd.f32 %v343_v9, %v342_v11  ;;  %v1440_v11 = vld [vmem:[#allocation29_spill] sm:$0xff]  ;;  %v1441_v41 = vld [vmem:[#allocation31_spill] sm:$0xff] }
  0x63   :  { %v181_v10 = vadd.f32 %v1430_v7, %v179_v63  ;;  %v346_v1 = vadd.f32 %v345_v16, %v344_v24  ;;  %v1442_v24 = vld [vmem:[#allocation32_spill] sm:$0xff]  ;;  %v1443_v7 = vld [vmem:[#allocation33_spill] sm:$0xff] }
  0x65   :  { %v183_v25 = vadd.f32 %v1431_v55, %v181_v10  ;;  %v348_v60 = vadd.f32 %v347_v32, %v346_v1  ;;  %v1444_v1 = vld [vmem:[#allocation34_spill] sm:$0xff] }
  0x67   :  { %v185_v43 = vadd.f32 %v1432_v6, %v183_v25  ;;  %v350_v51 = vadd.f32 %v1072_v50, %v348_v60 }
  0x69   :  { %v187_v15 = vadd.f32 %v1433_v2, %v185_v43  ;;  %v352_v58 = vadd.f32 %v1075_v31, %v350_v51 }
  0x6b   :  { %v189_v61 = vadd.f32 %v1434_v0, %v187_v15  ;;  %v354_v5 = vadd.f32 %v1078_v26, %v352_v58 }
  0x6d   :  { %v191_v56 = vadd.f32 %v1435_v17, %v189_v61  ;;  %v356_v20 = vadd.f32 %v1081_v44, %v354_v5 }
  0x6f   :  { %v193_v34 = vadd.f32 %v1436_v3, %v191_v56  ;;  %v358_v49 = vadd.f32 %v1084_v57, %v356_v20 }
  0x71   :  { %v195_v30 = vadd.f32 %v1437_v35, %v193_v34  ;;  %v360_v50 = vadd.f32 %v1088_v13, %v358_v49 }
  0x73   :  { %v197_v9 = vadd.f32 %v1438_v62, %v195_v30  ;;  %v362_v31 = vadd.f32 %v1091_v18, %v360_v50 }
  0x75   :  { %v199_v14 = vadd.f32 %v1439_v12, %v197_v9  ;;  %v364_v26 = vadd.f32 %v1094_v19, %v362_v31 }
  0x77   :  { %v201_v16 = vadd.f32 %v1440_v11, %v199_v14  ;;  %v366_v44 = vadd.f32 %v1097_v21, %v364_v26 }
  0x79   :  { %v203_v63 = vadd.f32 %v1441_v41, %v201_v16  ;;  %v368_v57 = vadd.f32 %v1100_v22, %v366_v44 }
  0x7b   :  { %v205_v32 = vadd.f32 %v1442_v24, %v203_v63  ;;  %v370_v13 = vadd.f32 %v1103_v23, %v368_v57 }
  0x7d   :  { %v207_v10 = vadd.f32 %v1443_v7, %v205_v32  ;;  %v372_v18 = vadd.f32 %v1107_v45, %v370_v13  ;;  %v81_v45 = vld [vmem:[%s1319_s1] sm:$0x1] }
  0x7f   :  { %v209_v55 = vadd.f32 %v1444_v1, %v207_v10  ;;  %v374_v19 = vadd.f32 %v1110_v4, %v372_v18 }
  0x81   :  { %v210_v25 = vrot.slane %v209_v55, 4  ;;  %v376_v60 = vadd.f32 %v1113_v27, %v374_v19 }
  0x83   :  { %v211_v21 = vadd.f32 %v210_v25, %v209_v55  ;;  %v378_v6 = vadd.f32 %v1116_v28, %v376_v60 }
  0x85   :  { %v212_v43 = vrot.slane %v211_v21, 2  ;;  %v380_v22 = vadd.f32 %v1119_v29, %v378_v6 }
  0x87   :  { %v213_v51 = vadd.f32 %v212_v43, %v211_v21  ;;  %v382_v23 = vadd.f32 %v1122_v33, %v380_v22 }
  0x89   :  { %v214_v2 = vrot.slane %v213_v51, 1  ;;  %v384_v15 = vadd.f32 %v1126_v40, %v382_v23 }
  0x8b   :  { %v215_v4 = vadd.f32 %v214_v2, %v213_v51  ;;  %v386_v58 = vadd.f32 %v1129_v42, %v384_v15 }
  0x8d   :  { %v216_v27 = vadd.f32 %v215_v4, %v81_v45  ;;  %v388_v0 = vadd.f32 %v1132_v46, %v386_v58 }
  0x8f   :  { %218 = vst.msk [vmem:[%s1319_s1] sm:$0x1] %vm14_vm0, %v216_v27  ;;  %v390_v28 = vadd.f32 %v1135_v47, %v388_v0 }
  0x91   :  { %v392_v29 = vadd.f32 %v1138_v39, %v390_v28 }
  0x93   :  { %v394_v33 = vadd.f32 %v1141_v48, %v392_v29 }
  0x95   :  { %v396_v40 = vadd.f32 %v1145_v37, %v394_v33  ;;  %v219_v37 = vld [vmem:[%s1320_s2] sm:$0x1] }
  0x97   :  { %v398_v61 = vadd.f32 %v1148_v53, %v396_v40 }
  0x99   :  { %v400_v42 = vadd.f32 %v1151_v54, %v398_v61 }
  0x9b   :  { %v402_v5 = vadd.f32 %v1154_v38, %v400_v42 }
  0x9d   :  { %v404_v46 = vadd.f32 %v1157_v59, %v402_v5 }
  0x9f   :  { %v406_v17 = vadd.f32 %v1160_v36, %v404_v46 }
  0xa1   :  { %v408_v56 = vadd.f32 %v1169_v52, %v406_v17 }
  0xa3   :  { %v410_v47 = vadd.f32 %v1172_v8, %v408_v56 }
  0xa5   :  { %v411_v20 = vrot.slane %v410_v47, 4 }
  0xa7   :  { %v412_v39 = vadd.f32 %v411_v20, %v410_v47 }
  0xa9   :  { %v413_v3 = vrot.slane %v412_v39, 2 }
  0xab   :  { %v414_v48 = vadd.f32 %v413_v3, %v412_v39 }
  0xad   :  { %v415_v34 = vrot.slane %v414_v48, 1 }
  0xaf   :  { %v416_v53 = vadd.f32 %v415_v34, %v414_v48 }
  0xb1   :  { %v417_v54 = vadd.f32 %v416_v53, %v219_v37 }
  0xb3   :  { %418 = vst.msk [vmem:[%s1320_s2] sm:$0x1] %vm14_vm0, %v417_v54 }

// kernel: _lambda_.21
= control target key start
LH: loop header
LB: loop body
LE: loop exit
PB: predicated region body
PF: predicated region fallthrough
CT: control target
= control target key end

     0   :  { %vm284_vm0 = vcmask 130048   ;;  %s961_s0 = inlined_call_operand.vmem [shape: f32[512,16], index: 0, kind: input, shape index: {}]   ;;  %s962_s1 = inlined_call_operand.vmem [shape: f32[1,16], index: 1, kind: input, shape index: {}]   ;;  %s963_s2 = inlined_call_operand.vmem [shape: f32[1,16], index: 2, kind: input, shape index: {}]   ;;  %s964_s3 = inlined_call_operand.vmem [shape: f32[512,16], index: 3, kind: output, shape index: {}]  }
   0x1   :  { %v14_v0 = vld [vmem:[%s961_s0] sm:$0xff]  ;;  %v15_v4 = vld [vmem:[%s961_s0 + $0x8] sm:$0xff]  ;;  %v16_v5 = vld [vmem:[%s961_s0 + $0x10] sm:$0xff] }
   0x2   :  { %v381_v1 = vld [vmem:[%s962_s1] ss:$0 sm:$0xff]  ;;  %v17_v6 = vld [vmem:[%s961_s0 + $0x18] sm:$0xff]  ;;  %v19_v11 = vld [vmem:[%s961_s0 + $0x28] sm:$0xff] }
   0x3   :  { %v386_v2 = vld [vmem:[%s963_s2] ss:$0 sm:$0xff]  ;;  %v85_v3 = vmul.f32 %v381_v1, %v14_v0  ;;  %v86_v7 = vmul.f32 %v381_v1, %v15_v4  ;;  %v87_v8 = vmul.f32 %v381_v1, %v16_v5  ;;  %v88_v9 = vmul.f32 %v381_v1, %v17_v6  ;;  %v20_v12 = vld [vmem:[%s961_s0 + $0x30] sm:$0xff]  ;;  %v21_v17 = vld [vmem:[%s961_s0 + $0x38] sm:$0xff] }
   0x4   :  { %v18_v10 = vld [vmem:[%s961_s0 + $0x20] sm:$0xff]  ;;  %v90_v15 = vmul.f32 %v381_v1, %v19_v11  ;;  %v91_v16 = vmul.f32 %v381_v1, %v20_v12  ;;  %v92_v21 = vmul.f32 %v381_v1, %v21_v17  ;;  %v23_v27 = vld [vmem:[%s961_s0 + $0x48] sm:$0xff]  ;;  %v24_v28 = vld [vmem:[%s961_s0 + $0x50] sm:$0xff] }
   0x5   :  { %v156_v13 = vadd.f32 %v386_v2, %v85_v3  ;;  %v89_v14 = vmul.f32 %v381_v1, %v18_v10  ;;  %v157_v18 = vadd.f32 %v386_v2, %v86_v7  ;;  %v158_v19 = vadd.f32 %v386_v2, %v87_v8  ;;  %v22_v22 = vld [vmem:[%s961_s0 + $0x40] sm:$0xff]  ;;  %v25_v29 = vld [vmem:[%s961_s0 + $0x58] sm:$0xff]  ;;  %v27_v35 = vld [vmem:[%s961_s0 + $0x68] sm:$0xff] }
   0x6   :  { %v159_v20 = vadd.f32 %v386_v2, %v88_v9  ;;  %v161_v25 = vadd.f32 %v386_v2, %v90_v15  ;;  %v162_v26 = vadd.f32 %v386_v2, %v91_v16  ;;  %v163_v33 = vadd.f32 %v386_v2, %v92_v21  ;;  %v26_v34 = vld [vmem:[%s961_s0 + $0x60] sm:$0xff]  ;;  %v28_v36 = vld [vmem:[%s961_s0 + $0x70] sm:$0xff]  ;;  %v29_v41 = vld [vmem:[%s961_s0 + $0x78] sm:$0xff] }
   0x7   :  { %v220_v23 = vmax.f32 %v156_v13, 0.0  ;;  %v160_v24 = vadd.f32 %v386_v2, %v89_v14  ;;  %v221_v30 = vmax.f32 %v157_v18, 0.0  ;;  %v222_v31 = vmax.f32 %v158_v19, 0.0  ;;  %v30_v54 = vld [vmem:[%s961_s0 + $0x80] sm:$0xff]  ;;  %v31_v59 = vld [vmem:[%s961_s0 + $0x88] sm:$0xff]  ;;  %v32_v60 = vld [vmem:[%s961_s0 + $0x90] sm:$0xff] }
   0x8   :  { %v223_v32 = vmax.f32 %v159_v20, 0.0  ;;  %v225_v38 = vmax.f32 %v161_v25, 0.0  ;;  %v226_v39 = vmax.f32 %v162_v26, 0.0  ;;  %v93_v40 = vmul.f32 %v381_v1, %v22_v22  ;;  %v33_v61 = vld [vmem:[%s961_s0 + $0x98] sm:$0xff]  ;;  %v34_v4 = vld [vmem:[%s961_s0 + $0xa0] sm:$0xff]  ;;  %v35_v5 = vld [vmem:[%s961_s0 + $0xa8] sm:$0xff] }
   0x9   :  { %285 = vst.msk [vmem:[%s964_s3] sm:$0xff] %vm284_vm0, %v220_v23  ;;  %v224_v37 = vmax.f32 %v160_v24, 0.0  ;;  %286 = vst.msk [vmem:[%s964_s3 + $0x8] sm:$0xff] %vm284_vm0, %v221_v30  ;;  %v227_v42 = vmax.f32 %v163_v33, 0.0  ;;  %v94_v43 = vmul.f32 %v381_v1, %v23_v27  ;;  %v95_v44 = vmul.f32 %v381_v1, %v24_v28  ;;  %v36_v6 = vld [vmem:[%s961_s0 + $0xb0] sm:$0xff]  ;;  %v37_v11 = vld [vmem:[%s961_s0 + $0xb8] sm:$0xff] }
   0xa   :  { %287 = vst.msk [vmem:[%s964_s3 + $0x10] sm:$0xff] %vm284_vm0, %v222_v31  ;;  %288 = vst.msk [vmem:[%s964_s3 + $0x18] sm:$0xff] %vm284_vm0, %v223_v32  ;;  %v96_v45 = vmul.f32 %v381_v1, %v25_v29  ;;  %v164_v46 = vadd.f32 %v386_v2, %v93_v40  ;;  %v97_v47 = vmul.f32 %v381_v1, %v26_v34  ;;  %v38_v24 = vld [vmem:[%s961_s0 + $0xc0] sm:$0xff]  ;;  %v39_v29 = vld [vmem:[%s961_s0 + $0xc8] sm:$0xff] }
   0xb   :  { %289 = vst.msk [vmem:[%s964_s3 + $0x20] sm:$0xff] %vm284_vm0, %v224_v37  ;;  %290 = vst.msk [vmem:[%s964_s3 + $0x28] sm:$0xff] %vm284_vm0, %v225_v38  ;;  %v98_v48 = vmul.f32 %v381_v1, %v27_v35  ;;  %v99_v49 = vmul.f32 %v381_v1, %v28_v36  ;;  %v165_v50 = vadd.f32 %v386_v2, %v94_v43  ;;  %v40_v30 = vld [vmem:[%s961_s0 + $0xd0] sm:$0xff]  ;;  %v41_v31 = vld [vmem:[%s961_s0 + $0xd8] sm:$0xff] }
   0xc   :  { %291 = vst.msk [vmem:[%s964_s3 + $0x30] sm:$0xff] %vm284_vm0, %v226_v39  ;;  %292 = vst.msk [vmem:[%s964_s3 + $0x38] sm:$0xff] %vm284_vm0, %v227_v42  ;;  %v166_v51 = vadd.f32 %v386_v2, %v95_v44  ;;  %v167_v52 = vadd.f32 %v386_v2, %v96_v45  ;;  %v100_v53 = vmul.f32 %v381_v1, %v29_v41  ;;  %v228_v55 = vmax.f32 %v164_v46, 0.0  ;;  %v42_v36 = vld [vmem:[%s961_s0 + $0xe0] sm:$0xff]  ;;  %v43_v37 = vld [vmem:[%s961_s0 + $0xe8] sm:$0xff] }
   0xd   :  { %v168_v56 = vadd.f32 %v386_v2, %v97_v47  ;;  %v169_v57 = vadd.f32 %v386_v2, %v98_v48  ;;  %v170_v58 = vadd.f32 %v386_v2, %v99_v49  ;;  %v229_v62 = vmax.f32 %v165_v50, 0.0  ;;  %v44_v38 = vld [vmem:[%s961_s0 + $0xf0] sm:$0xff]  ;;  %v45_v43 = vld [vmem:[%s961_s0 + $0xf8] sm:$0xff] }
   0xe   :  { %v230_v63 = vmax.f32 %v166_v51, 0.0  ;;  %v231_v0 = vmax.f32 %v167_v52, 0.0  ;;  %v171_v3 = vadd.f32 %v386_v2, %v100_v53  ;;  %293 = vst.msk [vmem:[%s964_s3 + $0x40] sm:$0xff] %vm284_vm0, %v228_v55  ;;  %v101_v10 = vmul.f32 %v381_v1, %v30_v54 }
   0xf   :  { %v232_v7 = vmax.f32 %v168_v56, 0.0  ;;  %v233_v8 = vmax.f32 %v169_v57, 0.0  ;;  %v234_v9 = vmax.f32 %v170_v58, 0.0  ;;  %294 = vst.msk [vmem:[%s964_s3 + $0x48] sm:$0xff] %vm284_vm0, %v229_v62  ;;  %v102_v13 = vmul.f32 %v381_v1, %v31_v59  ;;  %v46_v56 = vld [vmem:[%s961_s0 + $0x100] sm:$0xff]  ;;  %v48_v62 = vld [vmem:[%s961_s0 + $0x110] sm:$0xff] }
  0x10   :  { %295 = vst.msk [vmem:[%s964_s3 + $0x50] sm:$0xff] %vm284_vm0, %v230_v63  ;;  %296 = vst.msk [vmem:[%s964_s3 + $0x58] sm:$0xff] %vm284_vm0, %v231_v0  ;;  %v235_v12 = vmax.f32 %v171_v3, 0.0  ;;  %v103_v14 = vmul.f32 %v381_v1, %v32_v60  ;;  %v104_v15 = vmul.f32 %v381_v1, %v33_v61  ;;  %v172_v16 = vadd.f32 %v386_v2, %v101_v10  ;;  %v47_v61 = vld [vmem:[%s961_s0 + $0x108] sm:$0xff]  ;;  %v49_v63 = vld [vmem:[%s961_s0 + $0x118] sm:$0xff] }
  0x11   :  { %297 = vst.msk [vmem:[%s964_s3 + $0x60] sm:$0xff] %vm284_vm0, %v232_v7  ;;  %298 = vst.msk [vmem:[%s964_s3 + $0x68] sm:$0xff] %vm284_vm0, %v233_v8  ;;  %v105_v17 = vmul.f32 %v381_v1, %v34_v4  ;;  %v106_v18 = vmul.f32 %v381_v1, %v35_v5  ;;  %v107_v19 = vmul.f32 %v381_v1, %v36_v6  ;;  %v50_v6 = vld [vmem:[%s961_s0 + $0x120] sm:$0xff]  ;;  %v51_v7 = vld [vmem:[%s961_s0 + $0x128] sm:$0xff] }
  0x12   :  { %299 = vst.msk [vmem:[%s964_s3 + $0x70] sm:$0xff] %vm284_vm0, %v234_v9  ;;  %300 = vst.msk [vmem:[%s964_s3 + $0x78] sm:$0xff] %vm284_vm0, %v235_v12  ;;  %v173_v20 = vadd.f32 %v386_v2, %v102_v13  ;;  %v174_v21 = vadd.f32 %v386_v2, %v103_v14  ;;  %v175_v22 = vadd.f32 %v386_v2, %v104_v15  ;;  %v236_v25 = vmax.f32 %v172_v16, 0.0  ;;  %v52_v8 = vld [vmem:[%s961_s0 + $0x130] sm:$0xff]  ;;  %v53_v13 = vld [vmem:[%s961_s0 + $0x138] sm:$0xff] }
  0x13   :  { %v108_v23 = vmul.f32 %v381_v1, %v37_v11  ;;  %v176_v26 = vadd.f32 %v386_v2, %v105_v17  ;;  %v177_v27 = vadd.f32 %v386_v2, %v106_v18  ;;  %v178_v28 = vadd.f32 %v386_v2, %v107_v19 }
  0x14   :  { %v237_v32 = vmax.f32 %v173_v20, 0.0  ;;  %v238_v33 = vmax.f32 %v174_v21, 0.0  ;;  %v239_v34 = vmax.f32 %v175_v22, 0.0  ;;  %301 = vst.msk [vmem:[%s964_s3 + $0x80] sm:$0xff] %vm284_vm0, %v236_v25  ;;  %v109_v42 = vmul.f32 %v381_v1, %v38_v24 }
  0x15   :  { %v179_v35 = vadd.f32 %v386_v2, %v108_v23  ;;  %v240_v39 = vmax.f32 %v176_v26, 0.0  ;;  %v241_v40 = vmax.f32 %v177_v27, 0.0  ;;  %v242_v41 = vmax.f32 %v178_v28, 0.0  ;;  %v54_v26 = vld [vmem:[%s961_s0 + $0x140] sm:$0xff] }
  0x16   :  { %302 = vst.msk [vmem:[%s964_s3 + $0x88] sm:$0xff] %vm284_vm0, %v237_v32  ;;  %303 = vst.msk [vmem:[%s964_s3 + $0x90] sm:$0xff] %vm284_vm0, %v238_v33  ;;  %v110_v45 = vmul.f32 %v381_v1, %v39_v29  ;;  %v111_v46 = vmul.f32 %v381_v1, %v40_v30  ;;  %v112_v47 = vmul.f32 %v381_v1, %v41_v31  ;;  %v55_v31 = vld [vmem:[%s961_s0 + $0x148] sm:$0xff]  ;;  %v56_v32 = vld [vmem:[%s961_s0 + $0x150] sm:$0xff] }
  0x17   :  { %304 = vst.msk [vmem:[%s964_s3 + $0x98] sm:$0xff] %vm284_vm0, %v239_v34  ;;  %v243_v44 = vmax.f32 %v179_v35, 0.0  ;;  %305 = vst.msk [vmem:[%s964_s3 + $0xa0] sm:$0xff] %vm284_vm0, %v240_v39  ;;  %v180_v48 = vadd.f32 %v386_v2, %v109_v42  ;;  %v113_v49 = vmul.f32 %v381_v1, %v42_v36  ;;  %v114_v50 = vmul.f32 %v381_v1, %v43_v37  ;;  %v57_v33 = vld [vmem:[%s961_s0 + $0x158] sm:$0xff]  ;;  %v59_v39 = vld [vmem:[%s961_s0 + $0x168] sm:$0xff] }
  0x18   :  { %306 = vst.msk [vmem:[%s964_s3 + $0xa8] sm:$0xff] %vm284_vm0, %v241_v40  ;;  %307 = vst.msk [vmem:[%s964_s3 + $0xb0] sm:$0xff] %vm284_vm0, %v242_v41  ;;  %v115_v51 = vmul.f32 %v381_v1, %v44_v38  ;;  %v181_v52 = vadd.f32 %v386_v2, %v110_v45  ;;  %v182_v53 = vadd.f32 %v386_v2, %v111_v46  ;;  %v58_v38 = vld [vmem:[%s961_s0 + $0x160] sm:$0xff]  ;;  %v60_v40 = vld [vmem:[%s961_s0 + $0x170] sm:$0xff] }
  0x19   :  { %308 = vst.msk [vmem:[%s964_s3 + $0xb8] sm:$0xff] %vm284_vm0, %v243_v44  ;;  %v183_v54 = vadd.f32 %v386_v2, %v112_v47  ;;  %v116_v55 = vmul.f32 %v381_v1, %v45_v43  ;;  %v244_v57 = vmax.f32 %v180_v48, 0.0  ;;  %v184_v58 = vadd.f32 %v386_v2, %v113_v49  ;;  %v61_v45 = vld [vmem:[%s961_s0 + $0x178] sm:$0xff] }
  0x1a   :  { %v185_v59 = vadd.f32 %v386_v2, %v114_v50  ;;  %v186_v60 = vadd.f32 %v386_v2, %v115_v51  ;;  %v245_v0 = vmax.f32 %v181_v52, 0.0  ;;  %v246_v3 = vmax.f32 %v182_v53, 0.0 }
  0x1b   :  { %v247_v4 = vmax.f32 %v183_v54, 0.0  ;;  %v187_v5 = vadd.f32 %v386_v2, %v116_v55  ;;  %309 = vst.msk [vmem:[%s964_s3 + $0xc0] sm:$0xff] %vm284_vm0, %v244_v57  ;;  %v248_v9 = vmax.f32 %v184_v58, 0.0  ;;  %v117_v12 = vmul.f32 %v381_v1, %v46_v56  ;;  %v62_v58 = vld [vmem:[%s961_s0 + $0x180] sm:$0xff] }
  0x1c   :  { %v249_v10 = vmax.f32 %v185_v59, 0.0  ;;  %v250_v11 = vmax.f32 %v186_v60, 0.0  ;;  %310 = vst.msk [vmem:[%s964_s3 + $0xc8] sm:$0xff] %vm284_vm0, %v245_v0  ;;  %311 = vst.msk [vmem:[%s964_s3 + $0xd0] sm:$0xff] %vm284_vm0, %v246_v3  ;;  %v118_v15 = vmul.f32 %v381_v1, %v47_v61  ;;  %v119_v16 = vmul.f32 %v381_v1, %v48_v62  ;;  %v64_v0 = vld [vmem:[%s961_s0 + $0x190] sm:$0xff]  ;;  %v65_v3 = vld [vmem:[%s961_s0 + $0x198] sm:$0xff] }
  0x1d   :  { %312 = vst.msk [vmem:[%s964_s3 + $0xd8] sm:$0xff] %vm284_vm0, %v247_v4  ;;  %v251_v14 = vmax.f32 %v187_v5, 0.0  ;;  %v120_v17 = vmul.f32 %v381_v1, %v49_v63  ;;  %313 = vst.msk [vmem:[%s964_s3 + $0xe0] sm:$0xff] %vm284_vm0, %v248_v9  ;;  %v188_v18 = vadd.f32 %v386_v2, %v117_v12  ;;  %v121_v19 = vmul.f32 %v381_v1, %v50_v6  ;;  %v63_v63 = vld [vmem:[%s961_s0 + $0x188] sm:$0xff] }
  0x1e   :  { %314 = vst.msk [vmem:[%s964_s3 + $0xe8] sm:$0xff] %vm284_vm0, %v249_v10  ;;  %315 = vst.msk [vmem:[%s964_s3 + $0xf0] sm:$0xff] %vm284_vm0, %v250_v11  ;;  %v122_v20 = vmul.f32 %v381_v1, %v51_v7  ;;  %v123_v21 = vmul.f32 %v381_v1, %v52_v8  ;;  %v189_v22 = vadd.f32 %v386_v2, %v118_v15  ;;  %v66_v8 = vld [vmem:[%s961_s0 + $0x1a0] sm:$0xff]  ;;  %v67_v9 = vld [vmem:[%s961_s0 + $0x1a8] sm:$0xff] }
  0x1f   :  { %316 = vst.msk [vmem:[%s964_s3 + $0xf8] sm:$0xff] %vm284_vm0, %v251_v14  ;;  %v190_v23 = vadd.f32 %v386_v2, %v119_v16  ;;  %v191_v24 = vadd.f32 %v386_v2, %v120_v17  ;;  %v124_v25 = vmul.f32 %v381_v1, %v53_v13  ;;  %v252_v27 = vmax.f32 %v188_v18, 0.0  ;;  %v68_v10 = vld [vmem:[%s961_s0 + $0x1b0] sm:$0xff]  ;;  %v69_v15 = vld [vmem:[%s961_s0 + $0x1b8] sm:$0xff] }
  0x20   :  { %v192_v28 = vadd.f32 %v386_v2, %v121_v19  ;;  %v193_v29 = vadd.f32 %v386_v2, %v122_v20  ;;  %v194_v30 = vadd.f32 %v386_v2, %v123_v21  ;;  %v253_v34 = vmax.f32 %v189_v22, 0.0 }
  0x21   :  { %v254_v35 = vmax.f32 %v190_v23, 0.0  ;;  %v255_v36 = vmax.f32 %v191_v24, 0.0  ;;  %v195_v37 = vadd.f32 %v386_v2, %v124_v25  ;;  %317 = vst.msk [vmem:[%s964_s3 + $0x100] sm:$0xff] %vm284_vm0, %v252_v27  ;;  %v125_v44 = vmul.f32 %v381_v1, %v54_v26 }
  0x22   :  { %v256_v41 = vmax.f32 %v192_v28, 0.0  ;;  %v257_v42 = vmax.f32 %v193_v29, 0.0  ;;  %v258_v43 = vmax.f32 %v194_v30, 0.0  ;;  %318 = vst.msk [vmem:[%s964_s3 + $0x108] sm:$0xff] %vm284_vm0, %v253_v34  ;;  %v126_v47 = vmul.f32 %v381_v1, %v55_v31  ;;  %v70_v28 = vld [vmem:[%s961_s0 + $0x1c0] sm:$0xff]  ;;  %v72_v34 = vld [vmem:[%s961_s0 + $0x1d0] sm:$0xff] }
  0x23   :  { %319 = vst.msk [vmem:[%s964_s3 + $0x110] sm:$0xff] %vm284_vm0, %v254_v35  ;;  %320 = vst.msk [vmem:[%s964_s3 + $0x118] sm:$0xff] %vm284_vm0, %v255_v36  ;;  %v259_v46 = vmax.f32 %v195_v37, 0.0  ;;  %v127_v48 = vmul.f32 %v381_v1, %v56_v32  ;;  %v128_v49 = vmul.f32 %v381_v1, %v57_v33  ;;  %v196_v50 = vadd.f32 %v386_v2, %v125_v44  ;;  %v71_v33 = vld [vmem:[%s961_s0 + $0x1c8] sm:$0xff]  ;;  %v73_v35 = vld [vmem:[%s961_s0 + $0x1d8] sm:$0xff] }
  0x24   :  { %321 = vst.msk [vmem:[%s964_s3 + $0x120] sm:$0xff] %vm284_vm0, %v256_v41  ;;  %322 = vst.msk [vmem:[%s964_s3 + $0x128] sm:$0xff] %vm284_vm0, %v257_v42  ;;  %v129_v51 = vmul.f32 %v381_v1, %v58_v38  ;;  %v130_v52 = vmul.f32 %v381_v1, %v59_v39  ;;  %v131_v53 = vmul.f32 %v381_v1, %v60_v40  ;;  %v74_v40 = vld [vmem:[%s961_s0 + $0x1e0] sm:$0xff]  ;;  %v75_v41 = vld [vmem:[%s961_s0 + $0x1e8] sm:$0xff] }
  0x25   :  { %323 = vst.msk [vmem:[%s964_s3 + $0x130] sm:$0xff] %vm284_vm0, %v258_v43  ;;  %324 = vst.msk [vmem:[%s964_s3 + $0x138] sm:$0xff] %vm284_vm0, %v259_v46  ;;  %v197_v54 = vadd.f32 %v386_v2, %v126_v47  ;;  %v198_v55 = vadd.f32 %v386_v2, %v127_v48  ;;  %v199_v56 = vadd.f32 %v386_v2, %v128_v49  ;;  %v260_v59 = vmax.f32 %v196_v50, 0.0  ;;  %v76_v42 = vld [vmem:[%s961_s0 + $0x1f0] sm:$0xff]  ;;  %v77_v47 = vld [vmem:[%s961_s0 + $0x1f8] sm:$0xff] }
  0x26   :  { %v132_v57 = vmul.f32 %v381_v1, %v61_v45  ;;  %v200_v60 = vadd.f32 %v386_v2, %v129_v51  ;;  %v201_v61 = vadd.f32 %v386_v2, %v130_v52  ;;  %v202_v62 = vadd.f32 %v386_v2, %v131_v53 }
  0x27   :  { %v261_v4 = vmax.f32 %v197_v54, 0.0  ;;  %v262_v5 = vmax.f32 %v198_v55, 0.0  ;;  %v263_v6 = vmax.f32 %v199_v56, 0.0  ;;  %325 = vst.msk [vmem:[%s964_s3 + $0x140] sm:$0xff] %vm284_vm0, %v260_v59  ;;  %v133_v14 = vmul.f32 %v381_v1, %v62_v58 }
  0x28   :  { %v203_v7 = vadd.f32 %v386_v2, %v132_v57  ;;  %v264_v11 = vmax.f32 %v200_v60, 0.0  ;;  %v265_v12 = vmax.f32 %v201_v61, 0.0  ;;  %v266_v13 = vmax.f32 %v202_v62, 0.0 }
  0x29   :  { %326 = vst.msk [vmem:[%s964_s3 + $0x148] sm:$0xff] %vm284_vm0, %v261_v4  ;;  %327 = vst.msk [vmem:[%s964_s3 + $0x150] sm:$0xff] %vm284_vm0, %v262_v5  ;;  %v134_v17 = vmul.f32 %v381_v1, %v63_v63  ;;  %v135_v18 = vmul.f32 %v381_v1, %v64_v0  ;;  %v136_v19 = vmul.f32 %v381_v1, %v65_v3 }
  0x2a   :  { %328 = vst.msk [vmem:[%s964_s3 + $0x158] sm:$0xff] %vm284_vm0, %v263_v6  ;;  %v267_v16 = vmax.f32 %v203_v7, 0.0  ;;  %329 = vst.msk [vmem:[%s964_s3 + $0x160] sm:$0xff] %vm284_vm0, %v264_v11  ;;  %v204_v20 = vadd.f32 %v386_v2, %v133_v14  ;;  %v137_v21 = vmul.f32 %v381_v1, %v66_v8  ;;  %v138_v22 = vmul.f32 %v381_v1, %v67_v9 }
  0x2b   :  { %330 = vst.msk [vmem:[%s964_s3 + $0x168] sm:$0xff] %vm284_vm0, %v265_v12  ;;  %331 = vst.msk [vmem:[%s964_s3 + $0x170] sm:$0xff] %vm284_vm0, %v266_v13  ;;  %v139_v23 = vmul.f32 %v381_v1, %v68_v10  ;;  %v205_v24 = vadd.f32 %v386_v2, %v134_v17  ;;  %v206_v25 = vadd.f32 %v386_v2, %v135_v18 }
  0x2c   :  { %332 = vst.msk [vmem:[%s964_s3 + $0x178] sm:$0xff] %vm284_vm0, %v267_v16  ;;  %v207_v26 = vadd.f32 %v386_v2, %v136_v19  ;;  %v140_v27 = vmul.f32 %v381_v1, %v69_v15  ;;  %v268_v29 = vmax.f32 %v204_v20, 0.0  ;;  %v208_v30 = vadd.f32 %v386_v2, %v137_v21 }
  0x2d   :  { %v209_v31 = vadd.f32 %v386_v2, %v138_v22  ;;  %v210_v32 = vadd.f32 %v386_v2, %v139_v23  ;;  %v269_v36 = vmax.f32 %v205_v24, 0.0  ;;  %v270_v37 = vmax.f32 %v206_v25, 0.0 }
  0x2e   :  { %v271_v38 = vmax.f32 %v207_v26, 0.0  ;;  %v211_v39 = vadd.f32 %v386_v2, %v140_v27  ;;  %333 = vst.msk [vmem:[%s964_s3 + $0x180] sm:$0xff] %vm284_vm0, %v268_v29  ;;  %v272_v43 = vmax.f32 %v208_v30, 0.0  ;;  %v141_v46 = vmul.f32 %v381_v1, %v70_v28 }
  0x2f   :  { %v273_v44 = vmax.f32 %v209_v31, 0.0  ;;  %v274_v45 = vmax.f32 %v210_v32, 0.0  ;;  %334 = vst.msk [vmem:[%s964_s3 + $0x188] sm:$0xff] %vm284_vm0, %v269_v36  ;;  %335 = vst.msk [vmem:[%s964_s3 + $0x190] sm:$0xff] %vm284_vm0, %v270_v37  ;;  %v142_v49 = vmul.f32 %v381_v1, %v71_v33  ;;  %v143_v50 = vmul.f32 %v381_v1, %v72_v34 }
  0x30   :  { %336 = vst.msk [vmem:[%s964_s3 + $0x198] sm:$0xff] %vm284_vm0, %v271_v38  ;;  %v275_v48 = vmax.f32 %v211_v39, 0.0  ;;  %v144_v51 = vmul.f32 %v381_v1, %v73_v35  ;;  %337 = vst.msk [vmem:[%s964_s3 + $0x1a0] sm:$0xff] %vm284_vm0, %v272_v43  ;;  %v212_v52 = vadd.f32 %v386_v2, %v141_v46  ;;  %v145_v53 = vmul.f32 %v381_v1, %v74_v40 }
  0x31   :  { %338 = vst.msk [vmem:[%s964_s3 + $0x1a8] sm:$0xff] %vm284_vm0, %v273_v44  ;;  %339 = vst.msk [vmem:[%s964_s3 + $0x1b0] sm:$0xff] %vm284_vm0, %v274_v45  ;;  %v146_v54 = vmul.f32 %v381_v1, %v75_v41  ;;  %v147_v55 = vmul.f32 %v381_v1, %v76_v42  ;;  %v213_v56 = vadd.f32 %v386_v2, %v142_v49 }
  0x32   :  { %340 = vst.msk [vmem:[%s964_s3 + $0x1b8] sm:$0xff] %vm284_vm0, %v275_v48  ;;  %v214_v57 = vadd.f32 %v386_v2, %v143_v50  ;;  %v215_v58 = vadd.f32 %v386_v2, %v144_v51  ;;  %v148_v59 = vmul.f32 %v381_v1, %v77_v47  ;;  %v276_v60 = vmax.f32 %v212_v52, 0.0 }
  0x33   :  { %v216_v61 = vadd.f32 %v386_v2, %v145_v53  ;;  %v217_v62 = vadd.f32 %v386_v2, %v146_v54  ;;  %v218_v63 = vadd.f32 %v386_v2, %v147_v55  ;;  %v277_v0 = vmax.f32 %v213_v56, 0.0 }
  0x34   :  { %v278_v3 = vmax.f32 %v214_v57, 0.0  ;;  %v279_v4 = vmax.f32 %v215_v58, 0.0  ;;  %v219_v5 = vadd.f32 %v386_v2, %v148_v59  ;;  %341 = vst.msk [vmem:[%s964_s3 + $0x1c0] sm:$0xff] %vm284_vm0, %v276_v60 }
  0x35   :  { %v280_v6 = vmax.f32 %v216_v61, 0.0  ;;  %v281_v7 = vmax.f32 %v217_v62, 0.0  ;;  %v282_v1 = vmax.f32 %v218_v63, 0.0  ;;  %342 = vst.msk [vmem:[%s964_s3 + $0x1c8] sm:$0xff] %vm284_vm0, %v277_v0 }
  0x36   :  { %343 = vst.msk [vmem:[%s964_s3 + $0x1d0] sm:$0xff] %vm284_vm0, %v278_v3  ;;  %344 = vst.msk [vmem:[%s964_s3 + $0x1d8] sm:$0xff] %vm284_vm0, %v279_v4  ;;  %v283_v2 = vmax.f32 %v219_v5, 0.0 }
  0x37   :  { %345 = vst.msk [vmem:[%s964_s3 + $0x1e0] sm:$0xff] %vm284_vm0, %v280_v6  ;;  %346 = vst.msk [vmem:[%s964_s3 + $0x1e8] sm:$0xff] %vm284_vm0, %v281_v7 }
  0x38   :  { %347 = vst.msk [vmem:[%s964_s3 + $0x1f0] sm:$0xff] %vm284_vm0, %v282_v1  ;;  %348 = vst.msk [vmem:[%s964_s3 + $0x1f8] sm:$0xff] %vm284_vm0, %v283_v2 }

// kernel: _lambda_.22
= control target key start
LH: loop header
LB: loop body
LE: loop exit
PB: predicated region body
PF: predicated region fallthrough
CT: control target
= control target key end

     0   :  { %s996_s12 = smov 0   ;;  %s998_s13 = smov 0   ;;  %s1281_s0 = inlined_call_operand.vmem [shape: f32[592,128], index: 0, kind: input, shape index: {}]   ;;  %s1282_s1 = inlined_call_operand.vmem [shape: f32[128,128], index: 1, kind: input, shape index: {}]   ;;  %s1283_s2 = inlined_call_operand.vmem [shape: f32[1,128], index: 2, kind: input, shape index: {}]   ;;  %s1284_s3 = inlined_call_operand.vmem [shape: f32[592,128], index: 3, kind: output, shape index: {}]  }
   0x1   :  { %s1000_s14 = smov 0  }
   0x2 LB: > { %s22_s15 = sadd.s32 1, %s967_s13  ;;  %p680_p0 = scmp.ge.s32.totalorder %s971_s14, 1  ;;  %s971_s14 = sphi %s1000_s14, %s13_s14   ;;  %s967_s13 = sphi %s998_s13, %s1286_s13   ;;  %s963_s12 = sphi %s996_s12, %s1285_s12  }
   0x3   : > { %p23_p1 = scmp.ge.s32.totalorder %s22_s15, 2  ;;  %p169_p2 = scmp.lt.s32.totalorder %s971_s14, 3 }
   0x5   : > { %s1288_s15 = smov (%p23_p1, %s22_s15), 0  ;;  %p170_p3 = pnand %p680_p0, %p169_p2 }
   0x6   : > { %v262_v0 = vld [vmem:[%s1282_s1] sm:$0xff] (!%p170_p3)  ;;  %v263_v1 = vld [vmem:[%s1282_s1 + $0x8] sm:$0xff] (!%p170_p3)  ;;  %v264_v2 = vld [vmem:[%s1282_s1 + $0x10] sm:$0xff] (!%p170_p3)  ;;  %v973_v3 = vmov (!%p170_p3), 0.0|0.0   ;;  %vm974_vm0 = vmmov (!%p170_p3), 0   ;;  %v975_v6 = vmov (!%p170_p3), 0.0  }
   0x7   : > { %173 = sbr.rel (%p170_p3) target bundleno = 327 (0x147), region = 32  ;;  %882 = vmatprep.subr.bf16.mxu0 (!%p170_p3), %v973_v3  ;;  %v883_v4 = vpack.c.bf16 (!%p170_p3), %v263_v1, %v262_v0  ;;  %906 = vmatprep.subr.bf16.mxu1 (!%p170_p3), %v973_v3  ;;  %v265_v5 = vld [vmem:[%s1282_s1 + $0x18] sm:$0xff] (!%p170_p3)  ;;  %v266_v8 = vld [vmem:[%s1282_s1 + $0x20] sm:$0xff] (!%p170_p3)  ;;  %v267_v9 = vld [vmem:[%s1282_s1 + $0x28] sm:$0xff] (!%p170_p3) }
   0x8   : > { %771 = vmatprep.mubr.msk.f32.mxu0 (!%p170_p3), %vm974_vm0, %v975_v6  ;;  %828 = vmatprep.mubr.msk.f32.mxu1 (!%p170_p3), %vm974_vm0, %v975_v6  ;;  %v886_v7 = vpack.c.bf16 (!%p170_p3), %v265_v5, %v264_v2  ;;  %v889_v10 = vpack.c.bf16 (!%p170_p3), %v267_v9, %v266_v8  ;;  %v268_v11 = vld [vmem:[%s1282_s1 + $0x30] sm:$0xff] (!%p170_p3)  ;;  %v269_v12 = vld [vmem:[%s1282_s1 + $0x38] sm:$0xff] (!%p170_p3)  ;;  %v270_v14 = vld [vmem:[%s1282_s1 + $0x40] sm:$0xff] (!%p170_p3)  ;;  %s203_s9 = smul.u32 (!%p170_p3), 37, %s963_s12 }
   0x9   : > { %884 = vmatpush3.bf16.msra.mxu0 (!%p170_p3), %v883_v4  ;;  %914 = vmatpush3.bf16.msra.mxu1 (!%p170_p3), %v883_v4  ;;  %v892_v13 = vpack.c.bf16 (!%p170_p3), %v269_v12, %v268_v11  ;;  %v271_v15 = vld [vmem:[%s1282_s1 + $0x48] sm:$0xff] (!%p170_p3)  ;;  %v272_v17 = vld [vmem:[%s1282_s1 + $0x50] sm:$0xff] (!%p170_p3)  ;;  %v273_v18 = vld [vmem:[%s1282_s1 + $0x58] sm:$0xff] (!%p170_p3) }
   0xa   : > { %885 = vmatprep.subr.bf16.mxu0 (!%p170_p3), %v973_v3  ;;  %907 = vmatprep.subr.bf16.mxu1 (!%p170_p3), %v973_v3  ;;  %v895_v16 = vpack.c.bf16 (!%p170_p3), %v271_v15, %v270_v14  ;;  %p204_p4 = scmp.lt.s32.totalorder (!%p170_p3), %s203_s9, 73  ;;  %v898_v19 = vpack.c.bf16 (!%p170_p3), %v273_v18, %v272_v17  ;;  %v274_v20 = vld [vmem:[%s1282_s1 + $0x60] sm:$0xff] (!%p170_p3)  ;;  %v275_v21 = vld [vmem:[%s1282_s1 + $0x68] sm:$0xff] (!%p170_p3)  ;;  %v276_v23 = vld [vmem:[%s1282_s1 + $0x70] sm:$0xff] (!%p170_p3) }
   0xb   : > { %v901_v22 = vpack.c.bf16 (!%p170_p3), %v275_v21, %v274_v20  ;;  %v277_v24 = vld [vmem:[%s1282_s1 + $0x78] sm:$0xff] (!%p170_p3)  ;;  %v1189_v63 = vld [vmem:[%s1283_s2] ss:$0 sm:$0xff] (!%p170_p3) }
   0xc   : > { %v904_v25 = vpack.c.bf16 (!%p170_p3), %v277_v24, %v276_v23 }
   0xd   : > { %887 = vmatpush3.bf16.msra.mxu0 (!%p170_p3), %v886_v7  ;;  %915 = vmatpush3.bf16.msra.mxu1 (!%p170_p3), %v886_v7 }
   0xe   : > { %888 = vmatprep.subr.bf16.mxu0 %v973_v3  ;;  %908 = vmatprep.subr.bf16.mxu1 %v973_v3  ;;  %s1290_s9 = smov (!%p204_p4, %s203_s9), 73 }
   0xf   : > { %s681_s25 = sshll.u32 %s1290_s9, 3 }
  0x10   : > { %s1077_s28 = scalar_lea.vmem %s1281_s0, %s681_s25  ;;  %s1196_s6 = scalar_lea.vmem %s1284_s3, %s681_s25 }
  0x11   : > { %890 = vmatpush3.bf16.msra.mxu0 %v889_v10  ;;  %916 = vmatpush3.bf16.msra.mxu1 %v889_v10  ;;  %v225_v26 = vld [vmem:[%s1077_s28] sm:$0xff]  ;;  %v244_v27 = vld [vmem:[%s1077_s28 + $0x98] sm:$0xff]  ;;  %v226_v28 = vld [vmem:[%s1077_s28 + $0x8] sm:$0xff] }
  0x12   : > { %891 = vmatprep.subr.bf16.mxu0 %v973_v3  ;;  %909 = vmatprep.subr.bf16.mxu1 %v973_v3  ;;  %v245_v29 = vld [vmem:[%s1077_s28 + $0xa0] sm:$0xff]  ;;  %v227_v30 = vld [vmem:[%s1077_s28 + $0x10] sm:$0xff]  ;;  %v246_v31 = vld [vmem:[%s1077_s28 + $0xa8] sm:$0xff] }
  0x13   : > { %v228_v32 = vld [vmem:[%s1077_s28 + $0x18] sm:$0xff]  ;;  %v247_v33 = vld [vmem:[%s1077_s28 + $0xb0] sm:$0xff]  ;;  %v229_v34 = vld [vmem:[%s1077_s28 + $0x20] sm:$0xff] }
  0x14   : > { %v248_v35 = vld [vmem:[%s1077_s28 + $0xb8] sm:$0xff]  ;;  %v230_v36 = vld [vmem:[%s1077_s28 + $0x28] sm:$0xff]  ;;  %v249_v37 = vld [vmem:[%s1077_s28 + $0xc0] sm:$0xff] }
  0x15   : > { %893 = vmatpush3.bf16.msra.mxu0 %v892_v13  ;;  %917 = vmatpush3.bf16.msra.mxu1 %v892_v13  ;;  %v231_v38 = vld [vmem:[%s1077_s28 + $0x30] sm:$0xff]  ;;  %v250_v39 = vld [vmem:[%s1077_s28 + $0xc8] sm:$0xff]  ;;  %v232_v40 = vld [vmem:[%s1077_s28 + $0x38] sm:$0xff] }
  0x16   : > { %894 = vmatprep.subr.bf16.mxu0 %v973_v3  ;;  %910 = vmatprep.subr.bf16.mxu1 %v973_v3  ;;  %v251_v41 = vld [vmem:[%s1077_s28 + $0xd0] sm:$0xff]  ;;  %v233_v42 = vld [vmem:[%s1077_s28 + $0x40] sm:$0xff]  ;;  %v252_v43 = vld [vmem:[%s1077_s28 + $0xd8] sm:$0xff] }
  0x17   : > { %v234_v44 = vld [vmem:[%s1077_s28 + $0x48] sm:$0xff]  ;;  %v253_v45 = vld [vmem:[%s1077_s28 + $0xe0] sm:$0xff]  ;;  %v235_v46 = vld [vmem:[%s1077_s28 + $0x50] sm:$0xff] }
  0x18   : > { %v254_v47 = vld [vmem:[%s1077_s28 + $0xe8] sm:$0xff]  ;;  %v236_v48 = vld [vmem:[%s1077_s28 + $0x58] sm:$0xff]  ;;  %v255_v49 = vld [vmem:[%s1077_s28 + $0xf0] sm:$0xff] }
  0x19   : > { %896 = vmatpush3.bf16.msra.mxu0 %v895_v16  ;;  %918 = vmatpush3.bf16.msra.mxu1 %v895_v16  ;;  %v237_v50 = vld [vmem:[%s1077_s28 + $0x60] sm:$0xff]  ;;  %v256_v51 = vld [vmem:[%s1077_s28 + $0xf8] sm:$0xff]  ;;  %v238_v52 = vld [vmem:[%s1077_s28 + $0x68] sm:$0xff] }
  0x1a   : > { %897 = vmatprep.subr.bf16.mxu0 %v973_v3  ;;  %911 = vmatprep.subr.bf16.mxu1 %v973_v3  ;;  %v257_v53 = vld [vmem:[%s1077_s28 + $0x100] sm:$0xff]  ;;  %v239_v54 = vld [vmem:[%s1077_s28 + $0x70] sm:$0xff]  ;;  %v258_v55 = vld [vmem:[%s1077_s28 + $0x108] sm:$0xff] }
  0x1b   : > { %v240_v56 = vld [vmem:[%s1077_s28 + $0x78] sm:$0xff]  ;;  %v259_v57 = vld [vmem:[%s1077_s28 + $0x110] sm:$0xff]  ;;  %v241_v58 = vld [vmem:[%s1077_s28 + $0x80] sm:$0xff] }
  0x1c   : > { %v260_v59 = vld [vmem:[%s1077_s28 + $0x118] sm:$0xff]  ;;  %v242_v60 = vld [vmem:[%s1077_s28 + $0x88] sm:$0xff]  ;;  %v261_v61 = vld [vmem:[%s1077_s28 + $0x120] sm:$0xff] }
  0x1d   : > { %899 = vmatpush3.bf16.msra.mxu0 %v898_v19  ;;  %919 = vmatpush3.bf16.msra.mxu1 %v898_v19  ;;  %v243_v62 = vld [vmem:[%s1077_s28 + $0x90] sm:$0xff] }
  0x1e   : > { %900 = vmatprep.subr.bf16.mxu0 %v973_v3  ;;  %912 = vmatprep.subr.bf16.mxu1 %v973_v3 }
  0x21   : > { %902 = vmatpush3.bf16.msra.mxu0 %v901_v22  ;;  %920 = vmatpush3.bf16.msra.mxu1 %v901_v22 }
  0x22   : > { %903 = vmatprep.subr.bf16.mxu0 %v973_v3  ;;  %913 = vmatprep.subr.bf16.mxu1 %v973_v3 }
  0x25   : > { %905 = vmatpush3.bf16.msra.mxu0 %v904_v25  ;;  %921 = vmatpush3.bf16.msra.mxu1 %v904_v25 }
  0x28   : > { %772 = vmatmul.mubr.f32.vlgmr.msra.gmra.mrb[0].mxu0 %v225_v26  ;;  %829 = vmatmul.mubr.f32.vlgmr.msra.gmra.mrb[0].mxu1 %v244_v27 }
  0x29   : > { %774 = vmatprep.mubr.msk.f32.mxu0 %vm974_vm0, %v975_v6  ;;  %831 = vmatprep.mubr.msk.f32.mxu1 %vm974_vm0, %v975_v6 }
  0x2c   : > { %775 = vmatmul.mubr.f32.gmra.mrb[2].mxu0 %v226_v28  ;;  %832 = vmatmul.mubr.f32.gmra.mrb[2].mxu1 %v245_v29 }
  0x2d   : > { %777 = vmatprep.mubr.msk.f32.mxu0 %vm974_vm0, %v975_v6  ;;  %834 = vmatprep.mubr.msk.f32.mxu1 %vm974_vm0, %v975_v6 }
  0x30   : > { %778 = vmatmul.mubr.f32.gmra.mrb[4].mxu0 %v227_v30  ;;  %835 = vmatmul.mubr.f32.gmra.mrb[4].mxu1 %v246_v31 }
  0x31   : > { %780 = vmatprep.mubr.msk.f32.mxu0 %vm974_vm0, %v975_v6  ;;  %837 = vmatprep.mubr.msk.f32.mxu1 %vm974_vm0, %v975_v6 }
  0x34   : > { %781 = vmatmul.mubr.f32.gmra.mrb[6].mxu0 %v228_v32  ;;  %838 = vmatmul.mubr.f32.gmra.mrb[6].mxu1 %v247_v33 }
  0x35   : > { %783 = vmatprep.mubr.msk.f32.mxu0 %vm974_vm0, %v975_v6  ;;  %840 = vmatprep.mubr.msk.f32.mxu1 %vm974_vm0, %v975_v6 }
  0x38   : > { %784 = vmatmul.mubr.f32.gmra.mrb[8].mxu0 %v229_v34  ;;  %841 = vmatmul.mubr.f32.gmra.mrb[8].mxu1 %v248_v35 }
  0x39   : > { %786 = vmatprep.mubr.msk.f32.mxu0 %vm974_vm0, %v975_v6  ;;  %843 = vmatprep.mubr.msk.f32.mxu1 %vm974_vm0, %v975_v6 }
  0x3c   : > { %787 = vmatmul.mubr.f32.gmra.mrb[10].mxu0 %v230_v36  ;;  %844 = vmatmul.mubr.f32.gmra.mrb[10].mxu1 %v249_v37 }
  0x3d   : > { %789 = vmatprep.mubr.msk.f32.mxu0 %vm974_vm0, %v975_v6  ;;  %846 = vmatprep.mubr.msk.f32.mxu1 %vm974_vm0, %v975_v6 }
  0x40   : > { %790 = vmatmul.mubr.f32.gmra.mrb[12].mxu0 %v231_v38  ;;  %847 = vmatmul.mubr.f32.gmra.mrb[12].mxu1 %v250_v39 }
  0x41   : > { %792 = vmatprep.mubr.msk.f32.mxu0 %vm974_vm0, %v975_v6  ;;  %849 = vmatprep.mubr.msk.f32.mxu1 %vm974_vm0, %v975_v6 }
  0x44   : > { %793 = vmatmul.mubr.f32.gmra.mrb[14].mxu0 %v232_v40  ;;  %850 = vmatmul.mubr.f32.gmra.mrb[14].mxu1 %v251_v41 }
  0x45   : > { %795 = vmatprep.mubr.msk.f32.mxu0 %vm974_vm0, %v975_v6  ;;  %852 = vmatprep.mubr.msk.f32.mxu1 %vm974_vm0, %v975_v6 }
  0x48   : > { %796 = vmatmul.mubr.f32.gmra.mrb[16].mxu0 %v233_v42  ;;  %853 = vmatmul.mubr.f32.gmra.mrb[16].mxu1 %v252_v43 }
  0x49   : > { %798 = vmatprep.mubr.msk.f32.mxu0 %vm974_vm0, %v975_v6  ;;  %855 = vmatprep.mubr.msk.f32.mxu1 %vm974_vm0, %v975_v6 }
  0x4c   : > { %799 = vmatmul.mubr.f32.gmra.mrb[18].mxu0 %v234_v44  ;;  %856 = vmatmul.mubr.f32.gmra.mrb[18].mxu1 %v253_v45 }
  0x4d   : > { %801 = vmatprep.mubr.msk.f32.mxu0 %vm974_vm0, %v975_v6  ;;  %858 = vmatprep.mubr.msk.f32.mxu1 %vm974_vm0, %v975_v6 }
  0x50   : > { %802 = vmatmul.mubr.f32.gmra.mrb[20].mxu0 %v235_v46  ;;  %859 = vmatmul.mubr.f32.gmra.mrb[20].mxu1 %v254_v47 }
  0x51   : > { %804 = vmatprep.mubr.msk.f32.mxu0 %vm974_vm0, %v975_v6  ;;  %861 = vmatprep.mubr.msk.f32.mxu1 %vm974_vm0, %v975_v6 }
  0x54   : > { %805 = vmatmul.mubr.f32.gmra.mrb[22].mxu0 %v236_v48  ;;  %862 = vmatmul.mubr.f32.gmra.mrb[22].mxu1 %v255_v49 }
  0x55   : > { %807 = vmatprep.mubr.msk.f32.mxu0 %vm974_vm0, %v975_v6  ;;  %864 = vmatprep.mubr.msk.f32.mxu1 %vm974_vm0, %v975_v6 }
  0x58   : > { %808 = vmatmul.mubr.f32.gmra.mrb[24].mxu0 %v237_v50  ;;  %865 = vmatmul.mubr.f32.gmra.mrb[24].mxu1 %v256_v51 }
  0x59   : > { %810 = vmatprep.mubr.msk.f32.mxu0 %vm974_vm0, %v975_v6  ;;  %867 = vmatprep.mubr.msk.f32.mxu1 %vm974_vm0, %v975_v6 }
  0x5c   : > { %811 = vmatmul.mubr.f32.gmra.mrb[26].mxu0 %v238_v52  ;;  %868 = vmatmul.mubr.f32.gmra.mrb[26].mxu1 %v257_v53 }
  0x5d   : > { %813 = vmatprep.mubr.msk.f32.mxu0 %vm974_vm0, %v975_v6  ;;  %870 = vmatprep.mubr.msk.f32.mxu1 %vm974_vm0, %v975_v6 }
  0x60   : > { %814 = vmatmul.mubr.f32.gmra.mrb[28].mxu0 %v239_v54  ;;  %871 = vmatmul.mubr.f32.gmra.mrb[28].mxu1 %v258_v55 }
  0x61   : > { %816 = vmatprep.mubr.msk.f32.mxu0 %vm974_vm0, %v975_v6  ;;  %873 = vmatprep.mubr.msk.f32.mxu1 %vm974_vm0, %v975_v6 }
  0x64   : > { %817 = vmatmul.mubr.f32.gmra.mrb[30].mxu0 %v240_v56  ;;  %874 = vmatmul.mubr.f32.gmra.mrb[30].mxu1 %v259_v57 }
  0x65   : > { %819 = vmatprep.mubr.msk.f32.mxu0 %vm974_vm0, %v975_v6  ;;  %876 = vmatprep.mubr.msk.f32.mxu1 %vm974_vm0, %v975_v6 }
  0x68   : > { %820 = vmatmul.mubr.f32.gmra.mrb[32].mxu0 %v241_v58  ;;  %877 = vmatmul.mubr.f32.gmra.mrb[32].mxu1 %v260_v59 }
  0x69   : > { %822 = vmatprep.mubr.msk.f32.mxu0 %vm974_vm0, %v975_v6  ;;  %879 = vmatprep.mubr.msk.f32.mxu1 %vm974_vm0, %v975_v6 }
  0x6c   : > { %823 = vmatmul.mubr.f32.gmra.mrb[34].mxu0 %v242_v60  ;;  %880 = vmatmul.mubr.f32.gmra.mrb[34].mxu1 %v261_v61 }
  0x6d   : > { %825 = vmatprep.mubr.msk.f32.mxu0 %vm974_vm0, %v975_v6 }
  0x70   : > { %826 = vmatmul.mubr.f32.gmra.mrb[36].mxu0 %v243_v62 }
  0xfb   : > { %v351_v0 = vpop.f32.mrb[0].mxu0  ;;  %v446_v1 = vpop.f32.mrb[0].mxu1 }
  0xfc   : > { %v352_v2 = vadd.f32 %v1189_v63, %v351_v0  ;;  %v773_v3 = vpop.f32.mrb[1].mxu0  ;;  %v447_v4 = vadd.f32 %v1189_v63, %v446_v1  ;;  %v830_v5 = vpop.f32.mrb[1].mxu1 }
  0xfe   : > { %535 = vst [vmem:[%s1196_s6] sm:$0xff] %v352_v2  ;;  %554 = vst [vmem:[%s1196_s6 + $0x98] sm:$0xff] %v447_v4 }
  0xff   : > { %v356_v6 = vpop.f32.mrb[2].mxu0  ;;  %v451_v7 = vpop.f32.mrb[2].mxu1 }
 0x100   : > { %v357_v8 = vadd.f32 %v1189_v63, %v356_v6  ;;  %v776_v9 = vpop.f32.mrb[3].mxu0  ;;  %v452_v10 = vadd.f32 %v1189_v63, %v451_v7  ;;  %v833_v11 = vpop.f32.mrb[3].mxu1 }
 0x102   : > { %536 = vst [vmem:[%s1196_s6 + $0x8] sm:$0xff] %v357_v8  ;;  %555 = vst [vmem:[%s1196_s6 + $0xa0] sm:$0xff] %v452_v10 }
 0x103   : > { %v361_v12 = vpop.f32.mrb[4].mxu0  ;;  %v456_v13 = vpop.f32.mrb[4].mxu1 }
 0x104   : > { %v362_v14 = vadd.f32 %v1189_v63, %v361_v12  ;;  %v779_v15 = vpop.f32.mrb[5].mxu0  ;;  %v457_v16 = vadd.f32 %v1189_v63, %v456_v13  ;;  %v836_v17 = vpop.f32.mrb[5].mxu1 }
 0x106   : > { %537 = vst [vmem:[%s1196_s6 + $0x10] sm:$0xff] %v362_v14  ;;  %556 = vst [vmem:[%s1196_s6 + $0xa8] sm:$0xff] %v457_v16 }
 0x107   : > { %v366_v18 = vpop.f32.mrb[6].mxu0  ;;  %v461_v19 = vpop.f32.mrb[6].mxu1 }
 0x108   : > { %v367_v20 = vadd.f32 %v1189_v63, %v366_v18  ;;  %v782_v21 = vpop.f32.mrb[7].mxu0  ;;  %v462_v22 = vadd.f32 %v1189_v63, %v461_v19  ;;  %v839_v23 = vpop.f32.mrb[7].mxu1 }
 0x10a   : > { %538 = vst [vmem:[%s1196_s6 + $0x18] sm:$0xff] %v367_v20  ;;  %557 = vst [vmem:[%s1196_s6 + $0xb0] sm:$0xff] %v462_v22 }
 0x10b   : > { %v371_v24 = vpop.f32.mrb[8].mxu0  ;;  %v466_v25 = vpop.f32.mrb[8].mxu1 }
 0x10c   : > { %v372_v26 = vadd.f32 %v1189_v63, %v371_v24  ;;  %v785_v27 = vpop.f32.mrb[9].mxu0  ;;  %v467_v28 = vadd.f32 %v1189_v63, %v466_v25  ;;  %v842_v29 = vpop.f32.mrb[9].mxu1 }
 0x10e   : > { %539 = vst [vmem:[%s1196_s6 + $0x20] sm:$0xff] %v372_v26  ;;  %558 = vst [vmem:[%s1196_s6 + $0xb8] sm:$0xff] %v467_v28 }
 0x10f   : > { %v376_v30 = vpop.f32.mrb[10].mxu0  ;;  %v471_v31 = vpop.f32.mrb[10].mxu1 }
 0x110   : > { %v377_v32 = vadd.f32 %v1189_v63, %v376_v30  ;;  %v788_v33 = vpop.f32.mrb[11].mxu0  ;;  %v472_v34 = vadd.f32 %v1189_v63, %v471_v31  ;;  %v845_v35 = vpop.f32.mrb[11].mxu1 }
 0x112   : > { %540 = vst [vmem:[%s1196_s6 + $0x28] sm:$0xff] %v377_v32  ;;  %559 = vst [vmem:[%s1196_s6 + $0xc0] sm:$0xff] %v472_v34 }
 0x113   : > { %v381_v36 = vpop.f32.mrb[12].mxu0  ;;  %v476_v37 = vpop.f32.mrb[12].mxu1 }
 0x114   : > { %v382_v38 = vadd.f32 %v1189_v63, %v381_v36  ;;  %v791_v39 = vpop.f32.mrb[13].mxu0  ;;  %v477_v40 = vadd.f32 %v1189_v63, %v476_v37  ;;  %v848_v41 = vpop.f32.mrb[13].mxu1 }
 0x116   : > { %541 = vst [vmem:[%s1196_s6 + $0x30] sm:$0xff] %v382_v38  ;;  %560 = vst [vmem:[%s1196_s6 + $0xc8] sm:$0xff] %v477_v40 }
 0x117   : > { %v386_v42 = vpop.f32.mrb[14].mxu0  ;;  %v481_v43 = vpop.f32.mrb[14].mxu1 }
 0x118   : > { %v387_v44 = vadd.f32 %v1189_v63, %v386_v42  ;;  %v794_v45 = vpop.f32.mrb[15].mxu0  ;;  %v482_v46 = vadd.f32 %v1189_v63, %v481_v43  ;;  %v851_v47 = vpop.f32.mrb[15].mxu1 }
 0x11a   : > { %542 = vst [vmem:[%s1196_s6 + $0x38] sm:$0xff] %v387_v44  ;;  %561 = vst [vmem:[%s1196_s6 + $0xd0] sm:$0xff] %v482_v46 }
 0x11b   : > { %v391_v48 = vpop.f32.mrb[16].mxu0  ;;  %v486_v49 = vpop.f32.mrb[16].mxu1 }
 0x11c   : > { %v392_v50 = vadd.f32 %v1189_v63, %v391_v48  ;;  %v797_v51 = vpop.f32.mrb[17].mxu0  ;;  %v487_v52 = vadd.f32 %v1189_v63, %v486_v49  ;;  %v854_v53 = vpop.f32.mrb[17].mxu1 }
 0x11e   : > { %543 = vst [vmem:[%s1196_s6 + $0x40] sm:$0xff] %v392_v50  ;;  %562 = vst [vmem:[%s1196_s6 + $0xd8] sm:$0xff] %v487_v52 }
 0x11f   : > { %v396_v54 = vpop.f32.mrb[18].mxu0  ;;  %v491_v55 = vpop.f32.mrb[18].mxu1 }
 0x120   : > { %v397_v56 = vadd.f32 %v1189_v63, %v396_v54  ;;  %v800_v57 = vpop.f32.mrb[19].mxu0  ;;  %v492_v58 = vadd.f32 %v1189_v63, %v491_v55  ;;  %v857_v59 = vpop.f32.mrb[19].mxu1 }
 0x122   : > { %544 = vst [vmem:[%s1196_s6 + $0x48] sm:$0xff] %v397_v56  ;;  %563 = vst [vmem:[%s1196_s6 + $0xe0] sm:$0xff] %v492_v58 }
 0x123   : > { %v401_v60 = vpop.f32.mrb[20].mxu0  ;;  %v496_v61 = vpop.f32.mrb[20].mxu1 }
 0x124   : > { %v402_v62 = vadd.f32 %v1189_v63, %v401_v60  ;;  %v803_v0 = vpop.f32.mrb[21].mxu0  ;;  %v497_v1 = vadd.f32 %v1189_v63, %v496_v61  ;;  %v860_v2 = vpop.f32.mrb[21].mxu1 }
 0x126   : > { %545 = vst [vmem:[%s1196_s6 + $0x50] sm:$0xff] %v402_v62  ;;  %564 = vst [vmem:[%s1196_s6 + $0xe8] sm:$0xff] %v497_v1 }
 0x127   : > { %v406_v3 = vpop.f32.mrb[22].mxu0  ;;  %v501_v4 = vpop.f32.mrb[22].mxu1 }
 0x128   : > { %v407_v5 = vadd.f32 %v1189_v63, %v406_v3  ;;  %v806_v6 = vpop.f32.mrb[23].mxu0  ;;  %v502_v7 = vadd.f32 %v1189_v63, %v501_v4  ;;  %v863_v8 = vpop.f32.mrb[23].mxu1 }
 0x12a   : > { %546 = vst [vmem:[%s1196_s6 + $0x58] sm:$0xff] %v407_v5  ;;  %565 = vst [vmem:[%s1196_s6 + $0xf0] sm:$0xff] %v502_v7 }
 0x12b   : > { %v411_v9 = vpop.f32.mrb[24].mxu0  ;;  %v506_v10 = vpop.f32.mrb[24].mxu1 }
 0x12c   : > { %v412_v11 = vadd.f32 %v1189_v63, %v411_v9  ;;  %v809_v12 = vpop.f32.mrb[25].mxu0  ;;  %v507_v13 = vadd.f32 %v1189_v63, %v506_v10  ;;  %v866_v14 = vpop.f32.mrb[25].mxu1 }
 0x12e   : > { %547 = vst [vmem:[%s1196_s6 + $0x60] sm:$0xff] %v412_v11  ;;  %566 = vst [vmem:[%s1196_s6 + $0xf8] sm:$0xff] %v507_v13 }
 0x12f   : > { %v416_v15 = vpop.f32.mrb[26].mxu0  ;;  %v511_v16 = vpop.f32.mrb[26].mxu1 }
 0x130   : > { %v417_v17 = vadd.f32 %v1189_v63, %v416_v15  ;;  %v812_v18 = vpop.f32.mrb[27].mxu0  ;;  %v512_v19 = vadd.f32 %v1189_v63, %v511_v16  ;;  %v869_v20 = vpop.f32.mrb[27].mxu1 }
 0x132   : > { %548 = vst [vmem:[%s1196_s6 + $0x68] sm:$0xff] %v417_v17  ;;  %567 = vst [vmem:[%s1196_s6 + $0x100] sm:$0xff] %v512_v19 }
 0x133   : > { %v421_v21 = vpop.f32.mrb[28].mxu0  ;;  %v516_v22 = vpop.f32.mrb[28].mxu1 }
 0x134   : > { %v422_v23 = vadd.f32 %v1189_v63, %v421_v21  ;;  %v815_v24 = vpop.f32.mrb[29].mxu0  ;;  %v517_v25 = vadd.f32 %v1189_v63, %v516_v22  ;;  %v872_v26 = vpop.f32.mrb[29].mxu1 }
 0x136   : > { %549 = vst [vmem:[%s1196_s6 + $0x70] sm:$0xff] %v422_v23  ;;  %568 = vst [vmem:[%s1196_s6 + $0x108] sm:$0xff] %v517_v25 }
 0x137   : > { %v426_v27 = vpop.f32.mrb[30].mxu0  ;;  %v521_v28 = vpop.f32.mrb[30].mxu1 }
 0x138   : > { %v427_v29 = vadd.f32 %v1189_v63, %v426_v27  ;;  %v818_v30 = vpop.f32.mrb[31].mxu0  ;;  %v522_v31 = vadd.f32 %v1189_v63, %v521_v28  ;;  %v875_v32 = vpop.f32.mrb[31].mxu1 }
 0x13a   : > { %550 = vst [vmem:[%s1196_s6 + $0x78] sm:$0xff] %v427_v29  ;;  %569 = vst [vmem:[%s1196_s6 + $0x110] sm:$0xff] %v522_v31 }
 0x13b   : > { %v431_v33 = vpop.f32.mrb[32].mxu0  ;;  %v526_v34 = vpop.f32.mrb[32].mxu1 }
 0x13c   : > { %v432_v35 = vadd.f32 %v1189_v63, %v431_v33  ;;  %v821_v36 = vpop.f32.mrb[33].mxu0  ;;  %v527_v37 = vadd.f32 %v1189_v63, %v526_v34  ;;  %v878_v38 = vpop.f32.mrb[33].mxu1 }
 0x13e   : > { %551 = vst [vmem:[%s1196_s6 + $0x80] sm:$0xff] %v432_v35  ;;  %570 = vst [vmem:[%s1196_s6 + $0x118] sm:$0xff] %v527_v37 }
 0x13f   : > { %v436_v39 = vpop.f32.mrb[34].mxu0  ;;  %v531_v40 = vpop.f32.mrb[34].mxu1 }
 0x140   : > { %v437_v41 = vadd.f32 %v1189_v63, %v436_v39  ;;  %v824_v42 = vpop.f32.mrb[35].mxu0  ;;  %v532_v43 = vadd.f32 %v1189_v63, %v531_v40  ;;  %v881_v44 = vpop.f32.mrb[35].mxu1 }
 0x142   : > { %552 = vst [vmem:[%s1196_s6 + $0x88] sm:$0xff] %v437_v41  ;;  %571 = vst [vmem:[%s1196_s6 + $0x120] sm:$0xff] %v532_v43 }
 0x143   : > { %v441_v45 = vpop.f32.mrb[36].mxu0 }
 0x144   : > { %v442_v46 = vadd.f32 %v1189_v63, %v441_v45  ;;  %v827_v47 = vpop.f32.mrb[37].mxu0 }
 0x146   : > { %553 = vst [vmem:[%s1196_s6 + $0x90] sm:$0xff] %v442_v46 }
 0x147 PF: > { %s13_s14 = sadd.s32 1, %s971_s14   ;;  %s1285_s12 = smov %s967_s13 }
 0x148   : > { %p10_p5 = scmp.ge.s32.totalorder %s13_s14, 4   ;;  %s1286_s13 = smov %s1288_s15 }
 0x14a   :  { %12 = sbr.rel (!%p10_p5) target bundleno = 2 (0x2), region = 68 }

// kernel: _lambda_.23
= control target key start
LH: loop header
LB: loop body
LE: loop exit
PB: predicated region body
PF: predicated region fallthrough
CT: control target
= control target key end

     0   :  { %s614_s9 = smov 0   ;;  %s1132_s0 = inlined_call_operand.vmem [shape: f32[2048,8], index: 0, kind: input, shape index: {}]   ;;  %s1133_s1 = inlined_call_operand.vmem [shape: f32[1,8], index: 1, kind: output, shape index: {0}]   ;;  %s1134_s2 = inlined_call_operand.vmem [shape: f32[1,8], index: 2, kind: output, shape index: {1}]  }
   0x1 LB: > { %s572_s10 = sadd.s32 4294967295, %s596_s9   ;;  %p575_p0 = scmp.ge.s32.totalorder %s596_s9, 1  ;;  %s596_s9 = sphi %s614_s9, %s13_s9  }
   0x2   : > { %p106_p1 = scmp.lt.s32.totalorder %s596_s9, 5 }
   0x4   : > { %p107_p2 = pnand %p575_p0, %p106_p1 }
   0x5   : > { %s576_s11 = sshll.u32 (!%p107_p2), %s572_s10, 6  ;;  %p578_p4 = scmp.ne.s32.totalorder (!%p107_p2), %s572_s10, 0 }
   0x6   : > { %110 = sbr.rel (%p107_p2) target bundleno = 184 (0xb8), region = 24  ;;  %p124_p3 = scmp.lt.s32.totalorder (!%p107_p2), %s576_s11, 255 }
   0xd   : > { %s1136_s11 = smov (!%p124_p3, %s576_s11), 255  ;;  %132 = sbr.rel (%p578_p4) target bundleno = 20 (0x14), region = 28 }
   0xe   : > { %s577_s12 = sshll.u32 %s1136_s11, 3  ;;  %vm133_vm0 = vcmask (!%p578_p4), 57344   ;;  %v598_v0 = vmov (!%p578_p4), 0.0  }
   0xf   : > { %s625_s15 = scalar_lea.vmem %s1132_s0, %s577_s12  ;;  %134 = vst.msk [vmem:[%s1133_s1] sm:$0x1] (!%p578_p4), %vm133_vm0, %v598_v0  ;;  %135 = vst.msk [vmem:[%s1134_s2] sm:$0x1] (!%p578_p4), %vm133_vm0, %v598_v0 }
  0x14 PF: > { %v136_v1 = vld [vmem:[%s625_s15] sm:$0xff]  ;;  %v137_v2 = vld [vmem:[%s625_s15 + $0x8] sm:$0xff]  ;;  %v138_v3 = vld [vmem:[%s625_s15 + $0x10] sm:$0xff]  ;;  %vm201_vm1 = vcmask 64512   ;;  %vm336_vm2 = vcmask 57344  }
  0x15   : > { %v202_v4 = vsel %vm201_vm1, %v136_v1, 0.0  ;;  %v203_v5 = vsel %vm201_vm1, %v137_v2, 0.0  ;;  %v205_v6 = vsel %vm201_vm1, %v138_v3, 0.0  ;;  %v139_v7 = vld [vmem:[%s625_s15 + $0x18] sm:$0xff]  ;;  %v140_v10 = vld [vmem:[%s625_s15 + $0x20] sm:$0xff]  ;;  %v141_v13 = vld [vmem:[%s625_s15 + $0x28] sm:$0xff]  ;;  %v339_v55 = vmul.f32 %v136_v1, %v136_v1 }
  0x16   : > { %v204_v8 = vadd.f32 %v203_v5, %v202_v4  ;;  %v207_v9 = vsel %vm201_vm1, %v139_v7, 0.0  ;;  %v209_v12 = vsel %vm201_vm1, %v140_v10, 0.0  ;;  %v211_v15 = vsel %vm201_vm1, %v141_v13, 0.0  ;;  %v646_v16 = vld [vmem:[%s625_s15 + $0x30] sm:$0xff]  ;;  %v651_v19 = vld [vmem:[%s625_s15 + $0x38] sm:$0xff]  ;;  %v656_v22 = vld [vmem:[%s625_s15 + $0x40] sm:$0xff] }
  0x17   : > { %v213_v18 = vsel %vm201_vm1, %v646_v16, 0.0  ;;  %v215_v21 = vsel %vm201_vm1, %v651_v19, 0.0  ;;  %v217_v24 = vsel %vm201_vm1, %v656_v22, 0.0  ;;  %v661_v25 = vld [vmem:[%s625_s15 + $0x48] sm:$0xff]  ;;  %v666_v28 = vld [vmem:[%s625_s15 + $0x50] sm:$0xff]  ;;  %v671_v31 = vld [vmem:[%s625_s15 + $0x58] sm:$0xff]  ;;  %v340_v58 = vmul.f32 %v137_v2, %v137_v2 }
  0x18   : > { %v206_v11 = vadd.f32 %v205_v6, %v204_v8  ;;  %v219_v27 = vsel %vm201_vm1, %v661_v25, 0.0  ;;  %v221_v30 = vsel %vm201_vm1, %v666_v28, 0.0  ;;  %v223_v33 = vsel %vm201_vm1, %v671_v31, 0.0  ;;  %v676_v34 = vld [vmem:[%s625_s15 + $0x60] sm:$0xff]  ;;  %v681_v37 = vld [vmem:[%s625_s15 + $0x68] sm:$0xff]  ;;  %v686_v40 = vld [vmem:[%s625_s15 + $0x70] sm:$0xff] }
  0x19   : > { %v225_v36 = vsel %vm201_vm1, %v676_v34, 0.0  ;;  %v227_v39 = vsel %vm201_vm1, %v681_v37, 0.0  ;;  %v229_v42 = vsel %vm201_vm1, %v686_v40, 0.0  ;;  %v691_v43 = vld [vmem:[%s625_s15 + $0x78] sm:$0xff]  ;;  %v696_v46 = vld [vmem:[%s625_s15 + $0x80] sm:$0xff]  ;;  %v701_v49 = vld [vmem:[%s625_s15 + $0x88] sm:$0xff]  ;;  %v341_v59 = vmul.f32 %v138_v3, %v138_v3 }
  0x1a   : > { %v208_v14 = vadd.f32 %v207_v9, %v206_v11  ;;  %v231_v45 = vsel %vm201_vm1, %v691_v43, 0.0  ;;  %v233_v48 = vsel %vm201_vm1, %v696_v46, 0.0  ;;  %v235_v51 = vsel %vm201_vm1, %v701_v49, 0.0  ;;  %v706_v52 = vld [vmem:[%s625_s15 + $0x90] sm:$0xff]  ;;  %v711_v56 = vld [vmem:[%s625_s15 + $0x98] sm:$0xff]  ;;  %v716_v61 = vld [vmem:[%s625_s15 + $0xa0] sm:$0xff] }
  0x1b   : > { %v237_v54 = vsel %vm201_vm1, %v706_v52, 0.0  ;;  %v239_v60 = vsel %vm201_vm1, %v711_v56, 0.0  ;;  %v342_v63 = vmul.f32 %v139_v7, %v139_v7  ;;  %v241_v0 = vsel %vm201_vm1, %v716_v61, 0.0  ;;  %v722_v1 = vld [vmem:[%s625_s15 + $0xa8] sm:$0xff]  ;;  %v729_v7 = vld [vmem:[%s625_s15 + $0xb0] sm:$0xff] }
  0x1c   : > { %v210_v17 = vadd.f32 %v209_v12, %v208_v14  ;;  %v403_v4 = vsel %vm201_vm1, %v339_v55, 0.0  ;;  %v343_v6 = vmul.f32 %v140_v10, %v140_v10  ;;  %v404_v2 = vsel %vm201_vm1, %v340_v58, 0.0 }
  0x1d   : > { %v406_v3 = vsel %vm201_vm1, %v341_v59, 0.0  ;;  %v243_v8 = vsel %vm201_vm1, %v722_v1, 0.0  ;;  %v405_v9 = vadd.f32 %v404_v2, %v403_v4  ;;  %v344_v12 = vmul.f32 %v141_v13, %v141_v13 }
  0x1e   : > { %v212_v20 = vadd.f32 %v211_v15, %v210_v17  ;;  %v408_v14 = vsel %vm201_vm1, %v342_v63, 0.0  ;;  %v245_v15 = vsel %vm201_vm1, %v729_v7, 0.0  ;;  %v735_v17 = vld [vmem:[%s625_s15 + $0xb8] sm:$0xff]  ;;  %v351_v63 = vmul.f32 %v676_v34, %v676_v34 }
  0x1f   : > { %v407_v10 = vadd.f32 %v406_v3, %v405_v9  ;;  %v352_v2 = vmul.f32 %v681_v37, %v681_v37  ;;  %v799_v9 = vld [vmem:[%s625_s15 + $0xf8] sm:$0xff] }
  0x20   : > { %v214_v23 = vadd.f32 %v213_v18, %v212_v20  ;;  %v345_v20 = vmul.f32 %v646_v16, %v646_v16 }
  0x21   : > { %v409_v13 = vadd.f32 %v408_v14, %v407_v10  ;;  %v426_v14 = vsel %vm201_vm1, %v351_v63, 0.0  ;;  %v807_v10 = vld [vmem:[%s625_s15 + $0x100] sm:$0xff]  ;;  %v360_v63 = vmul.f32 %v722_v1, %v722_v1 }
  0x22   : > { %v216_v26 = vadd.f32 %v215_v21, %v214_v23  ;;  %v410_v21 = vsel %vm201_vm1, %v343_v6, 0.0  ;;  %v247_v23 = vsel %vm201_vm1, %v735_v17, 0.0 }
  0x23   : > { %v411_v16 = vadd.f32 %v410_v21, %v409_v13  ;;  %v428_v21 = vsel %vm201_vm1, %v352_v2, 0.0  ;;  %v815_v13 = vld [vmem:[%s625_s15 + $0x108] sm:$0xff]  ;;  %v361_v2 = vmul.f32 %v729_v7, %v729_v7 }
  0x24   : > { %v218_v29 = vadd.f32 %v217_v24, %v216_v26  ;;  %v743_v24 = vld [vmem:[%s625_s15 + $0xc0] sm:$0xff] }
  0x26   : > { %v220_v32 = vadd.f32 %v219_v27, %v218_v29  ;;  %v346_v27 = vmul.f32 %v651_v19, %v651_v19  ;;  %v412_v29 = vsel %vm201_vm1, %v344_v12, 0.0  ;;  %v353_v12 = vmul.f32 %v686_v40, %v686_v40 }
  0x27   : > { %v413_v19 = vadd.f32 %v412_v29, %v411_v16  ;;  %v823_v16 = vld [vmem:[%s625_s15 + $0x110] sm:$0xff] }
  0x28   : > { %v222_v35 = vadd.f32 %v221_v30, %v220_v32  ;;  %v249_v30 = vsel %vm201_vm1, %v743_v24, 0.0  ;;  %v751_v32 = vld [vmem:[%s625_s15 + $0xc8] sm:$0xff]  ;;  %v430_v29 = vsel %vm201_vm1, %v353_v12, 0.0  ;;  %v362_v12 = vmul.f32 %v735_v17, %v735_v17 }
  0x2a   : > { %v224_v38 = vadd.f32 %v223_v33, %v222_v35  ;;  %v347_v35 = vmul.f32 %v656_v22, %v656_v22 }
  0x2c   : > { %v226_v41 = vadd.f32 %v225_v36, %v224_v38  ;;  %v414_v36 = vsel %vm201_vm1, %v345_v20, 0.0  ;;  %v251_v38 = vsel %vm201_vm1, %v751_v32, 0.0  ;;  %v354_v20 = vmul.f32 %v691_v43, %v691_v43 }
  0x2d   : > { %v415_v22 = vadd.f32 %v414_v36, %v413_v19  ;;  %v831_v19 = vld [vmem:[%s625_s15 + $0x118] sm:$0xff] }
  0x2e   : > { %v228_v44 = vadd.f32 %v227_v39, %v226_v41  ;;  %v759_v39 = vld [vmem:[%s625_s15 + $0xd0] sm:$0xff]  ;;  %v432_v36 = vsel %vm201_vm1, %v354_v20, 0.0  ;;  %v363_v20 = vmul.f32 %v743_v24, %v743_v24 }
  0x30   : > { %v230_v47 = vadd.f32 %v229_v42, %v228_v44  ;;  %v348_v42 = vmul.f32 %v661_v25, %v661_v25  ;;  %v416_v44 = vsel %vm201_vm1, %v346_v27, 0.0  ;;  %v355_v27 = vmul.f32 %v696_v46, %v696_v46 }
  0x31   : > { %v417_v25 = vadd.f32 %v416_v44, %v415_v22  ;;  %v839_v22 = vld [vmem:[%s625_s15 + $0x120] sm:$0xff] }
  0x32   : > { %v232_v50 = vadd.f32 %v231_v45, %v230_v47  ;;  %v253_v45 = vsel %vm201_vm1, %v759_v39, 0.0  ;;  %v767_v47 = vld [vmem:[%s625_s15 + $0xd8] sm:$0xff]  ;;  %v420_v58 = vsel %vm201_vm1, %v348_v42, 0.0  ;;  %v357_v42 = vmul.f32 %v706_v52, %v706_v52 }
  0x33   : > { %v434_v44 = vsel %vm201_vm1, %v355_v27, 0.0  ;;  %v364_v27 = vmul.f32 %v751_v32, %v751_v32 }
  0x34   : > { %v234_v53 = vadd.f32 %v233_v48, %v232_v50  ;;  %v349_v50 = vmul.f32 %v666_v28, %v666_v28 }
  0x36   : > { %v236_v57 = vadd.f32 %v235_v51, %v234_v53  ;;  %v418_v51 = vsel %vm201_vm1, %v347_v35, 0.0  ;;  %v255_v53 = vsel %vm201_vm1, %v767_v47, 0.0  ;;  %v356_v35 = vmul.f32 %v701_v49, %v701_v49 }
  0x37   : > { %v419_v28 = vadd.f32 %v418_v51, %v417_v25  ;;  %v847_v25 = vld [vmem:[%s625_s15 + $0x128] sm:$0xff] }
  0x38   : > { %v238_v62 = vadd.f32 %v237_v54, %v236_v57  ;;  %v775_v54 = vld [vmem:[%s625_s15 + $0xe0] sm:$0xff]  ;;  %v350_v57 = vmul.f32 %v671_v31, %v671_v31  ;;  %v436_v51 = vsel %vm201_vm1, %v356_v35, 0.0  ;;  %v365_v35 = vmul.f32 %v759_v39, %v759_v39 }
  0x39   : > { %v257_v59 = vsel %vm201_vm1, %v775_v54, 0.0  ;;  %v421_v31 = vadd.f32 %v420_v58, %v419_v28  ;;  %v438_v58 = vsel %vm201_vm1, %v357_v42, 0.0  ;;  %v855_v28 = vld [vmem:[%s625_s15 + $0x130] sm:$0xff]  ;;  %v366_v42 = vmul.f32 %v767_v47, %v767_v47 }
  0x3a   : > { %v240_v5 = vadd.f32 %v239_v60, %v238_v62  ;;  %v783_v60 = vld [vmem:[%s625_s15 + $0xe8] sm:$0xff]  ;;  %v424_v3 = vsel %vm201_vm1, %v350_v57, 0.0  ;;  %v359_v57 = vmul.f32 %v716_v61, %v716_v61 }
  0x3b   : > { %v259_v4 = vsel %vm201_vm1, %v783_v60, 0.0 }
  0x3c   : > { %v242_v11 = vadd.f32 %v241_v0, %v240_v5  ;;  %v422_v0 = vsel %vm201_vm1, %v349_v50, 0.0  ;;  %v791_v5 = vld [vmem:[%s625_s15 + $0xf0] sm:$0xff]  ;;  %v358_v50 = vmul.f32 %v711_v56, %v711_v56 }
  0x3d   : > { %v423_v34 = vadd.f32 %v422_v0, %v421_v31  ;;  %v863_v31 = vld [vmem:[%s625_s15 + $0x138] sm:$0xff] }
  0x3e   : > { %v244_v18 = vadd.f32 %v243_v8, %v242_v11  ;;  %v261_v8 = vsel %vm201_vm1, %v791_v5, 0.0  ;;  %v440_v0 = vsel %vm201_vm1, %v358_v50, 0.0  ;;  %v367_v50 = vmul.f32 %v775_v54, %v775_v54 }
  0x3f   : > { %v425_v37 = vadd.f32 %v424_v3, %v423_v34  ;;  %v442_v3 = vsel %vm201_vm1, %v359_v57, 0.0  ;;  %v871_v34 = vld [vmem:[%s625_s15 + $0x140] sm:$0xff]  ;;  %v368_v57 = vmul.f32 %v783_v60, %v783_v60 }
  0x40   : > { %v246_v26 = vadd.f32 %v245_v15, %v244_v18  ;;  %v263_v15 = vsel %vm201_vm1, %v799_v9, 0.0 }
  0x41   : > { %v427_v40 = vadd.f32 %v426_v14, %v425_v37  ;;  %v444_v14 = vsel %vm201_vm1, %v360_v63, 0.0  ;;  %v879_v37 = vld [vmem:[%s625_s15 + $0x148] sm:$0xff]  ;;  %v369_v63 = vmul.f32 %v791_v5, %v791_v5 }
  0x42   : > { %v248_v33 = vadd.f32 %v247_v23, %v246_v26  ;;  %v265_v23 = vsel %vm201_vm1, %v807_v10, 0.0 }
  0x43   : > { %v429_v43 = vadd.f32 %v428_v21, %v427_v40  ;;  %v446_v21 = vsel %vm201_vm1, %v361_v2, 0.0  ;;  %v887_v40 = vld [vmem:[%s625_s15 + $0x150] sm:$0xff]  ;;  %v370_v2 = vmul.f32 %v799_v9, %v799_v9 }
  0x44   : > { %v250_v41 = vadd.f32 %v249_v30, %v248_v33  ;;  %v267_v30 = vsel %vm201_vm1, %v815_v13, 0.0 }
  0x45   : > { %v431_v46 = vadd.f32 %v430_v29, %v429_v43  ;;  %v448_v29 = vsel %vm201_vm1, %v362_v12, 0.0  ;;  %v895_v43 = vld [vmem:[%s625_s15 + $0x158] sm:$0xff]  ;;  %v371_v12 = vmul.f32 %v807_v10, %v807_v10 }
  0x46   : > { %v252_v48 = vadd.f32 %v251_v38, %v250_v41  ;;  %v269_v38 = vsel %vm201_vm1, %v823_v16, 0.0 }
  0x47   : > { %v433_v49 = vadd.f32 %v432_v36, %v431_v46  ;;  %v450_v36 = vsel %vm201_vm1, %v363_v20, 0.0  ;;  %v903_v46 = vld [vmem:[%s625_s15 + $0x160] sm:$0xff]  ;;  %v372_v20 = vmul.f32 %v815_v13, %v815_v13 }
  0x48   : > { %v254_v55 = vadd.f32 %v253_v45, %v252_v48  ;;  %v271_v45 = vsel %vm201_vm1, %v831_v19, 0.0 }
  0x49   : > { %v435_v52 = vadd.f32 %v434_v44, %v433_v49  ;;  %v452_v44 = vsel %vm201_vm1, %v364_v27, 0.0  ;;  %v911_v49 = vld [vmem:[%s625_s15 + $0x168] sm:$0xff]  ;;  %v373_v27 = vmul.f32 %v823_v16, %v823_v16 }
  0x4a   : > { %v256_v62 = vadd.f32 %v255_v53, %v254_v55  ;;  %v273_v53 = vsel %vm201_vm1, %v839_v22, 0.0 }
  0x4b   : > { %v437_v56 = vadd.f32 %v436_v51, %v435_v52  ;;  %v454_v51 = vsel %vm201_vm1, %v365_v35, 0.0  ;;  %v919_v52 = vld [vmem:[%s625_s15 + $0x170] sm:$0xff]  ;;  %v374_v35 = vmul.f32 %v831_v19, %v831_v19 }
  0x4c   : > { %v258_v6 = vadd.f32 %v257_v59, %v256_v62  ;;  %v275_v59 = vsel %vm201_vm1, %v847_v25, 0.0 }
  0x4d   : > { %v439_v61 = vadd.f32 %v438_v58, %v437_v56  ;;  %v456_v58 = vsel %vm201_vm1, %v366_v42, 0.0  ;;  %v927_v56 = vld [vmem:[%s625_s15 + $0x178] sm:$0xff]  ;;  %v375_v42 = vmul.f32 %v839_v22, %v839_v22 }
  0x4e   : > { %v260_v11 = vadd.f32 %v259_v4, %v258_v6  ;;  %v277_v4 = vsel %vm201_vm1, %v855_v28, 0.0 }
  0x4f   : > { %v441_v1 = vadd.f32 %v440_v0, %v439_v61  ;;  %v458_v0 = vsel %vm201_vm1, %v367_v50, 0.0  ;;  %v935_v61 = vld [vmem:[%s625_s15 + $0x180] sm:$0xff]  ;;  %v376_v50 = vmul.f32 %v847_v25, %v847_v25 }
  0x50   : > { %v262_v18 = vadd.f32 %v261_v8, %v260_v11  ;;  %v279_v8 = vsel %vm201_vm1, %v863_v31, 0.0 }
  0x51   : > { %v443_v7 = vadd.f32 %v442_v3, %v441_v1  ;;  %v460_v3 = vsel %vm201_vm1, %v368_v57, 0.0  ;;  %v943_v1 = vld [vmem:[%s625_s15 + $0x188] sm:$0xff]  ;;  %v377_v57 = vmul.f32 %v855_v28, %v855_v28 }
  0x52   : > { %v264_v26 = vadd.f32 %v263_v15, %v262_v18  ;;  %v281_v15 = vsel %vm201_vm1, %v871_v34, 0.0 }
  0x53   : > { %v445_v17 = vadd.f32 %v444_v14, %v443_v7  ;;  %v462_v14 = vsel %vm201_vm1, %v369_v63, 0.0  ;;  %v951_v7 = vld [vmem:[%s625_s15 + $0x190] sm:$0xff]  ;;  %v378_v63 = vmul.f32 %v863_v31, %v863_v31 }
  0x54   : > { %v266_v33 = vadd.f32 %v265_v23, %v264_v26  ;;  %v283_v23 = vsel %vm201_vm1, %v879_v37, 0.0 }
  0x55   : > { %v447_v24 = vadd.f32 %v446_v21, %v445_v17  ;;  %v464_v21 = vsel %vm201_vm1, %v370_v2, 0.0  ;;  %v959_v17 = vld [vmem:[%s625_s15 + $0x198] sm:$0xff]  ;;  %v379_v2 = vmul.f32 %v871_v34, %v871_v34 }
  0x56   : > { %v268_v41 = vadd.f32 %v267_v30, %v266_v33  ;;  %v285_v30 = vsel %vm201_vm1, %v887_v40, 0.0 }
  0x57   : > { %v449_v32 = vadd.f32 %v448_v29, %v447_v24  ;;  %v466_v29 = vsel %vm201_vm1, %v371_v12, 0.0  ;;  %v967_v24 = vld [vmem:[%s625_s15 + $0x1a0] sm:$0xff]  ;;  %v380_v12 = vmul.f32 %v879_v37, %v879_v37 }
  0x58   : > { %v270_v48 = vadd.f32 %v269_v38, %v268_v41  ;;  %v287_v38 = vsel %vm201_vm1, %v895_v43, 0.0 }
  0x59   : > { %v451_v39 = vadd.f32 %v450_v36, %v449_v32  ;;  %v468_v36 = vsel %vm201_vm1, %v372_v20, 0.0  ;;  %v975_v32 = vld [vmem:[%s625_s15 + $0x1a8] sm:$0xff]  ;;  %v381_v20 = vmul.f32 %v887_v40, %v887_v40 }
  0x5a   : > { %v272_v55 = vadd.f32 %v271_v45, %v270_v48  ;;  %v289_v45 = vsel %vm201_vm1, %v903_v46, 0.0 }
  0x5b   : > { %v453_v47 = vadd.f32 %v452_v44, %v451_v39  ;;  %v470_v44 = vsel %vm201_vm1, %v373_v27, 0.0  ;;  %v983_v39 = vld [vmem:[%s625_s15 + $0x1b0] sm:$0xff]  ;;  %v382_v27 = vmul.f32 %v895_v43, %v895_v43 }
  0x5c   : > { %v274_v62 = vadd.f32 %v273_v53, %v272_v55  ;;  %v291_v53 = vsel %vm201_vm1, %v911_v49, 0.0  ;;  %v1047_v43 = vld [vmem:[%s625_s15 + $0x1f0] sm:$0xff] }
  0x5d   : > { %v455_v54 = vadd.f32 %v454_v51, %v453_v47  ;;  %v472_v51 = vsel %vm201_vm1, %v374_v35, 0.0  ;;  %v991_v47 = vld [vmem:[%s625_s15 + $0x1b8] sm:$0xff]  ;;  %v383_v35 = vmul.f32 %v903_v46, %v903_v46 }
  0x5e   : > { %v276_v6 = vadd.f32 %v275_v59, %v274_v62  ;;  %v293_v59 = vsel %vm201_vm1, %v919_v52, 0.0 }
  0x5f   : > { %v457_v60 = vadd.f32 %v456_v58, %v455_v54  ;;  %v474_v58 = vsel %vm201_vm1, %v375_v42, 0.0  ;;  %v999_v54 = vld [vmem:[%s625_s15 + $0x1c0] sm:$0xff]  ;;  %v384_v42 = vmul.f32 %v911_v49, %v911_v49  ;;  %v386_v49 = vmul.f32 %v927_v56, %v927_v56 }
  0x60   : > { %v278_v11 = vadd.f32 %v277_v4, %v276_v6  ;;  %v295_v4 = vsel %vm201_vm1, %v927_v56, 0.0  ;;  %v389_v56 = vmul.f32 %v951_v7, %v951_v7 }
  0x61   : > { %v459_v5 = vadd.f32 %v458_v0, %v457_v60  ;;  %v476_v0 = vsel %vm201_vm1, %v376_v50, 0.0  ;;  %v1007_v60 = vld [vmem:[%s625_s15 + $0x1c8] sm:$0xff]  ;;  %v385_v50 = vmul.f32 %v919_v52, %v919_v52 }
  0x62   : > { %v280_v18 = vadd.f32 %v279_v8, %v278_v11  ;;  %v297_v8 = vsel %vm201_vm1, %v935_v61, 0.0 }
  0x63   : > { %v461_v9 = vadd.f32 %v460_v3, %v459_v5  ;;  %v478_v3 = vsel %vm201_vm1, %v377_v57, 0.0  ;;  %v1015_v5 = vld [vmem:[%s625_s15 + $0x1d0] sm:$0xff]  ;;  %v492_v57 = vsel %vm201_vm1, %v384_v42, 0.0 }
  0x64   : > { %v282_v26 = vadd.f32 %v281_v15, %v280_v18  ;;  %v299_v15 = vsel %vm201_vm1, %v943_v1, 0.0 }
  0x65   : > { %v463_v10 = vadd.f32 %v462_v14, %v461_v9  ;;  %v480_v14 = vsel %vm201_vm1, %v378_v63, 0.0  ;;  %v1023_v9 = vld [vmem:[%s625_s15 + $0x1d8] sm:$0xff] }
  0x66   : > { %v284_v33 = vadd.f32 %v283_v23, %v282_v26  ;;  %v301_v23 = vsel %vm201_vm1, %v951_v7, 0.0  ;;  %v392_v7 = vmul.f32 %v975_v32, %v975_v32 }
  0x67   : > { %v465_v13 = vadd.f32 %v464_v21, %v463_v10  ;;  %v482_v21 = vsel %vm201_vm1, %v379_v2, 0.0  ;;  %v1031_v10 = vld [vmem:[%s625_s15 + $0x1e0] sm:$0xff] }
  0x68   : > { %v286_v41 = vadd.f32 %v285_v30, %v284_v33  ;;  %v303_v30 = vsel %vm201_vm1, %v959_v17, 0.0 }
  0x69   : > { %v467_v16 = vadd.f32 %v466_v29, %v465_v13  ;;  %v484_v29 = vsel %vm201_vm1, %v380_v12, 0.0  ;;  %v1039_v13 = vld [vmem:[%s625_s15 + $0x1e8] sm:$0xff] }
  0x6a   : > { %v288_v48 = vadd.f32 %v287_v38, %v286_v41  ;;  %v305_v38 = vsel %vm201_vm1, %v967_v24, 0.0 }
  0x6b   : > { %v469_v19 = vadd.f32 %v468_v36, %v467_v16  ;;  %v486_v36 = vsel %vm201_vm1, %v381_v20, 0.0 }
  0x6c   : > { %v290_v55 = vadd.f32 %v289_v45, %v288_v48  ;;  %v307_v45 = vsel %vm201_vm1, %v975_v32, 0.0  ;;  %v508_v32 = vsel %vm201_vm1, %v392_v7, 0.0 }
  0x6d   : > { %v471_v22 = vadd.f32 %v470_v44, %v469_v19  ;;  %v488_v44 = vsel %vm201_vm1, %v382_v27, 0.0  ;;  %v394_v27 = vmul.f32 %v991_v47, %v991_v47 }
  0x6e   : > { %v292_v62 = vadd.f32 %v291_v53, %v290_v55  ;;  %v309_v53 = vsel %vm201_vm1, %v983_v39, 0.0 }
  0x6f   : > { %v473_v25 = vadd.f32 %v472_v51, %v471_v22  ;;  %v490_v51 = vsel %vm201_vm1, %v383_v35, 0.0  ;;  %v512_v35 = vsel %vm201_vm1, %v394_v27, 0.0 }
  0x70   : > { %v294_v6 = vadd.f32 %v293_v59, %v292_v62  ;;  %v311_v59 = vsel %vm201_vm1, %v991_v47, 0.0 }
  0x71   : > { %v475_v28 = vadd.f32 %v474_v58, %v473_v25  ;;  %v387_v25 = vmul.f32 %v935_v61, %v935_v61  ;;  %v390_v61 = vmul.f32 %v959_v17, %v959_v17  ;;  %v200_v17 = vld [vmem:[%s1133_s1] sm:$0x1] }
  0x72   : > { %v296_v11 = vadd.f32 %v295_v4, %v294_v6  ;;  %v313_v4 = vsel %vm201_vm1, %v999_v54, 0.0 }
  0x73   : > { %v477_v31 = vadd.f32 %v476_v0, %v475_v28  ;;  %v388_v0 = vmul.f32 %v943_v1, %v943_v1  ;;  %v498_v2 = vsel %vm201_vm1, %v387_v25, 0.0  ;;  %v391_v1 = vmul.f32 %v967_v24, %v967_v24 }
  0x74   : > { %v298_v18 = vadd.f32 %v297_v8, %v296_v11  ;;  %v315_v8 = vsel %vm201_vm1, %v1007_v60, 0.0 }
  0x75   : > { %v479_v34 = vadd.f32 %v478_v3, %v477_v31  ;;  %v500_v31 = vsel %vm201_vm1, %v388_v0, 0.0  ;;  %v506_v24 = vsel %vm201_vm1, %v391_v1, 0.0 }
  0x76   : > { %v300_v26 = vadd.f32 %v299_v15, %v298_v18  ;;  %v317_v15 = vsel %vm201_vm1, %v1015_v5, 0.0 }
  0x77   : > { %v481_v37 = vadd.f32 %v480_v14, %v479_v34  ;;  %v502_v14 = vsel %vm201_vm1, %v389_v56, 0.0 }
  0x78   : > { %v302_v33 = vadd.f32 %v301_v23, %v300_v26  ;;  %v319_v23 = vsel %vm201_vm1, %v1023_v9, 0.0 }
  0x79   : > { %v483_v40 = vadd.f32 %v482_v21, %v481_v37 }
  0x7a   : > { %v304_v41 = vadd.f32 %v303_v30, %v302_v33  ;;  %v321_v30 = vsel %vm201_vm1, %v1031_v10, 0.0 }
  0x7b   : > { %v485_v16 = vadd.f32 %v484_v29, %v483_v40 }
  0x7c   : > { %v306_v48 = vadd.f32 %v305_v38, %v304_v41  ;;  %v323_v38 = vsel %vm201_vm1, %v1039_v13, 0.0 }
  0x7d   : > { %v487_v19 = vadd.f32 %v486_v36, %v485_v16  ;;  %v397_v36 = vmul.f32 %v1015_v5, %v1015_v5 }
  0x7e   : > { %v308_v55 = vadd.f32 %v307_v45, %v306_v48  ;;  %v325_v45 = vsel %vm201_vm1, %v1047_v43, 0.0  ;;  %v1055_v48 = vld [vmem:[%s625_s15 + $0x1f8] sm:$0xff] }
  0x7f   : > { %v489_v22 = vadd.f32 %v488_v44, %v487_v19  ;;  %v399_v44 = vmul.f32 %v1031_v10, %v1031_v10  ;;  %v400_v19 = vmul.f32 %v1039_v13, %v1039_v13 }
  0x80   : > { %v310_v62 = vadd.f32 %v309_v53, %v308_v55  ;;  %v327_v53 = vsel %vm201_vm1, %v1055_v48, 0.0 }
  0x81   : > { %v491_v58 = vadd.f32 %v490_v51, %v489_v22  ;;  %v524_v10 = vsel %vm201_vm1, %v400_v19, 0.0 }
  0x82   : > { %v312_v6 = vadd.f32 %v311_v59, %v310_v62  ;;  %v494_v62 = vsel %vm201_vm1, %v385_v50, 0.0  ;;  %v401_v50 = vmul.f32 %v1047_v43, %v1047_v43 }
  0x83   : > { %v493_v52 = vadd.f32 %v492_v57, %v491_v58 }
  0x84   : > { %v314_v11 = vadd.f32 %v313_v4, %v312_v6  ;;  %v496_v4 = vsel %vm201_vm1, %v386_v49, 0.0 }
  0x85   : > { %v495_v28 = vadd.f32 %v494_v62, %v493_v52 }
  0x86   : > { %v316_v18 = vadd.f32 %v315_v8, %v314_v11 }
  0x87   : > { %v497_v3 = vadd.f32 %v496_v4, %v495_v28 }
  0x88   : > { %v318_v26 = vadd.f32 %v317_v15, %v316_v18  ;;  %v504_v18 = vsel %vm201_vm1, %v390_v61, 0.0 }
  0x89   : > { %v499_v11 = vadd.f32 %v498_v2, %v497_v3 }
  0x8a   : > { %v320_v33 = vadd.f32 %v319_v23, %v318_v26  ;;  %v393_v23 = vmul.f32 %v983_v39, %v983_v39 }
  0x8b   : > { %v501_v15 = vadd.f32 %v500_v31, %v499_v11 }
  0x8c   : > { %v322_v41 = vadd.f32 %v321_v30, %v320_v33  ;;  %v395_v30 = vmul.f32 %v999_v54, %v999_v54  ;;  %v510_v39 = vsel %vm201_vm1, %v393_v23, 0.0  ;;  %v396_v33 = vmul.f32 %v1007_v60, %v1007_v60 }
  0x8d   : > { %v503_v20 = vadd.f32 %v502_v14, %v501_v15  ;;  %v518_v60 = vsel %vm201_vm1, %v397_v36, 0.0 }
  0x8e   : > { %v324_v46 = vadd.f32 %v323_v38, %v322_v41  ;;  %v514_v38 = vsel %vm201_vm1, %v395_v30, 0.0  ;;  %v398_v41 = vmul.f32 %v1023_v9, %v1023_v9  ;;  %v516_v54 = vsel %vm201_vm1, %v396_v33, 0.0 }
  0x8f   : > { %v505_v37 = vadd.f32 %v504_v18, %v503_v20  ;;  %v522_v9 = vsel %vm201_vm1, %v399_v44, 0.0 }
  0x90   : > { %v326_v55 = vadd.f32 %v325_v45, %v324_v46  ;;  %v520_v5 = vsel %vm201_vm1, %v398_v41, 0.0 }
  0x91   : > { %v507_v29 = vadd.f32 %v506_v24, %v505_v37 }
  0x92   : > { %v328_v59 = vadd.f32 %v327_v53, %v326_v55  ;;  %v402_v53 = vmul.f32 %v1055_v48, %v1055_v48  ;;  %v526_v55 = vsel %vm201_vm1, %v401_v50, 0.0 }
  0x93   : > { %v509_v40 = vadd.f32 %v508_v32, %v507_v29 }
  0x94   : > { %v329_v63 = vrot.slane %v328_v59, 4  ;;  %v528_v13 = vsel %vm201_vm1, %v402_v53, 0.0 }
  0x95   : > { %v511_v47 = vadd.f32 %v510_v39, %v509_v40 }
  0x96   : > { %v330_v6 = vadd.f32 %v329_v63, %v328_v59  ;;  %v338_v63 = vld [vmem:[%s1134_s2] sm:$0x1] }
  0x97   : > { %v513_v16 = vadd.f32 %v512_v35, %v511_v47 }
  0x98   : > { %v331_v8 = vrot.slane %v330_v6, 2 }
  0x99   : > { %v515_v42 = vadd.f32 %v514_v38, %v513_v16 }
  0x9a   : > { %v332_v12 = vadd.f32 %v331_v8, %v330_v6 }
  0x9b   : > { %v517_v45 = vadd.f32 %v516_v54, %v515_v42 }
  0x9c   : > { %v333_v34 = vrot.slane %v332_v12, 1 }
  0x9d   : > { %v519_v46 = vadd.f32 %v518_v60, %v517_v45 }
  0x9e   : > { %v334_v21 = vadd.f32 %v333_v34, %v332_v12 }
  0x9f   : > { %v521_v51 = vadd.f32 %v520_v5, %v519_v46 }
  0xa0   : > { %v335_v26 = vadd.f32 %v334_v21, %v200_v17 }
  0xa1   : > { %v523_v22 = vadd.f32 %v522_v9, %v521_v51 }
  0xa2   : > { %337 = vst.msk [vmem:[%s1133_s1] sm:$0x1] %vm336_vm2, %v335_v26 }
  0xa3   : > { %v525_v49 = vadd.f32 %v524_v10, %v523_v22 }
  0xa5   : > { %v527_v57 = vadd.f32 %v526_v55, %v525_v49 }
  0xa7   : > { %v529_v58 = vadd.f32 %v528_v13, %v527_v57 }
  0xa9   : > { %v530_v59 = vrot.slane %v529_v58, 4 }
  0xab   : > { %v531_v25 = vadd.f32 %v530_v59, %v529_v58 }
  0xad   : > { %v532_v62 = vrot.slane %v531_v25, 2 }
  0xaf   : > { %v533_v43 = vadd.f32 %v532_v62, %v531_v25 }
  0xb1   : > { %v534_v52 = vrot.slane %v533_v43, 1 }
  0xb3   : > { %v535_v48 = vadd.f32 %v534_v52, %v533_v43 }
  0xb5   : > { %v536_v0 = vadd.f32 %v535_v48, %v338_v63 }
  0xb7   : > { %537 = vst.msk [vmem:[%s1134_s2] sm:$0x1] %vm336_vm2, %v536_v0 }
  0xb8 PF: > { %s13_s9 = sadd.s32 1, %s596_s9  }
  0xb9   : > { %p10_p5 = scmp.ge.s32.totalorder %s13_s9, 6  }
  0xbb   :  { %12 = sbr.rel (!%p10_p5) target bundleno = 1 (0x1), region = 62 }

// kernel: _lambda_.24
= control target key start
LH: loop header
LB: loop body
LE: loop exit
PB: predicated region body
PF: predicated region fallthrough
CT: control target
= control target key end

     0   :  { %s614_s12 = smov 0   ;;  %s965_s0 = inlined_call_operand.vmem [shape: f32[2048,8], index: 0, kind: input, shape index: {}]   ;;  %s966_s1 = inlined_call_operand.vmem [shape: f32[1,8], index: 1, kind: input, shape index: {}]   ;;  %s967_s2 = inlined_call_operand.vmem [shape: f32[1,8], index: 2, kind: input, shape index: {}]   ;;  %s968_s3 = inlined_call_operand.vmem [shape: f32[2048,8], index: 3, kind: output, shape index: {}]  }
   0x1 LB: > { %s565_s13 = sadd.s32 4294967295, %s592_s12   ;;  %p569_p0 = scmp.ge.s32.totalorder %s592_s12, 1  ;;  %s592_s12 = sphi %s614_s12, %s13_s12  }
   0x2   : > { %p138_p1 = scmp.lt.s32.totalorder %s592_s12, 5 }
   0x4   : > { %p139_p2 = pnand %p569_p0, %p138_p1 }
   0x5   : > { %s570_s14 = sshll.u32 (!%p139_p2), %s565_s13, 6  ;;  %v625_v0 = vld [vmem:[%s966_s1] ss:$0 sm:$0xff] (!%p139_p2)  ;;  %vm444_vm0 = vcmask (!%p139_p2), 64512  }
   0x6   : > { %142 = sbr.rel (%p139_p2) target bundleno = 70 (0x46), region = 32  ;;  %p163_p3 = scmp.lt.s32.totalorder (!%p139_p2), %s570_s14, 255  ;;  %v635_v1 = vld [vmem:[%s967_s2] ss:$0 sm:$0xff] (!%p139_p2) }
   0xd   : > { %s970_s14 = smov (!%p163_p3, %s570_s14), 255 }
   0xe   : > { %s571_s15 = sshll.u32 %s970_s14, 3 }
   0xf   : > { %s630_s20 = scalar_lea.vmem %s965_s0, %s571_s15  ;;  %s658_s25 = scalar_lea.vmem %s968_s3, %s571_s15 }
  0x10   : > { %v174_v2 = vld [vmem:[%s630_s20] sm:$0xff]  ;;  %v175_v3 = vld [vmem:[%s630_s20 + $0x8] sm:$0xff]  ;;  %v176_v4 = vld [vmem:[%s630_s20 + $0x10] sm:$0xff] }
  0x11   : > { %v245_v5 = vmul.f32 %v625_v0, %v174_v2  ;;  %v246_v6 = vmul.f32 %v625_v0, %v175_v3  ;;  %v247_v7 = vmul.f32 %v625_v0, %v176_v4  ;;  %v177_v8 = vld [vmem:[%s630_s20 + $0x18] sm:$0xff]  ;;  %v178_v9 = vld [vmem:[%s630_s20 + $0x20] sm:$0xff]  ;;  %v179_v10 = vld [vmem:[%s630_s20 + $0x28] sm:$0xff] }
  0x12   : > { %v248_v11 = vmul.f32 %v625_v0, %v177_v8  ;;  %v249_v12 = vmul.f32 %v625_v0, %v178_v9  ;;  %v250_v13 = vmul.f32 %v625_v0, %v179_v10  ;;  %v180_v14 = vld [vmem:[%s630_s20 + $0x30] sm:$0xff]  ;;  %v181_v15 = vld [vmem:[%s630_s20 + $0x38] sm:$0xff]  ;;  %v182_v24 = vld [vmem:[%s630_s20 + $0x40] sm:$0xff] }
  0x13   : > { %v316_v16 = vadd.f32 %v635_v1, %v245_v5  ;;  %v317_v17 = vadd.f32 %v635_v1, %v246_v6  ;;  %v318_v18 = vadd.f32 %v635_v1, %v247_v7  ;;  %v251_v19 = vmul.f32 %v625_v0, %v180_v14  ;;  %v183_v25 = vld [vmem:[%s630_s20 + $0x48] sm:$0xff]  ;;  %v184_v26 = vld [vmem:[%s630_s20 + $0x50] sm:$0xff]  ;;  %v185_v31 = vld [vmem:[%s630_s20 + $0x58] sm:$0xff] }
  0x14   : > { %v319_v20 = vadd.f32 %v635_v1, %v248_v11  ;;  %v320_v21 = vadd.f32 %v635_v1, %v249_v12  ;;  %v321_v22 = vadd.f32 %v635_v1, %v250_v13  ;;  %v252_v23 = vmul.f32 %v625_v0, %v181_v15  ;;  %v186_v32 = vld [vmem:[%s630_s20 + $0x60] sm:$0xff]  ;;  %v187_v33 = vld [vmem:[%s630_s20 + $0x68] sm:$0xff]  ;;  %v188_v38 = vld [vmem:[%s630_s20 + $0x70] sm:$0xff] }
  0x15   : > { %v380_v27 = vmax.f32 %v316_v16, 0.0  ;;  %v381_v28 = vmax.f32 %v317_v17, 0.0  ;;  %v382_v29 = vmax.f32 %v318_v18, 0.0  ;;  %v322_v30 = vadd.f32 %v635_v1, %v251_v19  ;;  %v189_v43 = vld [vmem:[%s630_s20 + $0x78] sm:$0xff]  ;;  %v190_v56 = vld [vmem:[%s630_s20 + $0x80] sm:$0xff]  ;;  %v191_v57 = vld [vmem:[%s630_s20 + $0x88] sm:$0xff] }
  0x16   : > { %v383_v34 = vmax.f32 %v319_v20, 0.0  ;;  %v384_v35 = vmax.f32 %v320_v21, 0.0  ;;  %v385_v36 = vmax.f32 %v321_v22, 0.0  ;;  %v323_v37 = vadd.f32 %v635_v1, %v252_v23  ;;  %v192_v58 = vld [vmem:[%s630_s20 + $0x90] sm:$0xff]  ;;  %v193_v63 = vld [vmem:[%s630_s20 + $0x98] sm:$0xff]  ;;  %v194_v2 = vld [vmem:[%s630_s20 + $0xa0] sm:$0xff] }
  0x17   : > { %445 = vst.msk [vmem:[%s658_s25] sm:$0xff] %vm444_vm0, %v380_v27  ;;  %446 = vst.msk [vmem:[%s658_s25 + $0x8] sm:$0xff] %vm444_vm0, %v381_v28  ;;  %v386_v39 = vmax.f32 %v322_v30, 0.0  ;;  %v253_v40 = vmul.f32 %v625_v0, %v182_v24  ;;  %v254_v41 = vmul.f32 %v625_v0, %v183_v25  ;;  %v255_v42 = vmul.f32 %v625_v0, %v184_v26  ;;  %v195_v3 = vld [vmem:[%s630_s20 + $0xa8] sm:$0xff]  ;;  %v196_v8 = vld [vmem:[%s630_s20 + $0xb0] sm:$0xff] }
  0x18   : > { %447 = vst.msk [vmem:[%s658_s25 + $0x10] sm:$0xff] %vm444_vm0, %v382_v29  ;;  %448 = vst.msk [vmem:[%s658_s25 + $0x18] sm:$0xff] %vm444_vm0, %v383_v34  ;;  %v387_v44 = vmax.f32 %v323_v37, 0.0  ;;  %v256_v45 = vmul.f32 %v625_v0, %v185_v31  ;;  %v257_v46 = vmul.f32 %v625_v0, %v186_v32  ;;  %v258_v47 = vmul.f32 %v625_v0, %v187_v33  ;;  %v197_v13 = vld [vmem:[%s630_s20 + $0xb8] sm:$0xff]  ;;  %v198_v26 = vld [vmem:[%s630_s20 + $0xc0] sm:$0xff] }
  0x19   : > { %449 = vst.msk [vmem:[%s658_s25 + $0x20] sm:$0xff] %vm444_vm0, %v384_v35  ;;  %450 = vst.msk [vmem:[%s658_s25 + $0x28] sm:$0xff] %vm444_vm0, %v385_v36  ;;  %v324_v48 = vadd.f32 %v635_v1, %v253_v40  ;;  %v325_v49 = vadd.f32 %v635_v1, %v254_v41  ;;  %v326_v50 = vadd.f32 %v635_v1, %v255_v42  ;;  %v199_v27 = vld [vmem:[%s630_s20 + $0xc8] sm:$0xff]  ;;  %v200_v28 = vld [vmem:[%s630_s20 + $0xd0] sm:$0xff] }
  0x1a   : > { %451 = vst.msk [vmem:[%s658_s25 + $0x30] sm:$0xff] %vm444_vm0, %v386_v39  ;;  %v259_v51 = vmul.f32 %v625_v0, %v188_v38  ;;  %452 = vst.msk [vmem:[%s658_s25 + $0x38] sm:$0xff] %vm444_vm0, %v387_v44  ;;  %v327_v52 = vadd.f32 %v635_v1, %v256_v45  ;;  %v328_v53 = vadd.f32 %v635_v1, %v257_v46  ;;  %v201_v33 = vld [vmem:[%s630_s20 + $0xd8] sm:$0xff]  ;;  %v202_v34 = vld [vmem:[%s630_s20 + $0xe0] sm:$0xff] }
  0x1b   : > { %v329_v54 = vadd.f32 %v635_v1, %v258_v47  ;;  %v260_v55 = vmul.f32 %v625_v0, %v189_v43  ;;  %v388_v59 = vmax.f32 %v324_v48, 0.0  ;;  %v389_v60 = vmax.f32 %v325_v49, 0.0  ;;  %v203_v35 = vld [vmem:[%s630_s20 + $0xe8] sm:$0xff]  ;;  %v204_v40 = vld [vmem:[%s630_s20 + $0xf0] sm:$0xff]  ;;  %v205_v45 = vld [vmem:[%s630_s20 + $0xf8] sm:$0xff] }
  0x1c   : > { %v390_v61 = vmax.f32 %v326_v50, 0.0  ;;  %v330_v62 = vadd.f32 %v635_v1, %v259_v51  ;;  %v391_v4 = vmax.f32 %v327_v52, 0.0  ;;  %v392_v5 = vmax.f32 %v328_v53, 0.0 }
  0x1d   : > { %v393_v6 = vmax.f32 %v329_v54, 0.0  ;;  %v331_v7 = vadd.f32 %v635_v1, %v260_v55  ;;  %453 = vst.msk [vmem:[%s658_s25 + $0x40] sm:$0xff] %vm444_vm0, %v388_v59  ;;  %454 = vst.msk [vmem:[%s658_s25 + $0x48] sm:$0xff] %vm444_vm0, %v389_v60  ;;  %v261_v10 = vmul.f32 %v625_v0, %v190_v56  ;;  %v262_v11 = vmul.f32 %v625_v0, %v191_v57  ;;  %v207_v59 = vld [vmem:[%s630_s20 + $0x108] sm:$0xff]  ;;  %v208_v60 = vld [vmem:[%s630_s20 + $0x110] sm:$0xff] }
  0x1e   : > { %455 = vst.msk [vmem:[%s658_s25 + $0x50] sm:$0xff] %vm444_vm0, %v390_v61  ;;  %v394_v9 = vmax.f32 %v330_v62, 0.0  ;;  %v263_v12 = vmul.f32 %v625_v0, %v192_v58  ;;  %456 = vst.msk [vmem:[%s658_s25 + $0x58] sm:$0xff] %vm444_vm0, %v391_v4  ;;  %v264_v15 = vmul.f32 %v625_v0, %v193_v63  ;;  %v265_v16 = vmul.f32 %v625_v0, %v194_v2  ;;  %v206_v58 = vld [vmem:[%s630_s20 + $0x100] sm:$0xff] }
  0x1f   : > { %457 = vst.msk [vmem:[%s658_s25 + $0x60] sm:$0xff] %vm444_vm0, %v392_v5  ;;  %458 = vst.msk [vmem:[%s658_s25 + $0x68] sm:$0xff] %vm444_vm0, %v393_v6  ;;  %v395_v14 = vmax.f32 %v331_v7, 0.0  ;;  %v266_v17 = vmul.f32 %v625_v0, %v195_v3  ;;  %v332_v18 = vadd.f32 %v635_v1, %v261_v10  ;;  %v333_v19 = vadd.f32 %v635_v1, %v262_v11  ;;  %v209_v3 = vld [vmem:[%s630_s20 + $0x118] sm:$0xff]  ;;  %v210_v4 = vld [vmem:[%s630_s20 + $0x120] sm:$0xff] }
  0x20   : > { %459 = vst.msk [vmem:[%s658_s25 + $0x70] sm:$0xff] %vm444_vm0, %v394_v9  ;;  %v334_v20 = vadd.f32 %v635_v1, %v263_v12  ;;  %v267_v21 = vmul.f32 %v625_v0, %v196_v8  ;;  %v335_v22 = vadd.f32 %v635_v1, %v264_v15  ;;  %v336_v23 = vadd.f32 %v635_v1, %v265_v16  ;;  %v211_v5 = vld [vmem:[%s630_s20 + $0x128] sm:$0xff]  ;;  %v212_v10 = vld [vmem:[%s630_s20 + $0x130] sm:$0xff]  ;;  %v213_v15 = vld [vmem:[%s630_s20 + $0x138] sm:$0xff] }
  0x21   : > { %460 = vst.msk [vmem:[%s658_s25 + $0x78] sm:$0xff] %vm444_vm0, %v395_v14  ;;  %v337_v24 = vadd.f32 %v635_v1, %v266_v17  ;;  %v268_v25 = vmul.f32 %v625_v0, %v197_v13  ;;  %v396_v29 = vmax.f32 %v332_v18, 0.0  ;;  %v397_v30 = vmax.f32 %v333_v19, 0.0 }
  0x22   : > { %v398_v31 = vmax.f32 %v334_v20, 0.0  ;;  %v338_v32 = vadd.f32 %v635_v1, %v267_v21  ;;  %v399_v36 = vmax.f32 %v335_v22, 0.0  ;;  %v400_v37 = vmax.f32 %v336_v23, 0.0 }
  0x23   : > { %v401_v38 = vmax.f32 %v337_v24, 0.0  ;;  %v339_v39 = vadd.f32 %v635_v1, %v268_v25  ;;  %461 = vst.msk [vmem:[%s658_s25 + $0x80] sm:$0xff] %vm444_vm0, %v396_v29  ;;  %462 = vst.msk [vmem:[%s658_s25 + $0x88] sm:$0xff] %vm444_vm0, %v397_v30  ;;  %v269_v42 = vmul.f32 %v625_v0, %v198_v26  ;;  %v270_v43 = vmul.f32 %v625_v0, %v199_v27  ;;  %v215_v29 = vld [vmem:[%s630_s20 + $0x148] sm:$0xff]  ;;  %v216_v30 = vld [vmem:[%s630_s20 + $0x150] sm:$0xff] }
  0x24   : > { %463 = vst.msk [vmem:[%s658_s25 + $0x90] sm:$0xff] %vm444_vm0, %v398_v31  ;;  %v402_v41 = vmax.f32 %v338_v32, 0.0  ;;  %v271_v44 = vmul.f32 %v625_v0, %v200_v28  ;;  %464 = vst.msk [vmem:[%s658_s25 + $0x98] sm:$0xff] %vm444_vm0, %v399_v36  ;;  %v272_v47 = vmul.f32 %v625_v0, %v201_v33  ;;  %v273_v48 = vmul.f32 %v625_v0, %v202_v34  ;;  %v214_v28 = vld [vmem:[%s630_s20 + $0x140] sm:$0xff] }
  0x25   : > { %465 = vst.msk [vmem:[%s658_s25 + $0xa0] sm:$0xff] %vm444_vm0, %v400_v37  ;;  %466 = vst.msk [vmem:[%s658_s25 + $0xa8] sm:$0xff] %vm444_vm0, %v401_v38  ;;  %v403_v46 = vmax.f32 %v339_v39, 0.0  ;;  %v274_v49 = vmul.f32 %v625_v0, %v203_v35  ;;  %v340_v50 = vadd.f32 %v635_v1, %v269_v42  ;;  %v341_v51 = vadd.f32 %v635_v1, %v270_v43  ;;  %v217_v35 = vld [vmem:[%s630_s20 + $0x158] sm:$0xff]  ;;  %v218_v36 = vld [vmem:[%s630_s20 + $0x160] sm:$0xff] }
  0x26   : > { %467 = vst.msk [vmem:[%s658_s25 + $0xb0] sm:$0xff] %vm444_vm0, %v402_v41  ;;  %v342_v52 = vadd.f32 %v635_v1, %v271_v44  ;;  %v275_v53 = vmul.f32 %v625_v0, %v204_v40  ;;  %v343_v54 = vadd.f32 %v635_v1, %v272_v47  ;;  %v344_v55 = vadd.f32 %v635_v1, %v273_v48  ;;  %v219_v37 = vld [vmem:[%s630_s20 + $0x168] sm:$0xff]  ;;  %v220_v42 = vld [vmem:[%s630_s20 + $0x170] sm:$0xff]  ;;  %v221_v47 = vld [vmem:[%s630_s20 + $0x178] sm:$0xff] }
  0x27   : > { %468 = vst.msk [vmem:[%s658_s25 + $0xb8] sm:$0xff] %vm444_vm0, %v403_v46  ;;  %v345_v56 = vadd.f32 %v635_v1, %v274_v49  ;;  %v276_v57 = vmul.f32 %v625_v0, %v205_v45  ;;  %v404_v61 = vmax.f32 %v340_v50, 0.0  ;;  %v405_v62 = vmax.f32 %v341_v51, 0.0 }
  0x28   : > { %v406_v63 = vmax.f32 %v342_v52, 0.0  ;;  %v346_v2 = vadd.f32 %v635_v1, %v275_v53  ;;  %v407_v6 = vmax.f32 %v343_v54, 0.0  ;;  %v408_v7 = vmax.f32 %v344_v55, 0.0 }
  0x29   : > { %v409_v8 = vmax.f32 %v345_v56, 0.0  ;;  %v347_v9 = vadd.f32 %v635_v1, %v276_v57  ;;  %469 = vst.msk [vmem:[%s658_s25 + $0xc0] sm:$0xff] %vm444_vm0, %v404_v61  ;;  %470 = vst.msk [vmem:[%s658_s25 + $0xc8] sm:$0xff] %vm444_vm0, %v405_v62  ;;  %v277_v12 = vmul.f32 %v625_v0, %v206_v58  ;;  %v278_v13 = vmul.f32 %v625_v0, %v207_v59  ;;  %v223_v61 = vld [vmem:[%s630_s20 + $0x188] sm:$0xff]  ;;  %v224_v62 = vld [vmem:[%s630_s20 + $0x190] sm:$0xff] }
  0x2a   : > { %471 = vst.msk [vmem:[%s658_s25 + $0xd0] sm:$0xff] %vm444_vm0, %v406_v63  ;;  %v410_v11 = vmax.f32 %v346_v2, 0.0  ;;  %v279_v14 = vmul.f32 %v625_v0, %v208_v60  ;;  %472 = vst.msk [vmem:[%s658_s25 + $0xd8] sm:$0xff] %vm444_vm0, %v407_v6  ;;  %v280_v17 = vmul.f32 %v625_v0, %v209_v3  ;;  %v281_v18 = vmul.f32 %v625_v0, %v210_v4  ;;  %v222_v60 = vld [vmem:[%s630_s20 + $0x180] sm:$0xff] }
  0x2b   : > { %473 = vst.msk [vmem:[%s658_s25 + $0xe0] sm:$0xff] %vm444_vm0, %v408_v7  ;;  %474 = vst.msk [vmem:[%s658_s25 + $0xe8] sm:$0xff] %vm444_vm0, %v409_v8  ;;  %v411_v16 = vmax.f32 %v347_v9, 0.0  ;;  %v282_v19 = vmul.f32 %v625_v0, %v211_v5  ;;  %v348_v20 = vadd.f32 %v635_v1, %v277_v12  ;;  %v349_v21 = vadd.f32 %v635_v1, %v278_v13  ;;  %v225_v5 = vld [vmem:[%s630_s20 + $0x198] sm:$0xff]  ;;  %v226_v6 = vld [vmem:[%s630_s20 + $0x1a0] sm:$0xff] }
  0x2c   : > { %475 = vst.msk [vmem:[%s658_s25 + $0xf0] sm:$0xff] %vm444_vm0, %v410_v11  ;;  %v350_v22 = vadd.f32 %v635_v1, %v279_v14  ;;  %v283_v23 = vmul.f32 %v625_v0, %v212_v10  ;;  %v351_v24 = vadd.f32 %v635_v1, %v280_v17  ;;  %v352_v25 = vadd.f32 %v635_v1, %v281_v18  ;;  %v227_v7 = vld [vmem:[%s630_s20 + $0x1a8] sm:$0xff]  ;;  %v228_v12 = vld [vmem:[%s630_s20 + $0x1b0] sm:$0xff]  ;;  %v229_v17 = vld [vmem:[%s630_s20 + $0x1b8] sm:$0xff] }
  0x2d   : > { %476 = vst.msk [vmem:[%s658_s25 + $0xf8] sm:$0xff] %vm444_vm0, %v411_v16  ;;  %v353_v26 = vadd.f32 %v635_v1, %v282_v19  ;;  %v284_v27 = vmul.f32 %v625_v0, %v213_v15  ;;  %v412_v31 = vmax.f32 %v348_v20, 0.0  ;;  %v413_v32 = vmax.f32 %v349_v21, 0.0 }
  0x2e   : > { %v414_v33 = vmax.f32 %v350_v22, 0.0  ;;  %v354_v34 = vadd.f32 %v635_v1, %v283_v23  ;;  %v415_v38 = vmax.f32 %v351_v24, 0.0  ;;  %v416_v39 = vmax.f32 %v352_v25, 0.0 }
  0x2f   : > { %v417_v40 = vmax.f32 %v353_v26, 0.0  ;;  %v355_v41 = vadd.f32 %v635_v1, %v284_v27  ;;  %477 = vst.msk [vmem:[%s658_s25 + $0x100] sm:$0xff] %vm444_vm0, %v412_v31  ;;  %478 = vst.msk [vmem:[%s658_s25 + $0x108] sm:$0xff] %vm444_vm0, %v413_v32  ;;  %v285_v44 = vmul.f32 %v625_v0, %v214_v28  ;;  %v286_v45 = vmul.f32 %v625_v0, %v215_v29  ;;  %v231_v31 = vld [vmem:[%s630_s20 + $0x1c8] sm:$0xff]  ;;  %v232_v32 = vld [vmem:[%s630_s20 + $0x1d0] sm:$0xff] }
  0x30   : > { %479 = vst.msk [vmem:[%s658_s25 + $0x110] sm:$0xff] %vm444_vm0, %v414_v33  ;;  %v418_v43 = vmax.f32 %v354_v34, 0.0  ;;  %v287_v46 = vmul.f32 %v625_v0, %v216_v30  ;;  %480 = vst.msk [vmem:[%s658_s25 + $0x118] sm:$0xff] %vm444_vm0, %v415_v38  ;;  %v288_v49 = vmul.f32 %v625_v0, %v217_v35  ;;  %v289_v50 = vmul.f32 %v625_v0, %v218_v36  ;;  %v230_v30 = vld [vmem:[%s630_s20 + $0x1c0] sm:$0xff] }
  0x31   : > { %481 = vst.msk [vmem:[%s658_s25 + $0x120] sm:$0xff] %vm444_vm0, %v416_v39  ;;  %482 = vst.msk [vmem:[%s658_s25 + $0x128] sm:$0xff] %vm444_vm0, %v417_v40  ;;  %v419_v48 = vmax.f32 %v355_v41, 0.0  ;;  %v290_v51 = vmul.f32 %v625_v0, %v219_v37  ;;  %v356_v52 = vadd.f32 %v635_v1, %v285_v44  ;;  %v357_v53 = vadd.f32 %v635_v1, %v286_v45  ;;  %v233_v37 = vld [vmem:[%s630_s20 + $0x1d8] sm:$0xff]  ;;  %v234_v38 = vld [vmem:[%s630_s20 + $0x1e0] sm:$0xff] }
  0x32   : > { %483 = vst.msk [vmem:[%s658_s25 + $0x130] sm:$0xff] %vm444_vm0, %v418_v43  ;;  %v358_v54 = vadd.f32 %v635_v1, %v287_v46  ;;  %v291_v55 = vmul.f32 %v625_v0, %v220_v42  ;;  %v359_v56 = vadd.f32 %v635_v1, %v288_v49  ;;  %v360_v57 = vadd.f32 %v635_v1, %v289_v50  ;;  %v235_v39 = vld [vmem:[%s630_s20 + $0x1e8] sm:$0xff]  ;;  %v236_v44 = vld [vmem:[%s630_s20 + $0x1f0] sm:$0xff]  ;;  %v237_v49 = vld [vmem:[%s630_s20 + $0x1f8] sm:$0xff] }
  0x33   : > { %484 = vst.msk [vmem:[%s658_s25 + $0x138] sm:$0xff] %vm444_vm0, %v419_v48  ;;  %v361_v58 = vadd.f32 %v635_v1, %v290_v51  ;;  %v292_v59 = vmul.f32 %v625_v0, %v221_v47  ;;  %v420_v63 = vmax.f32 %v356_v52, 0.0  ;;  %v421_v2 = vmax.f32 %v357_v53, 0.0 }
  0x34   : > { %v422_v3 = vmax.f32 %v358_v54, 0.0  ;;  %v362_v4 = vadd.f32 %v635_v1, %v291_v55  ;;  %v423_v8 = vmax.f32 %v359_v56, 0.0  ;;  %v424_v9 = vmax.f32 %v360_v57, 0.0 }
  0x35   : > { %v425_v10 = vmax.f32 %v361_v58, 0.0  ;;  %v363_v11 = vadd.f32 %v635_v1, %v292_v59  ;;  %485 = vst.msk [vmem:[%s658_s25 + $0x140] sm:$0xff] %vm444_vm0, %v420_v63  ;;  %486 = vst.msk [vmem:[%s658_s25 + $0x148] sm:$0xff] %vm444_vm0, %v421_v2  ;;  %v293_v14 = vmul.f32 %v625_v0, %v222_v60  ;;  %v294_v15 = vmul.f32 %v625_v0, %v223_v61 }
  0x36   : > { %487 = vst.msk [vmem:[%s658_s25 + $0x150] sm:$0xff] %vm444_vm0, %v422_v3  ;;  %v426_v13 = vmax.f32 %v362_v4, 0.0  ;;  %v295_v16 = vmul.f32 %v625_v0, %v224_v62  ;;  %488 = vst.msk [vmem:[%s658_s25 + $0x158] sm:$0xff] %vm444_vm0, %v423_v8  ;;  %v296_v19 = vmul.f32 %v625_v0, %v225_v5  ;;  %v297_v20 = vmul.f32 %v625_v0, %v226_v6 }
  0x37   : > { %489 = vst.msk [vmem:[%s658_s25 + $0x160] sm:$0xff] %vm444_vm0, %v424_v9  ;;  %490 = vst.msk [vmem:[%s658_s25 + $0x168] sm:$0xff] %vm444_vm0, %v425_v10  ;;  %v427_v18 = vmax.f32 %v363_v11, 0.0  ;;  %v298_v21 = vmul.f32 %v625_v0, %v227_v7  ;;  %v364_v22 = vadd.f32 %v635_v1, %v293_v14  ;;  %v365_v23 = vadd.f32 %v635_v1, %v294_v15 }
  0x38   : > { %491 = vst.msk [vmem:[%s658_s25 + $0x170] sm:$0xff] %vm444_vm0, %v426_v13  ;;  %v366_v24 = vadd.f32 %v635_v1, %v295_v16  ;;  %v299_v25 = vmul.f32 %v625_v0, %v228_v12  ;;  %v367_v26 = vadd.f32 %v635_v1, %v296_v19  ;;  %v368_v27 = vadd.f32 %v635_v1, %v297_v20 }
  0x39   : > { %492 = vst.msk [vmem:[%s658_s25 + $0x178] sm:$0xff] %vm444_vm0, %v427_v18  ;;  %v369_v28 = vadd.f32 %v635_v1, %v298_v21  ;;  %v300_v29 = vmul.f32 %v625_v0, %v229_v17  ;;  %v428_v33 = vmax.f32 %v364_v22, 0.0  ;;  %v429_v34 = vmax.f32 %v365_v23, 0.0 }
  0x3a   : > { %v430_v35 = vmax.f32 %v366_v24, 0.0  ;;  %v370_v36 = vadd.f32 %v635_v1, %v299_v25  ;;  %v431_v40 = vmax.f32 %v367_v26, 0.0  ;;  %v432_v41 = vmax.f32 %v368_v27, 0.0 }
  0x3b   : > { %v433_v42 = vmax.f32 %v369_v28, 0.0  ;;  %v371_v43 = vadd.f32 %v635_v1, %v300_v29  ;;  %493 = vst.msk [vmem:[%s658_s25 + $0x180] sm:$0xff] %vm444_vm0, %v428_v33  ;;  %494 = vst.msk [vmem:[%s658_s25 + $0x188] sm:$0xff] %vm444_vm0, %v429_v34  ;;  %v301_v46 = vmul.f32 %v625_v0, %v230_v30  ;;  %v302_v47 = vmul.f32 %v625_v0, %v231_v31 }
  0x3c   : > { %495 = vst.msk [vmem:[%s658_s25 + $0x190] sm:$0xff] %vm444_vm0, %v430_v35  ;;  %v434_v45 = vmax.f32 %v370_v36, 0.0  ;;  %v303_v48 = vmul.f32 %v625_v0, %v232_v32  ;;  %496 = vst.msk [vmem:[%s658_s25 + $0x198] sm:$0xff] %vm444_vm0, %v431_v40  ;;  %v304_v51 = vmul.f32 %v625_v0, %v233_v37  ;;  %v305_v52 = vmul.f32 %v625_v0, %v234_v38 }
  0x3d   : > { %497 = vst.msk [vmem:[%s658_s25 + $0x1a0] sm:$0xff] %vm444_vm0, %v432_v41  ;;  %498 = vst.msk [vmem:[%s658_s25 + $0x1a8] sm:$0xff] %vm444_vm0, %v433_v42  ;;  %v435_v50 = vmax.f32 %v371_v43, 0.0  ;;  %v306_v53 = vmul.f32 %v625_v0, %v235_v39  ;;  %v372_v54 = vadd.f32 %v635_v1, %v301_v46  ;;  %v373_v55 = vadd.f32 %v635_v1, %v302_v47 }
  0x3e   : > { %499 = vst.msk [vmem:[%s658_s25 + $0x1b0] sm:$0xff] %vm444_vm0, %v434_v45  ;;  %v374_v56 = vadd.f32 %v635_v1, %v303_v48  ;;  %v307_v57 = vmul.f32 %v625_v0, %v236_v44  ;;  %v375_v58 = vadd.f32 %v635_v1, %v304_v51  ;;  %v376_v59 = vadd.f32 %v635_v1, %v305_v52 }
  0x3f   : > { %500 = vst.msk [vmem:[%s658_s25 + $0x1b8] sm:$0xff] %vm444_vm0, %v435_v50  ;;  %v377_v60 = vadd.f32 %v635_v1, %v306_v53  ;;  %v308_v61 = vmul.f32 %v625_v0, %v237_v49  ;;  %v436_v62 = vmax.f32 %v372_v54, 0.0  ;;  %v437_v63 = vmax.f32 %v373_v55, 0.0 }
  0x40   : > { %v438_v2 = vmax.f32 %v374_v56, 0.0  ;;  %v378_v3 = vadd.f32 %v635_v1, %v307_v57  ;;  %v439_v4 = vmax.f32 %v375_v58, 0.0  ;;  %v440_v5 = vmax.f32 %v376_v59, 0.0 }
  0x41   : > { %v441_v6 = vmax.f32 %v377_v60, 0.0  ;;  %v379_v7 = vadd.f32 %v635_v1, %v308_v61  ;;  %501 = vst.msk [vmem:[%s658_s25 + $0x1c0] sm:$0xff] %vm444_vm0, %v436_v62  ;;  %502 = vst.msk [vmem:[%s658_s25 + $0x1c8] sm:$0xff] %vm444_vm0, %v437_v63 }
  0x42   : > { %503 = vst.msk [vmem:[%s658_s25 + $0x1d0] sm:$0xff] %vm444_vm0, %v438_v2  ;;  %v442_v8 = vmax.f32 %v378_v3, 0.0  ;;  %504 = vst.msk [vmem:[%s658_s25 + $0x1d8] sm:$0xff] %vm444_vm0, %v439_v4 }
  0x43   : > { %505 = vst.msk [vmem:[%s658_s25 + $0x1e0] sm:$0xff] %vm444_vm0, %v440_v5  ;;  %506 = vst.msk [vmem:[%s658_s25 + $0x1e8] sm:$0xff] %vm444_vm0, %v441_v6  ;;  %v443_v0 = vmax.f32 %v379_v7, 0.0 }
  0x44   : > { %507 = vst.msk [vmem:[%s658_s25 + $0x1f0] sm:$0xff] %vm444_vm0, %v442_v8 }
  0x45   : > { %508 = vst.msk [vmem:[%s658_s25 + $0x1f8] sm:$0xff] %vm444_vm0, %v443_v0 }
  0x46 PF: > { %s13_s12 = sadd.s32 1, %s592_s12  }
  0x47   : > { %p10_p4 = scmp.ge.s32.totalorder %s13_s12, 6  }
  0x49   :  { %12 = sbr.rel (!%p10_p4) target bundleno = 1 (0x1), region = 62 }

// kernel: _lambda_.25
= control target key start
LH: loop header
LB: loop body
LE: loop exit
PB: predicated region body
PF: predicated region fallthrough
CT: control target
= control target key end

     0   :  { %s1359_s12 = smov 0   ;;  %s1361_s13 = smov 0   ;;  %s1734_s0 = inlined_call_operand.vmem [shape: f32[2200,128], index: 0, kind: input, shape index: {}]   ;;  %s1735_s1 = inlined_call_operand.vmem [shape: f32[128,128], index: 1, kind: input, shape index: {}]   ;;  %s1736_s2 = inlined_call_operand.vmem [shape: f32[1,128], index: 2, kind: input, shape index: {}]   ;;  %s1737_s3 = inlined_call_operand.vmem [shape: f32[2200,128], index: 3, kind: output, shape index: {}]  }
   0x1   :  { %s1363_s14 = smov 0  }
   0x2 LB: > { %s22_s15 = sadd.s32 1, %s1330_s13  ;;  %p861_p0 = scmp.ge.s32.totalorder %s1334_s14, 1  ;;  %s1334_s14 = sphi %s1363_s14, %s13_s14   ;;  %s1330_s13 = sphi %s1361_s13, %s1739_s13   ;;  %s1326_s12 = sphi %s1359_s12, %s1738_s12  }
   0x3   : > { %p23_p1 = scmp.ge.s32.totalorder %s22_s15, 5  ;;  %p169_p2 = scmp.lt.s32.totalorder %s1334_s14, 6 }
   0x5   : > { %s1741_s15 = smov (%p23_p1, %s22_s15), 0  ;;  %p170_p3 = pnand %p861_p0, %p169_p2 }
   0x6   : > { %v280_v0 = vld [vmem:[%s1735_s1] sm:$0xff] (!%p170_p3)  ;;  %v281_v1 = vld [vmem:[%s1735_s1 + $0x8] sm:$0xff] (!%p170_p3)  ;;  %v282_v2 = vld [vmem:[%s1735_s1 + $0x10] sm:$0xff] (!%p170_p3)  ;;  %v1336_v3 = vmov (!%p170_p3), 0.0|0.0   ;;  %vm1337_vm0 = vmmov (!%p170_p3), 0   ;;  %v1338_v6 = vmov (!%p170_p3), 0.0  }
   0x7   : > { %173 = sbr.rel (%p170_p3) target bundleno = 374 (0x176), region = 32  ;;  %1135 = vmatprep.subr.bf16.mxu0 (!%p170_p3), %v1336_v3  ;;  %v1136_v4 = vpack.c.bf16 (!%p170_p3), %v281_v1, %v280_v0  ;;  %1159 = vmatprep.subr.bf16.mxu1 (!%p170_p3), %v1336_v3  ;;  %v283_v5 = vld [vmem:[%s1735_s1 + $0x18] sm:$0xff] (!%p170_p3)  ;;  %v284_v8 = vld [vmem:[%s1735_s1 + $0x20] sm:$0xff] (!%p170_p3)  ;;  %v285_v9 = vld [vmem:[%s1735_s1 + $0x28] sm:$0xff] (!%p170_p3) }
   0x8   : > { %970 = vmatprep.mubr.msk.f32.mxu0 (!%p170_p3), %vm1337_vm0, %v1338_v6  ;;  %1054 = vmatprep.mubr.msk.f32.mxu1 (!%p170_p3), %vm1337_vm0, %v1338_v6  ;;  %v1139_v7 = vpack.c.bf16 (!%p170_p3), %v283_v5, %v282_v2  ;;  %v1142_v10 = vpack.c.bf16 (!%p170_p3), %v285_v9, %v284_v8  ;;  %v286_v11 = vld [vmem:[%s1735_s1 + $0x30] sm:$0xff] (!%p170_p3)  ;;  %v287_v12 = vld [vmem:[%s1735_s1 + $0x38] sm:$0xff] (!%p170_p3)  ;;  %v288_v14 = vld [vmem:[%s1735_s1 + $0x40] sm:$0xff] (!%p170_p3)  ;;  %s203_s9 = smul.u32 (!%p170_p3), 55, %s1326_s12 }
   0x9   : > { %1137 = vmatpush3.bf16.msra.mxu0 (!%p170_p3), %v1136_v4  ;;  %1167 = vmatpush3.bf16.msra.mxu1 (!%p170_p3), %v1136_v4  ;;  %v1145_v13 = vpack.c.bf16 (!%p170_p3), %v287_v12, %v286_v11  ;;  %v289_v15 = vld [vmem:[%s1735_s1 + $0x48] sm:$0xff] (!%p170_p3)  ;;  %v290_v17 = vld [vmem:[%s1735_s1 + $0x50] sm:$0xff] (!%p170_p3)  ;;  %v291_v18 = vld [vmem:[%s1735_s1 + $0x58] sm:$0xff] (!%p170_p3) }
   0xa   : > { %1138 = vmatprep.subr.bf16.mxu0 (!%p170_p3), %v1336_v3  ;;  %1160 = vmatprep.subr.bf16.mxu1 (!%p170_p3), %v1336_v3  ;;  %v1148_v16 = vpack.c.bf16 (!%p170_p3), %v289_v15, %v288_v14  ;;  %p204_p4 = scmp.lt.s32.totalorder (!%p170_p3), %s203_s9, 274  ;;  %v1151_v19 = vpack.c.bf16 (!%p170_p3), %v291_v18, %v290_v17  ;;  %v292_v20 = vld [vmem:[%s1735_s1 + $0x60] sm:$0xff] (!%p170_p3)  ;;  %v293_v21 = vld [vmem:[%s1735_s1 + $0x68] sm:$0xff] (!%p170_p3)  ;;  %v294_v23 = vld [vmem:[%s1735_s1 + $0x70] sm:$0xff] (!%p170_p3) }
   0xb   : > { %v1154_v22 = vpack.c.bf16 (!%p170_p3), %v293_v21, %v292_v20  ;;  %v295_v24 = vld [vmem:[%s1735_s1 + $0x78] sm:$0xff] (!%p170_p3)  ;;  %v1606_v18 = vld [vmem:[%s1736_s2] ss:$0 sm:$0xff] (!%p170_p3) }
   0xc   : > { %v1157_v25 = vpack.c.bf16 (!%p170_p3), %v295_v24, %v294_v23 }
   0xd   : > { %1140 = vmatpush3.bf16.msra.mxu0 (!%p170_p3), %v1139_v7  ;;  %1168 = vmatpush3.bf16.msra.mxu1 (!%p170_p3), %v1139_v7 }
   0xe   : > { %1141 = vmatprep.subr.bf16.mxu0 %v1336_v3  ;;  %1161 = vmatprep.subr.bf16.mxu1 %v1336_v3  ;;  %s1743_s9 = smov (!%p204_p4, %s203_s9), 274 }
   0xf   : > { %s862_s25 = sshll.u32 %s1743_s9, 3 }
  0x10   : > { %s1440_s28 = scalar_lea.vmem %s1734_s0, %s862_s25  ;;  %s1619_s6 = scalar_lea.vmem %s1737_s3, %s862_s25 }
  0x11   : > { %1143 = vmatpush3.bf16.msra.mxu0 %v1142_v10  ;;  %1169 = vmatpush3.bf16.msra.mxu1 %v1142_v10  ;;  %v225_v26 = vld [vmem:[%s1440_s28] sm:$0xff]  ;;  %v226_v28 = vld [vmem:[%s1440_s28 + $0x8] sm:$0xff]  ;;  %v227_v30 = vld [vmem:[%s1440_s28 + $0x10] sm:$0xff] }
  0x12   : > { %1144 = vmatprep.subr.bf16.mxu0 %v1336_v3  ;;  %1162 = vmatprep.subr.bf16.mxu1 %v1336_v3  ;;  %v253_v27 = vld [vmem:[%s1440_s28 + $0xe0] sm:$0xff]  ;;  %v254_v29 = vld [vmem:[%s1440_s28 + $0xe8] sm:$0xff]  ;;  %v255_v31 = vld [vmem:[%s1440_s28 + $0xf0] sm:$0xff] }
  0x13   : > { %v228_v32 = vld [vmem:[%s1440_s28 + $0x18] sm:$0xff]  ;;  %v229_v34 = vld [vmem:[%s1440_s28 + $0x20] sm:$0xff]  ;;  %v230_v36 = vld [vmem:[%s1440_s28 + $0x28] sm:$0xff] }
  0x14   : > { %v256_v33 = vld [vmem:[%s1440_s28 + $0xf8] sm:$0xff]  ;;  %v257_v35 = vld [vmem:[%s1440_s28 + $0x100] sm:$0xff]  ;;  %v258_v37 = vld [vmem:[%s1440_s28 + $0x108] sm:$0xff] }
  0x15   : > { %1146 = vmatpush3.bf16.msra.mxu0 %v1145_v13  ;;  %1170 = vmatpush3.bf16.msra.mxu1 %v1145_v13  ;;  %v231_v38 = vld [vmem:[%s1440_s28 + $0x30] sm:$0xff]  ;;  %v232_v40 = vld [vmem:[%s1440_s28 + $0x38] sm:$0xff]  ;;  %v233_v42 = vld [vmem:[%s1440_s28 + $0x40] sm:$0xff] }
  0x16   : > { %1147 = vmatprep.subr.bf16.mxu0 %v1336_v3  ;;  %1163 = vmatprep.subr.bf16.mxu1 %v1336_v3  ;;  %v259_v39 = vld [vmem:[%s1440_s28 + $0x110] sm:$0xff]  ;;  %v260_v41 = vld [vmem:[%s1440_s28 + $0x118] sm:$0xff]  ;;  %v261_v43 = vld [vmem:[%s1440_s28 + $0x120] sm:$0xff] }
  0x17   : > { %v234_v44 = vld [vmem:[%s1440_s28 + $0x48] sm:$0xff]  ;;  %v235_v46 = vld [vmem:[%s1440_s28 + $0x50] sm:$0xff]  ;;  %v236_v48 = vld [vmem:[%s1440_s28 + $0x58] sm:$0xff] }
  0x18   : > { %v262_v45 = vld [vmem:[%s1440_s28 + $0x128] sm:$0xff]  ;;  %v263_v47 = vld [vmem:[%s1440_s28 + $0x130] sm:$0xff]  ;;  %v264_v49 = vld [vmem:[%s1440_s28 + $0x138] sm:$0xff] }
  0x19   : > { %1149 = vmatpush3.bf16.msra.mxu0 %v1148_v16  ;;  %1171 = vmatpush3.bf16.msra.mxu1 %v1148_v16  ;;  %v237_v50 = vld [vmem:[%s1440_s28 + $0x60] sm:$0xff]  ;;  %v238_v52 = vld [vmem:[%s1440_s28 + $0x68] sm:$0xff]  ;;  %v239_v54 = vld [vmem:[%s1440_s28 + $0x70] sm:$0xff] }
  0x1a   : > { %1150 = vmatprep.subr.bf16.mxu0 %v1336_v3  ;;  %1164 = vmatprep.subr.bf16.mxu1 %v1336_v3  ;;  %v265_v51 = vld [vmem:[%s1440_s28 + $0x140] sm:$0xff]  ;;  %v266_v53 = vld [vmem:[%s1440_s28 + $0x148] sm:$0xff]  ;;  %v267_v55 = vld [vmem:[%s1440_s28 + $0x150] sm:$0xff] }
  0x1b   : > { %v240_v56 = vld [vmem:[%s1440_s28 + $0x78] sm:$0xff]  ;;  %v241_v58 = vld [vmem:[%s1440_s28 + $0x80] sm:$0xff]  ;;  %v242_v60 = vld [vmem:[%s1440_s28 + $0x88] sm:$0xff] }
  0x1c   : > { %v268_v57 = vld [vmem:[%s1440_s28 + $0x158] sm:$0xff]  ;;  %v269_v59 = vld [vmem:[%s1440_s28 + $0x160] sm:$0xff]  ;;  %v270_v61 = vld [vmem:[%s1440_s28 + $0x168] sm:$0xff] }
  0x1d   : > { %1152 = vmatpush3.bf16.msra.mxu0 %v1151_v19  ;;  %1172 = vmatpush3.bf16.msra.mxu1 %v1151_v19  ;;  %v243_v62 = vld [vmem:[%s1440_s28 + $0x90] sm:$0xff]  ;;  %v244_v0 = vld [vmem:[%s1440_s28 + $0x98] sm:$0xff]  ;;  %v245_v2 = vld [vmem:[%s1440_s28 + $0xa0] sm:$0xff] }
  0x1e   : > { %1153 = vmatprep.subr.bf16.mxu0 %v1336_v3  ;;  %1165 = vmatprep.subr.bf16.mxu1 %v1336_v3  ;;  %v271_v63 = vld [vmem:[%s1440_s28 + $0x170] sm:$0xff]  ;;  %v272_v1 = vld [vmem:[%s1440_s28 + $0x178] sm:$0xff]  ;;  %v246_v4 = vld [vmem:[%s1440_s28 + $0xa8] sm:$0xff] }
  0x1f   : > { %v274_v5 = vld [vmem:[%s1440_s28 + $0x188] sm:$0xff]  ;;  %v247_v7 = vld [vmem:[%s1440_s28 + $0xb0] sm:$0xff]  ;;  %v248_v9 = vld [vmem:[%s1440_s28 + $0xb8] sm:$0xff] }
  0x20   : > { %v275_v8 = vld [vmem:[%s1440_s28 + $0x190] sm:$0xff]  ;;  %v276_v10 = vld [vmem:[%s1440_s28 + $0x198] sm:$0xff]  ;;  %v249_v11 = vld [vmem:[%s1440_s28 + $0xc0] sm:$0xff] }
  0x21   : > { %1155 = vmatpush3.bf16.msra.mxu0 %v1154_v22  ;;  %1173 = vmatpush3.bf16.msra.mxu1 %v1154_v22  ;;  %v277_v12 = vld [vmem:[%s1440_s28 + $0x1a0] sm:$0xff]  ;;  %v250_v13 = vld [vmem:[%s1440_s28 + $0xc8] sm:$0xff]  ;;  %v251_v15 = vld [vmem:[%s1440_s28 + $0xd0] sm:$0xff] }
  0x22   : > { %1156 = vmatprep.subr.bf16.mxu0 %v1336_v3  ;;  %1166 = vmatprep.subr.bf16.mxu1 %v1336_v3  ;;  %v273_v3 = vld [vmem:[%s1440_s28 + $0x180] sm:$0xff]  ;;  %v278_v14 = vld [vmem:[%s1440_s28 + $0x1a8] sm:$0xff]  ;;  %v279_v16 = vld [vmem:[%s1440_s28 + $0x1b0] sm:$0xff] }
  0x23   : > { %v252_v17 = vld [vmem:[%s1440_s28 + $0xd8] sm:$0xff] }
  0x25   : > { %1158 = vmatpush3.bf16.msra.mxu0 %v1157_v25  ;;  %1174 = vmatpush3.bf16.msra.mxu1 %v1157_v25 }
  0x28   : > { %971 = vmatmul.mubr.f32.vlgmr.msra.gmra.mrb[0].mxu0 %v225_v26  ;;  %1055 = vmatmul.mubr.f32.vlgmr.msra.gmra.mrb[0].mxu1 %v253_v27 }
  0x29   : > { %973 = vmatprep.mubr.msk.f32.mxu0 %vm1337_vm0, %v1338_v6  ;;  %1057 = vmatprep.mubr.msk.f32.mxu1 %vm1337_vm0, %v1338_v6 }
  0x2c   : > { %974 = vmatmul.mubr.f32.gmra.mrb[2].mxu0 %v226_v28  ;;  %1058 = vmatmul.mubr.f32.gmra.mrb[2].mxu1 %v254_v29 }
  0x2d   : > { %976 = vmatprep.mubr.msk.f32.mxu0 %vm1337_vm0, %v1338_v6  ;;  %1060 = vmatprep.mubr.msk.f32.mxu1 %vm1337_vm0, %v1338_v6 }
  0x30   : > { %977 = vmatmul.mubr.f32.gmra.mrb[4].mxu0 %v227_v30  ;;  %1061 = vmatmul.mubr.f32.gmra.mrb[4].mxu1 %v255_v31 }
  0x31   : > { %979 = vmatprep.mubr.msk.f32.mxu0 %vm1337_vm0, %v1338_v6  ;;  %1063 = vmatprep.mubr.msk.f32.mxu1 %vm1337_vm0, %v1338_v6 }
  0x34   : > { %980 = vmatmul.mubr.f32.gmra.mrb[6].mxu0 %v228_v32  ;;  %1064 = vmatmul.mubr.f32.gmra.mrb[6].mxu1 %v256_v33 }
  0x35   : > { %982 = vmatprep.mubr.msk.f32.mxu0 %vm1337_vm0, %v1338_v6  ;;  %1066 = vmatprep.mubr.msk.f32.mxu1 %vm1337_vm0, %v1338_v6 }
  0x38   : > { %983 = vmatmul.mubr.f32.gmra.mrb[8].mxu0 %v229_v34  ;;  %1067 = vmatmul.mubr.f32.gmra.mrb[8].mxu1 %v257_v35 }
  0x39   : > { %985 = vmatprep.mubr.msk.f32.mxu0 %vm1337_vm0, %v1338_v6  ;;  %1069 = vmatprep.mubr.msk.f32.mxu1 %vm1337_vm0, %v1338_v6 }
  0x3c   : > { %986 = vmatmul.mubr.f32.gmra.mrb[10].mxu0 %v230_v36  ;;  %1070 = vmatmul.mubr.f32.gmra.mrb[10].mxu1 %v258_v37 }
  0x3d   : > { %988 = vmatprep.mubr.msk.f32.mxu0 %vm1337_vm0, %v1338_v6  ;;  %1072 = vmatprep.mubr.msk.f32.mxu1 %vm1337_vm0, %v1338_v6 }
  0x40   : > { %989 = vmatmul.mubr.f32.gmra.mrb[12].mxu0 %v231_v38  ;;  %1073 = vmatmul.mubr.f32.gmra.mrb[12].mxu1 %v259_v39 }
  0x41   : > { %991 = vmatprep.mubr.msk.f32.mxu0 %vm1337_vm0, %v1338_v6  ;;  %1075 = vmatprep.mubr.msk.f32.mxu1 %vm1337_vm0, %v1338_v6 }
  0x44   : > { %992 = vmatmul.mubr.f32.gmra.mrb[14].mxu0 %v232_v40  ;;  %1076 = vmatmul.mubr.f32.gmra.mrb[14].mxu1 %v260_v41 }
  0x45   : > { %994 = vmatprep.mubr.msk.f32.mxu0 %vm1337_vm0, %v1338_v6  ;;  %1078 = vmatprep.mubr.msk.f32.mxu1 %vm1337_vm0, %v1338_v6 }
  0x48   : > { %995 = vmatmul.mubr.f32.gmra.mrb[16].mxu0 %v233_v42  ;;  %1079 = vmatmul.mubr.f32.gmra.mrb[16].mxu1 %v261_v43 }
  0x49   : > { %997 = vmatprep.mubr.msk.f32.mxu0 %vm1337_vm0, %v1338_v6  ;;  %1081 = vmatprep.mubr.msk.f32.mxu1 %vm1337_vm0, %v1338_v6 }
  0x4c   : > { %998 = vmatmul.mubr.f32.gmra.mrb[18].mxu0 %v234_v44  ;;  %1082 = vmatmul.mubr.f32.gmra.mrb[18].mxu1 %v262_v45 }
  0x4d   : > { %1000 = vmatprep.mubr.msk.f32.mxu0 %vm1337_vm0, %v1338_v6  ;;  %1084 = vmatprep.mubr.msk.f32.mxu1 %vm1337_vm0, %v1338_v6 }
  0x50   : > { %1001 = vmatmul.mubr.f32.gmra.mrb[20].mxu0 %v235_v46  ;;  %1085 = vmatmul.mubr.f32.gmra.mrb[20].mxu1 %v263_v47 }
  0x51   : > { %1003 = vmatprep.mubr.msk.f32.mxu0 %vm1337_vm0, %v1338_v6  ;;  %1087 = vmatprep.mubr.msk.f32.mxu1 %vm1337_vm0, %v1338_v6 }
  0x54   : > { %1004 = vmatmul.mubr.f32.gmra.mrb[22].mxu0 %v236_v48  ;;  %1088 = vmatmul.mubr.f32.gmra.mrb[22].mxu1 %v264_v49 }
  0x55   : > { %1006 = vmatprep.mubr.msk.f32.mxu0 %vm1337_vm0, %v1338_v6  ;;  %1090 = vmatprep.mubr.msk.f32.mxu1 %vm1337_vm0, %v1338_v6 }
  0x58   : > { %1007 = vmatmul.mubr.f32.gmra.mrb[24].mxu0 %v237_v50  ;;  %1091 = vmatmul.mubr.f32.gmra.mrb[24].mxu1 %v265_v51 }
  0x59   : > { %1009 = vmatprep.mubr.msk.f32.mxu0 %vm1337_vm0, %v1338_v6  ;;  %1093 = vmatprep.mubr.msk.f32.mxu1 %vm1337_vm0, %v1338_v6 }
  0x5c   : > { %1010 = vmatmul.mubr.f32.gmra.mrb[26].mxu0 %v238_v52  ;;  %1094 = vmatmul.mubr.f32.gmra.mrb[26].mxu1 %v266_v53 }
  0x5d   : > { %1012 = vmatprep.mubr.msk.f32.mxu0 %vm1337_vm0, %v1338_v6  ;;  %1096 = vmatprep.mubr.msk.f32.mxu1 %vm1337_vm0, %v1338_v6 }
  0x60   : > { %1013 = vmatmul.mubr.f32.gmra.mrb[28].mxu0 %v239_v54  ;;  %1097 = vmatmul.mubr.f32.gmra.mrb[28].mxu1 %v267_v55 }
  0x61   : > { %1015 = vmatprep.mubr.msk.f32.mxu0 %vm1337_vm0, %v1338_v6  ;;  %1099 = vmatprep.mubr.msk.f32.mxu1 %vm1337_vm0, %v1338_v6 }
  0x64   : > { %1016 = vmatmul.mubr.f32.gmra.mrb[30].mxu0 %v240_v56  ;;  %1100 = vmatmul.mubr.f32.gmra.mrb[30].mxu1 %v268_v57 }
  0x65   : > { %1018 = vmatprep.mubr.msk.f32.mxu0 %vm1337_vm0, %v1338_v6  ;;  %1102 = vmatprep.mubr.msk.f32.mxu1 %vm1337_vm0, %v1338_v6 }
  0x68   : > { %1019 = vmatmul.mubr.f32.gmra.mrb[32].mxu0 %v241_v58  ;;  %1103 = vmatmul.mubr.f32.gmra.mrb[32].mxu1 %v269_v59 }
  0x69   : > { %1021 = vmatprep.mubr.msk.f32.mxu0 %vm1337_vm0, %v1338_v6  ;;  %1105 = vmatprep.mubr.msk.f32.mxu1 %vm1337_vm0, %v1338_v6 }
  0x6c   : > { %1022 = vmatmul.mubr.f32.gmra.mrb[34].mxu0 %v242_v60  ;;  %1106 = vmatmul.mubr.f32.gmra.mrb[34].mxu1 %v270_v61 }
  0x6d   : > { %1024 = vmatprep.mubr.msk.f32.mxu0 %vm1337_vm0, %v1338_v6  ;;  %1108 = vmatprep.mubr.msk.f32.mxu1 %vm1337_vm0, %v1338_v6 }
  0x70   : > { %1025 = vmatmul.mubr.f32.gmra.mrb[36].mxu0 %v243_v62  ;;  %1109 = vmatmul.mubr.f32.gmra.mrb[36].mxu1 %v271_v63 }
  0x71   : > { %1027 = vmatprep.mubr.msk.f32.mxu0 %vm1337_vm0, %v1338_v6  ;;  %1111 = vmatprep.mubr.msk.f32.mxu1 %vm1337_vm0, %v1338_v6 }
  0x74   : > { %1028 = vmatmul.mubr.f32.gmra.mrb[38].mxu0 %v244_v0  ;;  %1112 = vmatmul.mubr.f32.gmra.mrb[38].mxu1 %v272_v1 }
  0x75   : > { %1030 = vmatprep.mubr.msk.f32.mxu0 %vm1337_vm0, %v1338_v6  ;;  %1114 = vmatprep.mubr.msk.f32.mxu1 %vm1337_vm0, %v1338_v6 }
  0x78   : > { %1031 = vmatmul.mubr.f32.gmra.mrb[40].mxu0 %v245_v2  ;;  %1115 = vmatmul.mubr.f32.gmra.mrb[40].mxu1 %v273_v3 }
  0x79   : > { %1033 = vmatprep.mubr.msk.f32.mxu0 %vm1337_vm0, %v1338_v6  ;;  %1117 = vmatprep.mubr.msk.f32.mxu1 %vm1337_vm0, %v1338_v6 }
  0x7c   : > { %1034 = vmatmul.mubr.f32.gmra.mrb[42].mxu0 %v246_v4  ;;  %1118 = vmatmul.mubr.f32.gmra.mrb[42].mxu1 %v274_v5 }
  0x7d   : > { %1036 = vmatprep.mubr.msk.f32.mxu0 %vm1337_vm0, %v1338_v6  ;;  %1120 = vmatprep.mubr.msk.f32.mxu1 %vm1337_vm0, %v1338_v6 }
  0x80   : > { %1037 = vmatmul.mubr.f32.gmra.mrb[44].mxu0 %v247_v7  ;;  %1121 = vmatmul.mubr.f32.gmra.mrb[44].mxu1 %v275_v8 }
  0x81   : > { %1039 = vmatprep.mubr.msk.f32.mxu0 %vm1337_vm0, %v1338_v6  ;;  %1123 = vmatprep.mubr.msk.f32.mxu1 %vm1337_vm0, %v1338_v6 }
  0x84   : > { %1040 = vmatmul.mubr.f32.gmra.mrb[46].mxu0 %v248_v9  ;;  %1124 = vmatmul.mubr.f32.gmra.mrb[46].mxu1 %v276_v10 }
  0x85   : > { %1042 = vmatprep.mubr.msk.f32.mxu0 %vm1337_vm0, %v1338_v6  ;;  %1126 = vmatprep.mubr.msk.f32.mxu1 %vm1337_vm0, %v1338_v6 }
  0x88   : > { %1043 = vmatmul.mubr.f32.gmra.mrb[48].mxu0 %v249_v11  ;;  %1127 = vmatmul.mubr.f32.gmra.mrb[48].mxu1 %v277_v12 }
  0x89   : > { %1045 = vmatprep.mubr.msk.f32.mxu0 %vm1337_vm0, %v1338_v6  ;;  %1129 = vmatprep.mubr.msk.f32.mxu1 %vm1337_vm0, %v1338_v6 }
  0x8c   : > { %1046 = vmatmul.mubr.f32.gmra.mrb[50].mxu0 %v250_v13  ;;  %1130 = vmatmul.mubr.f32.gmra.mrb[50].mxu1 %v278_v14 }
  0x8d   : > { %1048 = vmatprep.mubr.msk.f32.mxu0 %vm1337_vm0, %v1338_v6  ;;  %1132 = vmatprep.mubr.msk.f32.mxu1 %vm1337_vm0, %v1338_v6 }
  0x90   : > { %1049 = vmatmul.mubr.f32.gmra.mrb[52].mxu0 %v251_v15  ;;  %1133 = vmatmul.mubr.f32.gmra.mrb[52].mxu1 %v279_v16 }
  0x91   : > { %1051 = vmatprep.mubr.msk.f32.mxu0 %vm1337_vm0, %v1338_v6 }
  0x94   : > { %1052 = vmatmul.mubr.f32.gmra.mrb[54].mxu0 %v252_v17 }
  0xfb   : > { %v369_v19 = vpop.f32.mrb[0].mxu0  ;;  %v509_v20 = vpop.f32.mrb[0].mxu1 }
  0xfc   : > { %v370_v21 = vadd.f32 %v1606_v18, %v369_v19  ;;  %v972_v22 = vpop.f32.mrb[1].mxu0  ;;  %v510_v23 = vadd.f32 %v1606_v18, %v509_v20  ;;  %v1056_v24 = vpop.f32.mrb[1].mxu1 }
  0xfe   : > { %1202 = vtanh.f32 %v370_v21 }
  0xff   : > { %1204 = vtanh.f32 %v510_v23  ;;  %v374_v25 = vpop.f32.mrb[2].mxu0  ;;  %v514_v6 = vpop.f32.mrb[2].mxu1 }
 0x100   : > { %v375_v26 = vadd.f32 %v1606_v18, %v374_v25  ;;  %v975_v27 = vpop.f32.mrb[3].mxu0  ;;  %v515_v28 = vadd.f32 %v1606_v18, %v514_v6  ;;  %v1059_v29 = vpop.f32.mrb[3].mxu1 }
 0x102   : > { %1206 = vtanh.f32 %v375_v26 }
 0x103   : > { %1208 = vtanh.f32 %v515_v28  ;;  %v379_v30 = vpop.f32.mrb[4].mxu0  ;;  %v519_v31 = vpop.f32.mrb[4].mxu1 }
 0x104   : > { %v380_v32 = vadd.f32 %v1606_v18, %v379_v30  ;;  %v978_v33 = vpop.f32.mrb[5].mxu0  ;;  %v520_v34 = vadd.f32 %v1606_v18, %v519_v31  ;;  %v1062_v35 = vpop.f32.mrb[5].mxu1 }
 0x106   : > { %1210 = vtanh.f32 %v380_v32 }
 0x107   : > { %1212 = vtanh.f32 %v520_v34  ;;  %v384_v36 = vpop.f32.mrb[6].mxu0  ;;  %v524_v37 = vpop.f32.mrb[6].mxu1 }
 0x108   : > { %v1203_v38 = vpop.eup %1202  ;;  %v385_v39 = vadd.f32 %v1606_v18, %v384_v36  ;;  %v981_v40 = vpop.f32.mrb[7].mxu0  ;;  %v525_v41 = vadd.f32 %v1606_v18, %v524_v37 }
 0x109   : > { %v1065_v42 = vpop.f32.mrb[7].mxu1  ;;  %v1205_v43 = vpop.eup %1204  ;;  %698 = vst [vmem:[%s1619_s6] sm:$0xff] %v1203_v38 }
 0x10a   : > { %726 = vst [vmem:[%s1619_s6 + $0xe0] sm:$0xff] %v1205_v43  ;;  %1214 = vtanh.f32 %v385_v39 }
 0x10b   : > { %1216 = vtanh.f32 %v525_v41  ;;  %v389_v44 = vpop.f32.mrb[8].mxu0  ;;  %v529_v45 = vpop.f32.mrb[8].mxu1 }
 0x10c   : > { %v1207_v46 = vpop.eup %1206  ;;  %v390_v47 = vadd.f32 %v1606_v18, %v389_v44  ;;  %v984_v48 = vpop.f32.mrb[9].mxu0  ;;  %v530_v49 = vadd.f32 %v1606_v18, %v529_v45 }
 0x10d   : > { %v1068_v50 = vpop.f32.mrb[9].mxu1  ;;  %v1209_v51 = vpop.eup %1208  ;;  %699 = vst [vmem:[%s1619_s6 + $0x8] sm:$0xff] %v1207_v46 }
 0x10e   : > { %727 = vst [vmem:[%s1619_s6 + $0xe8] sm:$0xff] %v1209_v51  ;;  %1218 = vtanh.f32 %v390_v47 }
 0x10f   : > { %1220 = vtanh.f32 %v530_v49  ;;  %v394_v52 = vpop.f32.mrb[10].mxu0  ;;  %v534_v53 = vpop.f32.mrb[10].mxu1 }
 0x110   : > { %v1211_v54 = vpop.eup %1210  ;;  %v395_v55 = vadd.f32 %v1606_v18, %v394_v52  ;;  %v987_v56 = vpop.f32.mrb[11].mxu0  ;;  %v535_v57 = vadd.f32 %v1606_v18, %v534_v53 }
 0x111   : > { %v1071_v58 = vpop.f32.mrb[11].mxu1  ;;  %v1213_v59 = vpop.eup %1212  ;;  %700 = vst [vmem:[%s1619_s6 + $0x10] sm:$0xff] %v1211_v54 }
 0x112   : > { %728 = vst [vmem:[%s1619_s6 + $0xf0] sm:$0xff] %v1213_v59  ;;  %1222 = vtanh.f32 %v395_v55 }
 0x113   : > { %1224 = vtanh.f32 %v535_v57  ;;  %v399_v60 = vpop.f32.mrb[12].mxu0  ;;  %v539_v61 = vpop.f32.mrb[12].mxu1 }
 0x114   : > { %v1215_v62 = vpop.eup %1214  ;;  %v400_v63 = vadd.f32 %v1606_v18, %v399_v60  ;;  %v990_v0 = vpop.f32.mrb[13].mxu0  ;;  %v540_v1 = vadd.f32 %v1606_v18, %v539_v61 }
 0x115   : > { %v1074_v2 = vpop.f32.mrb[13].mxu1  ;;  %v1217_v3 = vpop.eup %1216  ;;  %701 = vst [vmem:[%s1619_s6 + $0x18] sm:$0xff] %v1215_v62 }
 0x116   : > { %729 = vst [vmem:[%s1619_s6 + $0xf8] sm:$0xff] %v1217_v3  ;;  %1226 = vtanh.f32 %v400_v63 }
 0x117   : > { %1228 = vtanh.f32 %v540_v1  ;;  %v404_v4 = vpop.f32.mrb[14].mxu0  ;;  %v544_v5 = vpop.f32.mrb[14].mxu1 }
 0x118   : > { %v1219_v7 = vpop.eup %1218  ;;  %v405_v8 = vadd.f32 %v1606_v18, %v404_v4  ;;  %v993_v9 = vpop.f32.mrb[15].mxu0  ;;  %v545_v10 = vadd.f32 %v1606_v18, %v544_v5 }
 0x119   : > { %v1077_v11 = vpop.f32.mrb[15].mxu1  ;;  %v1221_v12 = vpop.eup %1220  ;;  %702 = vst [vmem:[%s1619_s6 + $0x20] sm:$0xff] %v1219_v7 }
 0x11a   : > { %730 = vst [vmem:[%s1619_s6 + $0x100] sm:$0xff] %v1221_v12  ;;  %1230 = vtanh.f32 %v405_v8 }
 0x11b   : > { %1232 = vtanh.f32 %v545_v10  ;;  %v409_v13 = vpop.f32.mrb[16].mxu0  ;;  %v549_v14 = vpop.f32.mrb[16].mxu1 }
 0x11c   : > { %v1223_v15 = vpop.eup %1222  ;;  %v410_v16 = vadd.f32 %v1606_v18, %v409_v13  ;;  %v996_v17 = vpop.f32.mrb[17].mxu0  ;;  %v550_v19 = vadd.f32 %v1606_v18, %v549_v14 }
 0x11d   : > { %v1080_v20 = vpop.f32.mrb[17].mxu1  ;;  %v1225_v21 = vpop.eup %1224  ;;  %703 = vst [vmem:[%s1619_s6 + $0x28] sm:$0xff] %v1223_v15 }
 0x11e   : > { %731 = vst [vmem:[%s1619_s6 + $0x108] sm:$0xff] %v1225_v21  ;;  %1234 = vtanh.f32 %v410_v16 }
 0x11f   : > { %1236 = vtanh.f32 %v550_v19  ;;  %v414_v22 = vpop.f32.mrb[18].mxu0  ;;  %v554_v23 = vpop.f32.mrb[18].mxu1 }
 0x120   : > { %v1227_v24 = vpop.eup %1226  ;;  %v415_v25 = vadd.f32 %v1606_v18, %v414_v22  ;;  %v999_v6 = vpop.f32.mrb[19].mxu0  ;;  %v555_v26 = vadd.f32 %v1606_v18, %v554_v23 }
 0x121   : > { %v1083_v27 = vpop.f32.mrb[19].mxu1  ;;  %v1229_v28 = vpop.eup %1228  ;;  %704 = vst [vmem:[%s1619_s6 + $0x30] sm:$0xff] %v1227_v24 }
 0x122   : > { %732 = vst [vmem:[%s1619_s6 + $0x110] sm:$0xff] %v1229_v28  ;;  %1238 = vtanh.f32 %v415_v25 }
 0x123   : > { %1240 = vtanh.f32 %v555_v26  ;;  %v419_v29 = vpop.f32.mrb[20].mxu0  ;;  %v559_v30 = vpop.f32.mrb[20].mxu1 }
 0x124   : > { %v1231_v31 = vpop.eup %1230  ;;  %v420_v32 = vadd.f32 %v1606_v18, %v419_v29  ;;  %v1002_v33 = vpop.f32.mrb[21].mxu0  ;;  %v560_v34 = vadd.f32 %v1606_v18, %v559_v30 }
 0x125   : > { %v1086_v35 = vpop.f32.mrb[21].mxu1  ;;  %v1233_v36 = vpop.eup %1232  ;;  %705 = vst [vmem:[%s1619_s6 + $0x38] sm:$0xff] %v1231_v31 }
 0x126   : > { %733 = vst [vmem:[%s1619_s6 + $0x118] sm:$0xff] %v1233_v36  ;;  %1242 = vtanh.f32 %v420_v32 }
 0x127   : > { %1244 = vtanh.f32 %v560_v34  ;;  %v424_v37 = vpop.f32.mrb[22].mxu0  ;;  %v564_v38 = vpop.f32.mrb[22].mxu1 }
 0x128   : > { %v1235_v39 = vpop.eup %1234  ;;  %v425_v40 = vadd.f32 %v1606_v18, %v424_v37  ;;  %v1005_v41 = vpop.f32.mrb[23].mxu0  ;;  %v565_v42 = vadd.f32 %v1606_v18, %v564_v38 }
 0x129   : > { %v1089_v43 = vpop.f32.mrb[23].mxu1  ;;  %v1237_v44 = vpop.eup %1236  ;;  %706 = vst [vmem:[%s1619_s6 + $0x40] sm:$0xff] %v1235_v39 }
 0x12a   : > { %734 = vst [vmem:[%s1619_s6 + $0x120] sm:$0xff] %v1237_v44  ;;  %1246 = vtanh.f32 %v425_v40 }
 0x12b   : > { %1248 = vtanh.f32 %v565_v42  ;;  %v429_v45 = vpop.f32.mrb[24].mxu0  ;;  %v569_v46 = vpop.f32.mrb[24].mxu1 }
 0x12c   : > { %v1239_v47 = vpop.eup %1238  ;;  %v430_v48 = vadd.f32 %v1606_v18, %v429_v45  ;;  %v1008_v49 = vpop.f32.mrb[25].mxu0  ;;  %v570_v50 = vadd.f32 %v1606_v18, %v569_v46 }
 0x12d   : > { %v1092_v51 = vpop.f32.mrb[25].mxu1  ;;  %v1241_v52 = vpop.eup %1240  ;;  %707 = vst [vmem:[%s1619_s6 + $0x48] sm:$0xff] %v1239_v47 }
 0x12e   : > { %735 = vst [vmem:[%s1619_s6 + $0x128] sm:$0xff] %v1241_v52  ;;  %1250 = vtanh.f32 %v430_v48 }
 0x12f   : > { %1252 = vtanh.f32 %v570_v50  ;;  %v434_v53 = vpop.f32.mrb[26].mxu0  ;;  %v574_v54 = vpop.f32.mrb[26].mxu1 }
 0x130   : > { %v1243_v55 = vpop.eup %1242  ;;  %v435_v56 = vadd.f32 %v1606_v18, %v434_v53  ;;  %v1011_v57 = vpop.f32.mrb[27].mxu0  ;;  %v575_v58 = vadd.f32 %v1606_v18, %v574_v54 }
 0x131   : > { %v1095_v59 = vpop.f32.mrb[27].mxu1  ;;  %v1245_v60 = vpop.eup %1244  ;;  %708 = vst [vmem:[%s1619_s6 + $0x50] sm:$0xff] %v1243_v55 }
 0x132   : > { %736 = vst [vmem:[%s1619_s6 + $0x130] sm:$0xff] %v1245_v60  ;;  %1254 = vtanh.f32 %v435_v56 }
 0x133   : > { %1256 = vtanh.f32 %v575_v58  ;;  %v439_v61 = vpop.f32.mrb[28].mxu0  ;;  %v579_v62 = vpop.f32.mrb[28].mxu1 }
 0x134   : > { %v1247_v63 = vpop.eup %1246  ;;  %v440_v0 = vadd.f32 %v1606_v18, %v439_v61  ;;  %v1014_v1 = vpop.f32.mrb[29].mxu0  ;;  %v580_v2 = vadd.f32 %v1606_v18, %v579_v62 }
 0x135   : > { %v1098_v3 = vpop.f32.mrb[29].mxu1  ;;  %v1249_v4 = vpop.eup %1248  ;;  %709 = vst [vmem:[%s1619_s6 + $0x58] sm:$0xff] %v1247_v63 }
 0x136   : > { %737 = vst [vmem:[%s1619_s6 + $0x138] sm:$0xff] %v1249_v4  ;;  %1258 = vtanh.f32 %v440_v0 }
 0x137   : > { %1260 = vtanh.f32 %v580_v2  ;;  %v444_v5 = vpop.f32.mrb[30].mxu0  ;;  %v584_v7 = vpop.f32.mrb[30].mxu1 }
 0x138   : > { %v1251_v8 = vpop.eup %1250  ;;  %v445_v9 = vadd.f32 %v1606_v18, %v444_v5  ;;  %v1017_v10 = vpop.f32.mrb[31].mxu0  ;;  %v585_v11 = vadd.f32 %v1606_v18, %v584_v7 }
 0x139   : > { %v1101_v12 = vpop.f32.mrb[31].mxu1  ;;  %v1253_v13 = vpop.eup %1252  ;;  %710 = vst [vmem:[%s1619_s6 + $0x60] sm:$0xff] %v1251_v8 }
 0x13a   : > { %738 = vst [vmem:[%s1619_s6 + $0x140] sm:$0xff] %v1253_v13  ;;  %1262 = vtanh.f32 %v445_v9 }
 0x13b   : > { %1264 = vtanh.f32 %v585_v11  ;;  %v449_v14 = vpop.f32.mrb[32].mxu0  ;;  %v589_v15 = vpop.f32.mrb[32].mxu1 }
 0x13c   : > { %v1255_v16 = vpop.eup %1254  ;;  %v450_v17 = vadd.f32 %v1606_v18, %v449_v14  ;;  %v1020_v19 = vpop.f32.mrb[33].mxu0  ;;  %v590_v20 = vadd.f32 %v1606_v18, %v589_v15 }
 0x13d   : > { %v1104_v21 = vpop.f32.mrb[33].mxu1  ;;  %v1257_v22 = vpop.eup %1256  ;;  %711 = vst [vmem:[%s1619_s6 + $0x68] sm:$0xff] %v1255_v16 }
 0x13e   : > { %739 = vst [vmem:[%s1619_s6 + $0x148] sm:$0xff] %v1257_v22  ;;  %1266 = vtanh.f32 %v450_v17 }
 0x13f   : > { %1268 = vtanh.f32 %v590_v20  ;;  %v454_v23 = vpop.f32.mrb[34].mxu0  ;;  %v594_v24 = vpop.f32.mrb[34].mxu1 }
 0x140   : > { %v1259_v25 = vpop.eup %1258  ;;  %v455_v6 = vadd.f32 %v1606_v18, %v454_v23  ;;  %v1023_v26 = vpop.f32.mrb[35].mxu0  ;;  %v595_v27 = vadd.f32 %v1606_v18, %v594_v24 }
 0x141   : > { %v1107_v28 = vpop.f32.mrb[35].mxu1  ;;  %v1261_v29 = vpop.eup %1260  ;;  %712 = vst [vmem:[%s1619_s6 + $0x70] sm:$0xff] %v1259_v25 }
 0x142   : > { %740 = vst [vmem:[%s1619_s6 + $0x150] sm:$0xff] %v1261_v29  ;;  %1270 = vtanh.f32 %v455_v6 }
 0x143   : > { %1272 = vtanh.f32 %v595_v27  ;;  %v459_v30 = vpop.f32.mrb[36].mxu0  ;;  %v599_v31 = vpop.f32.mrb[36].mxu1 }
 0x144   : > { %v1263_v32 = vpop.eup %1262  ;;  %v460_v33 = vadd.f32 %v1606_v18, %v459_v30  ;;  %v1026_v34 = vpop.f32.mrb[37].mxu0  ;;  %v600_v35 = vadd.f32 %v1606_v18, %v599_v31 }
 0x145   : > { %v1110_v36 = vpop.f32.mrb[37].mxu1  ;;  %v1265_v37 = vpop.eup %1264  ;;  %713 = vst [vmem:[%s1619_s6 + $0x78] sm:$0xff] %v1263_v32 }
 0x146   : > { %741 = vst [vmem:[%s1619_s6 + $0x158] sm:$0xff] %v1265_v37  ;;  %1274 = vtanh.f32 %v460_v33 }
 0x147   : > { %1276 = vtanh.f32 %v600_v35  ;;  %v464_v38 = vpop.f32.mrb[38].mxu0  ;;  %v604_v39 = vpop.f32.mrb[38].mxu1 }
 0x148   : > { %v1267_v40 = vpop.eup %1266  ;;  %v465_v41 = vadd.f32 %v1606_v18, %v464_v38  ;;  %v1029_v42 = vpop.f32.mrb[39].mxu0  ;;  %v605_v43 = vadd.f32 %v1606_v18, %v604_v39 }
 0x149   : > { %v1113_v44 = vpop.f32.mrb[39].mxu1  ;;  %v1269_v45 = vpop.eup %1268  ;;  %714 = vst [vmem:[%s1619_s6 + $0x80] sm:$0xff] %v1267_v40 }
 0x14a   : > { %742 = vst [vmem:[%s1619_s6 + $0x160] sm:$0xff] %v1269_v45  ;;  %1278 = vtanh.f32 %v465_v41 }
 0x14b   : > { %1280 = vtanh.f32 %v605_v43  ;;  %v469_v46 = vpop.f32.mrb[40].mxu0  ;;  %v609_v47 = vpop.f32.mrb[40].mxu1 }
 0x14c   : > { %v1271_v48 = vpop.eup %1270  ;;  %v470_v49 = vadd.f32 %v1606_v18, %v469_v46  ;;  %v1032_v50 = vpop.f32.mrb[41].mxu0  ;;  %v610_v51 = vadd.f32 %v1606_v18, %v609_v47 }
 0x14d   : > { %v1116_v52 = vpop.f32.mrb[41].mxu1  ;;  %v1273_v53 = vpop.eup %1272  ;;  %715 = vst [vmem:[%s1619_s6 + $0x88] sm:$0xff] %v1271_v48 }
 0x14e   : > { %743 = vst [vmem:[%s1619_s6 + $0x168] sm:$0xff] %v1273_v53  ;;  %1282 = vtanh.f32 %v470_v49 }
 0x14f   : > { %1284 = vtanh.f32 %v610_v51  ;;  %v474_v54 = vpop.f32.mrb[42].mxu0  ;;  %v614_v55 = vpop.f32.mrb[42].mxu1 }
 0x150   : > { %v1275_v56 = vpop.eup %1274  ;;  %v475_v57 = vadd.f32 %v1606_v18, %v474_v54  ;;  %v1035_v58 = vpop.f32.mrb[43].mxu0  ;;  %v615_v59 = vadd.f32 %v1606_v18, %v614_v55 }
 0x151   : > { %v1119_v60 = vpop.f32.mrb[43].mxu1  ;;  %v1277_v61 = vpop.eup %1276  ;;  %716 = vst [vmem:[%s1619_s6 + $0x90] sm:$0xff] %v1275_v56 }
 0x152   : > { %744 = vst [vmem:[%s1619_s6 + $0x170] sm:$0xff] %v1277_v61  ;;  %1286 = vtanh.f32 %v475_v57 }
 0x153   : > { %1288 = vtanh.f32 %v615_v59  ;;  %v479_v62 = vpop.f32.mrb[44].mxu0  ;;  %v619_v63 = vpop.f32.mrb[44].mxu1 }
 0x154   : > { %v1279_v0 = vpop.eup %1278  ;;  %v480_v1 = vadd.f32 %v1606_v18, %v479_v62  ;;  %v1038_v2 = vpop.f32.mrb[45].mxu0  ;;  %v620_v3 = vadd.f32 %v1606_v18, %v619_v63 }
 0x155   : > { %v1122_v4 = vpop.f32.mrb[45].mxu1  ;;  %v1281_v5 = vpop.eup %1280  ;;  %717 = vst [vmem:[%s1619_s6 + $0x98] sm:$0xff] %v1279_v0 }
 0x156   : > { %745 = vst [vmem:[%s1619_s6 + $0x178] sm:$0xff] %v1281_v5  ;;  %1290 = vtanh.f32 %v480_v1 }
 0x157   : > { %1292 = vtanh.f32 %v620_v3  ;;  %v484_v7 = vpop.f32.mrb[46].mxu0  ;;  %v624_v8 = vpop.f32.mrb[46].mxu1 }
 0x158   : > { %v1283_v9 = vpop.eup %1282  ;;  %v485_v10 = vadd.f32 %v1606_v18, %v484_v7  ;;  %v1041_v11 = vpop.f32.mrb[47].mxu0  ;;  %v625_v12 = vadd.f32 %v1606_v18, %v624_v8 }
 0x159   : > { %v1125_v13 = vpop.f32.mrb[47].mxu1  ;;  %v1285_v14 = vpop.eup %1284  ;;  %718 = vst [vmem:[%s1619_s6 + $0xa0] sm:$0xff] %v1283_v9 }
 0x15a   : > { %746 = vst [vmem:[%s1619_s6 + $0x180] sm:$0xff] %v1285_v14  ;;  %1294 = vtanh.f32 %v485_v10 }
 0x15b   : > { %1296 = vtanh.f32 %v625_v12  ;;  %v489_v15 = vpop.f32.mrb[48].mxu0  ;;  %v629_v16 = vpop.f32.mrb[48].mxu1 }
 0x15c   : > { %v1287_v17 = vpop.eup %1286  ;;  %v490_v19 = vadd.f32 %v1606_v18, %v489_v15  ;;  %v1044_v20 = vpop.f32.mrb[49].mxu0  ;;  %v630_v21 = vadd.f32 %v1606_v18, %v629_v16 }
 0x15d   : > { %v1128_v22 = vpop.f32.mrb[49].mxu1  ;;  %v1289_v23 = vpop.eup %1288  ;;  %719 = vst [vmem:[%s1619_s6 + $0xa8] sm:$0xff] %v1287_v17 }
 0x15e   : > { %747 = vst [vmem:[%s1619_s6 + $0x188] sm:$0xff] %v1289_v23  ;;  %1298 = vtanh.f32 %v490_v19 }
 0x15f   : > { %1300 = vtanh.f32 %v630_v21  ;;  %v494_v24 = vpop.f32.mrb[50].mxu0  ;;  %v634_v25 = vpop.f32.mrb[50].mxu1 }
 0x160   : > { %v1291_v6 = vpop.eup %1290  ;;  %v495_v26 = vadd.f32 %v1606_v18, %v494_v24  ;;  %v1047_v27 = vpop.f32.mrb[51].mxu0  ;;  %v635_v28 = vadd.f32 %v1606_v18, %v634_v25 }
 0x161   : > { %v1131_v29 = vpop.f32.mrb[51].mxu1  ;;  %v1293_v30 = vpop.eup %1292  ;;  %720 = vst [vmem:[%s1619_s6 + $0xb0] sm:$0xff] %v1291_v6 }
 0x162   : > { %748 = vst [vmem:[%s1619_s6 + $0x190] sm:$0xff] %v1293_v30  ;;  %1302 = vtanh.f32 %v495_v26 }
 0x163   : > { %1304 = vtanh.f32 %v635_v28  ;;  %v499_v31 = vpop.f32.mrb[52].mxu0  ;;  %v639_v32 = vpop.f32.mrb[52].mxu1 }
 0x164   : > { %v1295_v33 = vpop.eup %1294  ;;  %v500_v34 = vadd.f32 %v1606_v18, %v499_v31  ;;  %v1050_v35 = vpop.f32.mrb[53].mxu0  ;;  %v640_v36 = vadd.f32 %v1606_v18, %v639_v32 }
 0x165   : > { %v1134_v37 = vpop.f32.mrb[53].mxu1  ;;  %v1297_v38 = vpop.eup %1296  ;;  %721 = vst [vmem:[%s1619_s6 + $0xb8] sm:$0xff] %v1295_v33 }
 0x166   : > { %749 = vst [vmem:[%s1619_s6 + $0x198] sm:$0xff] %v1297_v38  ;;  %1306 = vtanh.f32 %v500_v34 }
 0x167   : > { %1308 = vtanh.f32 %v640_v36  ;;  %v504_v39 = vpop.f32.mrb[54].mxu0 }
 0x168   : > { %v1299_v40 = vpop.eup %1298  ;;  %v505_v41 = vadd.f32 %v1606_v18, %v504_v39  ;;  %v1053_v42 = vpop.f32.mrb[55].mxu0 }
 0x169   : > { %v1301_v43 = vpop.eup %1300  ;;  %722 = vst [vmem:[%s1619_s6 + $0xc0] sm:$0xff] %v1299_v40 }
 0x16a   : > { %750 = vst [vmem:[%s1619_s6 + $0x1a0] sm:$0xff] %v1301_v43  ;;  %1310 = vtanh.f32 %v505_v41 }
 0x16c   : > { %v1303_v44 = vpop.eup %1302 }
 0x16d   : > { %v1305_v45 = vpop.eup %1304  ;;  %723 = vst [vmem:[%s1619_s6 + $0xc8] sm:$0xff] %v1303_v44 }
 0x16e   : > { %751 = vst [vmem:[%s1619_s6 + $0x1a8] sm:$0xff] %v1305_v45 }
 0x170   : > { %v1307_v46 = vpop.eup %1306 }
 0x171   : > { %v1309_v47 = vpop.eup %1308  ;;  %724 = vst [vmem:[%s1619_s6 + $0xd0] sm:$0xff] %v1307_v46 }
 0x172   : > { %752 = vst [vmem:[%s1619_s6 + $0x1b0] sm:$0xff] %v1309_v47 }
 0x174   : > { %v1311_v48 = vpop.eup %1310 }
 0x175   : > { %725 = vst [vmem:[%s1619_s6 + $0xd8] sm:$0xff] %v1311_v48 }
 0x176 PF: > { %s13_s14 = sadd.s32 1, %s1334_s14   ;;  %s1738_s12 = smov %s1330_s13 }
 0x177   : > { %p10_p5 = scmp.ge.s32.totalorder %s13_s14, 7   ;;  %s1739_s13 = smov %s1741_s15 }
 0x179   :  { %12 = sbr.rel (!%p10_p5) target bundleno = 2 (0x2), region = 68 }

</bundles_post_ra>
